<compile_context>
chip_gen: v6e
topology: v6e:2x2x1
jax: 0.10.0
libtpu: 0.0.40
codegen_flags: <defaults>
</compile_context>

<pallas_src>
import numpy as np

import jax
import jax.numpy as jnp
from jax.experimental import pallas as pl
from jax.experimental.pallas import tpu as pltpu


# ----------------------------------------------------------------------------
# Pallas kernels
# ----------------------------------------------------------------------------
def _conv1_dconv_bn_pool_kernel(p_ref, w1_ref, b1_ref, g1_ref, beta1_ref,
                                wd_ref, bd_ref, pooled_ref, d_ref):
    # p_ref: (4, R, 9) im2col patches, one slab per 2x2-pool phase.
    # Produces: pooled conv1 features (R, 4) and the dist-branch conv+relu
    # output per phase (4, R, 4).  Patches are read ONCE and reused for both
    # the conv1 and the dist-conv matmul.
    f32 = jnp.float32
    w1 = w1_ref[...]
    b1 = b1_ref[...]
    wd = wd_ref[...]
    bd = bd_ref[...]
    yc = []
    for ph in range(4):
        p = p_ref[ph]                                                 # (R, 9)
        yc.append(jnp.dot(p, w1, preferred_element_type=f32) + b1)    # conv1
        d_ref[ph] = jnp.maximum(                                      # dist conv
            jnp.dot(p, wd, preferred_element_type=f32) + bd, 0.0)
    # training-mode BatchNorm over all N*H*W pixels (= all 4 phases), biased var
    n_total = 4.0 * yc[0].shape[0]
    mean = (yc[0].sum(axis=0, keepdims=True) + yc[1].sum(axis=0, keepdims=True)
            + yc[2].sum(axis=0, keepdims=True)
            + yc[3].sum(axis=0, keepdims=True)) / n_total
    var = (((yc[0] - mean) ** 2).sum(axis=0, keepdims=True)
           + ((yc[1] - mean) ** 2).sum(axis=0, keepdims=True)
           + ((yc[2] - mean) ** 2).sum(axis=0, keepdims=True)
           + ((yc[3] - mean) ** 2).sum(axis=0, keepdims=True)) / n_total
    scale = jax.lax.rsqrt(var + 1e-5) * g1_ref[...]
    shift = beta1_ref[...]
    z = [jnp.maximum((y - mean) * scale + shift, 0.0) for y in yc]
    # fused 2x2 maxpool = elementwise max over the four phases
    pooled_ref[...] = jnp.maximum(jnp.maximum(z[0], z[1]),
                                  jnp.maximum(z[2], z[3]))


def _conv2_bn_pool_kernel(p_ref, w_ref, b_ref, g_ref, beta_ref, pooled_ref):
    # p_ref: (4, R, 36) phase-split patches of the pooled conv1 image.
    f32 = jnp.float32
    w = w_ref[...]
    b = b_ref[...]
    ys = [jnp.dot(p_ref[ph], w, preferred_element_type=f32) + b for ph in range(4)]
    n_total = 4.0 * ys[0].shape[0]
    mean = (ys[0].sum(axis=0, keepdims=True) + ys[1].sum(axis=0, keepdims=True)
            + ys[2].sum(axis=0, keepdims=True)
            + ys[3].sum(axis=0, keepdims=True)) / n_total
    var = (((ys[0] - mean) ** 2).sum(axis=0, keepdims=True)
           + ((ys[1] - mean) ** 2).sum(axis=0, keepdims=True)
           + ((ys[2] - mean) ** 2).sum(axis=0, keepdims=True)
           + ((ys[3] - mean) ** 2).sum(axis=0, keepdims=True)) / n_total
    scale = jax.lax.rsqrt(var + 1e-5) * g_ref[...]
    shift = beta_ref[...]
    z = [jnp.maximum((y - mean) * scale + shift, 0.0) for y in ys]
    pooled_ref[...] = jnp.maximum(jnp.maximum(z[0], z[1]),
                                  jnp.maximum(z[2], z[3]))


def _mlp_dist_kernel(x_ref, feat_ref, rmat_ref, d_ref,
                     cfc1_w, cfc1_b, fc1_w, fc1_b, fc2_w, fc2_b,
                     fc3_w, fc3_b, fc4_w, fc4_b, meff_ref, dcb_ref,
                     out_ref, mask_ref, outc_ref):
    f32 = jnp.float32
    x = x_ref[...]                                                  # (B_pad, 3)
    # cfc1 mask on the UNIQUE context rows only (no 250x redundant work).
    feat = jnp.maximum(feat_ref[...], 0.0)                          # (nc, 256)
    mask = jnp.maximum(
        jnp.dot(feat, cfc1_w[...], preferred_element_type=f32) + cfc1_b[...], 0.0)
    mask_ref[...] = mask
    # expand per-context mask to the batch inside VMEM
    if mask.shape[0] == 1:
        mask_full = jnp.broadcast_to(mask, (x.shape[0], mask.shape[1]))
    else:
        mask_full = jnp.dot(rmat_ref[...], mask, preferred_element_type=f32)
    # fc1..fc4 hot path
    h = jnp.maximum(jnp.dot(x, fc1_w[...], preferred_element_type=f32) + fc1_b[...], 0.0)
    h = jnp.maximum(jnp.dot(h * mask_full, fc2_w[...],
                            preferred_element_type=f32) + fc2_b[...], 0.0)
    h = jnp.maximum(jnp.dot(h, fc3_w[...], preferred_element_type=f32) + fc3_b[...], 0.0)
    out_ref[...] = jnp.dot(h, fc4_w[...], preferred_element_type=f32) + fc4_b[...]
    # dist branch: (avgpool + flatten + dist_cfc2) folded into one matrix
    outc_ref[...] = jnp.dot(d_ref[...], meff_ref[...],
                            preferred_element_type=f32) + dcb_ref[...]


# ----------------------------------------------------------------------------
# pallas_call helper (single full-array block; all operands are KB-scale so
# everything fits in VMEM comfortably — the network is launch/DMA bound, not
# compute bound, so minimizing call count dominates).
# ----------------------------------------------------------------------------
def _full_spec(shape):
    nd = len(shape)
    return pl.BlockSpec(shape, lambda i, _nd=nd: (0,) * _nd)


def _call(kernel, out_shapes, *args):
    single = not isinstance(out_shapes, (tuple, list))
    outs = (out_shapes,) if single else tuple(out_shapes)
    out_specs = _full_spec(outs[0].shape) if single else tuple(
        _full_spec(o.shape) for o in outs)
    fn = pl.pallas_call(
        kernel,
        grid=(1,),
        in_specs=[_full_spec(a.shape) for a in args],
        out_specs=out_specs,
        out_shape=out_shapes,
        compiler_params=pltpu.CompilerParams(dimension_semantics=("arbitrary",)),
    )
    return fn(*args)


# ----------------------------------------------------------------------------
# Wrapper-side glue: im2col, pool-phase split, weight layout (one-time).
# ----------------------------------------------------------------------------
def _im2col3x3(x):
    # x: (N, H, W, C) NHWC -> (N, H, W, 9*C) patches; 3x3, stride 1, pad 1.
    n, h, w, c = x.shape
    xp = jnp.pad(x, ((0, 0), (1, 1), (1, 1), (0, 0)))
    cols = [xp[:, dy:dy + h, dx:dx + w, :] for dy in range(3) for dx in range(3)]
    patches = jnp.stack(cols, axis=3)                  # (N, H, W, 9, C)
    return patches.reshape(n, h, w, 9 * c)


def _phase_split(patches):
    # (N, H, W, K) -> (4, N*(H/2)*(W/2), K); phase index = 2*dh + dw.
    n, h, w, k = patches.shape
    phases = [patches[:, dh::2, dw::2, :].reshape(n * (h // 2) * (w // 2), k)
              for dh in (0, 1) for dw in (0, 1)]
    return jnp.stack(phases, axis=0)


def _conv_w_to_matmul(w):
    # torch (Cout, Cin, kh, kw) -> (kh*kw*Cin, Cout), matching _im2col3x3 order.
    co, ci, kh, kw = w.shape
    return jnp.transpose(w, (2, 3, 1, 0)).reshape(kh * kw * ci, co)


def prepare_params(p, len_context=32):
    """One-time parameter preparation (hoisted out of the forward pass)."""
    H = len_context
    prep = dict(p)
    prep["w1m"] = _conv_w_to_matmul(p["conv1_w"])                      # (9, 4)
    prep["w2m"] = _conv_w_to_matmul(p["conv2_w"])                      # (36, 4)
    prep["wdm"] = _conv_w_to_matmul(p["dconv_w"])                      # (9, 4)
    # cfc1 rows permuted from NCHW (c,h,w) flatten to our (h,w,c) flatten.
    hq = H // 4
    prep["cfc1_wp"] = jnp.transpose(
        p["cfc1_w"].reshape(4, hq, hq, 256), (1, 2, 0, 3)).reshape(4 * hq * hq, 256)
    # Fold AvgPool2d(8, stride=4) + NCHW flatten + dist_cfc2 into one matrix,
    # reordered to match the phase-split dist-conv output layout
    # (rows indexed (h', w', phase, c) with phase = 2*dh + dw).
    n_out = (H - 8) // 4 + 1                                           # 7
    pool = np.zeros((H, n_out), np.float32)
    for i in range(n_out):
        pool[4 * i:4 * i + 8, i] = 1.0 / 8.0
    pool = jnp.asarray(pool)
    w2r = p["dcfc2_w"].reshape(4, n_out, n_out, 10)                    # (c, i, j, o)
    meff = jnp.einsum("hi,wj,cijo->hwco", pool, pool, w2r)             # (H, H, 4, 10)
    m = meff.reshape(H // 2, 2, H // 2, 2, 4, 10)                      # (h',dh,w',dw,c,o)
    m = jnp.transpose(m, (0, 2, 1, 3, 4, 5))                           # (h',w',dh,dw,c,o)
    prep["meff2"] = m.reshape(H * H * 4, 10)
    return prep


# ----------------------------------------------------------------------------
# Deterministic parameter init (PyTorch-style uniform(-1/sqrt(fan_in), ...))
# ----------------------------------------------------------------------------
def init_params(key, len_context=32):
    ks = jax.random.split(key, 20)

    def lin(kw, kb, fan_in, fan_out):
        b = 1.0 / (fan_in ** 0.5)
        w = jax.random.uniform(kw, (fan_in, fan_out), jnp.float32, -b, b)
        bias = jax.random.uniform(kb, (1, fan_out), jnp.float32, -b, b)
        return w, bias

    def conv(kw, kb, cin, cout):
        fan_in = cin * 9
        b = 1.0 / (fan_in ** 0.5)
        w = jax.random.uniform(kw, (cout, cin, 3, 3), jnp.float32, -b, b)
        bias = jax.random.uniform(kb, (1, cout), jnp.float32, -b, b)
        return w, bias

    p = {}
    p["fc1_w"], p["fc1_b"] = lin(ks[0], ks[1], 3, 256)
    p["fc2_w"], p["fc2_b"] = lin(ks[2], ks[3], 256, 256)
    p["fc3_w"], p["fc3_b"] = lin(ks[4], ks[5], 256, 256)
    p["fc4_w"], p["fc4_b"] = lin(ks[6], ks[7], 256, 6)
    p["cfc1_w"], p["cfc1_b"] = lin(ks[8], ks[9], 4 * (len_context // 4) ** 2, 256)
    p["conv1_w"], p["conv1_b"] = conv(ks[10], ks[11], 1, 4)
    p["conv2_w"], p["conv2_b"] = conv(ks[12], ks[13], 4, 4)
    p["bn1_g"] = jnp.ones((1, 4), jnp.float32)
    p["bn1_b"] = jnp.zeros((1, 4), jnp.float32)
    p["bn2_g"] = jnp.ones((1, 4), jnp.float32)
    p["bn2_b"] = jnp.zeros((1, 4), jnp.float32)
    p["dconv_w"], p["dconv_b"] = conv(ks[14], ks[15], 1, 4)
    dist_in = 4 * (((len_context - 8) // 4) + 1) ** 2                  # 4*7*7 = 196
    p["dcfc2_w"], p["dcfc2_b"] = lin(ks[16], ks[17], dist_in, 10)
    return p


# ----------------------------------------------------------------------------
# Forward pass (context_type='visual', concat=False)
# ----------------------------------------------------------------------------
def neural_net_forward(prep, x, context):
    # x: (B, 3);  context: (Nc, 1, H, W) NCHW with B == Nc * 250.
    nc = context.shape[0]
    H = context.shape[2]
    W = context.shape[3]
    B = x.shape[0]
    reps = B // nc                       # == 250 (hard-coded repeat in the module)

    ctx = jnp.transpose(context, (0, 2, 3, 1)).astype(jnp.float32)     # NHWC

    # ---- call 1: conv1 + dist-conv + BN + ReLU + 2x2 maxpool ----
    p1 = _phase_split(_im2col3x3(ctx))                 # (4, nc*(H/2)*(W/2), 9)
    R1 = nc * (H // 2) * (W // 2)
    pooled1, d_all = _call(
        _conv1_dconv_bn_pool_kernel,
        (jax.ShapeDtypeStruct((R1, 4), jnp.float32),
         jax.ShapeDtypeStruct((4, R1, 4), jnp.float32)),
        p1, prep["w1m"], prep["conv1_b"], prep["bn1_g"], prep["bn1_b"],
        prep["wdm"], prep["dconv_b"])

    # ---- call 2: conv2 + BN + ReLU + 2x2 maxpool ----
    img1 = pooled1.reshape(nc, H // 2, W // 2, 4)
    p2 = _phase_split(_im2col3x3(img1))                # (4, nc*(H/4)*(W/4), 36)
    R2 = nc * (H // 4) * (W // 4)
    pooled2 = _call(
        _conv2_bn_pool_kernel,
        jax.ShapeDtypeStruct((R2, 4), jnp.float32),
        p2, prep["w2m"], prep["conv2_b"], prep["bn2_g"], prep["bn2_b"])

    feat = pooled2.reshape(nc, (H // 4) * (W // 4) * 4)                # (nc, 256)
    d_flat = jnp.transpose(
        d_all.reshape(4, nc, (H // 2) * (W // 2), 4),
        (1, 2, 0, 3)).reshape(nc, H * W * 4)                           # (nc, H*W*4)

    # ---- call 3: mask on unique rows + fused MLP + dist linear ----
    B_pad = ((B + 7) // 8) * 8                         # 250 -> 256: clean sublane tiles
    x_pad = jnp.pad(x.astype(jnp.float32), ((0, B_pad - B), (0, 0)))
    rmat = (jnp.arange(B_pad)[:, None] // reps
            == jnp.arange(nc)[None, :]).astype(jnp.float32)            # (B_pad, nc)

    out_pad, mask_small, out_c = _call(
        _mlp_dist_kernel,
        (jax.ShapeDtypeStruct((B_pad, 6), jnp.float32),
         jax.ShapeDtypeStruct((nc, 256), jnp.float32),
         jax.ShapeDtypeStruct((nc, 10), jnp.float32)),
        x_pad, feat, rmat, d_flat,
        prep["cfc1_wp"], prep["cfc1_b"],
        prep["fc1_w"], prep["fc1_b"],
        prep["fc2_w"], prep["fc2_b"],
        prep["fc3_w"], prep["fc3_b"],
        prep["fc4_w"], prep["fc4_b"],
        prep["meff2"], prep["dcfc2_b"])

    out = out_pad[:B]
    out_mask = jnp.repeat(mask_small, reps, axis=0)                    # (B, 256)
    return out, out_mask, out_c


if __name__ == "__main__":
    key = jax.random.PRNGKey(0)
    kp, kx, kc = jax.random.split(key, 3)

    len_context = 32
    nc = 1                       # one context image
    B = nc * 250                 # forward hard-codes .repeat(1, 250)

    params = init_params(kp, len_context)
    prep = prepare_params(params, len_context)     # one-time parameter prep

    x = jax.random.normal(kx, (B, 3), jnp.float32)
    context = jax.random.normal(kc, (nc, 1, len_context, len_context), jnp.float32)

    fwd = jax.jit(neural_net_forward)
    out, out_mask, out_c = fwd(prep, x, context)
    jax.block_until_ready((out, out_mask, out_c))

    assert out.shape == (B, 6)
    assert out_mask.shape == (B, 256)
    assert out_c.shape == (nc, 10)
    print("KERNEL_OK")
</pallas_src>

<mosaic_0001>
module attributes {stable_mosaic.version = 11 : i64} {
  func.func @_conv1_dconv_bn_pool_kernel(%arg0: i32, %arg1: memref<4x256x9xf32, #tpu.memory_space<vmem>>, %arg2: memref<9x4xf32, #tpu.memory_space<vmem>>, %arg3: memref<1x4xf32, #tpu.memory_space<vmem>>, %arg4: memref<1x4xf32, #tpu.memory_space<vmem>>, %arg5: memref<1x4xf32, #tpu.memory_space<vmem>>, %arg6: memref<9x4xf32, #tpu.memory_space<vmem>>, %arg7: memref<1x4xf32, #tpu.memory_space<vmem>>, %arg8: memref<256x4xf32, #tpu.memory_space<vmem>>, %arg9: memref<4x256x4xf32, #tpu.memory_space<vmem>>) attributes {dimension_semantics = [#tpu.dimension_semantics<arbitrary>], iteration_bounds = array<i64: 1>, scalar_prefetch = 0 : i64, scratch_operands = 0 : i64, tpu.core_type = #tpu.core_type<tc>, window_params = [{pipeline_mode = #tpu.pipeline_mode<synchronous>, transform_indices = @transform_0, window_bounds = array<i64: 4, 256, 9>}, {pipeline_mode = #tpu.pipeline_mode<synchronous>, transform_indices = @transform_1, window_bounds = array<i64: 9, 4>}, {pipeline_mode = #tpu.pipeline_mode<synchronous>, transform_indices = @transform_2, window_bounds = array<i64: 1, 4>}, {pipeline_mode = #tpu.pipeline_mode<synchronous>, transform_indices = @transform_3, window_bounds = array<i64: 1, 4>}, {pipeline_mode = #tpu.pipeline_mode<synchronous>, transform_indices = @transform_4, window_bounds = array<i64: 1, 4>}, {pipeline_mode = #tpu.pipeline_mode<synchronous>, transform_indices = @transform_5, window_bounds = array<i64: 9, 4>}, {pipeline_mode = #tpu.pipeline_mode<synchronous>, transform_indices = @transform_6, window_bounds = array<i64: 1, 4>}, {pipeline_mode = #tpu.pipeline_mode<synchronous>, transform_indices = @transform_7, window_bounds = array<i64: 256, 4>}, {pipeline_mode = #tpu.pipeline_mode<synchronous>, transform_indices = @transform_8, window_bounds = array<i64: 4, 256, 4>}]} {
    %c0 = arith.constant 0 : index
    %c0_0 = arith.constant 0 : index
    %0 = vector.load %arg2[%c0, %c0_0] : memref<9x4xf32, #tpu.memory_space<vmem>>, vector<9x4xf32>
    %c0_1 = arith.constant 0 : index
    %c0_2 = arith.constant 0 : index
    %1 = vector.load %arg3[%c0_1, %c0_2] : memref<1x4xf32, #tpu.memory_space<vmem>>, vector<1x4xf32>
    %c0_3 = arith.constant 0 : index
    %c0_4 = arith.constant 0 : index
    %2 = vector.load %arg6[%c0_3, %c0_4] : memref<9x4xf32, #tpu.memory_space<vmem>>, vector<9x4xf32>
    %c0_5 = arith.constant 0 : index
    %c0_6 = arith.constant 0 : index
    %3 = vector.load %arg7[%c0_5, %c0_6] : memref<1x4xf32, #tpu.memory_space<vmem>>, vector<1x4xf32>
    %c0_7 = arith.constant 0 : index
    %c0_8 = arith.constant 0 : index
    %c0_9 = arith.constant 0 : index
    %4 = vector.load %arg1[%c0_7, %c0_8, %c0_9] : memref<4x256x9xf32, #tpu.memory_space<vmem>>, vector<1x256x9xf32>
    %5 = vector.shape_cast %4 : vector<1x256x9xf32> to vector<256x9xf32>
    %cst = arith.constant dense<0.000000e+00> : vector<256x4xf32>
    %6 = tpu.matmul %5, %0, %cst {dimension_numbers = #tpu.dot_dimension_numbers<[1], [0], [0], [1], [0, 0, 1, 1], [], []>} : vector<256x9xf32>, vector<9x4xf32>, vector<256x4xf32> -> vector<256x4xf32>
    %7 = vector.broadcast %1 : vector<1x4xf32> to vector<256x4xf32>
    %8 = arith.addf %6, %7 : vector<256x4xf32>
    %cst_10 = arith.constant dense<0.000000e+00> : vector<256x4xf32>
    %9 = tpu.matmul %5, %2, %cst_10 {dimension_numbers = #tpu.dot_dimension_numbers<[1], [0], [0], [1], [0, 0, 1, 1], [], []>} : vector<256x9xf32>, vector<9x4xf32>, vector<256x4xf32> -> vector<256x4xf32>
    %10 = vector.broadcast %3 : vector<1x4xf32> to vector<256x4xf32>
    %11 = arith.addf %9, %10 : vector<256x4xf32>
    %cst_11 = arith.constant 0.000000e+00 : f32
    %12 = vector.broadcast %cst_11 : f32 to vector<256x4xf32>
    %13 = arith.maximumf %11, %12 : vector<256x4xf32>
    %c0_12 = arith.constant 0 : index
    %c0_13 = arith.constant 0 : index
    %c0_14 = arith.constant 0 : index
    %14 = vector.load %arg9[%c0_12, %c0_13, %c0_14] : memref<4x256x4xf32, #tpu.memory_space<vmem>>, vector<1x256x4xf32>
    %15 = vector.shape_cast %14 : vector<1x256x4xf32> to vector<256x4xf32>
    %16 = vector.shape_cast %13 : vector<256x4xf32> to vector<1x256x4xf32>
    tpu.vector_store %arg9[%c0_12, %c0_13, %c0_14], %16 {strides = array<i32>} : memref<4x256x4xf32, #tpu.memory_space<vmem>>, vector<1x256x4xf32>,
    %c1 = arith.constant 1 : index
    %c0_15 = arith.constant 0 : index
    %c0_16 = arith.constant 0 : index
    %17 = vector.load %arg1[%c1, %c0_15, %c0_16] : memref<4x256x9xf32, #tpu.memory_space<vmem>>, vector<1x256x9xf32>
    %18 = vector.shape_cast %17 : vector<1x256x9xf32> to vector<256x9xf32>
    %cst_17 = arith.constant dense<0.000000e+00> : vector<256x4xf32>
    %19 = tpu.matmul %18, %0, %cst_17 {dimension_numbers = #tpu.dot_dimension_numbers<[1], [0], [0], [1], [0, 0, 1, 1], [], []>} : vector<256x9xf32>, vector<9x4xf32>, vector<256x4xf32> -> vector<256x4xf32>
    %20 = vector.broadcast %1 : vector<1x4xf32> to vector<256x4xf32>
    %21 = arith.addf %19, %20 : vector<256x4xf32>
    %cst_18 = arith.constant dense<0.000000e+00> : vector<256x4xf32>
    %22 = tpu.matmul %18, %2, %cst_18 {dimension_numbers = #tpu.dot_dimension_numbers<[1], [0], [0], [1], [0, 0, 1, 1], [], []>} : vector<256x9xf32>, vector<9x4xf32>, vector<256x4xf32> -> vector<256x4xf32>
    %23 = vector.broadcast %3 : vector<1x4xf32> to vector<256x4xf32>
    %24 = arith.addf %22, %23 : vector<256x4xf32>
    %cst_19 = arith.constant 0.000000e+00 : f32
    %25 = vector.broadcast %cst_19 : f32 to vector<256x4xf32>
    %26 = arith.maximumf %24, %25 : vector<256x4xf32>
    %c1_20 = arith.constant 1 : index
    %c0_21 = arith.constant 0 : index
    %c0_22 = arith.constant 0 : index
    %27 = vector.load %arg9[%c1_20, %c0_21, %c0_22] : memref<4x256x4xf32, #tpu.memory_space<vmem>>, vector<1x256x4xf32>
    %28 = vector.shape_cast %27 : vector<1x256x4xf32> to vector<256x4xf32>
    %29 = vector.shape_cast %26 : vector<256x4xf32> to vector<1x256x4xf32>
    tpu.vector_store %arg9[%c1_20, %c0_21, %c0_22], %29 {strides = array<i32>} : memref<4x256x4xf32, #tpu.memory_space<vmem>>, vector<1x256x4xf32>,
    %c2 = arith.constant 2 : index
    %c0_23 = arith.constant 0 : index
    %c0_24 = arith.constant 0 : index
    %30 = vector.load %arg1[%c2, %c0_23, %c0_24] : memref<4x256x9xf32, #tpu.memory_space<vmem>>, vector<1x256x9xf32>
    %31 = vector.shape_cast %30 : vector<1x256x9xf32> to vector<256x9xf32>
    %cst_25 = arith.constant dense<0.000000e+00> : vector<256x4xf32>
    %32 = tpu.matmul %31, %0, %cst_25 {dimension_numbers = #tpu.dot_dimension_numbers<[1], [0], [0], [1], [0, 0, 1, 1], [], []>} : vector<256x9xf32>, vector<9x4xf32>, vector<256x4xf32> -> vector<256x4xf32>
    %33 = vector.broadcast %1 : vector<1x4xf32> to vector<256x4xf32>
    %34 = arith.addf %32, %33 : vector<256x4xf32>
    %cst_26 = arith.constant dense<0.000000e+00> : vector<256x4xf32>
    %35 = tpu.matmul %31, %2, %cst_26 {dimension_numbers = #tpu.dot_dimension_numbers<[1], [0], [0], [1], [0, 0, 1, 1], [], []>} : vector<256x9xf32>, vector<9x4xf32>, vector<256x4xf32> -> vector<256x4xf32>
    %36 = vector.broadcast %3 : vector<1x4xf32> to vector<256x4xf32>
    %37 = arith.addf %35, %36 : vector<256x4xf32>
    %cst_27 = arith.constant 0.000000e+00 : f32
    %38 = vector.broadcast %cst_27 : f32 to vector<256x4xf32>
    %39 = arith.maximumf %37, %38 : vector<256x4xf32>
    %c2_28 = arith.constant 2 : index
    %c0_29 = arith.constant 0 : index
    %c0_30 = arith.constant 0 : index
    %40 = vector.load %arg9[%c2_28, %c0_29, %c0_30] : memref<4x256x4xf32, #tpu.memory_space<vmem>>, vector<1x256x4xf32>
    %41 = vector.shape_cast %40 : vector<1x256x4xf32> to vector<256x4xf32>
    %42 = vector.shape_cast %39 : vector<256x4xf32> to vector<1x256x4xf32>
    tpu.vector_store %arg9[%c2_28, %c0_29, %c0_30], %42 {strides = array<i32>} : memref<4x256x4xf32, #tpu.memory_space<vmem>>, vector<1x256x4xf32>,
    %c3 = arith.constant 3 : index
    %c0_31 = arith.constant 0 : index
    %c0_32 = arith.constant 0 : index
    %43 = vector.load %arg1[%c3, %c0_31, %c0_32] : memref<4x256x9xf32, #tpu.memory_space<vmem>>, vector<1x256x9xf32>
    %44 = vector.shape_cast %43 : vector<1x256x9xf32> to vector<256x9xf32>
    %cst_33 = arith.constant dense<0.000000e+00> : vector<256x4xf32>
    %45 = tpu.matmul %44, %0, %cst_33 {dimension_numbers = #tpu.dot_dimension_numbers<[1], [0], [0], [1], [0, 0, 1, 1], [], []>} : vector<256x9xf32>, vector<9x4xf32>, vector<256x4xf32> -> vector<256x4xf32>
    %46 = vector.broadcast %1 : vector<1x4xf32> to vector<256x4xf32>
    %47 = arith.addf %45, %46 : vector<256x4xf32>
    %cst_34 = arith.constant dense<0.000000e+00> : vector<256x4xf32>
    %48 = tpu.matmul %44, %2, %cst_34 {dimension_numbers = #tpu.dot_dimension_numbers<[1], [0], [0], [1], [0, 0, 1, 1], [], []>} : vector<256x9xf32>, vector<9x4xf32>, vector<256x4xf32> -> vector<256x4xf32>
    %49 = vector.broadcast %3 : vector<1x4xf32> to vector<256x4xf32>
    %50 = arith.addf %48, %49 : vector<256x4xf32>
    %cst_35 = arith.constant 0.000000e+00 : f32
    %51 = vector.broadcast %cst_35 : f32 to vector<256x4xf32>
    %52 = arith.maximumf %50, %51 : vector<256x4xf32>
    %c3_36 = arith.constant 3 : index
    %c0_37 = arith.constant 0 : index
    %c0_38 = arith.constant 0 : index
    %53 = vector.load %arg9[%c3_36, %c0_37, %c0_38] : memref<4x256x4xf32, #tpu.memory_space<vmem>>, vector<1x256x4xf32>
    %54 = vector.shape_cast %53 : vector<1x256x4xf32> to vector<256x4xf32>
    %55 = vector.shape_cast %52 : vector<256x4xf32> to vector<1x256x4xf32>
    tpu.vector_store %arg9[%c3_36, %c0_37, %c0_38], %55 {strides = array<i32>} : memref<4x256x4xf32, #tpu.memory_space<vmem>>, vector<1x256x4xf32>,
    %cst_39 = arith.constant dense<0.000000e+00> : vector<4xf32>
    %56 = vector.multi_reduction <add>, %8, %cst_39 [0] : vector<256x4xf32> to vector<4xf32>
    %57 = vector.shape_cast %56 : vector<4xf32> to vector<1x4xf32>
    %cst_40 = arith.constant dense<0.000000e+00> : vector<4xf32>
    %58 = vector.multi_reduction <add>, %21, %cst_40 [0] : vector<256x4xf32> to vector<4xf32>
    %59 = vector.shape_cast %58 : vector<4xf32> to vector<1x4xf32>
    %60 = arith.addf %57, %59 : vector<1x4xf32>
    %cst_41 = arith.constant dense<0.000000e+00> : vector<4xf32>
    %61 = vector.multi_reduction <add>, %34, %cst_41 [0] : vector<256x4xf32> to vector<4xf32>
    %62 = vector.shape_cast %61 : vector<4xf32> to vector<1x4xf32>
    %63 = arith.addf %60, %62 : vector<1x4xf32>
    %cst_42 = arith.constant dense<0.000000e+00> : vector<4xf32>
    %64 = vector.multi_reduction <add>, %47, %cst_42 [0] : vector<256x4xf32> to vector<4xf32>
    %65 = vector.shape_cast %64 : vector<4xf32> to vector<1x4xf32>
    %66 = arith.addf %63, %65 : vector<1x4xf32>
    %cst_43 = arith.constant 1.024000e+03 : f32
    %67 = vector.broadcast %cst_43 : f32 to vector<1x4xf32>
    %68 = arith.divf %66, %67 : vector<1x4xf32>
    %69 = vector.broadcast %68 : vector<1x4xf32> to vector<256x4xf32>
    %70 = arith.subf %8, %69 : vector<256x4xf32>
    %71 = arith.mulf %70, %70 : vector<256x4xf32>
    %cst_44 = arith.constant dense<0.000000e+00> : vector<4xf32>
    %72 = vector.multi_reduction <add>, %71, %cst_44 [0] : vector<256x4xf32> to vector<4xf32>
    %73 = vector.shape_cast %72 : vector<4xf32> to vector<1x4xf32>
    %74 = vector.broadcast %68 : vector<1x4xf32> to vector<256x4xf32>
    %75 = arith.subf %21, %74 : vector<256x4xf32>
    %76 = arith.mulf %75, %75 : vector<256x4xf32>
    %cst_45 = arith.constant dense<0.000000e+00> : vector<4xf32>
    %77 = vector.multi_reduction <add>, %76, %cst_45 [0] : vector<256x4xf32> to vector<4xf32>
    %78 = vector.shape_cast %77 : vector<4xf32> to vector<1x4xf32>
    %79 = arith.addf %73, %78 : vector<1x4xf32>
    %80 = vector.broadcast %68 : vector<1x4xf32> to vector<256x4xf32>
    %81 = arith.subf %34, %80 : vector<256x4xf32>
    %82 = arith.mulf %81, %81 : vector<256x4xf32>
    %cst_46 = arith.constant dense<0.000000e+00> : vector<4xf32>
    %83 = vector.multi_reduction <add>, %82, %cst_46 [0] : vector<256x4xf32> to vector<4xf32>
    %84 = vector.shape_cast %83 : vector<4xf32> to vector<1x4xf32>
    %85 = arith.addf %79, %84 : vector<1x4xf32>
    %86 = vector.broadcast %68 : vector<1x4xf32> to vector<256x4xf32>
    %87 = arith.subf %47, %86 : vector<256x4xf32>
    %88 = arith.mulf %87, %87 : vector<256x4xf32>
    %cst_47 = arith.constant dense<0.000000e+00> : vector<4xf32>
    %89 = vector.multi_reduction <add>, %88, %cst_47 [0] : vector<256x4xf32> to vector<4xf32>
    %90 = vector.shape_cast %89 : vector<4xf32> to vector<1x4xf32>
    %91 = arith.addf %85, %90 : vector<1x4xf32>
    %cst_48 = arith.constant 1.024000e+03 : f32
    %92 = vector.broadcast %cst_48 : f32 to vector<1x4xf32>
    %93 = arith.divf %91, %92 : vector<1x4xf32>
    %cst_49 = arith.constant 9.99999974E-6 : f32
    %94 = vector.broadcast %cst_49 : f32 to vector<1x4xf32>
    %95 = arith.addf %93, %94 : vector<1x4xf32>
    %96 = math.rsqrt %95 : vector<1x4xf32>
    %c0_50 = arith.constant 0 : index
    %c0_51 = arith.constant 0 : index
    %97 = vector.load %arg4[%c0_50, %c0_51] : memref<1x4xf32, #tpu.memory_space<vmem>>, vector<1x4xf32>
    %98 = arith.mulf %96, %97 : vector<1x4xf32>
    %c0_52 = arith.constant 0 : index
    %c0_53 = arith.constant 0 : index
    %99 = vector.load %arg5[%c0_52, %c0_53] : memref<1x4xf32, #tpu.memory_space<vmem>>, vector<1x4xf32>
    %100 = vector.broadcast %68 : vector<1x4xf32> to vector<256x4xf32>
    %101 = arith.subf %8, %100 : vector<256x4xf32>
    %102 = vector.broadcast %98 : vector<1x4xf32> to vector<256x4xf32>
    %103 = arith.mulf %101, %102 : vector<256x4xf32>
    %104 = vector.broadcast %99 : vector<1x4xf32> to vector<256x4xf32>
    %105 = arith.addf %103, %104 : vector<256x4xf32>
    %cst_54 = arith.constant 0.000000e+00 : f32
    %106 = vector.broadcast %cst_54 : f32 to vector<256x4xf32>
    %107 = arith.maximumf %105, %106 : vector<256x4xf32>
    %108 = vector.broadcast %68 : vector<1x4xf32> to vector<256x4xf32>
    %109 = arith.subf %21, %108 : vector<256x4xf32>
    %110 = vector.broadcast %98 : vector<1x4xf32> to vector<256x4xf32>
    %111 = arith.mulf %109, %110 : vector<256x4xf32>
    %112 = vector.broadcast %99 : vector<1x4xf32> to vector<256x4xf32>
    %113 = arith.addf %111, %112 : vector<256x4xf32>
    %cst_55 = arith.constant 0.000000e+00 : f32
    %114 = vector.broadcast %cst_55 : f32 to vector<256x4xf32>
    %115 = arith.maximumf %113, %114 : vector<256x4xf32>
    %116 = vector.broadcast %68 : vector<1x4xf32> to vector<256x4xf32>
    %117 = arith.subf %34, %116 : vector<256x4xf32>
    %118 = vector.broadcast %98 : vector<1x4xf32> to vector<256x4xf32>
    %119 = arith.mulf %117, %118 : vector<256x4xf32>
    %120 = vector.broadcast %99 : vector<1x4xf32> to vector<256x4xf32>
    %121 = arith.addf %119, %120 : vector<256x4xf32>
    %cst_56 = arith.constant 0.000000e+00 : f32
    %122 = vector.broadcast %cst_56 : f32 to vector<256x4xf32>
    %123 = arith.maximumf %121, %122 : vector<256x4xf32>
    %124 = vector.broadcast %68 : vector<1x4xf32> to vector<256x4xf32>
    %125 = arith.subf %47, %124 : vector<256x4xf32>
    %126 = vector.broadcast %98 : vector<1x4xf32> to vector<256x4xf32>
    %127 = arith.mulf %125, %126 : vector<256x4xf32>
    %128 = vector.broadcast %99 : vector<1x4xf32> to vector<256x4xf32>
    %129 = arith.addf %127, %128 : vector<256x4xf32>
    %cst_57 = arith.constant 0.000000e+00 : f32
    %130 = vector.broadcast %cst_57 : f32 to vector<256x4xf32>
    %131 = arith.maximumf %129, %130 : vector<256x4xf32>
    %132 = arith.maximumf %107, %115 : vector<256x4xf32>
    %133 = arith.maximumf %123, %131 : vector<256x4xf32>
    %134 = arith.maximumf %132, %133 : vector<256x4xf32>
    %c0_58 = arith.constant 0 : index
    %c0_59 = arith.constant 0 : index
    %135 = vector.load %arg8[%c0_58, %c0_59] : memref<256x4xf32, #tpu.memory_space<vmem>>, vector<256x4xf32>
    tpu.vector_store %arg8[%c0_58, %c0_59], %134 {strides = array<i32>} : memref<256x4xf32, #tpu.memory_space<vmem>>, vector<256x4xf32>,
    return
  }
  func.func @transform_0(%arg0: i32) -> (i32, i32, i32) {
    %c0_i32 = arith.constant 0 : i32
    %c0_i32_0 = arith.constant 0 : i32
    %c0_i32_1 = arith.constant 0 : i32
    %c0_i32_2 = arith.constant 0 : i32
    return %c0_i32, %c0_i32_0, %c0_i32_1 : i32, i32, i32
  }
  func.func @transform_1(%arg0: i32) -> (i32, i32) {
    %c0_i32 = arith.constant 0 : i32
    %c0_i32_0 = arith.constant 0 : i32
    %c0_i32_1 = arith.constant 0 : i32
    return %c0_i32, %c0_i32_0 : i32, i32
  }
  func.func @transform_2(%arg0: i32) -> (i32, i32) {
    %c0_i32 = arith.constant 0 : i32
    %c0_i32_0 = arith.constant 0 : i32
    %c0_i32_1 = arith.constant 0 : i32
    return %c0_i32, %c0_i32_0 : i32, i32
  }
  func.func @transform_3(%arg0: i32) -> (i32, i32) {
    %c0_i32 = arith.constant 0 : i32
    %c0_i32_0 = arith.constant 0 : i32
    %c0_i32_1 = arith.constant 0 : i32
    return %c0_i32, %c0_i32_0 : i32, i32
  }
  func.func @transform_4(%arg0: i32) -> (i32, i32) {
    %c0_i32 = arith.constant 0 : i32
    %c0_i32_0 = arith.constant 0 : i32
    %c0_i32_1 = arith.constant 0 : i32
    return %c0_i32, %c0_i32_0 : i32, i32
  }
  func.func @transform_5(%arg0: i32) -> (i32, i32) {
    %c0_i32 = arith.constant 0 : i32
    %c0_i32_0 = arith.constant 0 : i32
    %c0_i32_1 = arith.constant 0 : i32
    return %c0_i32, %c0_i32_0 : i32, i32
  }
  func.func @transform_6(%arg0: i32) -> (i32, i32) {
    %c0_i32 = arith.constant 0 : i32
    %c0_i32_0 = arith.constant 0 : i32
    %c0_i32_1 = arith.constant 0 : i32
    return %c0_i32, %c0_i32_0 : i32, i32
  }
  func.func @transform_7(%arg0: i32) -> (i32, i32) {
    %c0_i32 = arith.constant 0 : i32
    %c0_i32_0 = arith.constant 0 : i32
    %c0_i32_1 = arith.constant 0 : i32
    return %c0_i32, %c0_i32_0 : i32, i32
  }
  func.func @transform_8(%arg0: i32) -> (i32, i32, i32) {
    %c0_i32 = arith.constant 0 : i32
    %c0_i32_0 = arith.constant 0 : i32
    %c0_i32_1 = arith.constant 0 : i32
    %c0_i32_2 = arith.constant 0 : i32
    return %c0_i32, %c0_i32_0, %c0_i32_1 : i32, i32, i32
  }
}

module attributes {stable_mosaic.version = 11 : i64} {
  func.func @_conv2_bn_pool_kernel(%arg0: i32, %arg1: memref<4x64x36xf32, #tpu.memory_space<vmem>>, %arg2: memref<36x4xf32, #tpu.memory_space<vmem>>, %arg3: memref<1x4xf32, #tpu.memory_space<vmem>>, %arg4: memref<1x4xf32, #tpu.memory_space<vmem>>, %arg5: memref<1x4xf32, #tpu.memory_space<vmem>>, %arg6: memref<64x4xf32, #tpu.memory_space<vmem>>) attributes {dimension_semantics = [#tpu.dimension_semantics<arbitrary>], iteration_bounds = array<i64: 1>, scalar_prefetch = 0 : i64, scratch_operands = 0 : i64, tpu.core_type = #tpu.core_type<tc>, window_params = [{pipeline_mode = #tpu.pipeline_mode<synchronous>, transform_indices = @transform_0, window_bounds = array<i64: 4, 64, 36>}, {pipeline_mode = #tpu.pipeline_mode<synchronous>, transform_indices = @transform_1, window_bounds = array<i64: 36, 4>}, {pipeline_mode = #tpu.pipeline_mode<synchronous>, transform_indices = @transform_2, window_bounds = array<i64: 1, 4>}, {pipeline_mode = #tpu.pipeline_mode<synchronous>, transform_indices = @transform_3, window_bounds = array<i64: 1, 4>}, {pipeline_mode = #tpu.pipeline_mode<synchronous>, transform_indices = @transform_4, window_bounds = array<i64: 1, 4>}, {pipeline_mode = #tpu.pipeline_mode<synchronous>, transform_indices = @transform_5, window_bounds = array<i64: 64, 4>}]} {
    %c0 = arith.constant 0 : index
    %c0_0 = arith.constant 0 : index
    %0 = vector.load %arg2[%c0, %c0_0] : memref<36x4xf32, #tpu.memory_space<vmem>>, vector<36x4xf32>
    %c0_1 = arith.constant 0 : index
    %c0_2 = arith.constant 0 : index
    %1 = vector.load %arg3[%c0_1, %c0_2] : memref<1x4xf32, #tpu.memory_space<vmem>>, vector<1x4xf32>
    %c0_3 = arith.constant 0 : index
    %c0_4 = arith.constant 0 : index
    %c0_5 = arith.constant 0 : index
    %2 = vector.load %arg1[%c0_3, %c0_4, %c0_5] : memref<4x64x36xf32, #tpu.memory_space<vmem>>, vector<1x64x36xf32>
    %3 = vector.shape_cast %2 : vector<1x64x36xf32> to vector<64x36xf32>
    %cst = arith.constant dense<0.000000e+00> : vector<64x4xf32>
    %4 = tpu.matmul %3, %0, %cst {dimension_numbers = #tpu.dot_dimension_numbers<[1], [0], [0], [1], [0, 0, 1, 1], [], []>} : vector<64x36xf32>, vector<36x4xf32>, vector<64x4xf32> -> vector<64x4xf32>
    %5 = vector.broadcast %1 : vector<1x4xf32> to vector<64x4xf32>
    %6 = arith.addf %4, %5 : vector<64x4xf32>
    %c1 = arith.constant 1 : index
    %c0_6 = arith.constant 0 : index
    %c0_7 = arith.constant 0 : index
    %7 = vector.load %arg1[%c1, %c0_6, %c0_7] : memref<4x64x36xf32, #tpu.memory_space<vmem>>, vector<1x64x36xf32>
    %8 = vector.shape_cast %7 : vector<1x64x36xf32> to vector<64x36xf32>
    %cst_8 = arith.constant dense<0.000000e+00> : vector<64x4xf32>
    %9 = tpu.matmul %8, %0, %cst_8 {dimension_numbers = #tpu.dot_dimension_numbers<[1], [0], [0], [1], [0, 0, 1, 1], [], []>} : vector<64x36xf32>, vector<36x4xf32>, vector<64x4xf32> -> vector<64x4xf32>
    %10 = vector.broadcast %1 : vector<1x4xf32> to vector<64x4xf32>
    %11 = arith.addf %9, %10 : vector<64x4xf32>
    %c2 = arith.constant 2 : index
    %c0_9 = arith.constant 0 : index
    %c0_10 = arith.constant 0 : index
    %12 = vector.load %arg1[%c2, %c0_9, %c0_10] : memref<4x64x36xf32, #tpu.memory_space<vmem>>, vector<1x64x36xf32>
    %13 = vector.shape_cast %12 : vector<1x64x36xf32> to vector<64x36xf32>
    %cst_11 = arith.constant dense<0.000000e+00> : vector<64x4xf32>
    %14 = tpu.matmul %13, %0, %cst_11 {dimension_numbers = #tpu.dot_dimension_numbers<[1], [0], [0], [1], [0, 0, 1, 1], [], []>} : vector<64x36xf32>, vector<36x4xf32>, vector<64x4xf32> -> vector<64x4xf32>
    %15 = vector.broadcast %1 : vector<1x4xf32> to vector<64x4xf32>
    %16 = arith.addf %14, %15 : vector<64x4xf32>
    %c3 = arith.constant 3 : index
    %c0_12 = arith.constant 0 : index
    %c0_13 = arith.constant 0 : index
    %17 = vector.load %arg1[%c3, %c0_12, %c0_13] : memref<4x64x36xf32, #tpu.memory_space<vmem>>, vector<1x64x36xf32>
    %18 = vector.shape_cast %17 : vector<1x64x36xf32> to vector<64x36xf32>
    %cst_14 = arith.constant dense<0.000000e+00> : vector<64x4xf32>
    %19 = tpu.matmul %18, %0, %cst_14 {dimension_numbers = #tpu.dot_dimension_numbers<[1], [0], [0], [1], [0, 0, 1, 1], [], []>} : vector<64x36xf32>, vector<36x4xf32>, vector<64x4xf32> -> vector<64x4xf32>
    %20 = vector.broadcast %1 : vector<1x4xf32> to vector<64x4xf32>
    %21 = arith.addf %19, %20 : vector<64x4xf32>
    %cst_15 = arith.constant dense<0.000000e+00> : vector<4xf32>
    %22 = vector.multi_reduction <add>, %6, %cst_15 [0] : vector<64x4xf32> to vector<4xf32>
    %23 = vector.shape_cast %22 : vector<4xf32> to vector<1x4xf32>
    %cst_16 = arith.constant dense<0.000000e+00> : vector<4xf32>
    %24 = vector.multi_reduction <add>, %11, %cst_16 [0] : vector<64x4xf32> to vector<4xf32>
    %25 = vector.shape_cast %24 : vector<4xf32> to vector<1x4xf32>
    %26 = arith.addf %23, %25 : vector<1x4xf32>
    %cst_17 = arith.constant dense<0.000000e+00> : vector<4xf32>
    %27 = vector.multi_reduction <add>, %16, %cst_17 [0] : vector<64x4xf32> to vector<4xf32>
    %28 = vector.shape_cast %27 : vector<4xf32> to vector<1x4xf32>
    %29 = arith.addf %26, %28 : vector<1x4xf32>
    %cst_18 = arith.constant dense<0.000000e+00> : vector<4xf32>
    %30 = vector.multi_reduction <add>, %21, %cst_18 [0] : vector<64x4xf32> to vector<4xf32>
    %31 = vector.shape_cast %30 : vector<4xf32> to vector<1x4xf32>
    %32 = arith.addf %29, %31 : vector<1x4xf32>
    %cst_19 = arith.constant 2.560000e+02 : f32
    %33 = vector.broadcast %cst_19 : f32 to vector<1x4xf32>
    %34 = arith.divf %32, %33 : vector<1x4xf32>
    %35 = vector.broadcast %34 : vector<1x4xf32> to vector<64x4xf32>
    %36 = arith.subf %6, %35 : vector<64x4xf32>
    %37 = arith.mulf %36, %36 : vector<64x4xf32>
    %cst_20 = arith.constant dense<0.000000e+00> : vector<4xf32>
    %38 = vector.multi_reduction <add>, %37, %cst_20 [0] : vector<64x4xf32> to vector<4xf32>
    %39 = vector.shape_cast %38 : vector<4xf32> to vector<1x4xf32>
    %40 = vector.broadcast %34 : vector<1x4xf32> to vector<64x4xf32>
    %41 = arith.subf %11, %40 : vector<64x4xf32>
    %42 = arith.mulf %41, %41 : vector<64x4xf32>
    %cst_21 = arith.constant dense<0.000000e+00> : vector<4xf32>
    %43 = vector.multi_reduction <add>, %42, %cst_21 [0] : vector<64x4xf32> to vector<4xf32>
    %44 = vector.shape_cast %43 : vector<4xf32> to vector<1x4xf32>
    %45 = arith.addf %39, %44 : vector<1x4xf32>
    %46 = vector.broadcast %34 : vector<1x4xf32> to vector<64x4xf32>
    %47 = arith.subf %16, %46 : vector<64x4xf32>
    %48 = arith.mulf %47, %47 : vector<64x4xf32>
    %cst_22 = arith.constant dense<0.000000e+00> : vector<4xf32>
    %49 = vector.multi_reduction <add>, %48, %cst_22 [0] : vector<64x4xf32> to vector<4xf32>
    %50 = vector.shape_cast %49 : vector<4xf32> to vector<1x4xf32>
    %51 = arith.addf %45, %50 : vector<1x4xf32>
    %52 = vector.broadcast %34 : vector<1x4xf32> to vector<64x4xf32>
    %53 = arith.subf %21, %52 : vector<64x4xf32>
    %54 = arith.mulf %53, %53 : vector<64x4xf32>
    %cst_23 = arith.constant dense<0.000000e+00> : vector<4xf32>
    %55 = vector.multi_reduction <add>, %54, %cst_23 [0] : vector<64x4xf32> to vector<4xf32>
    %56 = vector.shape_cast %55 : vector<4xf32> to vector<1x4xf32>
    %57 = arith.addf %51, %56 : vector<1x4xf32>
    %cst_24 = arith.constant 2.560000e+02 : f32
    %58 = vector.broadcast %cst_24 : f32 to vector<1x4xf32>
    %59 = arith.divf %57, %58 : vector<1x4xf32>
    %cst_25 = arith.constant 9.99999974E-6 : f32
    %60 = vector.broadcast %cst_25 : f32 to vector<1x4xf32>
    %61 = arith.addf %59, %60 : vector<1x4xf32>
    %62 = math.rsqrt %61 : vector<1x4xf32>
    %c0_26 = arith.constant 0 : index
    %c0_27 = arith.constant 0 : index
    %63 = vector.load %arg4[%c0_26, %c0_27] : memref<1x4xf32, #tpu.memory_space<vmem>>, vector<1x4xf32>
    %64 = arith.mulf %62, %63 : vector<1x4xf32>
    %c0_28 = arith.constant 0 : index
    %c0_29 = arith.constant 0 : index
    %65 = vector.load %arg5[%c0_28, %c0_29] : memref<1x4xf32, #tpu.memory_space<vmem>>, vector<1x4xf32>
    %66 = vector.broadcast %34 : vector<1x4xf32> to vector<64x4xf32>
    %67 = arith.subf %6, %66 : vector<64x4xf32>
    %68 = vector.broadcast %64 : vector<1x4xf32> to vector<64x4xf32>
    %69 = arith.mulf %67, %68 : vector<64x4xf32>
    %70 = vector.broadcast %65 : vector<1x4xf32> to vector<64x4xf32>
    %71 = arith.addf %69, %70 : vector<64x4xf32>
    %cst_30 = arith.constant 0.000000e+00 : f32
    %72 = vector.broadcast %cst_30 : f32 to vector<64x4xf32>
    %73 = arith.maximumf %71, %72 : vector<64x4xf32>
    %74 = vector.broadcast %34 : vector<1x4xf32> to vector<64x4xf32>
    %75 = arith.subf %11, %74 : vector<64x4xf32>
    %76 = vector.broadcast %64 : vector<1x4xf32> to vector<64x4xf32>
    %77 = arith.mulf %75, %76 : vector<64x4xf32>
    %78 = vector.broadcast %65 : vector<1x4xf32> to vector<64x4xf32>
    %79 = arith.addf %77, %78 : vector<64x4xf32>
    %cst_31 = arith.constant 0.000000e+00 : f32
    %80 = vector.broadcast %cst_31 : f32 to vector<64x4xf32>
    %81 = arith.maximumf %79, %80 : vector<64x4xf32>
    %82 = vector.broadcast %34 : vector<1x4xf32> to vector<64x4xf32>
    %83 = arith.subf %16, %82 : vector<64x4xf32>
    %84 = vector.broadcast %64 : vector<1x4xf32> to vector<64x4xf32>
    %85 = arith.mulf %83, %84 : vector<64x4xf32>
    %86 = vector.broadcast %65 : vector<1x4xf32> to vector<64x4xf32>
    %87 = arith.addf %85, %86 : vector<64x4xf32>
    %cst_32 = arith.constant 0.000000e+00 : f32
    %88 = vector.broadcast %cst_32 : f32 to vector<64x4xf32>
    %89 = arith.maximumf %87, %88 : vector<64x4xf32>
    %90 = vector.broadcast %34 : vector<1x4xf32> to vector<64x4xf32>
    %91 = arith.subf %21, %90 : vector<64x4xf32>
    %92 = vector.broadcast %64 : vector<1x4xf32> to vector<64x4xf32>
    %93 = arith.mulf %91, %92 : vector<64x4xf32>
    %94 = vector.broadcast %65 : vector<1x4xf32> to vector<64x4xf32>
    %95 = arith.addf %93, %94 : vector<64x4xf32>
    %cst_33 = arith.constant 0.000000e+00 : f32
    %96 = vector.broadcast %cst_33 : f32 to vector<64x4xf32>
    %97 = arith.maximumf %95, %96 : vector<64x4xf32>
    %98 = arith.maximumf %73, %81 : vector<64x4xf32>
    %99 = arith.maximumf %89, %97 : vector<64x4xf32>
    %100 = arith.maximumf %98, %99 : vector<64x4xf32>
    %c0_34 = arith.constant 0 : index
    %c0_35 = arith.constant 0 : index
    %101 = vector.load %arg6[%c0_34, %c0_35] : memref<64x4xf32, #tpu.memory_space<vmem>>, vector<64x4xf32>
    tpu.vector_store %arg6[%c0_34, %c0_35], %100 {strides = array<i32>} : memref<64x4xf32, #tpu.memory_space<vmem>>, vector<64x4xf32>,
    return
  }
  func.func @transform_0(%arg0: i32) -> (i32, i32, i32) {
    %c0_i32 = arith.constant 0 : i32
    %c0_i32_0 = arith.constant 0 : i32
    %c0_i32_1 = arith.constant 0 : i32
    %c0_i32_2 = arith.constant 0 : i32
    return %c0_i32, %c0_i32_0, %c0_i32_1 : i32, i32, i32
  }
  func.func @transform_1(%arg0: i32) -> (i32, i32) {
    %c0_i32 = arith.constant 0 : i32
    %c0_i32_0 = arith.constant 0 : i32
    %c0_i32_1 = arith.constant 0 : i32
    return %c0_i32, %c0_i32_0 : i32, i32
  }
  func.func @transform_2(%arg0: i32) -> (i32, i32) {
    %c0_i32 = arith.constant 0 : i32
    %c0_i32_0 = arith.constant 0 : i32
    %c0_i32_1 = arith.constant 0 : i32
    return %c0_i32, %c0_i32_0 : i32, i32
  }
  func.func @transform_3(%arg0: i32) -> (i32, i32) {
    %c0_i32 = arith.constant 0 : i32
    %c0_i32_0 = arith.constant 0 : i32
    %c0_i32_1 = arith.constant 0 : i32
    return %c0_i32, %c0_i32_0 : i32, i32
  }
  func.func @transform_4(%arg0: i32) -> (i32, i32) {
    %c0_i32 = arith.constant 0 : i32
    %c0_i32_0 = arith.constant 0 : i32
    %c0_i32_1 = arith.constant 0 : i32
    return %c0_i32, %c0_i32_0 : i32, i32
  }
  func.func @transform_5(%arg0: i32) -> (i32, i32) {
    %c0_i32 = arith.constant 0 : i32
    %c0_i32_0 = arith.constant 0 : i32
    %c0_i32_1 = arith.constant 0 : i32
    return %c0_i32, %c0_i32_0 : i32, i32
  }
}

module attributes {stable_mosaic.version = 11 : i64} {
  func.func @_mlp_dist_kernel(%arg0: i32, %arg1: memref<256x3xf32, #tpu.memory_space<vmem>>, %arg2: memref<1x256xf32, #tpu.memory_space<vmem>>, %arg3: memref<256x1xf32, #tpu.memory_space<vmem>>, %arg4: memref<1x4096xf32, #tpu.memory_space<vmem>>, %arg5: memref<256x256xf32, #tpu.memory_space<vmem>>, %arg6: memref<1x256xf32, #tpu.memory_space<vmem>>, %arg7: memref<3x256xf32, #tpu.memory_space<vmem>>, %arg8: memref<1x256xf32, #tpu.memory_space<vmem>>, %arg9: memref<256x256xf32, #tpu.memory_space<vmem>>, %arg10: memref<1x256xf32, #tpu.memory_space<vmem>>, %arg11: memref<256x256xf32, #tpu.memory_space<vmem>>, %arg12: memref<1x256xf32, #tpu.memory_space<vmem>>, %arg13: memref<256x6xf32, #tpu.memory_space<vmem>>, %arg14: memref<1x6xf32, #tpu.memory_space<vmem>>, %arg15: memref<4096x10xf32, #tpu.memory_space<vmem>>, %arg16: memref<1x10xf32, #tpu.memory_space<vmem>>, %arg17: memref<256x6xf32, #tpu.memory_space<vmem>>, %arg18: memref<1x256xf32, #tpu.memory_space<vmem>>, %arg19: memref<1x10xf32, #tpu.memory_space<vmem>>) attributes {dimension_semantics = [#tpu.dimension_semantics<arbitrary>], iteration_bounds = array<i64: 1>, scalar_prefetch = 0 : i64, scratch_operands = 0 : i64, tpu.core_type = #tpu.core_type<tc>, window_params = [{pipeline_mode = #tpu.pipeline_mode<synchronous>, transform_indices = @transform_0, window_bounds = array<i64: 256, 3>}, {pipeline_mode = #tpu.pipeline_mode<synchronous>, transform_indices = @transform_1, window_bounds = array<i64: 1, 256>}, {pipeline_mode = #tpu.pipeline_mode<synchronous>, transform_indices = @transform_2, window_bounds = array<i64: 256, 1>}, {pipeline_mode = #tpu.pipeline_mode<synchronous>, transform_indices = @transform_3, window_bounds = array<i64: 1, 4096>}, {pipeline_mode = #tpu.pipeline_mode<synchronous>, transform_indices = @transform_4, window_bounds = array<i64: 256, 256>}, {pipeline_mode = #tpu.pipeline_mode<synchronous>, transform_indices = @transform_5, window_bounds = array<i64: 1, 256>}, {pipeline_mode = #tpu.pipeline_mode<synchronous>, transform_indices = @transform_6, window_bounds = array<i64: 3, 256>}, {pipeline_mode = #tpu.pipeline_mode<synchronous>, transform_indices = @transform_7, window_bounds = array<i64: 1, 256>}, {pipeline_mode = #tpu.pipeline_mode<synchronous>, transform_indices = @transform_8, window_bounds = array<i64: 256, 256>}, {pipeline_mode = #tpu.pipeline_mode<synchronous>, transform_indices = @transform_9, window_bounds = array<i64: 1, 256>}, {pipeline_mode = #tpu.pipeline_mode<synchronous>, transform_indices = @transform_10, window_bounds = array<i64: 256, 256>}, {pipeline_mode = #tpu.pipeline_mode<synchronous>, transform_indices = @transform_11, window_bounds = array<i64: 1, 256>}, {pipeline_mode = #tpu.pipeline_mode<synchronous>, transform_indices = @transform_12, window_bounds = array<i64: 256, 6>}, {pipeline_mode = #tpu.pipeline_mode<synchronous>, transform_indices = @transform_13, window_bounds = array<i64: 1, 6>}, {pipeline_mode = #tpu.pipeline_mode<synchronous>, transform_indices = @transform_14, window_bounds = array<i64: 4096, 10>}, {pipeline_mode = #tpu.pipeline_mode<synchronous>, transform_indices = @transform_15, window_bounds = array<i64: 1, 10>}, {pipeline_mode = #tpu.pipeline_mode<synchronous>, transform_indices = @transform_16, window_bounds = array<i64: 256, 6>}, {pipeline_mode = #tpu.pipeline_mode<synchronous>, transform_indices = @transform_17, window_bounds = array<i64: 1, 256>}, {pipeline_mode = #tpu.pipeline_mode<synchronous>, transform_indices = @transform_18, window_bounds = array<i64: 1, 10>}]} {
    %c0 = arith.constant 0 : index
    %c0_0 = arith.constant 0 : index
    %0 = vector.load %arg1[%c0, %c0_0] : memref<256x3xf32, #tpu.memory_space<vmem>>, vector<256x3xf32>
    %c0_1 = arith.constant 0 : index
    %c0_2 = arith.constant 0 : index
    %1 = vector.load %arg2[%c0_1, %c0_2] : memref<1x256xf32, #tpu.memory_space<vmem>>, vector<1x256xf32>
    %cst = arith.constant 0.000000e+00 : f32
    %2 = vector.broadcast %cst : f32 to vector<1x256xf32>
    %3 = arith.maximumf %1, %2 : vector<1x256xf32>
    %c0_3 = arith.constant 0 : index
    %c0_4 = arith.constant 0 : index
    %4 = vector.load %arg5[%c0_3, %c0_4] : memref<256x256xf32, #tpu.memory_space<vmem>>, vector<256x256xf32>
    %cst_5 = arith.constant dense<0.000000e+00> : vector<1x256xf32>
    %5 = tpu.matmul %3, %4, %cst_5 {dimension_numbers = #tpu.dot_dimension_numbers<[1], [0], [0], [1], [0, 0, 1, 1], [], []>} : vector<1x256xf32>, vector<256x256xf32>, vector<1x256xf32> -> vector<1x256xf32>
    %c0_6 = arith.constant 0 : index
    %c0_7 = arith.constant 0 : index
    %6 = vector.load %arg6[%c0_6, %c0_7] : memref<1x256xf32, #tpu.memory_space<vmem>>, vector<1x256xf32>
    %7 = arith.addf %5, %6 : vector<1x256xf32>
    %cst_8 = arith.constant 0.000000e+00 : f32
    %8 = vector.broadcast %cst_8 : f32 to vector<1x256xf32>
    %9 = arith.maximumf %7, %8 : vector<1x256xf32>
    %c0_9 = arith.constant 0 : index
    %c0_10 = arith.constant 0 : index
    %10 = vector.load %arg18[%c0_9, %c0_10] : memref<1x256xf32, #tpu.memory_space<vmem>>, vector<1x256xf32>
    tpu.vector_store %arg18[%c0_9, %c0_10], %9 {strides = array<i32>} : memref<1x256xf32, #tpu.memory_space<vmem>>, vector<1x256xf32>,
    %11 = vector.shape_cast %9 : vector<1x256xf32> to vector<1x256xf32>
    %12 = vector.broadcast %11 : vector<1x256xf32> to vector<256x256xf32>
    %c0_11 = arith.constant 0 : index
    %c0_12 = arith.constant 0 : index
    %13 = vector.load %arg7[%c0_11, %c0_12] : memref<3x256xf32, #tpu.memory_space<vmem>>, vector<3x256xf32>
    %cst_13 = arith.constant dense<0.000000e+00> : vector<256x256xf32>
    %14 = tpu.matmul %0, %13, %cst_13 {dimension_numbers = #tpu.dot_dimension_numbers<[1], [0], [0], [1], [0, 0, 1, 1], [], []>} : vector<256x3xf32>, vector<3x256xf32>, vector<256x256xf32> -> vector<256x256xf32>
    %c0_14 = arith.constant 0 : index
    %c0_15 = arith.constant 0 : index
    %15 = vector.load %arg8[%c0_14, %c0_15] : memref<1x256xf32, #tpu.memory_space<vmem>>, vector<1x256xf32>
    %16 = vector.broadcast %15 : vector<1x256xf32> to vector<256x256xf32>
    %17 = arith.addf %14, %16 : vector<256x256xf32>
    %cst_16 = arith.constant 0.000000e+00 : f32
    %18 = vector.broadcast %cst_16 : f32 to vector<256x256xf32>
    %19 = arith.maximumf %17, %18 : vector<256x256xf32>
    %20 = arith.mulf %19, %12 : vector<256x256xf32>
    %c0_17 = arith.constant 0 : index
    %c0_18 = arith.constant 0 : index
    %21 = vector.load %arg9[%c0_17, %c0_18] : memref<256x256xf32, #tpu.memory_space<vmem>>, vector<256x256xf32>
    %cst_19 = arith.constant dense<0.000000e+00> : vector<256x256xf32>
    %22 = tpu.matmul %20, %21, %cst_19 {dimension_numbers = #tpu.dot_dimension_numbers<[1], [0], [0], [1], [0, 0, 1, 1], [], []>} : vector<256x256xf32>, vector<256x256xf32>, vector<256x256xf32> -> vector<256x256xf32>
    %c0_20 = arith.constant 0 : index
    %c0_21 = arith.constant 0 : index
    %23 = vector.load %arg10[%c0_20, %c0_21] : memref<1x256xf32, #tpu.memory_space<vmem>>, vector<1x256xf32>
    %24 = vector.broadcast %23 : vector<1x256xf32> to vector<256x256xf32>
    %25 = arith.addf %22, %24 : vector<256x256xf32>
    %cst_22 = arith.constant 0.000000e+00 : f32
    %26 = vector.broadcast %cst_22 : f32 to vector<256x256xf32>
    %27 = arith.maximumf %25, %26 : vector<256x256xf32>
    %c0_23 = arith.constant 0 : index
    %c0_24 = arith.constant 0 : index
    %28 = vector.load %arg11[%c0_23, %c0_24] : memref<256x256xf32, #tpu.memory_space<vmem>>, vector<256x256xf32>
    %cst_25 = arith.constant dense<0.000000e+00> : vector<256x256xf32>
    %29 = tpu.matmul %27, %28, %cst_25 {dimension_numbers = #tpu.dot_dimension_numbers<[1], [0], [0], [1], [0, 0, 1, 1], [], []>} : vector<256x256xf32>, vector<256x256xf32>, vector<256x256xf32> -> vector<256x256xf32>
    %c0_26 = arith.constant 0 : index
    %c0_27 = arith.constant 0 : index
    %30 = vector.load %arg12[%c0_26, %c0_27] : memref<1x256xf32, #tpu.memory_space<vmem>>, vector<1x256xf32>
    %31 = vector.broadcast %30 : vector<1x256xf32> to vector<256x256xf32>
    %32 = arith.addf %29, %31 : vector<256x256xf32>
    %cst_28 = arith.constant 0.000000e+00 : f32
    %33 = vector.broadcast %cst_28 : f32 to vector<256x256xf32>
    %34 = arith.maximumf %32, %33 : vector<256x256xf32>
    %c0_29 = arith.constant 0 : index
    %c0_30 = arith.constant 0 : index
    %35 = vector.load %arg13[%c0_29, %c0_30] : memref<256x6xf32, #tpu.memory_space<vmem>>, vector<256x6xf32>
    %cst_31 = arith.constant dense<0.000000e+00> : vector<256x6xf32>
    %36 = tpu.matmul %34, %35, %cst_31 {dimension_numbers = #tpu.dot_dimension_numbers<[1], [0], [0], [1], [0, 0, 1, 1], [], []>} : vector<256x256xf32>, vector<256x6xf32>, vector<256x6xf32> -> vector<256x6xf32>
    %c0_32 = arith.constant 0 : index
    %c0_33 = arith.constant 0 : index
    %37 = vector.load %arg14[%c0_32, %c0_33] : memref<1x6xf32, #tpu.memory_space<vmem>>, vector<1x6xf32>
    %38 = vector.broadcast %37 : vector<1x6xf32> to vector<256x6xf32>
    %39 = arith.addf %36, %38 : vector<256x6xf32>
    %c0_34 = arith.constant 0 : index
    %c0_35 = arith.constant 0 : index
    %40 = vector.load %arg17[%c0_34, %c0_35] : memref<256x6xf32, #tpu.memory_space<vmem>>, vector<256x6xf32>
    tpu.vector_store %arg17[%c0_34, %c0_35], %39 {strides = array<i32>} : memref<256x6xf32, #tpu.memory_space<vmem>>, vector<256x6xf32>,
    %c0_36 = arith.constant 0 : index
    %c0_37 = arith.constant 0 : index
    %41 = vector.load %arg4[%c0_36, %c0_37] : memref<1x4096xf32, #tpu.memory_space<vmem>>, vector<1x4096xf32>
    %c0_38 = arith.constant 0 : index
    %c0_39 = arith.constant 0 : index
    %42 = vector.load %arg15[%c0_38, %c0_39] : memref<4096x10xf32, #tpu.memory_space<vmem>>, vector<4096x10xf32>
    %cst_40 = arith.constant dense<0.000000e+00> : vector<1x10xf32>
    %43 = tpu.matmul %41, %42, %cst_40 {dimension_numbers = #tpu.dot_dimension_numbers<[1], [0], [0], [1], [0, 0, 1, 1], [], []>} : vector<1x4096xf32>, vector<4096x10xf32>, vector<1x10xf32> -> vector<1x10xf32>
    %c0_41 = arith.constant 0 : index
    %c0_42 = arith.constant 0 : index
    %44 = vector.load %arg16[%c0_41, %c0_42] : memref<1x10xf32, #tpu.memory_space<vmem>>, vector<1x10xf32>
    %45 = arith.addf %43, %44 : vector<1x10xf32>
    %c0_43 = arith.constant 0 : index
    %c0_44 = arith.constant 0 : index
    %46 = vector.load %arg19[%c0_43, %c0_44] : memref<1x10xf32, #tpu.memory_space<vmem>>, vector<1x10xf32>
    tpu.vector_store %arg19[%c0_43, %c0_44], %45 {strides = array<i32>} : memref<1x10xf32, #tpu.memory_space<vmem>>, vector<1x10xf32>,
    return
  }
  func.func @transform_0(%arg0: i32) -> (i32, i32) {
    %c0_i32 = arith.constant 0 : i32
    %c0_i32_0 = arith.constant 0 : i32
    %c0_i32_1 = arith.constant 0 : i32
    return %c0_i32, %c0_i32_0 : i32, i32
  }
  func.func @transform_1(%arg0: i32) -> (i32, i32) {
    %c0_i32 = arith.constant 0 : i32
    %c0_i32_0 = arith.constant 0 : i32
    %c0_i32_1 = arith.constant 0 : i32
    return %c0_i32, %c0_i32_0 : i32, i32
  }
  func.func @transform_2(%arg0: i32) -> (i32, i32) {
    %c0_i32 = arith.constant 0 : i32
    %c0_i32_0 = arith.constant 0 : i32
    %c0_i32_1 = arith.constant 0 : i32
    return %c0_i32, %c0_i32_0 : i32, i32
  }
  func.func @transform_3(%arg0: i32) -> (i32, i32) {
    %c0_i32 = arith.constant 0 : i32
    %c0_i32_0 = arith.constant 0 : i32
    %c0_i32_1 = arith.constant 0 : i32
    return %c0_i32, %c0_i32_0 : i32, i32
  }
  func.func @transform_4(%arg0: i32) -> (i32, i32) {
    %c0_i32 = arith.constant 0 : i32
    %c0_i32_0 = arith.constant 0 : i32
    %c0_i32_1 = arith.constant 0 : i32
    return %c0_i32, %c0_i32_0 : i32, i32
  }
  func.func @transform_5(%arg0: i32) -> (i32, i32) {
    %c0_i32 = arith.constant 0 : i32
    %c0_i32_0 = arith.constant 0 : i32
    %c0_i32_1 = arith.constant 0 : i32
    return %c0_i32, %c0_i32_0 : i32, i32
  }
  func.func @transform_6(%arg0: i32) -> (i32, i32) {
    %c0_i32 = arith.constant 0 : i32
    %c0_i32_0 = arith.constant 0 : i32
    %c0_i32_1 = arith.constant 0 : i32
    return %c0_i32, %c0_i32_0 : i32, i32
  }
  func.func @transform_7(%arg0: i32) -> (i32, i32) {
    %c0_i32 = arith.constant 0 : i32
    %c0_i32_0 = arith.constant 0 : i32
    %c0_i32_1 = arith.constant 0 : i32
    return %c0_i32, %c0_i32_0 : i32, i32
  }
  func.func @transform_8(%arg0: i32) -> (i32, i32) {
    %c0_i32 = arith.constant 0 : i32
    %c0_i32_0 = arith.constant 0 : i32
    %c0_i32_1 = arith.constant 0 : i32
    return %c0_i32, %c0_i32_0 : i32, i32
  }
  func.func @transform_9(%arg0: i32) -> (i32, i32) {
    %c0_i32 = arith.constant 0 : i32
    %c0_i32_0 = arith.constant 0 : i32
    %c0_i32_1 = arith.constant 0 : i32
    return %c0_i32, %c0_i32_0 : i32, i32
  }
  func.func @transform_10(%arg0: i32) -> (i32, i32) {
    %c0_i32 = arith.constant 0 : i32
    %c0_i32_0 = arith.constant 0 : i32
    %c0_i32_1 = arith.constant 0 : i32
    return %c0_i32, %c0_i32_0 : i32, i32
  }
  func.func @transform_11(%arg0: i32) -> (i32, i32) {
    %c0_i32 = arith.constant 0 : i32
    %c0_i32_0 = arith.constant 0 : i32
    %c0_i32_1 = arith.constant 0 : i32
    return %c0_i32, %c0_i32_0 : i32, i32
  }
  func.func @transform_12(%arg0: i32) -> (i32, i32) {
    %c0_i32 = arith.constant 0 : i32
    %c0_i32_0 = arith.constant 0 : i32
    %c0_i32_1 = arith.constant 0 : i32
    return %c0_i32, %c0_i32_0 : i32, i32
  }
  func.func @transform_13(%arg0: i32) -> (i32, i32) {
    %c0_i32 = arith.constant 0 : i32
    %c0_i32_0 = arith.constant 0 : i32
    %c0_i32_1 = arith.constant 0 : i32
    return %c0_i32, %c0_i32_0 : i32, i32
  }
  func.func @transform_14(%arg0: i32) -> (i32, i32) {
    %c0_i32 = arith.constant 0 : i32
    %c0_i32_0 = arith.constant 0 : i32
    %c0_i32_1 = arith.constant 0 : i32
    return %c0_i32, %c0_i32_0 : i32, i32
  }
  func.func @transform_15(%arg0: i32) -> (i32, i32) {
    %c0_i32 = arith.constant 0 : i32
    %c0_i32_0 = arith.constant 0 : i32
    %c0_i32_1 = arith.constant 0 : i32
    return %c0_i32, %c0_i32_0 : i32, i32
  }
  func.func @transform_16(%arg0: i32) -> (i32, i32) {
    %c0_i32 = arith.constant 0 : i32
    %c0_i32_0 = arith.constant 0 : i32
    %c0_i32_1 = arith.constant 0 : i32
    return %c0_i32, %c0_i32_0 : i32, i32
  }
  func.func @transform_17(%arg0: i32) -> (i32, i32) {
    %c0_i32 = arith.constant 0 : i32
    %c0_i32_0 = arith.constant 0 : i32
    %c0_i32_1 = arith.constant 0 : i32
    return %c0_i32, %c0_i32_0 : i32, i32
  }
  func.func @transform_18(%arg0: i32) -> (i32, i32) {
    %c0_i32 = arith.constant 0 : i32
    %c0_i32_0 = arith.constant 0 : i32
    %c0_i32_1 = arith.constant 0 : i32
    return %c0_i32, %c0_i32_0 : i32, i32
  }
}

</mosaic_0001>

<bundles_post_ra>
// kernel: neural_net_forward.3
= control target key start
LH: loop header
LB: loop body
LE: loop exit
PB: predicated region body
PF: predicated region fallthrough
CT: control target
= control target key end

     0   :  { %vm169_vm0 = vcmask 1040384   ;;  %vm72_vm1 = vcmask 72704   ;;  %vm664_vm2 = vcmask 31744   ;;  %s10000_s1 = inlined_call_operand.vmem [shape: f32[9,4], index: 1, kind: input, shape index: {}]   ;;  %s10001_s0 = inlined_call_operand.vmem [shape: f32[4,256,9], index: 0, kind: input, shape index: {}]   ;;  %s10002_s5 = inlined_call_operand.vmem [shape: f32[9,4], index: 5, kind: input, shape index: {}]   ;;  %s10003_s6 = inlined_call_operand.vmem [shape: f32[1,4], index: 6, kind: input, shape index: {}]   ;;  %s10004_s8 = inlined_call_operand.vmem [shape: f32[4,256,4], index: 8, kind: output, shape index: {1}]   ;;  %s10005_s2 = inlined_call_operand.vmem [shape: f32[1,4], index: 2, kind: input, shape index: {}]   ;;  %s10006_s3 = inlined_call_operand.vmem [shape: f32[1,4], index: 3, kind: input, shape index: {}]   ;;  %s10007_s4 = inlined_call_operand.vmem [shape: f32[1,4], index: 4, kind: input, shape index: {}]   ;;  %s10008_s7 = inlined_call_operand.vmem [shape: f32[256,4], index: 7, kind: output, shape index: {0}]  }
   0x1   :  { %v5179_v0 = vld [vmem:[%s10000_s1 + $0x8] sm:$0x1]  ;;  %v5184_v1 = vld [vmem:[%s10000_s1] sm:$0xff]  ;;  %v36_v4 = vld [vmem:[%s10001_s0 + $0x10] sm:$0xff] }
   0x2   :  { %v34_v2 = vld [vmem:[%s10001_s0] sm:$0xff]  ;;  %4712 = vmatprep.subr.msk.mxu0 %vm169_vm0, %v5179_v0  ;;  %v35_v3 = vld [vmem:[%s10001_s0 + $0x8] sm:$0xff]  ;;  %v37_v5 = vld [vmem:[%s10001_s0 + $0x18] sm:$0xff] }
   0x3   :  { %4716 = vmatprep.mubr.msk.f32.mxu0 %vm72_vm1, %v34_v2  ;;  %4713 = vmatpush3.msk.msra.mxu0 %vm169_vm0, %v5179_v0  ;;  %v38_v6 = vld [vmem:[%s10001_s0 + $0x20] sm:$0xff]  ;;  %v39_v7 = vld [vmem:[%s10001_s0 + $0x28] sm:$0xff]  ;;  %v40_v8 = vld [vmem:[%s10001_s0 + $0x30] sm:$0xff] }
   0x4   :  { %4768 = vmatprep.mubr.msk.f32.mxu1 %vm72_vm1, %v34_v2  ;;  %4714 = vmatprep.subr.mxu0 %v5184_v1  ;;  %v41_v9 = vld [vmem:[%s10001_s0 + $0x38] sm:$0xff]  ;;  %v42_v10 = vld [vmem:[%s10001_s0 + $0x40] sm:$0xff]  ;;  %v43_v11 = vld [vmem:[%s10001_s0 + $0x48] sm:$0xff] }
   0x5   :  { %4715 = vmatpush3.msra.mxu0 %v5184_v1  ;;  %v44_v12 = vld [vmem:[%s10001_s0 + $0x50] sm:$0xff]  ;;  %v45_v13 = vld [vmem:[%s10001_s0 + $0x58] sm:$0xff]  ;;  %v5251_v14 = vld [vmem:[%s10002_s5 + $0x8] sm:$0x1] }
   0x6   :  { %4717 = vmatmul.mubr.msk.f32.vlgmr.msra.gmra.mxu0 %vm72_vm1, %v35_v3  ;;  %4816 = vmatprep.subr.msk.mxu0 %vm169_vm0, %v5179_v0  ;;  %v46_v15 = vld [vmem:[%s10001_s0 + $0x60] sm:$0xff]  ;;  %v47_v17 = vld [vmem:[%s10001_s0 + $0x68] sm:$0xff]  ;;  %v48_v18 = vld [vmem:[%s10001_s0 + $0x70] sm:$0xff] }
   0x7   :  { %4817 = vmatpush3.msk.msra.mxu0 %vm169_vm0, %v5179_v0  ;;  %4719 = vmatprep.mubr.msk.f32.mxu0 %vm72_vm1, %v36_v4  ;;  %v5261_v16 = vld [vmem:[%s10002_s5] sm:$0xff]  ;;  %v49_v19 = vld [vmem:[%s10001_s0 + $0x78] sm:$0xff]  ;;  %v51_v21 = vld [vmem:[%s10001_s0 + $0x88] sm:$0xff] }
   0x8   :  { %4818 = vmatprep.subr.mxu0 %v5184_v1  ;;  %4764 = vmatprep.subr.msk.mxu1 %vm169_vm0, %v5251_v14  ;;  %v50_v20 = vld [vmem:[%s10001_s0 + $0x80] sm:$0xff]  ;;  %v52_v22 = vld [vmem:[%s10001_s0 + $0x90] sm:$0xff]  ;;  %v53_v23 = vld [vmem:[%s10001_s0 + $0x98] sm:$0xff] }
   0x9   :  { %4819 = vmatpush3.msra.mxu0 %v5184_v1  ;;  %4765 = vmatpush3.msk.msra.mxu1 %vm169_vm0, %v5251_v14  ;;  %v54_v24 = vld [vmem:[%s10001_s0 + $0xa0] sm:$0xff]  ;;  %v55_v25 = vld [vmem:[%s10001_s0 + $0xa8] sm:$0xff]  ;;  %v56_v26 = vld [vmem:[%s10001_s0 + $0xb0] sm:$0xff] }
   0xa   :  { %4720 = vmatmul.mubr.msk.f32.gmra.mxu0 %vm72_vm1, %v37_v5  ;;  %4920 = vmatprep.subr.msk.mxu0 %vm169_vm0, %v5179_v0  ;;  %v57_v27 = vld [vmem:[%s10001_s0 + $0xb8] sm:$0xff]  ;;  %v58_v28 = vld [vmem:[%s10001_s0 + $0xc0] sm:$0xff]  ;;  %v59_v29 = vld [vmem:[%s10001_s0 + $0xc8] sm:$0xff] }
   0xb   :  { %4722 = vmatprep.mubr.msk.f32.mxu0 %vm72_vm1, %v38_v6  ;;  %4766 = vmatprep.subr.mxu1 %v5261_v16  ;;  %v60_v30 = vld [vmem:[%s10001_s0 + $0xd0] sm:$0xff]  ;;  %v61_v31 = vld [vmem:[%s10001_s0 + $0xd8] sm:$0xff]  ;;  %v62_v32 = vld [vmem:[%s10001_s0 + $0xe0] sm:$0xff] }
   0xc   :  { %4767 = vmatpush3.msra.mxu1 %v5261_v16  ;;  %v63_v33 = vld [vmem:[%s10001_s0 + $0xe8] sm:$0xff]  ;;  %v64_v34 = vld [vmem:[%s10001_s0 + $0xf0] sm:$0xff]  ;;  %v65_v35 = vld [vmem:[%s10001_s0 + $0xf8] sm:$0xff] }
   0xd   :  { %4769 = vmatmul.mubr.msk.f32.vlgmr.msra.gmra.mxu1 %vm72_vm1, %v35_v3  ;;  %4868 = vmatprep.subr.msk.mxu1 %vm169_vm0, %v5251_v14  ;;  %v4049_v36 = vld [vmem:[%s10001_s0 + $0x100] sm:$0xff]  ;;  %v4050_v37 = vld [vmem:[%s10001_s0 + $0x108] sm:$0xff]  ;;  %v4051_v38 = vld [vmem:[%s10001_s0 + $0x110] sm:$0xff] }
   0xe   :  { %4723 = vmatmul.mubr.msk.f32.gmra.mxu0 %vm72_vm1, %v39_v7  ;;  %4869 = vmatpush3.msk.msra.mxu1 %vm169_vm0, %v5251_v14  ;;  %v4052_v39 = vld [vmem:[%s10001_s0 + $0x118] sm:$0xff]  ;;  %v4053_v40 = vld [vmem:[%s10001_s0 + $0x120] sm:$0xff]  ;;  %v4054_v41 = vld [vmem:[%s10001_s0 + $0x128] sm:$0xff] }
   0xf   :  { %4725 = vmatprep.mubr.msk.f32.mxu0 %vm72_vm1, %v40_v8  ;;  %4771 = vmatprep.mubr.msk.f32.mxu1 %vm72_vm1, %v36_v4  ;;  %v4055_v42 = vld [vmem:[%s10001_s0 + $0x130] sm:$0xff]  ;;  %v4056_v43 = vld [vmem:[%s10001_s0 + $0x138] sm:$0xff]  ;;  %v4057_v44 = vld [vmem:[%s10001_s0 + $0x140] sm:$0xff] }
  0x10   :  { %4870 = vmatprep.subr.mxu1 %v5261_v16  ;;  %v4058_v45 = vld [vmem:[%s10001_s0 + $0x148] sm:$0xff]  ;;  %v4059_v46 = vld [vmem:[%s10001_s0 + $0x150] sm:$0xff]  ;;  %v4060_v47 = vld [vmem:[%s10001_s0 + $0x158] sm:$0xff] }
  0x11   :  { %4871 = vmatpush3.msra.mxu1 %v5261_v16  ;;  %v4061_v48 = vld [vmem:[%s10001_s0 + $0x160] sm:$0xff]  ;;  %v4062_v49 = vld [vmem:[%s10001_s0 + $0x168] sm:$0xff]  ;;  %v4063_v50 = vld [vmem:[%s10001_s0 + $0x170] sm:$0xff] }
  0x12   :  { %4726 = vmatmul.mubr.msk.f32.gmra.mxu0 %vm72_vm1, %v41_v9  ;;  %4772 = vmatmul.mubr.msk.f32.gmra.mxu1 %vm72_vm1, %v37_v5  ;;  %v4064_v51 = vld [vmem:[%s10001_s0 + $0x178] sm:$0xff]  ;;  %v4065_v52 = vld [vmem:[%s10001_s0 + $0x180] sm:$0xff]  ;;  %v4066_v53 = vld [vmem:[%s10001_s0 + $0x188] sm:$0xff] }
  0x13   :  { %4728 = vmatprep.mubr.msk.f32.mxu0 %vm72_vm1, %v42_v10  ;;  %4972 = vmatprep.subr.msk.mxu1 %vm169_vm0, %v5251_v14  ;;  %v4067_v54 = vld [vmem:[%s10001_s0 + $0x190] sm:$0xff]  ;;  %v4068_v55 = vld [vmem:[%s10001_s0 + $0x198] sm:$0xff]  ;;  %v4069_v56 = vld [vmem:[%s10001_s0 + $0x1a0] sm:$0xff] }
  0x14   :  { %4774 = vmatprep.mubr.msk.f32.mxu1 %vm72_vm1, %v38_v6  ;;  %v4070_v57 = vld [vmem:[%s10001_s0 + $0x1a8] sm:$0xff]  ;;  %v4071_v58 = vld [vmem:[%s10001_s0 + $0x1b0] sm:$0xff]  ;;  %v4072_v59 = vld [vmem:[%s10001_s0 + $0x1b8] sm:$0xff] }
  0x15   :  { %v4073_v60 = vld [vmem:[%s10001_s0 + $0x1c0] sm:$0xff]  ;;  %v4074_v61 = vld [vmem:[%s10001_s0 + $0x1c8] sm:$0xff]  ;;  %v4075_v62 = vld [vmem:[%s10001_s0 + $0x1d0] sm:$0xff] }
  0x16   :  { %4729 = vmatmul.mubr.msk.f32.gmra.mxu0 %vm72_vm1, %v43_v11  ;;  %4775 = vmatmul.mubr.msk.f32.gmra.mxu1 %vm72_vm1, %v39_v7  ;;  %v4076_v63 = vld [vmem:[%s10001_s0 + $0x1d8] sm:$0xff]  ;;  %v4077_v2 = vld [vmem:[%s10001_s0 + $0x1e0] sm:$0xff]  ;;  %v4078_v3 = vld [vmem:[%s10001_s0 + $0x1e8] sm:$0xff] }
  0x17   :  { %4731 = vmatprep.mubr.msk.f32.mxu0 %vm72_vm1, %v44_v12  ;;  %4777 = vmatprep.mubr.msk.f32.mxu1 %vm72_vm1, %v40_v8  ;;  %v4079_v4 = vld [vmem:[%s10001_s0 + $0x1f0] sm:$0xff]  ;;  %v4080_v5 = vld [vmem:[%s10001_s0 + $0x1f8] sm:$0xff]  ;;  %v4179_v6 = vld [vmem:[%s10001_s0 + $0x200] sm:$0xff] }
  0x18   :  { %v4180_v7 = vld [vmem:[%s10001_s0 + $0x208] sm:$0xff]  ;;  %v4181_v8 = vld [vmem:[%s10001_s0 + $0x210] sm:$0xff] }
  0x1a   :  { %4732 = vmatmul.mubr.msk.f32.gmra.mxu0 %vm72_vm1, %v45_v13  ;;  %4778 = vmatmul.mubr.msk.f32.gmra.mxu1 %vm72_vm1, %v41_v9  ;;  %v4182_v9 = vld [vmem:[%s10001_s0 + $0x218] sm:$0xff] }
  0x1b   :  { %4734 = vmatprep.mubr.msk.f32.mxu0 %vm72_vm1, %v46_v15  ;;  %4780 = vmatprep.mubr.msk.f32.mxu1 %vm72_vm1, %v42_v10  ;;  %v4183_v10 = vld [vmem:[%s10001_s0 + $0x220] sm:$0xff] }
  0x1e   :  { %4735 = vmatmul.mubr.msk.f32.gmra.mxu0 %vm72_vm1, %v47_v17  ;;  %4781 = vmatmul.mubr.msk.f32.gmra.mxu1 %vm72_vm1, %v43_v11  ;;  %v4185_v11 = vld [vmem:[%s10001_s0 + $0x230] sm:$0xff] }
  0x1f   :  { %4737 = vmatprep.mubr.msk.f32.mxu0 %vm72_vm1, %v48_v18  ;;  %4783 = vmatprep.mubr.msk.f32.mxu1 %vm72_vm1, %v44_v12  ;;  %v4187_v12 = vld [vmem:[%s10001_s0 + $0x240] sm:$0xff] }
  0x22   :  { %4738 = vmatmul.mubr.msk.f32.gmra.mxu0 %vm72_vm1, %v49_v19  ;;  %4784 = vmatmul.mubr.msk.f32.gmra.mxu1 %vm72_vm1, %v45_v13  ;;  %v4188_v13 = vld [vmem:[%s10001_s0 + $0x248] sm:$0xff] }
  0x23   :  { %4740 = vmatprep.mubr.msk.f32.mxu0 %vm72_vm1, %v50_v20  ;;  %4786 = vmatprep.mubr.msk.f32.mxu1 %vm72_vm1, %v46_v15  ;;  %v4189_v15 = vld [vmem:[%s10001_s0 + $0x250] sm:$0xff] }
  0x26   :  { %4741 = vmatmul.mubr.msk.f32.gmra.mxu0 %vm72_vm1, %v51_v21  ;;  %4787 = vmatmul.mubr.msk.f32.gmra.mxu1 %vm72_vm1, %v47_v17  ;;  %v4190_v17 = vld [vmem:[%s10001_s0 + $0x258] sm:$0xff] }
  0x27   :  { %4743 = vmatprep.mubr.msk.f32.mxu0 %vm72_vm1, %v52_v22  ;;  %4789 = vmatprep.mubr.msk.f32.mxu1 %vm72_vm1, %v48_v18  ;;  %v4191_v18 = vld [vmem:[%s10001_s0 + $0x260] sm:$0xff] }
  0x2a   :  { %4744 = vmatmul.mubr.msk.f32.gmra.mxu0 %vm72_vm1, %v53_v23  ;;  %4790 = vmatmul.mubr.msk.f32.gmra.mxu1 %vm72_vm1, %v49_v19  ;;  %v4192_v19 = vld [vmem:[%s10001_s0 + $0x268] sm:$0xff] }
  0x2b   :  { %4746 = vmatprep.mubr.msk.f32.mxu0 %vm72_vm1, %v54_v24  ;;  %4792 = vmatprep.mubr.msk.f32.mxu1 %vm72_vm1, %v50_v20  ;;  %v4193_v20 = vld [vmem:[%s10001_s0 + $0x270] sm:$0xff] }
  0x2e   :  { %4747 = vmatmul.mubr.msk.f32.gmra.mxu0 %vm72_vm1, %v55_v25  ;;  %4793 = vmatmul.mubr.msk.f32.gmra.mxu1 %vm72_vm1, %v51_v21  ;;  %v4194_v21 = vld [vmem:[%s10001_s0 + $0x278] sm:$0xff] }
  0x2f   :  { %4749 = vmatprep.mubr.msk.f32.mxu0 %vm72_vm1, %v56_v26  ;;  %4795 = vmatprep.mubr.msk.f32.mxu1 %vm72_vm1, %v52_v22  ;;  %v4195_v22 = vld [vmem:[%s10001_s0 + $0x280] sm:$0xff] }
  0x32   :  { %4750 = vmatmul.mubr.msk.f32.gmra.mxu0 %vm72_vm1, %v57_v27  ;;  %4796 = vmatmul.mubr.msk.f32.gmra.mxu1 %vm72_vm1, %v53_v23  ;;  %v4198_v23 = vld [vmem:[%s10001_s0 + $0x298] sm:$0xff] }
  0x33   :  { %4752 = vmatprep.mubr.msk.f32.mxu0 %vm72_vm1, %v58_v28  ;;  %4798 = vmatprep.mubr.msk.f32.mxu1 %vm72_vm1, %v54_v24  ;;  %v4199_v24 = vld [vmem:[%s10001_s0 + $0x2a0] sm:$0xff] }
  0x36   :  { %4753 = vmatmul.mubr.msk.f32.gmra.mxu0 %vm72_vm1, %v59_v29  ;;  %4799 = vmatmul.mubr.msk.f32.gmra.mxu1 %vm72_vm1, %v55_v25  ;;  %v4200_v25 = vld [vmem:[%s10001_s0 + $0x2a8] sm:$0xff] }
  0x37   :  { %4755 = vmatprep.mubr.msk.f32.mxu0 %vm72_vm1, %v60_v30  ;;  %4801 = vmatprep.mubr.msk.f32.mxu1 %vm72_vm1, %v56_v26  ;;  %v4201_v26 = vld [vmem:[%s10001_s0 + $0x2b0] sm:$0xff] }
  0x3a   :  { %4756 = vmatmul.mubr.msk.f32.gmra.mxu0 %vm72_vm1, %v61_v31  ;;  %4802 = vmatmul.mubr.msk.f32.gmra.mxu1 %vm72_vm1, %v57_v27  ;;  %v4202_v27 = vld [vmem:[%s10001_s0 + $0x2b8] sm:$0xff] }
  0x3b   :  { %4758 = vmatprep.mubr.msk.f32.mxu0 %vm72_vm1, %v62_v32  ;;  %4804 = vmatprep.mubr.msk.f32.mxu1 %vm72_vm1, %v58_v28  ;;  %v4203_v28 = vld [vmem:[%s10001_s0 + $0x2c0] sm:$0xff] }
  0x3e   :  { %4759 = vmatmul.mubr.msk.f32.gmra.mxu0 %vm72_vm1, %v63_v33  ;;  %4805 = vmatmul.mubr.msk.f32.gmra.mxu1 %vm72_vm1, %v59_v29  ;;  %v4204_v29 = vld [vmem:[%s10001_s0 + $0x2c8] sm:$0xff] }
  0x3f   :  { %4761 = vmatprep.mubr.msk.f32.mxu0 %vm72_vm1, %v64_v34  ;;  %4807 = vmatprep.mubr.msk.f32.mxu1 %vm72_vm1, %v60_v30  ;;  %v4205_v30 = vld [vmem:[%s10001_s0 + $0x2d0] sm:$0xff] }
  0x42   :  { %4762 = vmatmul.mubr.msk.f32.gmra.mxu0 %vm72_vm1, %v65_v35  ;;  %4808 = vmatmul.mubr.msk.f32.gmra.mxu1 %vm72_vm1, %v61_v31  ;;  %v4206_v31 = vld [vmem:[%s10001_s0 + $0x2d8] sm:$0xff] }
  0x43   :  { %4820 = vmatprep.mubr.msk.f32.mxu0 %vm72_vm1, %v4049_v36  ;;  %4810 = vmatprep.mubr.msk.f32.mxu1 %vm72_vm1, %v62_v32  ;;  %v4207_v32 = vld [vmem:[%s10001_s0 + $0x2e0] sm:$0xff] }
  0x46   :  { %4821 = vmatmul.mubr.msk.f32.vlgmr.msra.gmra.mxu0 %vm72_vm1, %v4050_v37  ;;  %4811 = vmatmul.mubr.msk.f32.gmra.mxu1 %vm72_vm1, %v63_v33  ;;  %v4208_v33 = vld [vmem:[%s10001_s0 + $0x2e8] sm:$0xff] }
  0x47   :  { %4921 = vmatpush3.msk.msra.mxu0 %vm169_vm0, %v5179_v0  ;;  %4823 = vmatprep.mubr.msk.f32.mxu0 %vm72_vm1, %v4051_v38 }
  0x48   :  { %4922 = vmatprep.subr.mxu0 %v5184_v1  ;;  %4813 = vmatprep.mubr.msk.f32.mxu1 %vm72_vm1, %v64_v34  ;;  %v4209_v34 = vld [vmem:[%s10001_s0 + $0x2f0] sm:$0xff] }
  0x49   :  { %4923 = vmatpush3.msra.mxu0 %v5184_v1 }
  0x4a   :  { %4824 = vmatmul.mubr.msk.f32.gmra.mxu0 %vm72_vm1, %v4052_v39  ;;  %5024 = vmatprep.subr.msk.mxu0 %vm169_vm0, %v5179_v0 }
  0x4b   :  { %4826 = vmatprep.mubr.msk.f32.mxu0 %vm72_vm1, %v4053_v40  ;;  %4814 = vmatmul.mubr.msk.f32.gmra.mxu1 %vm72_vm1, %v65_v35  ;;  %v4210_v35 = vld [vmem:[%s10001_s0 + $0x2f8] sm:$0xff] }
  0x4c   :  { %4872 = vmatprep.mubr.msk.f32.mxu1 %vm72_vm1, %v4049_v36  ;;  %v4309_v36 = vld [vmem:[%s10001_s0 + $0x300] sm:$0xff] }
  0x4e   :  { %4827 = vmatmul.mubr.msk.f32.gmra.mxu0 %vm72_vm1, %v4054_v41 }
  0x4f   :  { %4829 = vmatprep.mubr.msk.f32.mxu0 %vm72_vm1, %v4055_v42  ;;  %4873 = vmatmul.mubr.msk.f32.vlgmr.msra.gmra.mxu1 %vm72_vm1, %v4050_v37  ;;  %v4310_v37 = vld [vmem:[%s10001_s0 + $0x308] sm:$0xff] }
  0x50   :  { %4973 = vmatpush3.msk.msra.mxu1 %vm169_vm0, %v5251_v14  ;;  %4875 = vmatprep.mubr.msk.f32.mxu1 %vm72_vm1, %v4051_v38  ;;  %v4311_v38 = vld [vmem:[%s10001_s0 + $0x310] sm:$0xff] }
  0x51   :  { %4974 = vmatprep.subr.mxu1 %v5261_v16 }
  0x52   :  { %4830 = vmatmul.mubr.msk.f32.gmra.mxu0 %vm72_vm1, %v4056_v43  ;;  %4975 = vmatpush3.msra.mxu1 %v5261_v16 }
  0x53   :  { %4832 = vmatprep.mubr.msk.f32.mxu0 %vm72_vm1, %v4057_v44  ;;  %4876 = vmatmul.mubr.msk.f32.gmra.mxu1 %vm72_vm1, %v4052_v39 }
  0x54   :  { %5076 = vmatprep.subr.msk.mxu1 %vm169_vm0, %v5251_v14  ;;  %4878 = vmatprep.mubr.msk.f32.mxu1 %vm72_vm1, %v4053_v40  ;;  %v4312_v40 = vld [vmem:[%s10001_s0 + $0x318] sm:$0xff] }
  0x56   :  { %4833 = vmatmul.mubr.msk.f32.gmra.mxu0 %vm72_vm1, %v4058_v45 }
  0x57   :  { %4835 = vmatprep.mubr.msk.f32.mxu0 %vm72_vm1, %v4059_v46  ;;  %4879 = vmatmul.mubr.msk.f32.gmra.mxu1 %vm72_vm1, %v4054_v41 }
  0x58   :  { %4881 = vmatprep.mubr.msk.f32.mxu1 %vm72_vm1, %v4055_v42  ;;  %v5737_v42 = vld [vmem:[%s10001_s0 + $0x320] sm:$0xff] }
  0x5a   :  { %4836 = vmatmul.mubr.msk.f32.gmra.mxu0 %vm72_vm1, %v4060_v47 }
  0x5b   :  { %4838 = vmatprep.mubr.msk.f32.mxu0 %vm72_vm1, %v4061_v48  ;;  %4882 = vmatmul.mubr.msk.f32.gmra.mxu1 %vm72_vm1, %v4056_v43 }
  0x5c   :  { %4884 = vmatprep.mubr.msk.f32.mxu1 %vm72_vm1, %v4057_v44  ;;  %v5749_v44 = vld [vmem:[%s10001_s0 + $0x328] sm:$0xff] }
  0x5e   :  { %4839 = vmatmul.mubr.msk.f32.gmra.mxu0 %vm72_vm1, %v4062_v49 }
  0x5f   :  { %4841 = vmatprep.mubr.msk.f32.mxu0 %vm72_vm1, %v4063_v50  ;;  %4885 = vmatmul.mubr.msk.f32.gmra.mxu1 %vm72_vm1, %v4058_v45 }
  0x60   :  { %4887 = vmatprep.mubr.msk.f32.mxu1 %vm72_vm1, %v4059_v46  ;;  %v5756_v46 = vld [vmem:[%s10001_s0 + $0x330] sm:$0xff] }
  0x62   :  { %4842 = vmatmul.mubr.msk.f32.gmra.mxu0 %vm72_vm1, %v4064_v51 }
  0x63   :  { %4844 = vmatprep.mubr.msk.f32.mxu0 %vm72_vm1, %v4065_v52  ;;  %4888 = vmatmul.mubr.msk.f32.gmra.mxu1 %vm72_vm1, %v4060_v47 }
  0x64   :  { %4890 = vmatprep.mubr.msk.f32.mxu1 %vm72_vm1, %v4061_v48  ;;  %v5769_v48 = vld [vmem:[%s10001_s0 + $0x338] sm:$0xff] }
  0x66   :  { %4845 = vmatmul.mubr.msk.f32.gmra.mxu0 %vm72_vm1, %v4066_v53 }
  0x67   :  { %4847 = vmatprep.mubr.msk.f32.mxu0 %vm72_vm1, %v4067_v54  ;;  %4891 = vmatmul.mubr.msk.f32.gmra.mxu1 %vm72_vm1, %v4062_v49 }
  0x68   :  { %4893 = vmatprep.mubr.msk.f32.mxu1 %vm72_vm1, %v4063_v50  ;;  %v5776_v50 = vld [vmem:[%s10001_s0 + $0x340] sm:$0xff] }
  0x6a   :  { %4848 = vmatmul.mubr.msk.f32.gmra.mxu0 %vm72_vm1, %v4068_v55 }
  0x6b   :  { %4850 = vmatprep.mubr.msk.f32.mxu0 %vm72_vm1, %v4069_v56  ;;  %4894 = vmatmul.mubr.msk.f32.gmra.mxu1 %vm72_vm1, %v4064_v51 }
  0x6c   :  { %4896 = vmatprep.mubr.msk.f32.mxu1 %vm72_vm1, %v4065_v52  ;;  %v5789_v52 = vld [vmem:[%s10001_s0 + $0x348] sm:$0xff] }
  0x6e   :  { %4851 = vmatmul.mubr.msk.f32.gmra.mxu0 %vm72_vm1, %v4070_v57 }
  0x6f   :  { %4853 = vmatprep.mubr.msk.f32.mxu0 %vm72_vm1, %v4071_v58  ;;  %4897 = vmatmul.mubr.msk.f32.gmra.mxu1 %vm72_vm1, %v4066_v53 }
  0x70   :  { %4899 = vmatprep.mubr.msk.f32.mxu1 %vm72_vm1, %v4067_v54  ;;  %v5796_v54 = vld [vmem:[%s10001_s0 + $0x350] sm:$0xff] }
  0x72   :  { %4854 = vmatmul.mubr.msk.f32.gmra.mxu0 %vm72_vm1, %v4072_v59 }
  0x73   :  { %4856 = vmatprep.mubr.msk.f32.mxu0 %vm72_vm1, %v4073_v60  ;;  %4900 = vmatmul.mubr.msk.f32.gmra.mxu1 %vm72_vm1, %v4068_v55 }
  0x74   :  { %4902 = vmatprep.mubr.msk.f32.mxu1 %vm72_vm1, %v4069_v56  ;;  %v5809_v56 = vld [vmem:[%s10001_s0 + $0x358] sm:$0xff] }
  0x76   :  { %4857 = vmatmul.mubr.msk.f32.gmra.mxu0 %vm72_vm1, %v4074_v61 }
  0x77   :  { %4859 = vmatprep.mubr.msk.f32.mxu0 %vm72_vm1, %v4075_v62  ;;  %4903 = vmatmul.mubr.msk.f32.gmra.mxu1 %vm72_vm1, %v4070_v57 }
  0x78   :  { %4905 = vmatprep.mubr.msk.f32.mxu1 %vm72_vm1, %v4071_v58  ;;  %v5816_v58 = vld [vmem:[%s10001_s0 + $0x360] sm:$0xff] }
  0x7a   :  { %4860 = vmatmul.mubr.msk.f32.gmra.mxu0 %vm72_vm1, %v4076_v63 }
  0x7b   :  { %4862 = vmatprep.mubr.msk.f32.mxu0 %vm72_vm1, %v4077_v2  ;;  %4906 = vmatmul.mubr.msk.f32.gmra.mxu1 %vm72_vm1, %v4072_v59 }
  0x7c   :  { %4908 = vmatprep.mubr.msk.f32.mxu1 %vm72_vm1, %v4073_v60  ;;  %v5827_v60 = vld [vmem:[%s10003_s6] ss:$0 sm:$0xff] }
  0x7e   :  { %4863 = vmatmul.mubr.msk.f32.gmra.mxu0 %vm72_vm1, %v4078_v3 }
  0x7f   :  { %4865 = vmatprep.mubr.msk.f32.mxu0 %vm72_vm1, %v4079_v4  ;;  %4909 = vmatmul.mubr.msk.f32.gmra.mxu1 %vm72_vm1, %v4074_v61  ;;  %v5834_v61 = vld [vmem:[%s10001_s0 + $0x368] sm:$0xff] }
  0x80   :  { %4911 = vmatprep.mubr.msk.f32.mxu1 %vm72_vm1, %v4075_v62 }
  0x82   :  { %4866 = vmatmul.mubr.msk.f32.gmra.mxu0 %vm72_vm1, %v4080_v5 }
  0x83   :  { %4924 = vmatprep.mubr.msk.f32.mxu0 %vm72_vm1, %v4179_v6  ;;  %4912 = vmatmul.mubr.msk.f32.gmra.mxu1 %vm72_vm1, %v4076_v63  ;;  %v5841_v63 = vld [vmem:[%s10001_s0 + $0x370] sm:$0xff] }
  0x84   :  { %4914 = vmatprep.mubr.msk.f32.mxu1 %vm72_vm1, %v4077_v2 }
  0x86   :  { %4925 = vmatmul.mubr.msk.f32.vlgmr.msra.gmra.mxu0 %vm72_vm1, %v4180_v7 }
  0x87   :  { %5025 = vmatpush3.msk.msra.mxu0 %vm169_vm0, %v5179_v0  ;;  %4927 = vmatprep.mubr.msk.f32.mxu0 %vm72_vm1, %v4181_v8  ;;  %v4184_v0 = vld [vmem:[%s10001_s0 + $0x228] sm:$0xff] }
  0x88   :  { %5026 = vmatprep.subr.mxu0 %v5184_v1  ;;  %4915 = vmatmul.mubr.msk.f32.gmra.mxu1 %vm72_vm1, %v4078_v3 }
  0x89   :  { %5027 = vmatpush3.msra.mxu0 %v5184_v1  ;;  %v4186_v1 = vld [vmem:[%s10001_s0 + $0x238] sm:$0xff]  ;;  %4917 = vmatprep.mubr.msk.f32.mxu1 %vm72_vm1, %v4079_v4 }
  0x8a   :  { %4928 = vmatmul.mubr.msk.f32.gmra.mxu0 %vm72_vm1, %v4182_v9 }
  0x8b   :  { %4930 = vmatprep.mubr.msk.f32.mxu0 %vm72_vm1, %v4183_v10 }
  0x8c   :  { %4918 = vmatmul.mubr.msk.f32.gmra.mxu1 %vm72_vm1, %v4080_v5 }
  0x8d   :  { %4976 = vmatprep.mubr.msk.f32.mxu1 %vm72_vm1, %v4179_v6  ;;  %v5855_v6 = vld [vmem:[%s10001_s0 + $0x378] sm:$0xff] }
  0x8e   :  { %4931 = vmatmul.mubr.msk.f32.gmra.mxu0 %vm72_vm1, %v4184_v0 }
  0x8f   :  { %4933 = vmatprep.mubr.msk.f32.mxu0 %vm72_vm1, %v4185_v11 }
  0x90   :  { %4977 = vmatmul.mubr.msk.f32.vlgmr.msra.gmra.mxu1 %vm72_vm1, %v4180_v7 }
  0x91   :  { %5077 = vmatpush3.msk.msra.mxu1 %vm169_vm0, %v5251_v14  ;;  %4979 = vmatprep.mubr.msk.f32.mxu1 %vm72_vm1, %v4181_v8  ;;  %v4196_v14 = vld [vmem:[%s10001_s0 + $0x288] sm:$0xff] }
  0x92   :  { %4934 = vmatmul.mubr.msk.f32.gmra.mxu0 %vm72_vm1, %v4186_v1  ;;  %5078 = vmatprep.subr.mxu1 %v5261_v16 }
  0x93   :  { %4936 = vmatprep.mubr.msk.f32.mxu0 %vm72_vm1, %v4187_v12  ;;  %5079 = vmatpush3.msra.mxu1 %v5261_v16  ;;  %v4197_v16 = vld [vmem:[%s10001_s0 + $0x290] sm:$0xff] }
  0x94   :  { %4980 = vmatmul.mubr.msk.f32.gmra.mxu1 %vm72_vm1, %v4182_v9 }
  0x95   :  { %4982 = vmatprep.mubr.msk.f32.mxu1 %vm72_vm1, %v4183_v10  ;;  %v5863_v10 = vld [vmem:[%s10001_s0 + $0x380] sm:$0xff] }
  0x96   :  { %4937 = vmatmul.mubr.msk.f32.gmra.mxu0 %vm72_vm1, %v4188_v13 }
  0x97   :  { %4939 = vmatprep.mubr.msk.f32.mxu0 %vm72_vm1, %v4189_v15 }
  0x98   :  { %4983 = vmatmul.mubr.msk.f32.gmra.mxu1 %vm72_vm1, %v4184_v0 }
  0x99   :  { %4985 = vmatprep.mubr.msk.f32.mxu1 %vm72_vm1, %v4185_v11 }
  0x9a   :  { %4940 = vmatmul.mubr.msk.f32.gmra.mxu0 %vm72_vm1, %v4190_v17 }
  0x9b   :  { %4942 = vmatprep.mubr.msk.f32.mxu0 %vm72_vm1, %v4191_v18 }
  0x9c   :  { %4986 = vmatmul.mubr.msk.f32.gmra.mxu1 %vm72_vm1, %v4186_v1 }
  0x9d   :  { %4988 = vmatprep.mubr.msk.f32.mxu1 %vm72_vm1, %v4187_v12 }
  0x9e   :  { %4943 = vmatmul.mubr.msk.f32.gmra.mxu0 %vm72_vm1, %v4192_v19 }
  0x9f   :  { %4945 = vmatprep.mubr.msk.f32.mxu0 %vm72_vm1, %v4193_v20 }
  0xa0   :  { %4989 = vmatmul.mubr.msk.f32.gmra.mxu1 %vm72_vm1, %v4188_v13 }
  0xa1   :  { %4991 = vmatprep.mubr.msk.f32.mxu1 %vm72_vm1, %v4189_v15  ;;  %v5882_v15 = vld [vmem:[%s10001_s0 + $0x388] sm:$0xff] }
  0xa2   :  { %4946 = vmatmul.mubr.msk.f32.gmra.mxu0 %vm72_vm1, %v4194_v21 }
  0xa3   :  { %4948 = vmatprep.mubr.msk.f32.mxu0 %vm72_vm1, %v4195_v22 }
  0xa4   :  { %4992 = vmatmul.mubr.msk.f32.gmra.mxu1 %vm72_vm1, %v4190_v17 }
  0xa5   :  { %4994 = vmatprep.mubr.msk.f32.mxu1 %vm72_vm1, %v4191_v18 }
  0xa6   :  { %4949 = vmatmul.mubr.msk.f32.gmra.mxu0 %vm72_vm1, %v4196_v14 }
  0xa7   :  { %4951 = vmatprep.mubr.msk.f32.mxu0 %vm72_vm1, %v4197_v16 }
  0xa8   :  { %4995 = vmatmul.mubr.msk.f32.gmra.mxu1 %vm72_vm1, %v4192_v19 }
  0xa9   :  { %4997 = vmatprep.mubr.msk.f32.mxu1 %vm72_vm1, %v4193_v20  ;;  %v5894_v20 = vld [vmem:[%s10001_s0 + $0x390] sm:$0xff] }
  0xaa   :  { %4952 = vmatmul.mubr.msk.f32.gmra.mxu0 %vm72_vm1, %v4198_v23 }
  0xab   :  { %4954 = vmatprep.mubr.msk.f32.mxu0 %vm72_vm1, %v4199_v24 }
  0xac   :  { %4998 = vmatmul.mubr.msk.f32.gmra.mxu1 %vm72_vm1, %v4194_v21 }
  0xad   :  { %5000 = vmatprep.mubr.msk.f32.mxu1 %vm72_vm1, %v4195_v22 }
  0xae   :  { %4955 = vmatmul.mubr.msk.f32.gmra.mxu0 %vm72_vm1, %v4200_v25 }
  0xaf   :  { %4957 = vmatprep.mubr.msk.f32.mxu0 %vm72_vm1, %v4201_v26 }
  0xb0   :  { %5001 = vmatmul.mubr.msk.f32.gmra.mxu1 %vm72_vm1, %v4196_v14 }
  0xb1   :  { %5003 = vmatprep.mubr.msk.f32.mxu1 %vm72_vm1, %v4197_v16 }
  0xb2   :  { %4958 = vmatmul.mubr.msk.f32.gmra.mxu0 %vm72_vm1, %v4202_v27 }
  0xb3   :  { %4960 = vmatprep.mubr.msk.f32.mxu0 %vm72_vm1, %v4203_v28 }
  0xb4   :  { %5004 = vmatmul.mubr.msk.f32.gmra.mxu1 %vm72_vm1, %v4198_v23 }
  0xb5   :  { %5006 = vmatprep.mubr.msk.f32.mxu1 %vm72_vm1, %v4199_v24  ;;  %v5914_v24 = vld [vmem:[%s10001_s0 + $0x398] sm:$0xff] }
  0xb6   :  { %4961 = vmatmul.mubr.msk.f32.gmra.mxu0 %vm72_vm1, %v4204_v29 }
  0xb7   :  { %4963 = vmatprep.mubr.msk.f32.mxu0 %vm72_vm1, %v4205_v30 }
  0xb8   :  { %5007 = vmatmul.mubr.msk.f32.gmra.mxu1 %vm72_vm1, %v4200_v25 }
  0xb9   :  { %5009 = vmatprep.mubr.msk.f32.mxu1 %vm72_vm1, %v4201_v26 }
  0xba   :  { %4964 = vmatmul.mubr.msk.f32.gmra.mxu0 %vm72_vm1, %v4206_v31 }
  0xbb   :  { %4966 = vmatprep.mubr.msk.f32.mxu0 %vm72_vm1, %v4207_v32 }
  0xbc   :  { %5010 = vmatmul.mubr.msk.f32.gmra.mxu1 %vm72_vm1, %v4202_v27 }
  0xbd   :  { %5012 = vmatprep.mubr.msk.f32.mxu1 %vm72_vm1, %v4203_v28  ;;  %v5926_v28 = vld [vmem:[%s10001_s0 + $0x3a0] sm:$0xff] }
  0xbe   :  { %4967 = vmatmul.mubr.msk.f32.gmra.mxu0 %vm72_vm1, %v4208_v33 }
  0xbf   :  { %4969 = vmatprep.mubr.msk.f32.mxu0 %vm72_vm1, %v4209_v34 }
  0xc0   :  { %5013 = vmatmul.mubr.msk.f32.gmra.mxu1 %vm72_vm1, %v4204_v29 }
  0xc1   :  { %5015 = vmatprep.mubr.msk.f32.mxu1 %vm72_vm1, %v4205_v30 }
  0xc2   :  { %4970 = vmatmul.mubr.msk.f32.gmra.mxu0 %vm72_vm1, %v4210_v35 }
  0xc3   :  { %5028 = vmatprep.mubr.msk.f32.mxu0 %vm72_vm1, %v4309_v36 }
  0xc4   :  { %5016 = vmatmul.mubr.msk.f32.gmra.mxu1 %vm72_vm1, %v4206_v31 }
  0xc5   :  { %5018 = vmatprep.mubr.msk.f32.mxu1 %vm72_vm1, %v4207_v32 }
  0xc6   :  { %v5725_v39 = vpop.f32.mrf.mxu0  ;;  %5029 = vmatmul.mubr.msk.f32.vlgmr.msra.gmra.mxu0 %vm72_vm1, %v4310_v37 }
  0xc7   :  { %5031 = vmatprep.mubr.msk.f32.mxu0 %vm72_vm1, %v4311_v38 }
  0xc8   :  { %v5732_v41 = vpop.f32.mrf.mxu0  ;;  %5019 = vmatmul.mubr.msk.f32.gmra.mxu1 %vm72_vm1, %v4208_v33 }
  0xc9   :  { %5021 = vmatprep.mubr.msk.f32.mxu1 %vm72_vm1, %v4209_v34  ;;  %v5946_v34 = vld [vmem:[%s10001_s0 + $0x3a8] sm:$0xff] }
  0xca   :  { %v5741_v43 = vpop.f32.mrf.mxu0  ;;  %5032 = vmatmul.mubr.msk.f32.gmra.mxu0 %vm72_vm1, %v4312_v40 }
  0xcb   :  { %5034 = vmatprep.mubr.msk.f32.mxu0 %vm72_vm1, %v5737_v42 }
  0xcc   :  { %v5751_v45 = vpop.f32.mrf.mxu0  ;;  %5022 = vmatmul.mubr.msk.f32.gmra.mxu1 %vm72_vm1, %v4210_v35 }
  0xcd   :  { %5080 = vmatprep.mubr.msk.f32.mxu1 %vm72_vm1, %v4309_v36  ;;  %v4770_v2 = vpop.f32.mrf.mxu1 }
  0xce   :  { %v5760_v47 = vpop.f32.mrf.mxu0  ;;  %5035 = vmatmul.mubr.msk.f32.gmra.mxu0 %vm72_vm1, %v5749_v44  ;;  %v479_v3 = vadd.f32 %v4770_v2, %v5827_v60 }
  0xcf   :  { %5037 = vmatprep.mubr.msk.f32.mxu0 %vm72_vm1, %v5756_v46  ;;  %v473_v5 = vpop.f32.mrf.mxu1 }
  0xd0   :  { %v5771_v49 = vpop.f32.mrf.mxu0  ;;  %5081 = vmatmul.mubr.msk.f32.vlgmr.msra.gmra.mxu1 %vm72_vm1, %v4310_v37  ;;  %v633_v7 = vmax.f32 %v479_v3, 0.0  ;;  %v474_v8 = vadd.f32 %v5827_v60, %v473_v5  ;;  %v5990_v3 = vld [vmem:[%s10001_s0 + $0x3c0] sm:$0xff] }
  0xd1   :  { %5083 = vmatprep.mubr.msk.f32.mxu1 %vm72_vm1, %v4311_v38  ;;  %v5958_v38 = vld [vmem:[%s10001_s0 + $0x3b0] sm:$0xff] }
  0xd2   :  { %v5780_v51 = vpop.f32.mrf.mxu0  ;;  %5038 = vmatmul.mubr.msk.f32.gmra.mxu0 %vm72_vm1, %v5769_v48  ;;  %v4773_v0 = vpop.f32.mrf.mxu1  ;;  %666 = vst.msk [vmem:[%s10004_s8 + $0x8] sm:$0xff] %vm664_vm2, %v633_v7  ;;  %v632_v11 = vmax.f32 %v474_v8, 0.0 }
  0xd3   :  { %5040 = vmatprep.mubr.msk.f32.mxu0 %vm72_vm1, %v5776_v50  ;;  %v489_v1 = vadd.f32 %v4773_v0, %v5827_v60 }
  0xd4   :  { %v5791_v53 = vpop.f32.mrf.mxu0  ;;  %5084 = vmatmul.mubr.msk.f32.gmra.mxu1 %vm72_vm1, %v4312_v40  ;;  %v483_v13 = vpop.f32.mrf.mxu1  ;;  %665 = vst.msk [vmem:[%s10004_s8] sm:$0xff] %vm664_vm2, %v632_v11 }
  0xd5   :  { %5086 = vmatprep.mubr.msk.f32.mxu1 %vm72_vm1, %v5737_v42  ;;  %v635_v17 = vmax.f32 %v489_v1, 0.0  ;;  %v484_v18 = vadd.f32 %v5827_v60, %v483_v13 }
  0xd6   :  { %v5800_v55 = vpop.f32.mrf.mxu0  ;;  %5041 = vmatmul.mubr.msk.f32.gmra.mxu0 %vm72_vm1, %v5789_v52  ;;  %v4776_v21 = vpop.f32.mrf.mxu1 }
  0xd7   :  { %5043 = vmatprep.mubr.msk.f32.mxu0 %vm72_vm1, %v5796_v54  ;;  %668 = vst.msk [vmem:[%s10004_s8 + $0x18] sm:$0xff] %vm664_vm2, %v635_v17  ;;  %v634_v22 = vmax.f32 %v484_v18, 0.0  ;;  %v499_v14 = vadd.f32 %v4776_v21, %v5827_v60  ;;  %v6022_v17 = vld [vmem:[%s10001_s0 + $0x3d0] sm:$0xff] }
  0xd8   :  { %v5811_v57 = vpop.f32.mrf.mxu0  ;;  %5087 = vmatmul.mubr.msk.f32.gmra.mxu1 %vm72_vm1, %v5749_v44  ;;  %v493_v23 = vpop.f32.mrf.mxu1 }
  0xd9   :  { %5089 = vmatprep.mubr.msk.f32.mxu1 %vm72_vm1, %v5756_v46  ;;  %667 = vst.msk [vmem:[%s10004_s8 + $0x10] sm:$0xff] %vm664_vm2, %v634_v22  ;;  %v637_v25 = vmax.f32 %v499_v14, 0.0  ;;  %v494_v26 = vadd.f32 %v5827_v60, %v493_v23 }
  0xda   :  { %v5820_v59 = vpop.f32.mrf.mxu0  ;;  %5044 = vmatmul.mubr.msk.f32.gmra.mxu0 %vm72_vm1, %v5809_v56  ;;  %v4779_v29 = vpop.f32.mrf.mxu1 }
  0xdb   :  { %5046 = vmatprep.mubr.msk.f32.mxu0 %vm72_vm1, %v5816_v58  ;;  %670 = vst.msk [vmem:[%s10004_s8 + $0x28] sm:$0xff] %vm664_vm2, %v637_v25  ;;  %v636_v30 = vmax.f32 %v494_v26, 0.0  ;;  %v509_v31 = vadd.f32 %v4779_v29, %v5827_v60  ;;  %v6054_v29 = vld [vmem:[%s10001_s0 + $0x3e0] sm:$0xff] }
  0xdc   :  { %v5836_v62 = vpop.f32.mrf.mxu0  ;;  %5090 = vmatmul.mubr.msk.f32.gmra.mxu1 %vm72_vm1, %v5769_v48  ;;  %v503_v33 = vpop.f32.mrf.mxu1 }
  0xdd   :  { %5092 = vmatprep.mubr.msk.f32.mxu1 %vm72_vm1, %v5776_v50  ;;  %669 = vst.msk [vmem:[%s10004_s8 + $0x20] sm:$0xff] %vm664_vm2, %v636_v30  ;;  %v639_v35 = vmax.f32 %v509_v31, 0.0  ;;  %v504_v36 = vadd.f32 %v5827_v60, %v503_v33  ;;  %v5978_v50 = vld [vmem:[%s10001_s0 + $0x3b8] sm:$0xff] }
  0xde   :  { %v5846_v4 = vpop.f32.mrf.mxu0  ;;  %5047 = vmatmul.mubr.msk.f32.gmra.mxu0 %vm72_vm1, %v5834_v61  ;;  %v4782_v40 = vpop.f32.mrf.mxu1 }
  0xdf   :  { %5049 = vmatprep.mubr.msk.f32.mxu0 %vm72_vm1, %v5841_v63  ;;  %672 = vst.msk [vmem:[%s10004_s8 + $0x38] sm:$0xff] %vm664_vm2, %v639_v35  ;;  %v638_v42 = vmax.f32 %v504_v36, 0.0  ;;  %v519_v44 = vadd.f32 %v4782_v40, %v5827_v60 }
  0xe0   :  { %v5858_v9 = vpop.f32.mrf.mxu0  ;;  %5093 = vmatmul.mubr.msk.f32.gmra.mxu1 %vm72_vm1, %v5789_v52  ;;  %v513_v48 = vpop.f32.mrf.mxu1 }
  0xe1   :  { %5095 = vmatprep.mubr.msk.f32.mxu1 %vm72_vm1, %v5796_v54  ;;  %671 = vst.msk [vmem:[%s10004_s8 + $0x30] sm:$0xff] %vm664_vm2, %v638_v42  ;;  %v641_v52 = vmax.f32 %v519_v44, 0.0  ;;  %v514_v54 = vadd.f32 %v5827_v60, %v513_v48  ;;  %v6086_v44 = vld [vmem:[%s10001_s0 + $0x3f0] sm:$0xff] }
  0xe2   :  { %v5873_v12 = vpop.f32.mrf.mxu0  ;;  %5050 = vmatmul.mubr.msk.f32.gmra.mxu0 %vm72_vm1, %v5855_v6  ;;  %v4785_v5 = vpop.f32.mrf.mxu1 }
  0xe3   :  { %5052 = vmatprep.mubr.msk.f32.mxu0 %vm72_vm1, %v5863_v10  ;;  %674 = vst.msk [vmem:[%s10004_s8 + $0x48] sm:$0xff] %vm664_vm2, %v641_v52  ;;  %v640_v7 = vmax.f32 %v514_v54, 0.0  ;;  %v529_v8 = vadd.f32 %v4785_v5, %v5827_v60 }
  0xe4   :  { %v5889_v19 = vpop.f32.mrf.mxu0  ;;  %5096 = vmatmul.mubr.msk.f32.gmra.mxu1 %vm72_vm1, %v5809_v56  ;;  %v523_v11 = vpop.f32.mrf.mxu1  ;;  %v6010_v56 = vld [vmem:[%s10001_s0 + $0x3c8] sm:$0xff] }
  0xe5   :  { %5098 = vmatprep.mubr.msk.f32.mxu1 %vm72_vm1, %v5816_v58  ;;  %673 = vst.msk [vmem:[%s10004_s8 + $0x40] sm:$0xff] %vm664_vm2, %v640_v7  ;;  %v643_v58 = vmax.f32 %v529_v8, 0.0  ;;  %v524_v1 = vadd.f32 %v5827_v60, %v523_v11 }
  0xe6   :  { %v5905_v16 = vpop.f32.mrf.mxu0  ;;  %5053 = vmatmul.mubr.msk.f32.gmra.mxu0 %vm72_vm1, %v5882_v15  ;;  %v4788_v18 = vpop.f32.mrf.mxu1 }
  0xe7   :  { %5055 = vmatprep.mubr.msk.f32.mxu0 %vm72_vm1, %v5894_v20  ;;  %676 = vst.msk [vmem:[%s10004_s8 + $0x58] sm:$0xff] %vm664_vm2, %v643_v58  ;;  %v642_v21 = vmax.f32 %v524_v1, 0.0  ;;  %v539_v22 = vadd.f32 %v4788_v18, %v5827_v60 }
  0xe8   :  { %v5921_v27 = vpop.f32.mrf.mxu0  ;;  %5099 = vmatmul.mubr.msk.f32.gmra.mxu1 %vm72_vm1, %v5834_v61  ;;  %v533_v23 = vpop.f32.mrf.mxu1  ;;  %v6042_v61 = vld [vmem:[%s10001_s0 + $0x3d8] sm:$0xff] }
  0xe9   :  { %5101 = vmatprep.mubr.msk.f32.mxu1 %vm72_vm1, %v5841_v63  ;;  %675 = vst.msk [vmem:[%s10004_s8 + $0x50] sm:$0xff] %vm664_vm2, %v642_v21  ;;  %v645_v63 = vmax.f32 %v539_v22, 0.0  ;;  %v534_v25 = vadd.f32 %v5827_v60, %v533_v23 }
  0xea   :  { %v5937_v32 = vpop.f32.mrf.mxu0  ;;  %5056 = vmatmul.mubr.msk.f32.gmra.mxu0 %vm72_vm1, %v5914_v24  ;;  %v4791_v30 = vpop.f32.mrf.mxu1 }
  0xeb   :  { %5058 = vmatprep.mubr.msk.f32.mxu0 %vm72_vm1, %v5926_v28  ;;  %678 = vst.msk [vmem:[%s10004_s8 + $0x68] sm:$0xff] %vm664_vm2, %v645_v63  ;;  %v644_v31 = vmax.f32 %v534_v25, 0.0  ;;  %v549_v33 = vadd.f32 %v4791_v30, %v5827_v60 }
  0xec   :  { %v5953_v37 = vpop.f32.mrf.mxu0  ;;  %5102 = vmatmul.mubr.msk.f32.gmra.mxu1 %vm72_vm1, %v5855_v6  ;;  %v543_v36 = vpop.f32.mrf.mxu1  ;;  %v6074_v6 = vld [vmem:[%s10001_s0 + $0x3e8] sm:$0xff] }
  0xed   :  { %5104 = vmatprep.mubr.msk.f32.mxu1 %vm72_vm1, %v5863_v10  ;;  %677 = vst.msk [vmem:[%s10004_s8 + $0x60] sm:$0xff] %vm664_vm2, %v644_v31  ;;  %v647_v10 = vmax.f32 %v549_v33, 0.0  ;;  %v544_v40 = vadd.f32 %v5827_v60, %v543_v36 }
  0xee   :  { %v5969_v46 = vpop.f32.mrf.mxu0  ;;  %5059 = vmatmul.mubr.msk.f32.gmra.mxu0 %vm72_vm1, %v5946_v34  ;;  %v4794_v48 = vpop.f32.mrf.mxu1 }
  0xef   :  { %5061 = vmatprep.mubr.msk.f32.mxu0 %vm72_vm1, %v5958_v38  ;;  %680 = vst.msk [vmem:[%s10004_s8 + $0x78] sm:$0xff] %vm664_vm2, %v647_v10  ;;  %v646_v52 = vmax.f32 %v544_v40, 0.0  ;;  %v559_v54 = vadd.f32 %v4794_v48, %v5827_v60 }
  0xf0   :  { %v5985_v2 = vpop.f32.mrf.mxu0  ;;  %5105 = vmatmul.mubr.msk.f32.gmra.mxu1 %vm72_vm1, %v5882_v15  ;;  %v553_v7 = vpop.f32.mrf.mxu1  ;;  %v6106_v15 = vld [vmem:[%s10001_s0 + $0x3f8] sm:$0xff] }
  0xf1   :  { %5107 = vmatprep.mubr.msk.f32.mxu1 %vm72_vm1, %v5894_v20  ;;  %679 = vst.msk [vmem:[%s10004_s8 + $0x70] sm:$0xff] %vm664_vm2, %v646_v52  ;;  %v649_v20 = vmax.f32 %v559_v54, 0.0  ;;  %v554_v8 = vadd.f32 %v5827_v60, %v553_v7 }
  0xf2   :  { %v6001_v0 = vpop.f32.mrf.mxu0  ;;  %5062 = vmatmul.mubr.msk.f32.gmra.mxu0 %vm72_vm1, %v5978_v50  ;;  %v4797_v58 = vpop.f32.mrf.mxu1 }
  0xf3   :  { %5064 = vmatprep.mubr.msk.f32.mxu0 %vm72_vm1, %v5990_v3  ;;  %682 = vst.msk [vmem:[%s10004_s8 + $0x88] sm:$0xff] %vm664_vm2, %v649_v20  ;;  %v648_v1 = vmax.f32 %v554_v8, 0.0  ;;  %v569_v18 = vadd.f32 %v4797_v58, %v5827_v60 }
  0xf4   :  { %v6017_v13 = vpop.f32.mrf.mxu0  ;;  %5108 = vmatmul.mubr.msk.f32.gmra.mxu1 %vm72_vm1, %v5914_v24  ;;  %v563_v22 = vpop.f32.mrf.mxu1 }
  0xf5   :  { %5110 = vmatprep.mubr.msk.f32.mxu1 %vm72_vm1, %v5926_v28  ;;  %681 = vst.msk [vmem:[%s10004_s8 + $0x80] sm:$0xff] %vm664_vm2, %v648_v1  ;;  %v651_v24 = vmax.f32 %v569_v18, 0.0  ;;  %v564_v23 = vadd.f32 %v5827_v60, %v563_v22 }
  0xf6   :  { %v6033_v14 = vpop.f32.mrf.mxu0  ;;  %5065 = vmatmul.mubr.msk.f32.gmra.mxu0 %vm72_vm1, %v6010_v56  ;;  %v4800_v25 = vpop.f32.mrf.mxu1 }
  0xf7   :  { %10297 = vst [vmem:[#allocation2_spill] sm:$0xff] %v6033_v14  ;;  %5067 = vmatprep.mubr.msk.f32.mxu0 %vm72_vm1, %v6022_v17  ;;  %684 = vst.msk [vmem:[%s10004_s8 + $0x98] sm:$0xff] %vm664_vm2, %v651_v24  ;;  %v650_v28 = vmax.f32 %v564_v23, 0.0  ;;  %v579_v30 = vadd.f32 %v4800_v25, %v5827_v60 }
  0xf8   :  { %v6049_v26 = vpop.f32.mrf.mxu0  ;;  %5111 = vmatmul.mubr.msk.f32.gmra.mxu1 %vm72_vm1, %v5946_v34  ;;  %v573_v33 = vpop.f32.mrf.mxu1 }
  0xf9   :  { %5113 = vmatprep.mubr.msk.f32.mxu1 %vm72_vm1, %v5958_v38  ;;  %683 = vst.msk [vmem:[%s10004_s8 + $0x90] sm:$0xff] %vm664_vm2, %v650_v28  ;;  %v653_v34 = vmax.f32 %v579_v30, 0.0  ;;  %v574_v36 = vadd.f32 %v5827_v60, %v573_v33 }
  0xfa   :  { %v6065_v35 = vpop.f32.mrf.mxu0  ;;  %5068 = vmatmul.mubr.msk.f32.gmra.mxu0 %vm72_vm1, %v6042_v61  ;;  %v4803_v40 = vpop.f32.mrf.mxu1 }
  0xfb   :  { %10298 = vst [vmem:[#allocation3_spill] sm:$0xff] %v6065_v35  ;;  %5070 = vmatprep.mubr.msk.f32.mxu0 %vm72_vm1, %v6054_v29  ;;  %686 = vst.msk [vmem:[%s10004_s8 + $0xa8] sm:$0xff] %vm664_vm2, %v653_v34  ;;  %v652_v38 = vmax.f32 %v574_v36, 0.0  ;;  %v589_v48 = vadd.f32 %v4803_v40, %v5827_v60 }
  0xfc   :  { %v6081_v42 = vpop.f32.mrf.mxu0  ;;  %5114 = vmatmul.mubr.msk.f32.gmra.mxu1 %vm72_vm1, %v5978_v50  ;;  %v583_v54 = vpop.f32.mrf.mxu1 }
  0xfd   :  { %10299 = vst [vmem:[#allocation4_spill] sm:$0xff] %v6081_v42  ;;  %5116 = vmatprep.mubr.msk.f32.mxu1 %vm72_vm1, %v5990_v3  ;;  %685 = vst.msk [vmem:[%s10004_s8 + $0xa0] sm:$0xff] %vm664_vm2, %v652_v38  ;;  %v655_v50 = vmax.f32 %v589_v48, 0.0  ;;  %v584_v7 = vadd.f32 %v5827_v60, %v583_v54 }
  0xfe   :  { %v6097_v5 = vpop.f32.mrf.mxu0  ;;  %5071 = vmatmul.mubr.msk.f32.gmra.mxu0 %vm72_vm1, %v6074_v6  ;;  %v4806_v8 = vpop.f32.mrf.mxu1 }
  0xff   :  { %10300 = vst [vmem:[#allocation5_spill] sm:$0xff] %v6097_v5  ;;  %5073 = vmatprep.mubr.msk.f32.mxu0 %vm72_vm1, %v6086_v44  ;;  %688 = vst.msk [vmem:[%s10004_s8 + $0xb8] sm:$0xff] %vm664_vm2, %v655_v50  ;;  %v654_v3 = vmax.f32 %v584_v7, 0.0  ;;  %v599_v58 = vadd.f32 %v4806_v8, %v5827_v60 }
 0x100   :  { %v6113_v11 = vpop.f32.mrf.mxu0  ;;  %5117 = vmatmul.mubr.msk.f32.gmra.mxu1 %vm72_vm1, %v6010_v56  ;;  %v593_v18 = vpop.f32.mrf.mxu1 }
 0x101   :  { %10301 = vst [vmem:[#allocation6_spill] sm:$0xff] %v6113_v11  ;;  %5119 = vmatprep.mubr.msk.f32.mxu1 %vm72_vm1, %v6022_v17  ;;  %687 = vst.msk [vmem:[%s10004_s8 + $0xb0] sm:$0xff] %vm664_vm2, %v654_v3  ;;  %v657_v56 = vmax.f32 %v599_v58, 0.0  ;;  %v594_v22 = vadd.f32 %v5827_v60, %v593_v18 }
 0x102   :  { %v6124_v21 = vpop.f32.mrf.mxu0  ;;  %5074 = vmatmul.mubr.msk.f32.gmra.mxu0 %vm72_vm1, %v6106_v15  ;;  %v4809_v23 = vpop.f32.mrf.mxu1 }
 0x103   :  { %10302 = vst [vmem:[#allocation7_spill] sm:$0xff] %v6124_v21  ;;  %690 = vst.msk [vmem:[%s10004_s8 + $0xc8] sm:$0xff] %vm664_vm2, %v657_v56  ;;  %v656_v17 = vmax.f32 %v594_v22, 0.0  ;;  %v609_v25 = vadd.f32 %v4809_v23, %v5827_v60 }
 0x104   :  { %v6133_v63 = vpop.f32.mrf.mxu0  ;;  %5120 = vmatmul.mubr.msk.f32.gmra.mxu1 %vm72_vm1, %v6042_v61  ;;  %v603_v30 = vpop.f32.mrf.mxu1 }
 0x105   :  { %10303 = vst [vmem:[#allocation8_spill] sm:$0xff] %v6133_v63  ;;  %5122 = vmatprep.mubr.msk.f32.mxu1 %vm72_vm1, %v6054_v29  ;;  %689 = vst.msk [vmem:[%s10004_s8 + $0xc0] sm:$0xff] %vm664_vm2, %v656_v17  ;;  %v659_v61 = vmax.f32 %v609_v25, 0.0  ;;  %v604_v33 = vadd.f32 %v5827_v60, %v603_v30 }
 0x106   :  { %v6144_v31 = vpop.f32.mrf.mxu0  ;;  %v4812_v36 = vpop.f32.mrf.mxu1 }
 0x107   :  { %692 = vst.msk [vmem:[%s10004_s8 + $0xd8] sm:$0xff] %vm664_vm2, %v659_v61  ;;  %v658_v29 = vmax.f32 %v604_v33, 0.0  ;;  %v619_v40 = vadd.f32 %v4812_v36, %v5827_v60 }
 0x108   :  { %v6151_v10 = vpop.f32.mrf.mxu0  ;;  %5123 = vmatmul.mubr.msk.f32.gmra.mxu1 %vm72_vm1, %v6074_v6  ;;  %v613_v48 = vpop.f32.mrf.mxu1 }
 0x109   :  { %5125 = vmatprep.mubr.msk.f32.mxu1 %vm72_vm1, %v6086_v44  ;;  %691 = vst.msk [vmem:[%s10004_s8 + $0xd0] sm:$0xff] %vm664_vm2, %v658_v29  ;;  %v661_v6 = vmax.f32 %v619_v40, 0.0  ;;  %v614_v54 = vadd.f32 %v5827_v60, %v613_v48 }
 0x10a   :  { %v6162_v52 = vpop.f32.mrf.mxu0 }
 0x10b   :  { %v4815_v7 = vpop.f32.mrf.mxu1  ;;  %694 = vst.msk [vmem:[%s10004_s8 + $0xe8] sm:$0xff] %vm664_vm2, %v661_v6  ;;  %v660_v44 = vmax.f32 %v614_v54, 0.0 }
 0x10c   :  { %v6169_v20 = vpop.f32.mrf.mxu0  ;;  %5126 = vmatmul.mubr.msk.f32.gmra.mxu1 %vm72_vm1, %v6106_v15  ;;  %v629_v8 = vadd.f32 %v4815_v7, %v5827_v60 }
 0x10d   :  { %v623_v58 = vpop.f32.mrf.mxu1  ;;  %693 = vst.msk [vmem:[%s10004_s8 + $0xe0] sm:$0xff] %vm664_vm2, %v660_v44 }
 0x10e   :  { %v6180_v1 = vpop.f32.mrf.mxu0  ;;  %v663_v18 = vmax.f32 %v629_v8, 0.0  ;;  %v624_v56 = vadd.f32 %v5827_v60, %v623_v58 }
 0x10f   :  { %v4874_v22 = vpop.f32.mrf.mxu1 }
 0x110   :  { %v6187_v24 = vpop.f32.mrf.mxu0  ;;  %696 = vst.msk [vmem:[%s10004_s8 + $0xf8] sm:$0xff] %vm664_vm2, %v663_v18  ;;  %v662_v23 = vmax.f32 %v624_v56, 0.0  ;;  %v1123_v17 = vadd.f32 %v4874_v22, %v5827_v60 }
 0x111   :  { %v1117_v30 = vpop.f32.mrf.mxu1 }
 0x112   :  { %v6198_v28 = vpop.f32.mrf.mxu0  ;;  %695 = vst.msk [vmem:[%s10004_s8 + $0xf0] sm:$0xff] %vm664_vm2, %v662_v23  ;;  %v1277_v61 = vmax.f32 %v1123_v17, 0.0  ;;  %v1118_v33 = vadd.f32 %v5827_v60, %v1117_v30 }
 0x113   :  { %v4877_v29 = vpop.f32.mrf.mxu1 }
 0x114   :  { %v6205_v34 = vpop.f32.mrf.mxu0  ;;  %4148 = vst.msk [vmem:[%s10004_s8 + $0x108] sm:$0xff] %vm664_vm2, %v1277_v61  ;;  %v1276_v40 = vmax.f32 %v1118_v33, 0.0  ;;  %v1133_v48 = vadd.f32 %v4877_v29, %v5827_v60 }
 0x115   :  { %v1127_v54 = vpop.f32.mrf.mxu1 }
 0x116   :  { %v6216_v38 = vpop.f32.mrf.mxu0  ;;  %4147 = vst.msk [vmem:[%s10004_s8 + $0x100] sm:$0xff] %vm664_vm2, %v1276_v40  ;;  %v1279_v7 = vmax.f32 %v1133_v48, 0.0  ;;  %v1128_v44 = vadd.f32 %v5827_v60, %v1127_v54 }
 0x117   :  { %v4880_v58 = vpop.f32.mrf.mxu1 }
 0x118   :  { %v6223_v50 = vpop.f32.mrf.mxu0  ;;  %4150 = vst.msk [vmem:[%s10004_s8 + $0x118] sm:$0xff] %vm664_vm2, %v1279_v7  ;;  %v1278_v18 = vmax.f32 %v1128_v44, 0.0  ;;  %v1143_v56 = vadd.f32 %v4880_v58, %v5827_v60 }
 0x119   :  { %v1137_v23 = vpop.f32.mrf.mxu1 }
 0x11a   :  { %v6232_v3 = vpop.f32.mrf.mxu0  ;;  %4149 = vst.msk [vmem:[%s10004_s8 + $0x110] sm:$0xff] %vm664_vm2, %v1278_v18  ;;  %v1281_v17 = vmax.f32 %v1143_v56, 0.0  ;;  %v1138_v30 = vadd.f32 %v5827_v60, %v1137_v23 }
 0x11b   :  { %v4883_v33 = vpop.f32.mrf.mxu1 }
 0x11c   :  { %v6239_v15 = vpop.f32.mrf.mxu0  ;;  %4152 = vst.msk [vmem:[%s10004_s8 + $0x128] sm:$0xff] %vm664_vm2, %v1281_v17  ;;  %v1280_v29 = vmax.f32 %v1138_v30, 0.0  ;;  %v1153_v40 = vadd.f32 %v4883_v33, %v5827_v60 }
 0x11d   :  { %v1147_v54 = vpop.f32.mrf.mxu1 }
 0x11e   :  { %v6246_v25 = vpop.f32.mrf.mxu0  ;;  %4151 = vst.msk [vmem:[%s10004_s8 + $0x120] sm:$0xff] %vm664_vm2, %v1280_v29  ;;  %v1283_v7 = vmax.f32 %v1153_v40, 0.0  ;;  %v1148_v44 = vadd.f32 %v5827_v60, %v1147_v54 }
 0x11f   :  { %v4886_v18 = vpop.f32.mrf.mxu1 }
 0x120   :  { %v6253_v36 = vpop.f32.mrf.mxu0  ;;  %4154 = vst.msk [vmem:[%s10004_s8 + $0x138] sm:$0xff] %vm664_vm2, %v1283_v7  ;;  %v1282_v56 = vmax.f32 %v1148_v44, 0.0  ;;  %v1163_v23 = vadd.f32 %v4886_v18, %v5827_v60 }
 0x121   :  { %v1157_v30 = vpop.f32.mrf.mxu1 }
 0x122   :  { %v6260_v6 = vpop.f32.mrf.mxu0  ;;  %4153 = vst.msk [vmem:[%s10004_s8 + $0x130] sm:$0xff] %vm664_vm2, %v1282_v56  ;;  %v1285_v33 = vmax.f32 %v1163_v23, 0.0  ;;  %v1158_v29 = vadd.f32 %v5827_v60, %v1157_v30 }
 0x123   :  { %v4889_v54 = vpop.f32.mrf.mxu1 }
 0x124   :  { %v6267_v8 = vpop.f32.mrf.mxu0  ;;  %4156 = vst.msk [vmem:[%s10004_s8 + $0x148] sm:$0xff] %vm664_vm2, %v1285_v33  ;;  %v1284_v7 = vmax.f32 %v1158_v29, 0.0  ;;  %v1173_v44 = vadd.f32 %v4889_v54, %v5827_v60 }
 0x125   :  { %v1167_v21 = vpop.f32.mrf.mxu1 }
 0x126   :  { %v6274_v22 = vpop.f32.mrf.mxu0  ;;  %4155 = vst.msk [vmem:[%s10004_s8 + $0x140] sm:$0xff] %vm664_vm2, %v1284_v7  ;;  %v1287_v56 = vmax.f32 %v1173_v44, 0.0  ;;  %v1168_v23 = vadd.f32 %v5827_v60, %v1167_v21 }
 0x127   :  { %v4892_v63 = vpop.f32.mrf.mxu1 }
 0x128   :  { %v6281_v61 = vpop.f32.mrf.mxu0  ;;  %4158 = vst.msk [vmem:[%s10004_s8 + $0x158] sm:$0xff] %vm664_vm2, %v1287_v56  ;;  %v1286_v33 = vmax.f32 %v1168_v23, 0.0  ;;  %v1183_v29 = vadd.f32 %v4892_v63, %v5827_v60 }
 0x129   :  { %v1177_v5 = vpop.f32.mrf.mxu1 }
 0x12a   :  { %v6288_v48 = vpop.f32.mrf.mxu0  ;;  %4157 = vst.msk [vmem:[%s10004_s8 + $0x150] sm:$0xff] %vm664_vm2, %v1286_v33  ;;  %v1289_v21 = vmax.f32 %v1183_v29, 0.0  ;;  %v1178_v7 = vadd.f32 %v5827_v60, %v1177_v5 }
 0x12b   :  { %v4895_v11 = vpop.f32.mrf.mxu1 }
 0x12c   :  { %v6295_v58 = vpop.f32.mrf.mxu0  ;;  %4160 = vst.msk [vmem:[%s10004_s8 + $0x168] sm:$0xff] %vm664_vm2, %v1289_v21  ;;  %v1288_v63 = vmax.f32 %v1178_v7, 0.0  ;;  %v1193_v56 = vadd.f32 %v4895_v11, %v5827_v60  ;;  %v6361_v7 = vld [vmem:[%s10005_s2] ss:$0 sm:$0xff] }
 0x12d   :  { %v1187_v35 = vpop.f32.mrf.mxu1 }
 0x12e   :  { %v6302_v17 = vpop.f32.mrf.mxu0  ;;  %4159 = vst.msk [vmem:[%s10004_s8 + $0x160] sm:$0xff] %vm664_vm2, %v1288_v63  ;;  %v1291_v5 = vmax.f32 %v1193_v56, 0.0  ;;  %v1188_v33 = vadd.f32 %v5827_v60, %v1187_v35  ;;  %v6367_v35 = vadd.f32 %v6361_v7, %v6151_v10  ;;  %v6386_v10 = vadd.f32 %v6361_v7, %v6169_v20 }
 0x12f   :  { %v4898_v42 = vpop.f32.mrf.mxu1 }
 0x130   :  { %v6309_v40 = vpop.f32.mrf.mxu0  ;;  %4162 = vst.msk [vmem:[%s10004_s8 + $0x178] sm:$0xff] %vm664_vm2, %v1291_v5  ;;  %v1290_v11 = vmax.f32 %v1188_v33, 0.0  ;;  %v1203_v21 = vadd.f32 %v4898_v42, %v5827_v60  ;;  %10308 = vst [vmem:[#allocation13_spill] sm:$0xff] %v6367_v35  ;;  %v6376_v33 = vadd.f32 %v6361_v7, %v5732_v41  ;;  %v2698_v20 = vsel %vm664_vm2, %v6367_v35, 0.0 }
 0x131   :  { %v1197_v56 = vpop.f32.mrf.mxu1  ;;  %10312 = vst [vmem:[#allocation17_spill] sm:$0xff] %v6386_v10  ;;  %v2701_v35 = vsel %vm664_vm2, %v6386_v10, 0.0  ;;  %v6429_v10 = vadd.f32 %v6162_v52, %v6361_v7 }
 0x132   :  { %v6316_v18 = vpop.f32.mrf.mxu0  ;;  %4161 = vst.msk [vmem:[%s10004_s8 + $0x170] sm:$0xff] %vm664_vm2, %v1290_v11  ;;  %v1293_v5 = vmax.f32 %v1203_v21, 0.0  ;;  %v1198_v42 = vadd.f32 %v5827_v60, %v1197_v56  ;;  %10309 = vst [vmem:[#allocation14_spill] sm:$0xff] %v6376_v33  ;;  %v6395_v21 = vadd.f32 %v5725_v39, %v6361_v7  ;;  %v2629_v39 = vsel %vm664_vm2, %v6376_v33, 0.0 }
 0x133   :  { %10317 = vst [vmem:[#allocation22_spill] sm:$0xff] %v6429_v10 }
 0x134   :  { %v6323_v30 = vpop.f32.mrf.mxu0  ;;  %4164 = vst.msk [vmem:[%s10004_s8 + $0x188] sm:$0xff] %vm664_vm2, %v1293_v5  ;;  %v1292_v11 = vmax.f32 %v1198_v42, 0.0  ;;  %10313 = vst [vmem:[#allocation18_spill] sm:$0xff] %v6395_v21 }
 0x136   :  { %v6330_v54 = vpop.f32.mrf.mxu0  ;;  %4163 = vst.msk [vmem:[%s10004_s8 + $0x180] sm:$0xff] %vm664_vm2, %v1292_v11 }
 0x137   :  { %10304 = vst [vmem:[#allocation9_spill] sm:$0xff] %v6330_v54 }
 0x138   :  { %v6337_v44 = vpop.f32.mrf.mxu0 }
 0x13a   :  { %v6344_v23 = vpop.f32.mrf.mxu0 }
 0x13b   :  { %10305 = vst [vmem:[#allocation10_spill] sm:$0xff] %v6344_v23 }
 0x13c   :  { %v6351_v29 = vpop.f32.mrf.mxu0 }
 0x13d   :  { %10306 = vst [vmem:[#allocation11_spill] sm:$0xff] %v6351_v29  ;;  %v6382_v29 = vadd.f32 %v6144_v31, %v6361_v7 }
 0x13e   :  { %v6363_v63 = vpop.f32.mrf.mxu0 }
 0x13f   :  { %10307 = vst [vmem:[#allocation12_spill] sm:$0xff] %v6363_v63  ;;  %v4901_v63 = vpop.f32.mrf.mxu1  ;;  %10311 = vst [vmem:[#allocation16_spill] sm:$0xff] %v6382_v29 }
 0x140   :  { %v6378_v23 = vpop.f32.mrf.mxu0  ;;  %v1213_v41 = vadd.f32 %v4901_v63, %v5827_v60 }
 0x141   :  { %10310 = vst [vmem:[#allocation15_spill] sm:$0xff] %v6378_v23  ;;  %v1207_v31 = vpop.f32.mrf.mxu1  ;;  %v6401_v23 = vadd.f32 %v6361_v7, %v5751_v45  ;;  %v2699_v45 = vsel %vm664_vm2, %v6382_v29, 0.0 }
 0x142   :  { %v6397_v56 = vpop.f32.mrf.mxu0  ;;  %v1295_v63 = vmax.f32 %v1213_v41, 0.0  ;;  %v1208_v5 = vadd.f32 %v5827_v60, %v1207_v31  ;;  %v2630_v31 = vsel %vm664_vm2, %v6395_v21, 0.0  ;;  %v2700_v33 = vadd.f32 %v2699_v45, %v2698_v20 }
 0x143   :  { %10314 = vst [vmem:[#allocation19_spill] sm:$0xff] %v6397_v56  ;;  %10315 = vst [vmem:[#allocation20_spill] sm:$0xff] %v6401_v23  ;;  %v4904_v56 = vpop.f32.mrf.mxu1  ;;  %v2632_v29 = vsel %vm664_vm2, %v6401_v23, 0.0  ;;  %v6438_v20 = vadd.f32 %v5741_v43, %v6361_v7  ;;  %v6442_v23 = vadd.f32 %v6361_v7, %v6187_v24  ;;  %v6457_v24 = vadd.f32 %v6361_v7, %v5771_v49 }
 0x144   :  { %v6412_v42 = vpop.f32.mrf.mxu0  ;;  %4166 = vst.msk [vmem:[%s10004_s8 + $0x198] sm:$0xff] %vm664_vm2, %v1295_v63  ;;  %v1294_v11 = vmax.f32 %v1208_v5, 0.0  ;;  %v1223_v41 = vadd.f32 %v4904_v56, %v5827_v60  ;;  %v2631_v5 = vadd.f32 %v2630_v31, %v2629_v39  ;;  %v2702_v45 = vadd.f32 %v2701_v35, %v2700_v33 }
 0x145   :  { %10316 = vst [vmem:[#allocation21_spill] sm:$0xff] %v6412_v42  ;;  %v1217_v14 = vpop.f32.mrf.mxu1  ;;  %10318 = vst [vmem:[#allocation23_spill] sm:$0xff] %v6442_v23  ;;  %v2634_v49 = vsel %vm664_vm2, %v6438_v20, 0.0 }
 0x146   :  { %v4926_v42 = vpop.f32.mrf.mxu0  ;;  %4165 = vst.msk [vmem:[%s10004_s8 + $0x190] sm:$0xff] %vm664_vm2, %v1294_v11  ;;  %v1297_v63 = vmax.f32 %v1223_v41, 0.0  ;;  %v1218_v56 = vadd.f32 %v5827_v60, %v1217_v14  ;;  %v2633_v35 = vadd.f32 %v2632_v29, %v2631_v5  ;;  %10321 = vst [vmem:[#allocation26_spill] sm:$0xff] %v6457_v24 }
 0x147   :  { %v4907_v21 = vpop.f32.mrf.mxu1  ;;  %v6445_v54 = vadd.f32 %v4926_v42, %v6361_v7  ;;  %v2703_v42 = vsel %vm664_vm2, %v6429_v10, 0.0  ;;  %v6493_v10 = vadd.f32 %v6180_v1, %v6361_v7 }
 0x148   :  { %v1536_v52 = vpop.f32.mrf.mxu0  ;;  %4168 = vst.msk [vmem:[%s10004_s8 + $0x1a8] sm:$0xff] %vm664_vm2, %v1297_v63  ;;  %v1296_v43 = vmax.f32 %v1218_v56, 0.0  ;;  %v1233_v14 = vadd.f32 %v4907_v21, %v5827_v60  ;;  %v2704_v21 = vadd.f32 %v2703_v42, %v2702_v45  ;;  %v2705_v63 = vsel %vm664_vm2, %v6442_v23, 0.0 }
 0x149   :  { %10319 = vst [vmem:[#allocation24_spill] sm:$0xff] %v6445_v54  ;;  %v6448_v11 = vadd.f32 %v6361_v7, %v1536_v52  ;;  %v1227_v39 = vpop.f32.mrf.mxu1  ;;  %v2636_v42 = vsel %vm664_vm2, %v6457_v24, 0.0 }
 0x14a   :  { %v4929_v33 = vpop.f32.mrf.mxu0  ;;  %4167 = vst.msk [vmem:[%s10004_s8 + $0x1a0] sm:$0xff] %vm664_vm2, %v1296_v43  ;;  %v1299_v31 = vmax.f32 %v1233_v14, 0.0  ;;  %v1228_v29 = vadd.f32 %v5827_v60, %v1227_v39  ;;  %v2635_v39 = vadd.f32 %v2634_v49, %v2633_v35 }
 0x14b   :  { %10320 = vst [vmem:[#allocation25_spill] sm:$0xff] %v6448_v11  ;;  %v2768_v41 = vsel %vm664_vm2, %v6448_v11, 0.0  ;;  %v6473_v56 = vadd.f32 %v4929_v33, %v6361_v7  ;;  %v4910_v52 = vpop.f32.mrf.mxu1  ;;  %v2769_v11 = vsel %vm664_vm2, %v6445_v54, 0.0  ;;  %v6487_v33 = vadd.f32 %v5760_v47, %v6361_v7 }
 0x14c   :  { %v1546_v5 = vpop.f32.mrf.mxu0  ;;  %4170 = vst.msk [vmem:[%s10004_s8 + $0x1b8] sm:$0xff] %vm664_vm2, %v1299_v31  ;;  %v1298_v45 = vmax.f32 %v1228_v29, 0.0  ;;  %v1243_v14 = vadd.f32 %v4910_v52, %v5827_v60  ;;  %v2770_v54 = vadd.f32 %v2769_v11, %v2768_v41  ;;  %v2706_v29 = vadd.f32 %v2705_v63, %v2704_v21 }
 0x14d   :  { %10322 = vst [vmem:[#allocation27_spill] sm:$0xff] %v6473_v56  ;;  %v6478_v43 = vadd.f32 %v6361_v7, %v1546_v5  ;;  %v1237_v5 = vpop.f32.mrf.mxu1  ;;  %v6504_v11 = vadd.f32 %v6361_v7, %v6205_v34  ;;  %v2773_v1 = vsel %vm664_vm2, %v6473_v56, 0.0  ;;  %v2637_v63 = vadd.f32 %v2636_v42, %v2635_v39 }
 0x14e   :  { %v4932_v23 = vpop.f32.mrf.mxu0  ;;  %4169 = vst.msk [vmem:[%s10004_s8 + $0x1b0] sm:$0xff] %vm664_vm2, %v1298_v45  ;;  %v1301_v47 = vmax.f32 %v1243_v14, 0.0  ;;  %v1238_v35 = vadd.f32 %v5827_v60, %v1237_v5  ;;  %v2707_v5 = vsel %vm664_vm2, %v6493_v10, 0.0  ;;  %v6631_v56 = vadd.f32 %v5820_v59, %v6361_v7 }
 0x14f   :  { %10323 = vst [vmem:[#allocation28_spill] sm:$0xff] %v6478_v43  ;;  %v2771_v31 = vsel %vm664_vm2, %v6478_v43, 0.0  ;;  %v4913_v52 = vpop.f32.mrf.mxu1  ;;  %v6509_v43 = vadd.f32 %v4932_v23, %v6361_v7  ;;  %v2708_v42 = vadd.f32 %v2707_v5, %v2706_v29 }
 0x150   :  { %v2772_v41 = vadd.f32 %v2771_v31, %v2770_v54  ;;  %v1556_v49 = vpop.f32.mrf.mxu0  ;;  %4172 = vst.msk [vmem:[%s10004_s8 + $0x1c8] sm:$0xff] %vm664_vm2, %v1301_v47  ;;  %v1300_v21 = vmax.f32 %v1238_v35, 0.0  ;;  %v1253_v34 = vadd.f32 %v4913_v52, %v5827_v60  ;;  %v6521_v54 = vadd.f32 %v6361_v7, %v5791_v53 }
 0x151   :  { %10324 = vst [vmem:[#allocation29_spill] sm:$0xff] %v6509_v43  ;;  %v6512_v24 = vadd.f32 %v6361_v7, %v1556_v49  ;;  %v1247_v23 = vpop.f32.mrf.mxu1  ;;  %v2638_v53 = vsel %vm664_vm2, %v6487_v33, 0.0  ;;  %v2777_v49 = vsel %vm664_vm2, %v6509_v43, 0.0  ;;  %v6593_v43 = vadd.f32 %v5800_v55, %v6361_v7 }
 0x152   :  { %v2774_v45 = vadd.f32 %v2773_v1, %v2772_v41  ;;  %v4935_v14 = vpop.f32.mrf.mxu0  ;;  %4171 = vst.msk [vmem:[%s10004_s8 + $0x1c0] sm:$0xff] %vm664_vm2, %v1300_v21  ;;  %v1303_v47 = vmax.f32 %v1253_v34, 0.0  ;;  %v1248_v39 = vadd.f32 %v5827_v60, %v1247_v23  ;;  %v2709_v41 = vsel %vm664_vm2, %v6504_v11, 0.0 }
 0x153   :  { %10325 = vst [vmem:[#allocation30_spill] sm:$0xff] %v6512_v24  ;;  %v2775_v31 = vsel %vm664_vm2, %v6512_v24, 0.0  ;;  %v2639_v21 = vadd.f32 %v2638_v53, %v2637_v63  ;;  %v6549_v23 = vadd.f32 %v6198_v28, %v6361_v7  ;;  %v6559_v63 = vadd.f32 %v5780_v51, %v6361_v7 }
 0x154   :  { %v2776_v35 = vadd.f32 %v2775_v31, %v2774_v45  ;;  %v1566_v1 = vpop.f32.mrf.mxu0  ;;  %4174 = vst.msk [vmem:[%s10004_s8 + $0x1d8] sm:$0xff] %vm664_vm2, %v1303_v47  ;;  %v1302_v60 = vmax.f32 %v1248_v39, 0.0  ;;  %v2640_v45 = vsel %vm664_vm2, %v6521_v54, 0.0  ;;  %v2710_v31 = vadd.f32 %v2709_v41, %v2708_v42 }
 0x155   :  { %v6539_v52 = vadd.f32 %v6361_v7, %v1566_v1  ;;  %v6563_v39 = vadd.f32 %v6361_v7, %v6223_v50  ;;  %v6566_v28 = vadd.f32 %v4935_v14, %v6361_v7  ;;  %v2641_v53 = vadd.f32 %v2640_v45, %v2639_v21 }
 0x156   :  { %v2778_v34 = vadd.f32 %v2777_v49, %v2776_v35  ;;  %v4938_v29 = vpop.f32.mrf.mxu0  ;;  %4173 = vst.msk [vmem:[%s10004_s8 + $0x1d0] sm:$0xff] %vm664_vm2, %v1302_v60  ;;  %v6570_v49 = vadd.f32 %v6361_v7, %v5811_v57  ;;  %v2711_v42 = vsel %vm664_vm2, %v6549_v23, 0.0  ;;  %v2642_v50 = vsel %vm664_vm2, %v6559_v63, 0.0 }
 0x157   :  { %10326 = vst [vmem:[#allocation31_spill] sm:$0xff] %v6539_v52  ;;  %v2779_v5 = vsel %vm664_vm2, %v6539_v52, 0.0  ;;  %10327 = vst [vmem:[#allocation32_spill] sm:$0xff] %v6566_v28  ;;  %v2712_v41 = vadd.f32 %v2711_v42, %v2710_v31  ;;  %v2713_v14 = vsel %vm664_vm2, %v6563_v39, 0.0  ;;  %v2781_v21 = vsel %vm664_vm2, %v6566_v28, 0.0 }
 0x158   :  { %v1576_v47 = vpop.f32.mrf.mxu0  ;;  %v2780_v35 = vadd.f32 %v2779_v5, %v2778_v34  ;;  %v2643_v34 = vadd.f32 %v2642_v50, %v2641_v53  ;;  %v2644_v5 = vsel %vm664_vm2, %v6570_v49, 0.0  ;;  %v6597_v53 = vadd.f32 %v6361_v7, %v6239_v15 }
 0x159   :  { %v6575_v51 = vadd.f32 %v6361_v7, %v1576_v47  ;;  %v6587_v47 = vadd.f32 %v6216_v38, %v6361_v7  ;;  %v2714_v42 = vadd.f32 %v2713_v14, %v2712_v41 }
 0x15a   :  { %v4941_v1 = vpop.f32.mrf.mxu0  ;;  %v2782_v57 = vadd.f32 %v2781_v21, %v2780_v35  ;;  %v6600_v35 = vadd.f32 %v4938_v29, %v6361_v7  ;;  %v2645_v50 = vadd.f32 %v2644_v5, %v2643_v34  ;;  %v2646_v29 = vsel %vm664_vm2, %v6593_v43, 0.0 }
 0x15b   :  { %10328 = vst [vmem:[#allocation33_spill] sm:$0xff] %v6575_v51  ;;  %v2783_v31 = vsel %vm664_vm2, %v6575_v51, 0.0  ;;  %v6606_v51 = vadd.f32 %v6361_v7, %v5836_v62  ;;  %v2715_v41 = vsel %vm664_vm2, %v6587_v47, 0.0  ;;  %v2717_v34 = vsel %vm664_vm2, %v6597_v53, 0.0 }
 0x15c   :  { %v1586_v60 = vpop.f32.mrf.mxu0  ;;  %10329 = vst [vmem:[#allocation34_spill] sm:$0xff] %v6600_v35  ;;  %v2784_v21 = vadd.f32 %v2783_v31, %v2782_v57  ;;  %v2716_v14 = vadd.f32 %v2715_v41, %v2714_v42  ;;  %v2785_v57 = vsel %vm664_vm2, %v6600_v35, 0.0  ;;  %v2647_v5 = vadd.f32 %v2646_v29, %v2645_v50 }
 0x15d   :  { %v6611_v55 = vadd.f32 %v6361_v7, %v1586_v60  ;;  %v2648_v28 = vsel %vm664_vm2, %v6606_v51, 0.0  ;;  %v6625_v60 = vadd.f32 %v6232_v3, %v6361_v7  ;;  %v6635_v50 = vadd.f32 %v6361_v7, %v6253_v36 }
 0x15e   :  { %v4944_v45 = vpop.f32.mrf.mxu0  ;;  %v2786_v62 = vadd.f32 %v2785_v57, %v2784_v21  ;;  %v2718_v41 = vadd.f32 %v2717_v34, %v2716_v14  ;;  %v6638_v21 = vadd.f32 %v4941_v1, %v6361_v7  ;;  %v2649_v29 = vadd.f32 %v2648_v28, %v2647_v5 }
 0x15f   :  { %10330 = vst [vmem:[#allocation35_spill] sm:$0xff] %v6611_v55  ;;  %10331 = vst [vmem:[#allocation36_spill] sm:$0xff] %v6625_v60  ;;  %v2787_v42 = vsel %vm664_vm2, %v6611_v55, 0.0  ;;  %v6644_v55 = vadd.f32 %v6361_v7, %v5858_v9  ;;  %v2719_v14 = vsel %vm664_vm2, %v6625_v60, 0.0  ;;  %v2650_v1 = vsel %vm664_vm2, %v6631_v56, 0.0 }
 0x160   :  { %v1596_v52 = vpop.f32.mrf.mxu0  ;;  %10332 = vst [vmem:[#allocation37_spill] sm:$0xff] %v6635_v50  ;;  %10333 = vst [vmem:[#allocation38_spill] sm:$0xff] %v6638_v21  ;;  %v2788_v57 = vadd.f32 %v2787_v42, %v2786_v62  ;;  %v2720_v34 = vadd.f32 %v2719_v14, %v2718_v41  ;;  %v2721_v28 = vsel %vm664_vm2, %v6635_v50, 0.0  ;;  %v2789_v5 = vsel %vm664_vm2, %v6638_v21, 0.0 }
 0x161   :  { %v6649_v59 = vadd.f32 %v6361_v7, %v1596_v52  ;;  %v2651_v9 = vadd.f32 %v2650_v1, %v2649_v29  ;;  %v2652_v52 = vsel %vm664_vm2, %v6644_v55, 0.0  ;;  %v6665_v41 = vadd.f32 %v6246_v25, %v6361_v7 }
 0x162   :  { %v6602_v38 = vpop.f32.mrf.mxu0  ;;  %v2790_v62 = vadd.f32 %v2789_v5, %v2788_v57  ;;  %v2722_v35 = vadd.f32 %v2721_v28, %v2720_v34  ;;  %v6673_v21 = vadd.f32 %v5846_v4, %v6361_v7  ;;  %v6677_v29 = vadd.f32 %v6361_v7, %v6267_v8 }
 0x163   :  { %10334 = vst [vmem:[#allocation39_spill] sm:$0xff] %v6649_v59  ;;  %10335 = vst [vmem:[#allocation40_spill] sm:$0xff] %v6665_v41  ;;  %v2791_v14 = vsel %vm664_vm2, %v6649_v59, 0.0  ;;  %v6680_v57 = vadd.f32 %v4944_v45, %v6361_v7  ;;  %v2653_v1 = vadd.f32 %v2652_v52, %v2651_v9  ;;  %v6686_v34 = vadd.f32 %v6361_v7, %v5889_v19 }
 0x164   :  { %v1606_v15 = vpop.f32.mrf.mxu0  ;;  %10336 = vst [vmem:[#allocation41_spill] sm:$0xff] %v6677_v29  ;;  %v2792_v25 = vadd.f32 %v2791_v14, %v2790_v62  ;;  %v2723_v28 = vsel %vm664_vm2, %v6665_v41, 0.0  ;;  %v2654_v45 = vsel %vm664_vm2, %v6673_v21, 0.0  ;;  %v2725_v9 = vsel %vm664_vm2, %v6677_v29, 0.0 }
 0x165   :  { %10337 = vst [vmem:[#allocation42_spill] sm:$0xff] %v6680_v57  ;;  %v6691_v4 = vadd.f32 %v6361_v7, %v1606_v15  ;;  %v2724_v59 = vadd.f32 %v2723_v28, %v2722_v35  ;;  %v2793_v62 = vsel %vm664_vm2, %v6680_v57, 0.0  ;;  %v2655_v19 = vadd.f32 %v2654_v45, %v2653_v1 }
 0x166   :  { %v6619_v31 = vpop.f32.mrf.mxu0  ;;  %v2794_v52 = vadd.f32 %v2793_v62, %v2792_v25  ;;  %v2656_v15 = vsel %vm664_vm2, %v6686_v34, 0.0  ;;  %v6707_v35 = vadd.f32 %v6260_v6, %v6361_v7  ;;  %v6715_v57 = vadd.f32 %v5873_v12, %v6361_v7 }
 0x167   :  { %10338 = vst [vmem:[#allocation43_spill] sm:$0xff] %v6691_v4  ;;  %v2795_v28 = vsel %vm664_vm2, %v6691_v4, 0.0  ;;  %v2726_v41 = vadd.f32 %v2725_v9, %v2724_v59  ;;  %v6719_v1 = vadd.f32 %v6361_v7, %v6281_v61  ;;  %v6723_v25 = vadd.f32 %v6602_v38, %v6361_v7 }
 0x168   :  { %v1616_v24 = vpop.f32.mrf.mxu0  ;;  %10339 = vst [vmem:[#allocation44_spill] sm:$0xff] %v6707_v35  ;;  %v2657_v6 = vadd.f32 %v2656_v15, %v2655_v19  ;;  %v2796_v45 = vadd.f32 %v2795_v28, %v2794_v52  ;;  %v6729_v59 = vadd.f32 %v6361_v7, %v5921_v27  ;;  %v2727_v12 = vsel %vm664_vm2, %v6707_v35, 0.0 }
 0x169   :  { %10340 = vst [vmem:[#allocation45_spill] sm:$0xff] %v6719_v1  ;;  %10341 = vst [vmem:[#allocation46_spill] sm:$0xff] %v6723_v25  ;;  %v6734_v9 = vadd.f32 %v6361_v7, %v1616_v24  ;;  %v2728_v61 = vadd.f32 %v2727_v12, %v2726_v41  ;;  %v2658_v38 = vsel %vm664_vm2, %v6715_v57, 0.0  ;;  %v2729_v19 = vsel %vm664_vm2, %v6719_v1, 0.0 }
 0x16a   :  { %v6640_v3 = vpop.f32.mrf.mxu0  ;;  %v2797_v52 = vsel %vm664_vm2, %v6723_v25, 0.0  ;;  %v2659_v27 = vadd.f32 %v2658_v38, %v2657_v6  ;;  %v2660_v24 = vsel %vm664_vm2, %v6729_v59, 0.0  ;;  %v6750_v41 = vadd.f32 %v6274_v22, %v6361_v7 }
 0x16b   :  { %10342 = vst [vmem:[#allocation47_spill] sm:$0xff] %v6734_v9  ;;  %v2798_v15 = vadd.f32 %v2797_v52, %v2796_v45  ;;  %v2799_v12 = vsel %vm664_vm2, %v6734_v9, 0.0  ;;  %v2730_v35 = vadd.f32 %v2729_v19, %v2728_v61  ;;  %v6758_v25 = vadd.f32 %v5905_v16, %v6361_v7 }
 0x16c   :  { %v6651_v36 = vpop.f32.mrf.mxu0  ;;  %10343 = vst [vmem:[#allocation48_spill] sm:$0xff] %v6750_v41  ;;  %v6762_v6 = vadd.f32 %v6361_v7, %v6295_v58  ;;  %v6766_v45 = vadd.f32 %v6619_v31, %v6361_v7  ;;  %v2661_v22 = vadd.f32 %v2660_v24, %v2659_v27  ;;  %v6772_v61 = vadd.f32 %v6361_v7, %v5953_v37 }
 0x16d   :  { %v2800_v38 = vadd.f32 %v2799_v12, %v2798_v15  ;;  %v2731_v16 = vsel %vm664_vm2, %v6750_v41, 0.0  ;;  %v6778_v19 = vadd.f32 %v6361_v7, %v6651_v36  ;;  %v2662_v31 = vsel %vm664_vm2, %v6758_v25, 0.0 }
 0x16e   :  { %v6659_v42 = vpop.f32.mrf.mxu0  ;;  %10344 = vst [vmem:[#allocation49_spill] sm:$0xff] %v6762_v6  ;;  %10345 = vst [vmem:[#allocation50_spill] sm:$0xff] %v6766_v45  ;;  %v2732_v58 = vadd.f32 %v2731_v16, %v2730_v35  ;;  %v2733_v27 = vsel %vm664_vm2, %v6762_v6, 0.0  ;;  %v2801_v37 = vsel %vm664_vm2, %v6766_v45, 0.0  ;;  %v2663_v15 = vadd.f32 %v2662_v31, %v2661_v22 }
 0x16f   :  { %10346 = vst [vmem:[#allocation51_spill] sm:$0xff] %v6778_v19  ;;  %v2802_v24 = vadd.f32 %v2801_v37, %v2800_v38  ;;  %v2664_v41 = vsel %vm664_vm2, %v6772_v61, 0.0  ;;  %v6792_v36 = vadd.f32 %v6288_v48, %v6361_v7  ;;  %v2803_v35 = vsel %vm664_vm2, %v6778_v19, 0.0 }
 0x170   :  { %v6669_v60 = vpop.f32.mrf.mxu0  ;;  %v6798_v16 = vadd.f32 %v5937_v32, %v6361_v7  ;;  %v2734_v6 = vadd.f32 %v2733_v27, %v2732_v58  ;;  %v6802_v22 = vadd.f32 %v6361_v7, %v6309_v40  ;;  %v6806_v31 = vadd.f32 %v6640_v3, %v6361_v7 }
 0x171   :  { %10347 = vst [vmem:[#allocation52_spill] sm:$0xff] %v6792_v36  ;;  %v2665_v19 = vadd.f32 %v2664_v41, %v2663_v15  ;;  %v2804_v45 = vadd.f32 %v2803_v35, %v2802_v24  ;;  %v6816_v58 = vadd.f32 %v6361_v7, %v5985_v2  ;;  %v2735_v40 = vsel %vm664_vm2, %v6792_v36, 0.0 }
 0x172   :  { %v6682_v5 = vpop.f32.mrf.mxu0  ;;  %10348 = vst [vmem:[#allocation53_spill] sm:$0xff] %v6802_v22  ;;  %10349 = vst [vmem:[#allocation54_spill] sm:$0xff] %v6806_v31  ;;  %v6822_v3 = vadd.f32 %v6361_v7, %v6669_v60  ;;  %v2736_v41 = vadd.f32 %v2735_v40, %v2734_v6  ;;  %v2737_v15 = vsel %vm664_vm2, %v6802_v22, 0.0  ;;  %v2805_v2 = vsel %vm664_vm2, %v6806_v31, 0.0  ;;  %v10389_v31 = vld [vmem:[#allocation6_spill] sm:$0xff] }
 0x173   :  { %v2806_v36 = vadd.f32 %v2805_v2, %v2804_v45  ;;  %v2668_v40 = vsel %vm664_vm2, %v6816_v58, 0.0  ;;  %v6844_v22 = vadd.f32 %v6302_v17, %v6361_v7  ;;  %v6860_v17 = vadd.f32 %v6659_v42, %v6361_v7 }
 0x174   :  { %v6693_v8 = vpop.f32.mrf.mxu0  ;;  %10352 = vst [vmem:[#allocation57_spill] sm:$0xff] %v6822_v3  ;;  %v2738_v45 = vadd.f32 %v2737_v15, %v2736_v41 }
 0x175   :  { %10355 = vst [vmem:[#allocation60_spill] sm:$0xff] %v6860_v17  ;;  %v2739_v42 = vsel %vm664_vm2, %v6844_v22, 0.0 }
 0x176   :  { %v6701_v14 = vpop.f32.mrf.mxu0 }
 0x178   :  { %v6711_v50 = vpop.f32.mrf.mxu0 }
 0x17a   :  { %v6725_v62 = vpop.f32.mrf.mxu0 }
 0x17c   :  { %v6736_v4 = vpop.f32.mrf.mxu0 }
 0x17e   :  { %v6744_v28 = vpop.f32.mrf.mxu0 }
 0x180   :  { %v6754_v29 = vpop.f32.mrf.mxu0 }
 0x182   :  { %v6768_v52 = vpop.f32.mrf.mxu0 }
 0x184   :  { %v6780_v9 = vpop.f32.mrf.mxu0 }
 0x186   :  { %v5030_v12 = vpop.f32.mrf.mxu0 }
 0x187   :  { %v6809_v48 = vadd.f32 %v5030_v12, %v6361_v7  ;;  %v2666_v12 = vsel %vm664_vm2, %v6798_v16, 0.0 }
 0x188   :  { %v2180_v38 = vpop.f32.mrf.mxu0 }
 0x189   :  { %10350 = vst [vmem:[#allocation55_spill] sm:$0xff] %v6809_v48  ;;  %v6812_v37 = vadd.f32 %v6361_v7, %v2180_v38  ;;  %v2839_v35 = vsel %vm664_vm2, %v6809_v48, 0.0  ;;  %v2807_v48 = vsel %vm664_vm2, %v6822_v3, 0.0 }
 0x18a   :  { %v5033_v32 = vpop.f32.mrf.mxu0  ;;  %v2808_v15 = vadd.f32 %v2807_v48, %v2806_v36  ;;  %v2740_v36 = vadd.f32 %v2739_v42, %v2738_v45 }
 0x18b   :  { %10351 = vst [vmem:[#allocation56_spill] sm:$0xff] %v6812_v37  ;;  %v2838_v27 = vsel %vm664_vm2, %v6812_v37, 0.0  ;;  %v6835_v60 = vadd.f32 %v5033_v32, %v6361_v7  ;;  %v2667_v37 = vadd.f32 %v2666_v12, %v2665_v19  ;;  %v6856_v19 = vadd.f32 %v6361_v7, %v6323_v30 }
 0x18c   :  { %v2190_v24 = vpop.f32.mrf.mxu0  ;;  %v2840_v1 = vadd.f32 %v2839_v35, %v2838_v27 }
 0x18d   :  { %10353 = vst [vmem:[#allocation58_spill] sm:$0xff] %v6835_v60  ;;  %v6838_v38 = vadd.f32 %v6361_v7, %v2190_v24  ;;  %v6852_v24 = vadd.f32 %v5969_v46, %v6361_v7  ;;  %v2843_v2 = vsel %vm664_vm2, %v6835_v60, 0.0  ;;  %v2669_v41 = vadd.f32 %v2668_v40, %v2667_v37 }
 0x18e   :  { %v5036_v6 = vpop.f32.mrf.mxu0  ;;  %v2741_v48 = vsel %vm664_vm2, %v6856_v19, 0.0 }
 0x18f   :  { %10354 = vst [vmem:[#allocation59_spill] sm:$0xff] %v6838_v38  ;;  %v2841_v32 = vsel %vm664_vm2, %v6838_v38, 0.0  ;;  %v6865_v35 = vadd.f32 %v5036_v6, %v6361_v7  ;;  %v2670_v37 = vsel %vm664_vm2, %v6852_v24, 0.0 }
 0x190   :  { %v2842_v27 = vadd.f32 %v2841_v32, %v2840_v1  ;;  %v2200_v12 = vpop.f32.mrf.mxu0  ;;  %v6872_v1 = vadd.f32 %v6361_v7, %v6017_v13  ;;  %v6878_v32 = vadd.f32 %v6361_v7, %v6693_v8 }
 0x191   :  { %10356 = vst [vmem:[#allocation61_spill] sm:$0xff] %v6865_v35  ;;  %v6868_v46 = vadd.f32 %v6361_v7, %v2200_v12  ;;  %v2847_v12 = vsel %vm664_vm2, %v6865_v35, 0.0 }
 0x192   :  { %v2844_v38 = vadd.f32 %v2843_v2, %v2842_v27  ;;  %v5039_v30 = vpop.f32.mrf.mxu0  ;;  %10358 = vst [vmem:[#allocation63_spill] sm:$0xff] %v6878_v32  ;;  %v2809_v27 = vsel %vm664_vm2, %v6860_v17, 0.0  ;;  %v2811_v35 = vsel %vm664_vm2, %v6878_v32, 0.0  ;;  %v10377_v17 = vld [vmem:[#allocation4_spill] sm:$0xff] }
 0x193   :  { %10357 = vst [vmem:[#allocation62_spill] sm:$0xff] %v6868_v46  ;;  %v2845_v6 = vsel %vm664_vm2, %v6868_v46, 0.0  ;;  %v6891_v8 = vadd.f32 %v5039_v30, %v6361_v7  ;;  %v2671_v46 = vadd.f32 %v2670_v37, %v2669_v41  ;;  %v2810_v60 = vadd.f32 %v2809_v27, %v2808_v15 }
 0x194   :  { %v2846_v40 = vadd.f32 %v2845_v6, %v2844_v38  ;;  %v2210_v13 = vpop.f32.mrf.mxu0  ;;  %v2672_v38 = vsel %vm664_vm2, %v6872_v1, 0.0  ;;  %v6900_v6 = vadd.f32 %v6316_v18, %v6361_v7  ;;  %v2742_v41 = vadd.f32 %v2741_v48, %v2740_v36 }
 0x195   :  { %10359 = vst [vmem:[#allocation64_spill] sm:$0xff] %v6891_v8  ;;  %v6894_v2 = vadd.f32 %v6361_v7, %v2210_v13  ;;  %v6908_v13 = vadd.f32 %v6001_v0, %v6361_v7  ;;  %v6912_v15 = vadd.f32 %v6361_v7, %v6337_v44  ;;  %v6916_v18 = vadd.f32 %v6682_v5, %v6361_v7 }
 0x196   :  { %v2848_v45 = vadd.f32 %v2847_v12, %v2846_v40  ;;  %v5042_v42 = vpop.f32.mrf.mxu0  ;;  %10361 = vst [vmem:[#allocation66_spill] sm:$0xff] %v6900_v6  ;;  %v2851_v27 = vsel %vm664_vm2, %v6891_v8, 0.0  ;;  %v2673_v36 = vadd.f32 %v2672_v38, %v2671_v46  ;;  %v2812_v48 = vadd.f32 %v2811_v35, %v2810_v60 }
 0x197   :  { %10360 = vst [vmem:[#allocation65_spill] sm:$0xff] %v6894_v2  ;;  %v2849_v30 = vsel %vm664_vm2, %v6894_v2, 0.0  ;;  %10362 = vst [vmem:[#allocation67_spill] sm:$0xff] %v6912_v15  ;;  %v6921_v12 = vadd.f32 %v5042_v42, %v6361_v7  ;;  %v2743_v5 = vsel %vm664_vm2, %v6900_v6, 0.0  ;;  %v2674_v46 = vsel %vm664_vm2, %v6908_v13, 0.0 }
 0x198   :  { %v2850_v37 = vadd.f32 %v2849_v30, %v2848_v45  ;;  %v2220_v40 = vpop.f32.mrf.mxu0  ;;  %10363 = vst [vmem:[#allocation68_spill] sm:$0xff] %v6916_v18  ;;  %v6928_v45 = vadd.f32 %v6361_v7, %v6049_v26  ;;  %v6934_v30 = vadd.f32 %v6361_v7, %v6711_v50  ;;  %v2744_v60 = vadd.f32 %v2743_v5, %v2742_v41 }
 0x199   :  { %10364 = vst [vmem:[#allocation69_spill] sm:$0xff] %v6921_v12  ;;  %v6924_v0 = vadd.f32 %v6361_v7, %v2220_v40  ;;  %v2745_v35 = vsel %vm664_vm2, %v6912_v15, 0.0  ;;  %v2855_v40 = vsel %vm664_vm2, %v6921_v12, 0.0 }
 0x19a   :  { %v2852_v2 = vadd.f32 %v2851_v27, %v2850_v37  ;;  %v5045_v44 = vpop.f32.mrf.mxu0  ;;  %10366 = vst [vmem:[#allocation71_spill] sm:$0xff] %v6934_v30  ;;  %v2813_v37 = vsel %vm664_vm2, %v6916_v18, 0.0  ;;  %v2815_v12 = vsel %vm664_vm2, %v6934_v30, 0.0 }
 0x19b   :  { %10365 = vst [vmem:[#allocation70_spill] sm:$0xff] %v6924_v0  ;;  %v2853_v42 = vsel %vm664_vm2, %v6924_v0, 0.0  ;;  %v6947_v50 = vadd.f32 %v5045_v44, %v6361_v7  ;;  %v2675_v0 = vadd.f32 %v2674_v46, %v2673_v36  ;;  %v2814_v8 = vadd.f32 %v2813_v37, %v2812_v48  ;;  %v10372_v48 = vld [vmem:[#allocation11_spill] sm:$0xff] }
 0x19c   :  { %v2854_v38 = vadd.f32 %v2853_v42, %v2852_v2  ;;  %v2230_v26 = vpop.f32.mrf.mxu0  ;;  %v2676_v2 = vsel %vm664_vm2, %v6928_v45, 0.0  ;;  %v10369_v42 = vld [vmem:[#allocation9_spill] sm:$0xff]  ;;  %v2746_v36 = vadd.f32 %v2745_v35, %v2744_v60  ;;  %v6968_v46 = vadd.f32 %v6361_v7, %v10372_v48 }
 0x19d   :  { %10367 = vst [vmem:[#allocation72_spill] sm:$0xff] %v6947_v50  ;;  %v6950_v27 = vadd.f32 %v6361_v7, %v2230_v26  ;;  %v6956_v32 = vadd.f32 %v10369_v42, %v6361_v7  ;;  %v10371_v26 = vld [vmem:[#allocation2_spill] sm:$0xff]  ;;  %v2859_v42 = vsel %vm664_vm2, %v6947_v50, 0.0  ;;  %v2677_v60 = vadd.f32 %v2676_v2, %v2675_v0 }
 0x19e   :  { %v2856_v41 = vadd.f32 %v2855_v40, %v2854_v38  ;;  %v5048_v5 = vpop.f32.mrf.mxu0  ;;  %v6964_v18 = vadd.f32 %v10371_v26, %v6361_v7  ;;  %10373 = vst [vmem:[#allocation2_spill] sm:$0xff] %v6968_v46  ;;  %v6972_v40 = vadd.f32 %v6701_v14, %v6361_v7  ;;  %v2816_v35 = vadd.f32 %v2815_v12, %v2814_v8 }
 0x19f   :  { %10368 = vst [vmem:[#allocation73_spill] sm:$0xff] %v6950_v27  ;;  %10370 = vst [vmem:[#allocation9_spill] sm:$0xff] %v6956_v32  ;;  %v2857_v44 = vsel %vm664_vm2, %v6950_v27, 0.0  ;;  %v6977_v27 = vadd.f32 %v5048_v5, %v6361_v7  ;;  %v2747_v14 = vsel %vm664_vm2, %v6956_v32, 0.0  ;;  %v2749_v12 = vsel %vm664_vm2, %v6968_v46, 0.0 }
 0x1a0   :  { %v2858_v38 = vadd.f32 %v2857_v44, %v2856_v41  ;;  %v2240_v37 = vpop.f32.mrf.mxu0  ;;  %10374 = vst [vmem:[#allocation11_spill] sm:$0xff] %v6972_v40  ;;  %v6984_v41 = vadd.f32 %v6361_v7, %v10377_v17  ;;  %v6990_v44 = vadd.f32 %v6361_v7, %v6736_v4  ;;  %v2678_v0 = vsel %vm664_vm2, %v6964_v18, 0.0 }
 0x1a1   :  { %10375 = vst [vmem:[#allocation74_spill] sm:$0xff] %v6977_v27  ;;  %v6980_v26 = vadd.f32 %v6361_v7, %v2240_v37  ;;  %v2748_v8 = vadd.f32 %v2747_v14, %v2746_v36  ;;  %v2863_v37 = vsel %vm664_vm2, %v6977_v27, 0.0 }
 0x1a2   :  { %v2860_v30 = vadd.f32 %v2859_v42, %v2858_v38  ;;  %v5051_v48 = vpop.f32.mrf.mxu0  ;;  %10378 = vst [vmem:[#allocation4_spill] sm:$0xff] %v6990_v44  ;;  %v2817_v38 = vsel %vm664_vm2, %v6972_v40, 0.0  ;;  %v2819_v27 = vsel %vm664_vm2, %v6990_v44, 0.0 }
 0x1a3   :  { %10376 = vst [vmem:[#allocation75_spill] sm:$0xff] %v6980_v26  ;;  %v2861_v5 = vsel %vm664_vm2, %v6980_v26, 0.0  ;;  %v7003_v4 = vadd.f32 %v5051_v48, %v6361_v7  ;;  %v2679_v26 = vadd.f32 %v2678_v0, %v2677_v60  ;;  %v2818_v50 = vadd.f32 %v2817_v38, %v2816_v35  ;;  %v10384_v35 = vld [vmem:[#allocation15_spill] sm:$0xff] }
 0x1a4   :  { %v2862_v2 = vadd.f32 %v2861_v5, %v2860_v30  ;;  %v2250_v17 = vpop.f32.mrf.mxu0  ;;  %v2680_v30 = vsel %vm664_vm2, %v6984_v41, 0.0  ;;  %v10381_v5 = vld [vmem:[#allocation10_spill] sm:$0xff]  ;;  %v2750_v60 = vadd.f32 %v2749_v12, %v2748_v8  ;;  %v7024_v0 = vadd.f32 %v6361_v7, %v10384_v35 }
 0x1a5   :  { %10379 = vst [vmem:[#allocation76_spill] sm:$0xff] %v7003_v4  ;;  %v7006_v42 = vadd.f32 %v6361_v7, %v2250_v17  ;;  %v7012_v3 = vadd.f32 %v10381_v5, %v6361_v7  ;;  %v10383_v17 = vld [vmem:[#allocation3_spill] sm:$0xff]  ;;  %v2867_v5 = vsel %vm664_vm2, %v7003_v4, 0.0  ;;  %v2681_v8 = vadd.f32 %v2680_v30, %v2679_v26 }
 0x1a6   :  { %v2864_v36 = vadd.f32 %v2863_v37, %v2862_v2  ;;  %v5054_v14 = vpop.f32.mrf.mxu0  ;;  %v7020_v40 = vadd.f32 %v10383_v17, %v6361_v7  ;;  %10385 = vst [vmem:[#allocation3_spill] sm:$0xff] %v7024_v0  ;;  %v7028_v37 = vadd.f32 %v6725_v62, %v6361_v7  ;;  %v2820_v12 = vadd.f32 %v2819_v27, %v2818_v50 }
 0x1a7   :  { %10380 = vst [vmem:[#allocation77_spill] sm:$0xff] %v7006_v42  ;;  %10382 = vst [vmem:[#allocation10_spill] sm:$0xff] %v7012_v3  ;;  %v2865_v48 = vsel %vm664_vm2, %v7006_v42, 0.0  ;;  %v7033_v42 = vadd.f32 %v5054_v14, %v6361_v7  ;;  %v2751_v62 = vsel %vm664_vm2, %v7012_v3, 0.0  ;;  %v2753_v27 = vsel %vm664_vm2, %v7024_v0, 0.0  ;;  %v10401_v3 = vld [vmem:[#allocation8_spill] sm:$0xff] }
 0x1a8   :  { %v2866_v2 = vadd.f32 %v2865_v48, %v2864_v36  ;;  %v2260_v38 = vpop.f32.mrf.mxu0  ;;  %10386 = vst [vmem:[#allocation15_spill] sm:$0xff] %v7028_v37  ;;  %v7040_v36 = vadd.f32 %v6361_v7, %v10389_v31  ;;  %v7046_v48 = vadd.f32 %v6361_v7, %v6754_v29  ;;  %v2682_v26 = vsel %vm664_vm2, %v7020_v40, 0.0 }
 0x1a9   :  { %10387 = vst [vmem:[#allocation78_spill] sm:$0xff] %v7033_v42  ;;  %v7036_v17 = vadd.f32 %v6361_v7, %v2260_v38  ;;  %v2752_v50 = vadd.f32 %v2751_v62, %v2750_v60  ;;  %v2871_v38 = vsel %vm664_vm2, %v7033_v42, 0.0 }
 0x1aa   :  { %v2868_v44 = vadd.f32 %v2867_v5, %v2866_v2  ;;  %v5057_v35 = vpop.f32.mrf.mxu0  ;;  %10390 = vst [vmem:[#allocation6_spill] sm:$0xff] %v7046_v48  ;;  %v2821_v2 = vsel %vm664_vm2, %v7028_v37, 0.0  ;;  %v2823_v42 = vsel %vm664_vm2, %v7046_v48, 0.0 }
 0x1ab   :  { %10388 = vst [vmem:[#allocation79_spill] sm:$0xff] %v7036_v17  ;;  %v2869_v14 = vsel %vm664_vm2, %v7036_v17, 0.0  ;;  %v7059_v29 = vadd.f32 %v5057_v35, %v6361_v7  ;;  %v2683_v17 = vadd.f32 %v2682_v26, %v2681_v8  ;;  %v2822_v4 = vadd.f32 %v2821_v2, %v2820_v12  ;;  %v10396_v12 = vld [vmem:[#allocation21_spill] sm:$0xff] }
 0x1ac   :  { %v2870_v30 = vadd.f32 %v2869_v14, %v2868_v44  ;;  %v2270_v31 = vpop.f32.mrf.mxu0  ;;  %v2684_v44 = vsel %vm664_vm2, %v7040_v36, 0.0  ;;  %v10393_v14 = vld [vmem:[#allocation12_spill] sm:$0xff]  ;;  %v2754_v8 = vadd.f32 %v2753_v27, %v2752_v50  ;;  %v7080_v26 = vadd.f32 %v6361_v7, %v10396_v12 }
 0x1ad   :  { %10391 = vst [vmem:[#allocation80_spill] sm:$0xff] %v7059_v29  ;;  %v7062_v5 = vadd.f32 %v6361_v7, %v2270_v31  ;;  %v7068_v0 = vadd.f32 %v10393_v14, %v6361_v7  ;;  %v10395_v31 = vld [vmem:[#allocation5_spill] sm:$0xff]  ;;  %v2875_v14 = vsel %vm664_vm2, %v7059_v29, 0.0  ;;  %v2685_v50 = vadd.f32 %v2684_v44, %v2683_v17 }
 0x1ae   :  { %v2872_v60 = vadd.f32 %v2871_v38, %v2870_v30  ;;  %v5060_v62 = vpop.f32.mrf.mxu0  ;;  %v7076_v37 = vadd.f32 %v10395_v31, %v6361_v7  ;;  %10397 = vst [vmem:[#allocation5_spill] sm:$0xff] %v7080_v26  ;;  %v7084_v38 = vadd.f32 %v6744_v28, %v6361_v7  ;;  %v2824_v27 = vadd.f32 %v2823_v42, %v2822_v4 }
 0x1af   :  { %10392 = vst [vmem:[#allocation81_spill] sm:$0xff] %v7062_v5  ;;  %10394 = vst [vmem:[#allocation12_spill] sm:$0xff] %v7068_v0  ;;  %v2873_v35 = vsel %vm664_vm2, %v7062_v5, 0.0  ;;  %v7089_v5 = vadd.f32 %v5060_v62, %v6361_v7  ;;  %v2755_v28 = vsel %vm664_vm2, %v7068_v0, 0.0  ;;  %v2757_v42 = vsel %vm664_vm2, %v7080_v26, 0.0 }
 0x1b0   :  { %v2874_v30 = vadd.f32 %v2873_v35, %v2872_v60  ;;  %v2280_v2 = vpop.f32.mrf.mxu0  ;;  %10398 = vst [vmem:[#allocation21_spill] sm:$0xff] %v7084_v38  ;;  %v7096_v60 = vadd.f32 %v6361_v7, %v10401_v3  ;;  %v7102_v35 = vadd.f32 %v6361_v7, %v6780_v9  ;;  %v2686_v17 = vsel %vm664_vm2, %v7076_v37, 0.0 }
 0x1b1   :  { %10399 = vst [vmem:[#allocation82_spill] sm:$0xff] %v7089_v5  ;;  %v7092_v31 = vadd.f32 %v6361_v7, %v2280_v2  ;;  %v2756_v4 = vadd.f32 %v2755_v28, %v2754_v8  ;;  %v2879_v2 = vsel %vm664_vm2, %v7089_v5, 0.0 }
 0x1b2   :  { %v2876_v48 = vadd.f32 %v2875_v14, %v2874_v30  ;;  %v5063_v12 = vpop.f32.mrf.mxu0  ;;  %10402 = vst [vmem:[#allocation8_spill] sm:$0xff] %v7102_v35  ;;  %v2825_v30 = vsel %vm664_vm2, %v7084_v38, 0.0  ;;  %v2827_v5 = vsel %vm664_vm2, %v7102_v35, 0.0 }
 0x1b3   :  { %10400 = vst [vmem:[#allocation83_spill] sm:$0xff] %v7092_v31  ;;  %v2877_v62 = vsel %vm664_vm2, %v7092_v31, 0.0  ;;  %v7115_v9 = vadd.f32 %v5063_v12, %v6361_v7  ;;  %v2687_v31 = vadd.f32 %v2686_v17, %v2685_v50  ;;  %v2826_v29 = vadd.f32 %v2825_v30, %v2824_v27 }
 0x1b4   :  { %v2878_v44 = vadd.f32 %v2877_v62, %v2876_v48  ;;  %v2290_v3 = vpop.f32.mrf.mxu0  ;;  %v2688_v48 = vsel %vm664_vm2, %v7096_v60, 0.0  ;;  %v10405_v62 = vld [vmem:[#allocation19_spill] sm:$0xff]  ;;  %v2758_v50 = vadd.f32 %v2757_v42, %v2756_v4 }
 0x1b5   :  { %10403 = vst [vmem:[#allocation84_spill] sm:$0xff] %v7115_v9  ;;  %v7118_v14 = vadd.f32 %v6361_v7, %v2290_v3  ;;  %v7124_v26 = vadd.f32 %v10405_v62, %v6361_v7  ;;  %v10407_v3 = vld [vmem:[#allocation7_spill] sm:$0xff]  ;;  %v2883_v30 = vsel %vm664_vm2, %v7115_v9, 0.0  ;;  %v2828_v35 = vadd.f32 %v2827_v5, %v2826_v29 }
 0x1b6   :  { %v2880_v8 = vadd.f32 %v2879_v2, %v2878_v44  ;;  %v5066_v28 = vpop.f32.mrf.mxu0  ;;  %v7132_v38 = vadd.f32 %v10407_v3, %v6361_v7  ;;  %v7136_v44 = vadd.f32 %v6768_v52, %v6361_v7 }
 0x1b7   :  { %10404 = vst [vmem:[#allocation85_spill] sm:$0xff] %v7118_v14  ;;  %10406 = vst [vmem:[#allocation19_spill] sm:$0xff] %v7124_v26  ;;  %v2881_v12 = vsel %vm664_vm2, %v7118_v14, 0.0  ;;  %v7141_v2 = vadd.f32 %v5066_v28, %v6361_v7  ;;  %v2689_v14 = vadd.f32 %v2688_v48, %v2687_v31  ;;  %v2759_v4 = vsel %vm664_vm2, %v7124_v26, 0.0 }
 0x1b8   :  { %v2882_v27 = vadd.f32 %v2881_v12, %v2880_v8  ;;  %v2300_v17 = vpop.f32.mrf.mxu0  ;;  %10408 = vst [vmem:[#allocation7_spill] sm:$0xff] %v7136_v44  ;;  %v2690_v42 = vsel %vm664_vm2, %v7132_v38, 0.0  ;;  %v2760_v8 = vadd.f32 %v2759_v4, %v2758_v50 }
 0x1b9   :  { %10409 = vst [vmem:[#allocation86_spill] sm:$0xff] %v7141_v2  ;;  %v7144_v62 = vadd.f32 %v6361_v7, %v2300_v17  ;;  %v2829_v17 = vsel %vm664_vm2, %v7136_v44, 0.0  ;;  %v2887_v29 = vsel %vm664_vm2, %v7141_v2, 0.0  ;;  %v2691_v48 = vadd.f32 %v2690_v42, %v2689_v14 }
 0x1ba   :  { %v2884_v3 = vadd.f32 %v2883_v30, %v2882_v27  ;;  %v5069_v0 = vpop.f32.mrf.mxu0  ;;  %v2830_v27 = vadd.f32 %v2829_v17, %v2828_v35 }
 0x1bb   :  { %10410 = vst [vmem:[#allocation87_spill] sm:$0xff] %v7144_v62  ;;  %v2885_v52 = vsel %vm664_vm2, %v7144_v62, 0.0  ;;  %v7157_v5 = vadd.f32 %v5069_v0, %v6361_v7 }
 0x1bc   :  { %v2886_v12 = vadd.f32 %v2885_v52, %v2884_v3  ;;  %v2310_v28 = vpop.f32.mrf.mxu0  ;;  %v2761_v3 = vrot.slane %v2760_v8, 4  ;;  %v2831_v14 = vrot.slane %v2830_v27, 4 }
 0x1bd   :  { %10411 = vst [vmem:[#allocation88_spill] sm:$0xff] %v7157_v5  ;;  %v7160_v31 = vadd.f32 %v6361_v7, %v2310_v28  ;;  %v2891_v9 = vsel %vm664_vm2, %v7157_v5, 0.0  ;;  %v2692_v28 = vrot.slane %v2691_v48, 4 }
 0x1be   :  { %v2888_v30 = vadd.f32 %v2887_v29, %v2886_v12  ;;  %v5072_v62 = vpop.f32.mrf.mxu0  ;;  %v2762_v17 = vadd.f32 %v2761_v3, %v2760_v8 }
 0x1bf   :  { %10412 = vst [vmem:[#allocation89_spill] sm:$0xff] %v7160_v31  ;;  %v2889_v50 = vsel %vm664_vm2, %v7160_v31, 0.0  ;;  %v7167_v2 = vadd.f32 %v5072_v62, %v6361_v7  ;;  %v2832_v31 = vadd.f32 %v2831_v14, %v2830_v27 }
 0x1c0   :  { %v2890_v4 = vadd.f32 %v2889_v50, %v2888_v30  ;;  %v2320_v52 = vpop.f32.mrf.mxu0 }
 0x1c1   :  { %10413 = vst [vmem:[#allocation90_spill] sm:$0xff] %v7167_v2  ;;  %v7170_v0 = vadd.f32 %v6361_v7, %v2320_v52  ;;  %v2895_v50 = vsel %vm664_vm2, %v7167_v2, 0.0  ;;  %v2693_v52 = vadd.f32 %v2692_v28, %v2691_v48 }
 0x1c2   :  { %v2892_v35 = vadd.f32 %v2891_v9, %v2890_v4  ;;  %v5075_v42 = vpop.f32.mrf.mxu0  ;;  %v2763_v4 = vrot.slane %v2762_v17, 2 }
 0x1c3   :  { %10414 = vst [vmem:[#allocation91_spill] sm:$0xff] %v7170_v0  ;;  %v2893_v12 = vsel %vm664_vm2, %v7170_v0, 0.0  ;;  %v7177_v5 = vadd.f32 %v5075_v42, %v6361_v7  ;;  %v2694_v3 = vrot.slane %v2693_v52, 2 }
 0x1c4   :  { %v2894_v29 = vadd.f32 %v2893_v12, %v2892_v35  ;;  %v2330_v30 = vpop.f32.mrf.mxu0  ;;  %v2833_v35 = vrot.slane %v2832_v31, 2  ;;  %v2764_v2 = vadd.f32 %v2763_v4, %v2762_v17  ;;  %v10421_v4 = vld [vmem:[#allocation20_spill] sm:$0xff] }
 0x1c5   :  { %10415 = vst [vmem:[#allocation92_spill] sm:$0xff] %v7177_v5  ;;  %v7180_v62 = vadd.f32 %v6361_v7, %v2330_v30  ;;  %v2899_v8 = vsel %vm664_vm2, %v7177_v5, 0.0  ;;  %v2695_v26 = vadd.f32 %v2694_v3, %v2693_v52 }
 0x1c6   :  { %v2896_v44 = vadd.f32 %v2895_v50, %v2894_v29  ;;  %v2834_v46 = vadd.f32 %v2833_v35, %v2832_v31  ;;  %v2765_v30 = vrot.slane %v2764_v2, 1  ;;  %v10419_v31 = vld [vmem:[#allocation18_spill] sm:$0xff] }
 0x1c7   :  { %10416 = vst [vmem:[#allocation93_spill] sm:$0xff] %v7180_v62  ;;  %v2897_v9 = vsel %vm664_vm2, %v7180_v62, 0.0  ;;  %v2696_v27 = vrot.slane %v2695_v26, 1 }
 0x1c8   :  { %v2898_v0 = vadd.f32 %v2897_v9, %v2896_v44  ;;  %v2835_v28 = vrot.slane %v2834_v46, 1  ;;  %v2766_v29 = vadd.f32 %v2765_v30, %v2764_v2 }
 0x1c9   :  { %v2697_v62 = vadd.f32 %v2696_v27, %v2695_v26  ;;  %v10424_v26 = vld [vmem:[#allocation26_spill] sm:$0xff] }
 0x1ca   :  { %v2900_v12 = vadd.f32 %v2899_v8, %v2898_v0  ;;  %v2836_v44 = vadd.f32 %v2835_v28, %v2834_v46  ;;  %v10417_v0 = vld [vmem:[#allocation14_spill] sm:$0xff] }
 0x1cb   :  { %v2767_v9 = vadd.f32 %v2766_v29, %v2697_v62 }
 0x1cc   :  { %v2901_v42 = vrot.slane %v2900_v12, 4 }
 0x1cd   :  { %v2837_v5 = vadd.f32 %v2836_v44, %v2767_v9 }
 0x1ce   :  { %v2902_v7 = vadd.f32 %v2901_v42, %v2900_v12 }
 0x1d0   :  { %v2903_v48 = vrot.slane %v2902_v7, 2 }
 0x1d2   :  { %v2904_v14 = vadd.f32 %v2903_v48, %v2902_v7 }
 0x1d4   :  { %v2905_v50 = vrot.slane %v2904_v14, 1 }
 0x1d6   :  { %v2906_v32 = vadd.f32 %v2905_v50, %v2904_v14 }
 0x1d8   :  { %v2907_v15 = vadd.f32 %v2906_v32, %v2837_v5 }
 0x1da   :  { %v7186_v6 = vmul.f32 0.0009765625, %v2907_v15 }
 0x1dc   :  { %v7190_v17 = vsub.f32 %v10417_v0, %v7186_v6  ;;  %v7194_v52 = vsub.f32 %v10419_v31, %v7186_v6  ;;  %v7198_v2 = vsub.f32 %v10421_v4, %v7186_v6  ;;  %v7202_v46 = vsub.f32 %v6438_v20, %v7186_v6 }
 0x1dd   :  { %v7210_v5 = vsub.f32 %v10424_v26, %v7186_v6  ;;  %v7214_v62 = vsub.f32 %v6487_v33, %v7186_v6  ;;  %v7218_v8 = vsub.f32 %v6521_v54, %v7186_v6  ;;  %v7222_v20 = vsub.f32 %v6559_v63, %v7186_v6 }
 0x1de   :  { %10418 = vst [vmem:[#allocation14_spill] sm:$0xff] %v7190_v17  ;;  %10420 = vst [vmem:[#allocation18_spill] sm:$0xff] %v7194_v52  ;;  %v2942_v32 = vmul.f32 %v7190_v17, %v7190_v17  ;;  %v2943_v15 = vmul.f32 %v7194_v52, %v7194_v52  ;;  %v7226_v3 = vsub.f32 %v6570_v49, %v7186_v6  ;;  %v10567_v52 = vld [vmem:[#allocation21_spill] sm:$0xff]  ;;  %v10569_v17 = vld [vmem:[#allocation8_spill] sm:$0xff] }
 0x1df   :  { %10422 = vst [vmem:[#allocation20_spill] sm:$0xff] %v7198_v2  ;;  %10423 = vst [vmem:[#allocation94_spill] sm:$0xff] %v7202_v46  ;;  %v7230_v35 = vsub.f32 %v6593_v43, %v7186_v6  ;;  %v7234_v33 = vsub.f32 %v6606_v51, %v7186_v6  ;;  %v2944_v54 = vmul.f32 %v7198_v2, %v7198_v2 }
 0x1e0   :  { %10425 = vst [vmem:[#allocation26_spill] sm:$0xff] %v7210_v5  ;;  %10426 = vst [vmem:[#allocation95_spill] sm:$0xff] %v7214_v62  ;;  %v7240_v12 = vsub.f32 %v6631_v56, %v7186_v6  ;;  %v7244_v63 = vsub.f32 %v6644_v55, %v7186_v6  ;;  %v7248_v49 = vsub.f32 %v6673_v21, %v7186_v6  ;;  %v2974_v42 = vsel %vm664_vm2, %v2942_v32, 0.0 }
 0x1e1   :  { %10427 = vst [vmem:[#allocation96_spill] sm:$0xff] %v7218_v8  ;;  %10428 = vst [vmem:[#allocation97_spill] sm:$0xff] %v7222_v20  ;;  %v7252_v43 = vsub.f32 %v6686_v34, %v7186_v6  ;;  %v7256_v51 = vsub.f32 %v6715_v57, %v7186_v6  ;;  %v2945_v56 = vmul.f32 %v7202_v46, %v7202_v46  ;;  %v2975_v55 = vsel %vm664_vm2, %v2943_v15, 0.0 }
 0x1e2   :  { %10429 = vst [vmem:[#allocation98_spill] sm:$0xff] %v7226_v3  ;;  %10430 = vst [vmem:[#allocation99_spill] sm:$0xff] %v7230_v35  ;;  %v7264_v7 = vsub.f32 %v6729_v59, %v7186_v6  ;;  %v7268_v21 = vsub.f32 %v6758_v25, %v7186_v6  ;;  %v7272_v34 = vsub.f32 %v6772_v61, %v7186_v6  ;;  %v2977_v27 = vsel %vm664_vm2, %v2944_v54, 0.0 }
 0x1e3   :  { %10431 = vst [vmem:[#allocation100_spill] sm:$0xff] %v7234_v33  ;;  %10432 = vst [vmem:[#allocation101_spill] sm:$0xff] %v7240_v12  ;;  %v2976_v57 = vadd.f32 %v2975_v55, %v2974_v42  ;;  %v7276_v30 = vsub.f32 %v6798_v16, %v7186_v6  ;;  %v7280_v48 = vsub.f32 %v6816_v58, %v7186_v6  ;;  %v2979_v29 = vsel %vm664_vm2, %v2945_v56, 0.0 }
 0x1e4   :  { %10433 = vst [vmem:[#allocation102_spill] sm:$0xff] %v7244_v63  ;;  %10434 = vst [vmem:[#allocation103_spill] sm:$0xff] %v7248_v49  ;;  %v2946_v59 = vmul.f32 %v7210_v5, %v7210_v5  ;;  %v7287_v25 = vsub.f32 %v6852_v24, %v7186_v6  ;;  %v7291_v61 = vsub.f32 %v6872_v1, %v7186_v6 }
 0x1e5   :  { %10435 = vst [vmem:[#allocation104_spill] sm:$0xff] %v7252_v43  ;;  %10436 = vst [vmem:[#allocation105_spill] sm:$0xff] %v7256_v51  ;;  %v7295_v16 = vsub.f32 %v6908_v13, %v7186_v6  ;;  %v2978_v28 = vadd.f32 %v2977_v27, %v2976_v57  ;;  %v7299_v58 = vsub.f32 %v6928_v45, %v7186_v6 }
 0x1e6   :  { %10437 = vst [vmem:[#allocation106_spill] sm:$0xff] %v7264_v7  ;;  %10438 = vst [vmem:[#allocation107_spill] sm:$0xff] %v7268_v21  ;;  %v7303_v14 = vsub.f32 %v6964_v18, %v7186_v6  ;;  %v2947_v24 = vmul.f32 %v7214_v62, %v7214_v62  ;;  %v7310_v1 = vsub.f32 %v6984_v41, %v7186_v6  ;;  %v2981_v9 = vsel %vm664_vm2, %v2946_v59, 0.0  ;;  %v10553_v62 = vld [vmem:[#allocation63_spill] sm:$0xff] }
 0x1e7   :  { %10439 = vst [vmem:[#allocation108_spill] sm:$0xff] %v7272_v34  ;;  %10440 = vst [vmem:[#allocation109_spill] sm:$0xff] %v7276_v30  ;;  %v7314_v13 = vsub.f32 %v7020_v40, %v7186_v6  ;;  %v7318_v45 = vsub.f32 %v7040_v36, %v7186_v6  ;;  %v2980_v50 = vadd.f32 %v2979_v29, %v2978_v28 }
 0x1e8   :  { %10441 = vst [vmem:[#allocation110_spill] sm:$0xff] %v7280_v48  ;;  %10442 = vst [vmem:[#allocation111_spill] sm:$0xff] %v7287_v25  ;;  %v7322_v18 = vsub.f32 %v7076_v37, %v7186_v6  ;;  %v7326_v44 = vsub.f32 %v7096_v60, %v7186_v6  ;;  %v2948_v41 = vmul.f32 %v7218_v8, %v7218_v8  ;;  %v2983_v32 = vsel %vm664_vm2, %v2947_v24, 0.0 }
 0x1e9   :  { %10443 = vst [vmem:[#allocation112_spill] sm:$0xff] %v7291_v61  ;;  %10444 = vst [vmem:[#allocation113_spill] sm:$0xff] %v7295_v16  ;;  %v7333_v40 = vsub.f32 %v7132_v38, %v7186_v6  ;;  %v2949_v36 = vmul.f32 %v7222_v20, %v7222_v20  ;;  %v2950_v37 = vmul.f32 %v7226_v3, %v7226_v3  ;;  %v10547_v20 = vld [vmem:[#allocation54_spill] sm:$0xff] }
 0x1ea   :  { %10445 = vst [vmem:[#allocation114_spill] sm:$0xff] %v7299_v58  ;;  %10446 = vst [vmem:[#allocation115_spill] sm:$0xff] %v7303_v14  ;;  %v2982_v0 = vadd.f32 %v2981_v9, %v2980_v50  ;;  %v2951_v60 = vmul.f32 %v7230_v35, %v7230_v35  ;;  %v2952_v31 = vmul.f32 %v7234_v33, %v7234_v33  ;;  %v2985_v57 = vsel %vm664_vm2, %v2948_v41, 0.0  ;;  %v10541_v33 = vld [vmem:[#allocation47_spill] sm:$0xff] }
 0x1eb   :  { %10447 = vst [vmem:[#allocation116_spill] sm:$0xff] %v7310_v1  ;;  %10448 = vst [vmem:[#allocation117_spill] sm:$0xff] %v7314_v13  ;;  %v2953_v4 = vmul.f32 %v7240_v12, %v7240_v12  ;;  %v2954_v38 = vmul.f32 %v7244_v63, %v7244_v63  ;;  %v2955_v15 = vmul.f32 %v7248_v49, %v7248_v49  ;;  %v2987_v41 = vsel %vm664_vm2, %v2949_v36, 0.0  ;;  %v10507_v63 = vld [vmem:[#allocation19_spill] sm:$0xff]  ;;  %v10539_v12 = vld [vmem:[#allocation46_spill] sm:$0xff] }
 0x1ec   :  { %10449 = vst [vmem:[#allocation118_spill] sm:$0xff] %v7318_v45  ;;  %10450 = vst [vmem:[#allocation119_spill] sm:$0xff] %v7322_v18  ;;  %v2956_v26 = vmul.f32 %v7252_v43, %v7252_v43  ;;  %v2984_v54 = vadd.f32 %v2983_v32, %v2982_v0  ;;  %v2957_v56 = vmul.f32 %v7256_v51, %v7256_v51  ;;  %v2989_v36 = vsel %vm664_vm2, %v2950_v37, 0.0 }
 0x1ed   :  { %10451 = vst [vmem:[#allocation120_spill] sm:$0xff] %v7326_v44  ;;  %10452 = vst [vmem:[#allocation121_spill] sm:$0xff] %v7333_v40  ;;  %v2958_v42 = vmul.f32 %v7264_v7, %v7264_v7  ;;  %v2959_v55 = vmul.f32 %v7268_v21, %v7268_v21  ;;  %v2960_v59 = vmul.f32 %v7272_v34, %v7272_v34  ;;  %v10479_v34 = vld [vmem:[#allocation45_spill] sm:$0xff] }
 0x1ee   :  { %v2961_v27 = vmul.f32 %v7276_v30, %v7276_v30  ;;  %v2962_v28 = vmul.f32 %v7280_v48, %v7280_v48  ;;  %v2986_v24 = vadd.f32 %v2985_v57, %v2984_v54  ;;  %v2963_v29 = vmul.f32 %v7287_v25, %v7287_v25 }
 0x1ef   :  { %v2964_v50 = vmul.f32 %v7291_v61, %v7291_v61  ;;  %v2965_v9 = vmul.f32 %v7295_v16, %v7295_v16  ;;  %v2966_v0 = vmul.f32 %v7299_v58, %v7299_v58  ;;  %v2967_v32 = vmul.f32 %v7303_v14, %v7303_v14 }
 0x1f0   :  { %v2968_v54 = vmul.f32 %v7310_v1, %v7310_v1  ;;  %v2988_v57 = vadd.f32 %v2987_v41, %v2986_v24  ;;  %v2969_v25 = vmul.f32 %v7314_v13, %v7314_v13  ;;  %v2970_v61 = vmul.f32 %v7318_v45, %v7318_v45 }
 0x1f1   :  { %v2971_v16 = vmul.f32 %v7322_v18, %v7322_v18  ;;  %v2972_v58 = vmul.f32 %v7326_v44, %v7326_v44  ;;  %v2973_v14 = vmul.f32 %v7333_v40, %v7333_v40  ;;  %v2991_v24 = vsel %vm664_vm2, %v2951_v60, 0.0 }
 0x1f2   :  { %v2990_v48 = vadd.f32 %v2989_v36, %v2988_v57  ;;  %v2993_v41 = vsel %vm664_vm2, %v2952_v31, 0.0  ;;  %v2995_v13 = vsel %vm664_vm2, %v2953_v4, 0.0  ;;  %v2997_v45 = vsel %vm664_vm2, %v2954_v38, 0.0  ;;  %v10453_v38 = vld [vmem:[#allocation13_spill] sm:$0xff] }
 0x1f3   :  { %v2999_v1 = vsel %vm664_vm2, %v2955_v15, 0.0  ;;  %v3001_v37 = vsel %vm664_vm2, %v2956_v26, 0.0  ;;  %v3003_v30 = vsel %vm664_vm2, %v2957_v56, 0.0  ;;  %v3005_v44 = vsel %vm664_vm2, %v2958_v42, 0.0  ;;  %v10455_v26 = vld [vmem:[#allocation16_spill] sm:$0xff]  ;;  %v10457_v36 = vld [vmem:[#allocation17_spill] sm:$0xff] }
 0x1f4   :  { %v2992_v18 = vadd.f32 %v2991_v24, %v2990_v48  ;;  %v3007_v40 = vsel %vm664_vm2, %v2959_v55, 0.0  ;;  %v7399_v57 = vsel %vm664_vm2, %v2960_v59, 0.0  ;;  %v7402_v60 = vsel %vm664_vm2, %v2961_v27, 0.0 }
 0x1f5   :  { %v7405_v31 = vsel %vm664_vm2, %v2962_v28, 0.0  ;;  %v7408_v48 = vsel %vm664_vm2, %v2963_v29, 0.0  ;;  %v7412_v15 = vsub.f32 %v10453_v38, %v7186_v6  ;;  %v7416_v56 = vsub.f32 %v10455_v26, %v7186_v6 }
 0x1f6   :  { %v2994_v4 = vadd.f32 %v2993_v41, %v2992_v18  ;;  %v7419_v42 = vsel %vm664_vm2, %v2964_v50, 0.0  ;;  %v7422_v55 = vsel %vm664_vm2, %v2965_v9, 0.0  ;;  %v7425_v59 = vsel %vm664_vm2, %v2966_v0, 0.0 }
 0x1f7   :  { %10454 = vst [vmem:[#allocation13_spill] sm:$0xff] %v7412_v15  ;;  %10456 = vst [vmem:[#allocation16_spill] sm:$0xff] %v7416_v56  ;;  %v7428_v18 = vsel %vm664_vm2, %v2967_v32, 0.0  ;;  %v7431_v28 = vsel %vm664_vm2, %v2968_v54, 0.0  ;;  %v7434_v29 = vsel %vm664_vm2, %v2969_v25, 0.0  ;;  %v7438_v50 = vsub.f32 %v10457_v36, %v7186_v6  ;;  %v10459_v25 = vld [vmem:[#allocation22_spill] sm:$0xff] }
 0x1f8   :  { %v2996_v27 = vadd.f32 %v2995_v13, %v2994_v4  ;;  %v7441_v9 = vsel %vm664_vm2, %v2970_v61, 0.0  ;;  %v7444_v0 = vsel %vm664_vm2, %v2971_v16, 0.0  ;;  %v7447_v32 = vsel %vm664_vm2, %v2972_v58, 0.0  ;;  %v10461_v16 = vld [vmem:[#allocation23_spill] sm:$0xff]  ;;  %v10469_v36 = vld [vmem:[#allocation36_spill] sm:$0xff] }
 0x1f9   :  { %10458 = vst [vmem:[#allocation17_spill] sm:$0xff] %v7438_v50  ;;  %v7450_v13 = vsel %vm664_vm2, %v2973_v14, 0.0  ;;  %v7454_v24 = vsub.f32 %v10459_v25, %v7186_v6  ;;  %v3075_v41 = vmul.f32 %v7412_v15, %v7412_v15  ;;  %v3076_v61 = vmul.f32 %v7416_v56, %v7416_v56  ;;  %v10475_v56 = vld [vmem:[#allocation41_spill] sm:$0xff]  ;;  %v10477_v15 = vld [vmem:[#allocation44_spill] sm:$0xff] }
 0x1fa   :  { %v2998_v54 = vadd.f32 %v2997_v45, %v2996_v27  ;;  %v7462_v4 = vsub.f32 %v10461_v16, %v7186_v6  ;;  %v7466_v58 = vsub.f32 %v6493_v10, %v7186_v6  ;;  %v7470_v14 = vsub.f32 %v6504_v11, %v7186_v6 }
 0x1fb   :  { %10460 = vst [vmem:[#allocation22_spill] sm:$0xff] %v7454_v24  ;;  %v7474_v45 = vsub.f32 %v6549_v23, %v7186_v6  ;;  %v7478_v26 = vsub.f32 %v6563_v39, %v7186_v6  ;;  %v7482_v27 = vsub.f32 %v6587_v47, %v7186_v6  ;;  %v3077_v10 = vmul.f32 %v7438_v50, %v7438_v50  ;;  %v10473_v39 = vld [vmem:[#allocation40_spill] sm:$0xff] }
 0x1fc   :  { %10462 = vst [vmem:[#allocation23_spill] sm:$0xff] %v7462_v4  ;;  %10463 = vst [vmem:[#allocation122_spill] sm:$0xff] %v7466_v58  ;;  %v3000_v38 = vadd.f32 %v2999_v1, %v2998_v54  ;;  %v7488_v11 = vsub.f32 %v6597_v53, %v7186_v6  ;;  %v7492_v23 = vsub.f32 %v10469_v36, %v7186_v6  ;;  %v10471_v1 = vld [vmem:[#allocation37_spill] sm:$0xff]  ;;  %v3107_v50 = vsel %vm664_vm2, %v3075_v41, 0.0 }
 0x1fd   :  { %10464 = vst [vmem:[#allocation123_spill] sm:$0xff] %v7470_v14  ;;  %10465 = vst [vmem:[#allocation124_spill] sm:$0xff] %v7474_v45  ;;  %v7496_v54 = vsub.f32 %v10471_v1, %v7186_v6  ;;  %v7500_v25 = vsub.f32 %v10473_v39, %v7186_v6  ;;  %v3078_v16 = vmul.f32 %v7454_v24, %v7454_v24  ;;  %v3108_v53 = vsel %vm664_vm2, %v3076_v61, 0.0  ;;  %v10481_v24 = vld [vmem:[#allocation48_spill] sm:$0xff]  ;;  %v10483_v61 = vld [vmem:[#allocation49_spill] sm:$0xff] }
 0x1fe   :  { %10466 = vst [vmem:[#allocation125_spill] sm:$0xff] %v7478_v26  ;;  %10467 = vst [vmem:[#allocation126_spill] sm:$0xff] %v7482_v27  ;;  %v3002_v47 = vadd.f32 %v3001_v37, %v3000_v38  ;;  %v7508_v36 = vsub.f32 %v10475_v56, %v7186_v6  ;;  %v7512_v1 = vsub.f32 %v10477_v15, %v7186_v6  ;;  %v3110_v56 = vsel %vm664_vm2, %v3077_v10, 0.0  ;;  %v10485_v15 = vld [vmem:[#allocation52_spill] sm:$0xff] }
 0x1ff   :  { %10468 = vst [vmem:[#allocation127_spill] sm:$0xff] %v7488_v11  ;;  %10470 = vst [vmem:[#allocation36_spill] sm:$0xff] %v7492_v23  ;;  %v7516_v39 = vsub.f32 %v10479_v34, %v7186_v6  ;;  %v3109_v37 = vadd.f32 %v3108_v53, %v3107_v50  ;;  %v7520_v21 = vsub.f32 %v10481_v24, %v7186_v6  ;;  %v10487_v34 = vld [vmem:[#allocation53_spill] sm:$0xff]  ;;  %v3112_v53 = vsel %vm664_vm2, %v3078_v16, 0.0 }
 0x200   :  { %10472 = vst [vmem:[#allocation37_spill] sm:$0xff] %v7496_v54  ;;  %10474 = vst [vmem:[#allocation40_spill] sm:$0xff] %v7500_v25  ;;  %v3004_v38 = vadd.f32 %v3003_v30, %v3002_v47  ;;  %v3079_v41 = vmul.f32 %v7462_v4, %v7462_v4  ;;  %v7527_v7 = vsub.f32 %v10483_v61, %v7186_v6 }
 0x201   :  { %10476 = vst [vmem:[#allocation41_spill] sm:$0xff] %v7508_v36  ;;  %10478 = vst [vmem:[#allocation44_spill] sm:$0xff] %v7512_v1  ;;  %v7531_v51 = vsub.f32 %v10485_v15, %v7186_v6  ;;  %v7535_v30 = vsub.f32 %v10487_v34, %v7186_v6  ;;  %v3111_v50 = vadd.f32 %v3110_v56, %v3109_v37  ;;  %v10491_v15 = vld [vmem:[#allocation66_spill] sm:$0xff]  ;;  %v10493_v37 = vld [vmem:[#allocation67_spill] sm:$0xff] }
 0x202   :  { %10480 = vst [vmem:[#allocation45_spill] sm:$0xff] %v7516_v39  ;;  %10482 = vst [vmem:[#allocation48_spill] sm:$0xff] %v7520_v21  ;;  %v3006_v24 = vadd.f32 %v3005_v44, %v3004_v38  ;;  %v7539_v47 = vsub.f32 %v6844_v22, %v7186_v6  ;;  %v3080_v10 = vmul.f32 %v7466_v58, %v7466_v58  ;;  %v10495_v56 = vld [vmem:[#allocation9_spill] sm:$0xff]  ;;  %v10497_v58 = vld [vmem:[#allocation2_spill] sm:$0xff] }
 0x203   :  { %10484 = vst [vmem:[#allocation49_spill] sm:$0xff] %v7527_v7  ;;  %10486 = vst [vmem:[#allocation52_spill] sm:$0xff] %v7531_v51  ;;  %v7546_v61 = vsub.f32 %v6856_v19, %v7186_v6  ;;  %v7550_v4 = vsub.f32 %v10491_v15, %v7186_v6  ;;  %v7554_v44 = vsub.f32 %v10493_v37, %v7186_v6  ;;  %v3114_v19 = vsel %vm664_vm2, %v3079_v41, 0.0  ;;  %v10499_v15 = vld [vmem:[#allocation10_spill] sm:$0xff]  ;;  %v10503_v37 = vld [vmem:[#allocation12_spill] sm:$0xff] }
 0x204   :  { %10488 = vst [vmem:[#allocation53_spill] sm:$0xff] %v7535_v30  ;;  %10489 = vst [vmem:[#allocation128_spill] sm:$0xff] %v7539_v47  ;;  %v3113_v38 = vadd.f32 %v3112_v53, %v3111_v50  ;;  %v3008_v22 = vadd.f32 %v3007_v40, %v3006_v24  ;;  %v7558_v34 = vsub.f32 %v10495_v56, %v7186_v6  ;;  %v10501_v50 = vld [vmem:[#allocation3_spill] sm:$0xff] }
 0x205   :  { %10490 = vst [vmem:[#allocation129_spill] sm:$0xff] %v7546_v61  ;;  %10492 = vst [vmem:[#allocation66_spill] sm:$0xff] %v7550_v4  ;;  %v3081_v16 = vmul.f32 %v7470_v14, %v7470_v14  ;;  %v7565_v43 = vsub.f32 %v10497_v58, %v7186_v6  ;;  %v7569_v49 = vsub.f32 %v10499_v15, %v7186_v6  ;;  %v3116_v58 = vsel %vm664_vm2, %v3080_v10, 0.0  ;;  %v10505_v14 = vld [vmem:[#allocation5_spill] sm:$0xff] }
 0x206   :  { %10494 = vst [vmem:[#allocation67_spill] sm:$0xff] %v7554_v44  ;;  %10496 = vst [vmem:[#allocation9_spill] sm:$0xff] %v7558_v34  ;;  %v7573_v40 = vsub.f32 %v10501_v50, %v7186_v6  ;;  %v3115_v24 = vadd.f32 %v3114_v19, %v3113_v38  ;;  %v3010_v53 = vadd.f32 %v7399_v57, %v3008_v22 }
 0x207   :  { %10498 = vst [vmem:[#allocation2_spill] sm:$0xff] %v7565_v43  ;;  %10500 = vst [vmem:[#allocation10_spill] sm:$0xff] %v7569_v49  ;;  %v7578_v56 = vsub.f32 %v10503_v37, %v7186_v6  ;;  %v3082_v41 = vmul.f32 %v7474_v45, %v7474_v45  ;;  %v7585_v15 = vsub.f32 %v10505_v14, %v7186_v6  ;;  %v3118_v37 = vsel %vm664_vm2, %v3081_v16, 0.0  ;;  %v10537_v45 = vld [vmem:[#allocation43_spill] sm:$0xff] }
 0x208   :  { %10502 = vst [vmem:[#allocation3_spill] sm:$0xff] %v7573_v40  ;;  %v7589_v50 = vsub.f32 %v10507_v63, %v7186_v6  ;;  %v3083_v57 = vmul.f32 %v7478_v26, %v7478_v26  ;;  %v3117_v38 = vadd.f32 %v3116_v58, %v3115_v24  ;;  %v3012_v22 = vadd.f32 %v7402_v60, %v3010_v53 }
 0x209   :  { %10504 = vst [vmem:[#allocation12_spill] sm:$0xff] %v7578_v56  ;;  %10506 = vst [vmem:[#allocation5_spill] sm:$0xff] %v7585_v15  ;;  %v3084_v19 = vmul.f32 %v7482_v27, %v7482_v27  ;;  %v3085_v10 = vmul.f32 %v7488_v11, %v7488_v11  ;;  %v3086_v14 = vmul.f32 %v7492_v23, %v7492_v23  ;;  %v3120_v16 = vsel %vm664_vm2, %v3082_v41, 0.0 }
 0x20a   :  { %10508 = vst [vmem:[#allocation19_spill] sm:$0xff] %v7589_v50  ;;  %v3087_v63 = vmul.f32 %v7496_v54, %v7496_v54  ;;  %v3088_v26 = vmul.f32 %v7500_v25, %v7500_v25  ;;  %v3119_v24 = vadd.f32 %v3118_v37, %v3117_v38  ;;  %v3014_v60 = vadd.f32 %v7405_v31, %v3012_v22 }
 0x20b   :  { %v3089_v53 = vmul.f32 %v7508_v36, %v7508_v36  ;;  %v3090_v58 = vmul.f32 %v7512_v1, %v7512_v1  ;;  %v3091_v23 = vmul.f32 %v7516_v39, %v7516_v39  ;;  %v3092_v54 = vmul.f32 %v7520_v21, %v7520_v21 }
 0x20c   :  { %v3093_v25 = vmul.f32 %v7527_v7, %v7527_v7  ;;  %v3121_v38 = vadd.f32 %v3120_v16, %v3119_v24  ;;  %v3016_v31 = vadd.f32 %v7408_v48, %v3014_v60  ;;  %v3094_v22 = vmul.f32 %v7531_v51, %v7531_v51 }
 0x20d   :  { %v3095_v37 = vmul.f32 %v7535_v30, %v7535_v30  ;;  %v3122_v41 = vsel %vm664_vm2, %v3083_v57, 0.0  ;;  %v3096_v39 = vmul.f32 %v7539_v47, %v7539_v47  ;;  %v3097_v21 = vmul.f32 %v7546_v61, %v7546_v61 }
 0x20e   :  { %v3098_v7 = vmul.f32 %v7550_v4, %v7550_v4  ;;  %v3123_v24 = vadd.f32 %v3122_v41, %v3121_v38  ;;  %v3018_v48 = vadd.f32 %v7419_v42, %v3016_v31  ;;  %v3099_v60 = vmul.f32 %v7554_v44, %v7554_v44 }
 0x20f   :  { %v3100_v16 = vmul.f32 %v7558_v34, %v7558_v34  ;;  %v3124_v57 = vsel %vm664_vm2, %v3084_v19, 0.0  ;;  %v3101_v47 = vmul.f32 %v7565_v43, %v7565_v43  ;;  %v3102_v61 = vmul.f32 %v7569_v49, %v7569_v49  ;;  %v7647_v34 = vpop.f32.mrf.mxu1 }
 0x210   :  { %v3103_v4 = vmul.f32 %v7573_v40, %v7573_v40  ;;  %v3125_v38 = vadd.f32 %v3124_v57, %v3123_v24  ;;  %v3020_v42 = vadd.f32 %v7422_v55, %v3018_v48  ;;  %v3104_v31 = vmul.f32 %v7578_v56, %v7578_v56 }
 0x211   :  { %v3105_v41 = vmul.f32 %v7585_v15, %v7585_v15  ;;  %v3126_v19 = vsel %vm664_vm2, %v3085_v10, 0.0  ;;  %v3106_v43 = vmul.f32 %v7589_v50, %v7589_v50  ;;  %v3128_v44 = vsel %vm664_vm2, %v3086_v14, 0.0  ;;  %v7657_v56 = vpop.f32.mrf.mxu1 }
 0x212   :  { %v3127_v49 = vadd.f32 %v3126_v19, %v3125_v38  ;;  %v3130_v24 = vsel %vm664_vm2, %v3087_v63, 0.0  ;;  %v3022_v55 = vadd.f32 %v7425_v59, %v3020_v42  ;;  %v3132_v48 = vsel %vm664_vm2, %v3088_v26, 0.0 }
 0x213   :  { %v3134_v57 = vsel %vm664_vm2, %v3089_v53, 0.0  ;;  %v3136_v15 = vsel %vm664_vm2, %v3090_v58, 0.0  ;;  %v3138_v40 = vsel %vm664_vm2, %v3091_v23, 0.0  ;;  %v3140_v50 = vsel %vm664_vm2, %v3092_v54, 0.0  ;;  %v7674_v53 = vpop.f32.mrf.mxu1 }
 0x214   :  { %v3129_v10 = vadd.f32 %v3128_v44, %v3127_v49  ;;  %v3142_v38 = vsel %vm664_vm2, %v3093_v25, 0.0  ;;  %v7663_v14 = vsel %vm664_vm2, %v3094_v22, 0.0  ;;  %v7666_v59 = vsel %vm664_vm2, %v3095_v37, 0.0  ;;  %v10511_v22 = vld [vmem:[#allocation24_spill] sm:$0xff] }
 0x215   :  { %v7669_v26 = vsel %vm664_vm2, %v3096_v39, 0.0  ;;  %v7672_v63 = vsel %vm664_vm2, %v3097_v21, 0.0  ;;  %v3024_v49 = vadd.f32 %v7428_v18, %v3022_v55  ;;  %v7678_v54 = vsel %vm664_vm2, %v3098_v7, 0.0  ;;  %v10509_v21 = vld [vmem:[#allocation25_spill] sm:$0xff]  ;;  %v7697_v37 = vpop.f32.mrf.mxu1 }
 0x216   :  { %v3131_v23 = vadd.f32 %v3130_v24, %v3129_v10  ;;  %v7681_v25 = vsel %vm664_vm2, %v3099_v60, 0.0  ;;  %v7684_v44 = vsel %vm664_vm2, %v3100_v16, 0.0  ;;  %v7687_v39 = vsel %vm664_vm2, %v3101_v47, 0.0  ;;  %v10513_v24 = vld [vmem:[#allocation28_spill] sm:$0xff] }
 0x217   :  { %v7691_v58 = vsub.f32 %v10509_v21, %v7186_v6  ;;  %v7695_v18 = vsub.f32 %v10511_v22, %v7186_v6  ;;  %v7700_v60 = vsel %vm664_vm2, %v3102_v61, 0.0  ;;  %v7703_v16 = vsel %vm664_vm2, %v3103_v4, 0.0  ;;  %v7722_v10 = vpop.f32.mrf.mxu1  ;;  %v10521_v22 = vld [vmem:[#allocation31_spill] sm:$0xff] }
 0x218   :  { %v3133_v7 = vadd.f32 %v3132_v48, %v3131_v23  ;;  %v7706_v47 = vsel %vm664_vm2, %v3104_v31, 0.0  ;;  %v7709_v42 = vsel %vm664_vm2, %v3105_v41, 0.0  ;;  %v7712_v19 = vsel %vm664_vm2, %v3106_v43, 0.0  ;;  %v10515_v48 = vld [vmem:[#allocation27_spill] sm:$0xff]  ;;  %v10517_v23 = vld [vmem:[#allocation30_spill] sm:$0xff]  ;;  %v10519_v43 = vld [vmem:[#allocation29_spill] sm:$0xff] }
 0x219   :  { %10510 = vst [vmem:[#allocation25_spill] sm:$0xff] %v7691_v58  ;;  %10512 = vst [vmem:[#allocation24_spill] sm:$0xff] %v7695_v18  ;;  %v7716_v55 = vsub.f32 %v10513_v24, %v7186_v6  ;;  %v7720_v61 = vsub.f32 %v10515_v48, %v7186_v6  ;;  %v3026_v4 = vadd.f32 %v7431_v28, %v3024_v49  ;;  %v10523_v48 = vld [vmem:[#allocation32_spill] sm:$0xff]  ;;  %v7745_v49 = vpop.f32.mrf.mxu1 }
 0x21a   :  { %v3135_v31 = vadd.f32 %v3134_v57, %v3133_v7  ;;  %v7727_v41 = vsub.f32 %v10517_v23, %v7186_v6  ;;  %v7731_v21 = vsub.f32 %v10519_v43, %v7186_v6  ;;  %v7735_v24 = vsub.f32 %v10521_v22, %v7186_v6  ;;  %v10525_v23 = vld [vmem:[#allocation33_spill] sm:$0xff]  ;;  %v10527_v22 = vld [vmem:[#allocation34_spill] sm:$0xff] }
 0x21b   :  { %10514 = vst [vmem:[#allocation28_spill] sm:$0xff] %v7716_v55  ;;  %10516 = vst [vmem:[#allocation27_spill] sm:$0xff] %v7720_v61  ;;  %v7739_v30 = vsub.f32 %v10523_v48, %v7186_v6  ;;  %v3209_v28 = vmul.f32 %v7691_v58, %v7691_v58  ;;  %v3210_v57 = vmul.f32 %v7695_v18, %v7695_v18  ;;  %v10529_v48 = vld [vmem:[#allocation35_spill] sm:$0xff]  ;;  %v10531_v58 = vld [vmem:[#allocation38_spill] sm:$0xff] }
 0x21c   :  { %10518 = vst [vmem:[#allocation30_spill] sm:$0xff] %v7727_v41  ;;  %10520 = vst [vmem:[#allocation29_spill] sm:$0xff] %v7731_v21  ;;  %v3137_v7 = vadd.f32 %v3136_v15, %v3135_v31  ;;  %v7749_v43 = vsub.f32 %v10525_v23, %v7186_v6  ;;  %v7753_v51 = vsub.f32 %v10527_v22, %v7186_v6  ;;  %v10533_v18 = vld [vmem:[#allocation39_spill] sm:$0xff]  ;;  %v10535_v15 = vld [vmem:[#allocation42_spill] sm:$0xff]  ;;  %v7773_v22 = vpop.f32.mrf.mxu1 }
 0x21d   :  { %10522 = vst [vmem:[#allocation31_spill] sm:$0xff] %v7735_v24  ;;  %10524 = vst [vmem:[#allocation32_spill] sm:$0xff] %v7739_v30  ;;  %v7757_v1 = vsub.f32 %v10529_v48, %v7186_v6  ;;  %v7761_v36 = vsub.f32 %v10531_v58, %v7186_v6  ;;  %v7765_v11 = vsub.f32 %v10533_v18, %v7186_v6  ;;  %v3241_v35 = vsel %vm664_vm2, %v3209_v28, 0.0  ;;  %v10549_v28 = vld [vmem:[#allocation57_spill] sm:$0xff] }
 0x21e   :  { %10526 = vst [vmem:[#allocation33_spill] sm:$0xff] %v7749_v43  ;;  %10528 = vst [vmem:[#allocation34_spill] sm:$0xff] %v7753_v51  ;;  %v7769_v31 = vsub.f32 %v10535_v15, %v7186_v6  ;;  %v3211_v23 = vmul.f32 %v7716_v55, %v7716_v55  ;;  %v3028_v48 = vadd.f32 %v7434_v29, %v3026_v4  ;;  %v3242_v29 = vsel %vm664_vm2, %v3210_v57, 0.0 }
 0x21f   :  { %10530 = vst [vmem:[#allocation35_spill] sm:$0xff] %v7757_v1  ;;  %10532 = vst [vmem:[#allocation38_spill] sm:$0xff] %v7761_v36  ;;  %v3139_v27 = vadd.f32 %v3138_v40, %v3137_v7  ;;  %v7778_v58 = vsub.f32 %v10537_v45, %v7186_v6  ;;  %v7782_v18 = vsub.f32 %v10539_v12, %v7186_v6  ;;  %v7792_v40 = vpop.f32.mrf.mxu1  ;;  %v10543_v45 = vld [vmem:[#allocation50_spill] sm:$0xff]  ;;  %v10545_v12 = vld [vmem:[#allocation51_spill] sm:$0xff] }
 0x220   :  { %10534 = vst [vmem:[#allocation39_spill] sm:$0xff] %v7765_v11  ;;  %10536 = vst [vmem:[#allocation42_spill] sm:$0xff] %v7769_v31  ;;  %v7786_v15 = vsub.f32 %v10541_v33, %v7186_v6  ;;  %v3212_v55 = vmul.f32 %v7720_v61, %v7720_v61  ;;  %v7796_v7 = vsub.f32 %v10543_v45, %v7186_v6 }
 0x221   :  { %10538 = vst [vmem:[#allocation43_spill] sm:$0xff] %v7778_v58  ;;  %10540 = vst [vmem:[#allocation46_spill] sm:$0xff] %v7782_v18  ;;  %v3141_v4 = vadd.f32 %v3140_v50, %v3139_v27  ;;  %v7800_v3 = vsub.f32 %v10545_v12, %v7186_v6  ;;  %v3243_v33 = vadd.f32 %v3242_v29, %v3241_v35  ;;  %v3244_v50 = vsel %vm664_vm2, %v3211_v23, 0.0  ;;  %v7813_v57 = vpop.f32.mrf.mxu1  ;;  %v10551_v35 = vld [vmem:[#allocation60_spill] sm:$0xff] }
 0x222   :  { %10542 = vst [vmem:[#allocation47_spill] sm:$0xff] %v7786_v15  ;;  %10544 = vst [vmem:[#allocation50_spill] sm:$0xff] %v7796_v7  ;;  %v7804_v8 = vsub.f32 %v10547_v20, %v7186_v6  ;;  %v7808_v61 = vsub.f32 %v10549_v28, %v7186_v6  ;;  %v3213_v27 = vmul.f32 %v7727_v41, %v7727_v41  ;;  %v10555_v28 = vld [vmem:[#allocation68_spill] sm:$0xff]  ;;  %v3246_v41 = vsel %vm664_vm2, %v3212_v55, 0.0 }
 0x223   :  { %10546 = vst [vmem:[#allocation51_spill] sm:$0xff] %v7800_v3  ;;  %v3030_v45 = vadd.f32 %v7441_v9, %v3028_v48  ;;  %v3143_v12 = vadd.f32 %v3142_v38, %v3141_v4  ;;  %v7818_v29 = vsub.f32 %v10551_v35, %v7186_v6  ;;  %v3245_v20 = vadd.f32 %v3244_v50, %v3243_v33  ;;  %v7831_v9 = vpop.f32.mrf.mxu1  ;;  %v10557_v48 = vld [vmem:[#allocation71_spill] sm:$0xff]  ;;  %v10561_v35 = vld [vmem:[#allocation4_spill] sm:$0xff] }
 0x224   :  { %10548 = vst [vmem:[#allocation54_spill] sm:$0xff] %v7804_v8  ;;  %10550 = vst [vmem:[#allocation57_spill] sm:$0xff] %v7808_v61  ;;  %v7822_v5 = vsub.f32 %v10553_v62, %v7186_v6  ;;  %v7826_v46 = vsub.f32 %v10555_v28, %v7186_v6  ;;  %v3214_v23 = vmul.f32 %v7731_v21, %v7731_v21  ;;  %v10559_v62 = vld [vmem:[#allocation11_spill] sm:$0xff] }
 0x225   :  { %10552 = vst [vmem:[#allocation60_spill] sm:$0xff] %v7818_v29  ;;  %v3145_v38 = vadd.f32 %v7663_v14, %v3143_v12  ;;  %v7836_v4 = vsub.f32 %v10557_v48, %v7186_v6  ;;  %v7840_v33 = vsub.f32 %v10559_v62, %v7186_v6  ;;  %v3247_v50 = vadd.f32 %v3246_v41, %v3245_v20  ;;  %v10563_v21 = vld [vmem:[#allocation15_spill] sm:$0xff]  ;;  %v7853_v48 = vpop.f32.mrf.mxu1  ;;  %v10565_v41 = vld [vmem:[#allocation6_spill] sm:$0xff] }
 0x226   :  { %10554 = vst [vmem:[#allocation63_spill] sm:$0xff] %v7822_v5  ;;  %10556 = vst [vmem:[#allocation68_spill] sm:$0xff] %v7826_v46  ;;  %v7844_v28 = vsub.f32 %v10561_v35, %v7186_v6  ;;  %v7848_v55 = vsub.f32 %v10563_v21, %v7186_v6  ;;  %v3215_v14 = vmul.f32 %v7735_v24, %v7735_v24  ;;  %v3248_v12 = vsel %vm664_vm2, %v3213_v27, 0.0 }
 0x227   :  { %10558 = vst [vmem:[#allocation71_spill] sm:$0xff] %v7836_v4  ;;  %10560 = vst [vmem:[#allocation11_spill] sm:$0xff] %v7840_v33  ;;  %v3032_v2 = vadd.f32 %v7444_v0, %v3030_v45  ;;  %v3147_v62 = vadd.f32 %v7666_v59, %v3145_v38  ;;  %v7859_v20 = vsub.f32 %v10565_v41, %v7186_v6  ;;  %v3250_v0 = vsel %vm664_vm2, %v3214_v23, 0.0  ;;  %v7872_v45 = vpop.f32.mrf.mxu1  ;;  %v10571_v38 = vld [vmem:[#allocation7_spill] sm:$0xff] }
 0x228   :  { %10562 = vst [vmem:[#allocation4_spill] sm:$0xff] %v7844_v28  ;;  %10564 = vst [vmem:[#allocation15_spill] sm:$0xff] %v7848_v55  ;;  %v3249_v35 = vadd.f32 %v3248_v12, %v3247_v50  ;;  %v7863_v21 = vsub.f32 %v10567_v52, %v7186_v6  ;;  %v7867_v24 = vsub.f32 %v10569_v17, %v7186_v6 }
 0x229   :  { %10566 = vst [vmem:[#allocation6_spill] sm:$0xff] %v7859_v20  ;;  %v3216_v27 = vmul.f32 %v7739_v30, %v7739_v30  ;;  %v3149_v59 = vadd.f32 %v7669_v26, %v3147_v62  ;;  %v7877_v50 = vsub.f32 %v10571_v38, %v7186_v6  ;;  %v3217_v52 = vmul.f32 %v7749_v43, %v7749_v43  ;;  %v7888_v26 = vpop.f32.mrf.mxu1 }
 0x22a   :  { %10568 = vst [vmem:[#allocation21_spill] sm:$0xff] %v7863_v21  ;;  %10570 = vst [vmem:[#allocation8_spill] sm:$0xff] %v7867_v24  ;;  %v3251_v12 = vadd.f32 %v3250_v0, %v3249_v35  ;;  %v3218_v17 = vmul.f32 %v7753_v51, %v7753_v51  ;;  %v3219_v41 = vmul.f32 %v7757_v1, %v7757_v1  ;;  %v3252_v30 = vsel %vm664_vm2, %v3215_v14, 0.0 }
 0x22b   :  { %10572 = vst [vmem:[#allocation7_spill] sm:$0xff] %v7877_v50  ;;  %v3220_v23 = vmul.f32 %v7761_v36, %v7761_v36  ;;  %v3034_v62 = vadd.f32 %v7447_v32, %v3032_v2  ;;  %v3151_v38 = vadd.f32 %v7672_v63, %v3149_v59  ;;  %v3221_v35 = vmul.f32 %v7765_v11, %v7765_v11  ;;  %v7901_v43 = vpop.f32.mrf.mxu1 }
 0x22c   :  { %v3253_v0 = vadd.f32 %v3252_v30, %v3251_v12  ;;  %v3222_v51 = vmul.f32 %v7769_v31, %v7769_v31  ;;  %v3223_v1 = vmul.f32 %v7778_v58, %v7778_v58  ;;  %v3224_v36 = vmul.f32 %v7782_v18, %v7782_v18 }
 0x22d   :  { %v3254_v14 = vsel %vm664_vm2, %v3216_v27, 0.0  ;;  %v3153_v2 = vadd.f32 %v7678_v54, %v3151_v38  ;;  %v3225_v32 = vmul.f32 %v7786_v15, %v7786_v15  ;;  %v3226_v30 = vmul.f32 %v7796_v7, %v7796_v7  ;;  %v7915_v58 = vpop.f32.mrf.mxu1 }
 0x22e   :  { %v3255_v63 = vadd.f32 %v3254_v14, %v3253_v0  ;;  %v3227_v59 = vmul.f32 %v7800_v3, %v7800_v3  ;;  %v3228_v12 = vmul.f32 %v7804_v8, %v7804_v8  ;;  %v3229_v27 = vmul.f32 %v7808_v61, %v7808_v61 }
 0x22f   :  { %v3256_v18 = vsel %vm664_vm2, %v3217_v52, 0.0  ;;  %v7918_v54 = vadd.f32 %v7450_v13, %v3034_v62  ;;  %v3155_v38 = vadd.f32 %v7681_v25, %v3153_v2  ;;  %v3230_v0 = vmul.f32 %v7818_v29, %v7818_v29  ;;  %v7930_v7 = vpop.f32.mrf.mxu1 }
 0x230   :  { %v3257_v14 = vadd.f32 %v3256_v18, %v3255_v63  ;;  %v3231_v3 = vmul.f32 %v7822_v5, %v7822_v5  ;;  %v3232_v8 = vmul.f32 %v7826_v46, %v7826_v46  ;;  %v3233_v52 = vmul.f32 %v7836_v4, %v7836_v4 }
 0x231   :  { %10573 = vst [vmem:[#allocation130_spill] sm:$0xff] %v7918_v54  ;;  %v3258_v61 = vsel %vm664_vm2, %v3218_v17, 0.0  ;;  %v3157_v13 = vadd.f32 %v7684_v44, %v3155_v38  ;;  %v3234_v25 = vmul.f32 %v7840_v33, %v7840_v33  ;;  %v3235_v18 = vmul.f32 %v7844_v28, %v7844_v28  ;;  %v7944_v46 = vpop.f32.mrf.mxu1 }
 0x232   :  { %v3259_v62 = vadd.f32 %v3258_v61, %v3257_v14  ;;  %v3236_v2 = vmul.f32 %v7848_v55, %v7848_v55  ;;  %v3237_v63 = vmul.f32 %v7859_v20, %v7859_v20  ;;  %v3238_v17 = vmul.f32 %v7863_v21, %v7863_v21  ;;  %10574 = vst [vmem:[#allocation131_spill] sm:$0xff] %v7944_v46 }
 0x233   :  { %v3260_v4 = vsel %vm664_vm2, %v3219_v41, 0.0  ;;  %v3239_v38 = vmul.f32 %v7867_v24, %v7867_v24  ;;  %v3240_v61 = vmul.f32 %v7877_v50, %v7877_v50  ;;  %v3262_v55 = vsel %vm664_vm2, %v3220_v23, 0.0  ;;  %v7955_v41 = vpop.f32.mrf.mxu1 }
 0x234   :  { %v3261_v14 = vadd.f32 %v3260_v4, %v3259_v62  ;;  %v3264_v20 = vsel %vm664_vm2, %v3221_v35, 0.0  ;;  %v3266_v28 = vsel %vm664_vm2, %v3222_v51, 0.0  ;;  %v3268_v21 = vsel %vm664_vm2, %v3223_v1, 0.0  ;;  %10575 = vst [vmem:[#allocation132_spill] sm:$0xff] %v7955_v41  ;;  %v10586_v62 = vld [vmem:[#allocation55_spill] sm:$0xff] }
 0x235   :  { %v3159_v33 = vadd.f32 %v7687_v39, %v3157_v13  ;;  %v3270_v5 = vsel %vm664_vm2, %v3224_v36, 0.0  ;;  %v3272_v24 = vsel %vm664_vm2, %v3225_v32, 0.0  ;;  %v3274_v50 = vsel %vm664_vm2, %v3226_v30, 0.0  ;;  %v7968_v1 = vpop.f32.mrf.mxu1 }
 0x236   :  { %v3263_v44 = vadd.f32 %v3262_v55, %v3261_v14  ;;  %v3276_v4 = vsel %vm664_vm2, %v3227_v59, 0.0  ;;  %v7963_v23 = vsel %vm664_vm2, %v3228_v12, 0.0  ;;  %v7966_v51 = vsel %vm664_vm2, %v3229_v27, 0.0  ;;  %10576 = vst [vmem:[#allocation133_spill] sm:$0xff] %v7968_v1  ;;  %v10595_v14 = vld [vmem:[#allocation61_spill] sm:$0xff] }
 0x237   :  { %v7971_v39 = vsel %vm664_vm2, %v3230_v0, 0.0  ;;  %v7974_v36 = vsel %vm664_vm2, %v3231_v3, 0.0  ;;  %v7977_v55 = vsel %vm664_vm2, %v3232_v8, 0.0  ;;  %v7980_v32 = vsel %vm664_vm2, %v3233_v52, 0.0  ;;  %v7991_v12 = vpop.f32.mrf.mxu1  ;;  %v10629_v1 = vld [vmem:[#allocation85_spill] sm:$0xff] }
 0x238   :  { %v3265_v35 = vadd.f32 %v3264_v20, %v3263_v44  ;;  %v7983_v30 = vsel %vm664_vm2, %v3234_v25, 0.0  ;;  %v7986_v59 = vsel %vm664_vm2, %v3235_v18, 0.0  ;;  %v7989_v20 = vsel %vm664_vm2, %v3236_v2, 0.0  ;;  %10579 = vst [vmem:[#allocation136_spill] sm:$0xff] %v7991_v12  ;;  %v10584_v25 = vld [vmem:[#allocation56_spill] sm:$0xff]  ;;  %v10589_v2 = vld [vmem:[#allocation59_spill] sm:$0xff] }
 0x239   :  { %10577 = vst [vmem:[#allocation134_spill] sm:$0xff] %v7986_v59  ;;  %10578 = vst [vmem:[#allocation135_spill] sm:$0xff] %v7989_v20  ;;  %v3161_v3 = vadd.f32 %v7700_v60, %v3159_v33  ;;  %v7995_v8 = vsel %vm664_vm2, %v3237_v63, 0.0  ;;  %v7998_v0 = vsel %vm664_vm2, %v3238_v17, 0.0  ;;  %v8001_v52 = vsel %vm664_vm2, %v3239_v38, 0.0  ;;  %v8014_v33 = vpop.f32.mrf.mxu1  ;;  %v10591_v17 = vld [vmem:[#allocation58_spill] sm:$0xff] }
 0x23a   :  { %v3267_v27 = vadd.f32 %v3266_v28, %v3265_v35  ;;  %10580 = vst [vmem:[#allocation137_spill] sm:$0xff] %v7995_v8  ;;  %10581 = vst [vmem:[#allocation138_spill] sm:$0xff] %v7998_v0  ;;  %v8004_v13 = vsel %vm664_vm2, %v3240_v61, 0.0  ;;  %v8008_v18 = vsub.f32 %v10584_v25, %v7186_v6  ;;  %v8012_v60 = vsub.f32 %v10586_v62, %v7186_v6  ;;  %v10593_v38 = vld [vmem:[#allocation62_spill] sm:$0xff]  ;;  %v10596_v25 = vld [vmem:[#allocation65_spill] sm:$0xff] }
 0x23b   :  { %10582 = vst [vmem:[#allocation139_spill] sm:$0xff] %v8001_v52  ;;  %10583 = vst [vmem:[#allocation140_spill] sm:$0xff] %v8004_v13  ;;  %v8018_v63 = vsub.f32 %v10589_v2, %v7186_v6  ;;  %v8022_v44 = vsub.f32 %v10591_v17, %v7186_v6  ;;  %v8026_v61 = vsub.f32 %v10593_v38, %v7186_v6  ;;  %v10599_v2 = vld [vmem:[#allocation70_spill] sm:$0xff]  ;;  %v8044_v29 = vpop.f32.mrf.mxu1 }
 0x23c   :  { %10585 = vst [vmem:[#allocation56_spill] sm:$0xff] %v8008_v18  ;;  %10587 = vst [vmem:[#allocation55_spill] sm:$0xff] %v8012_v60  ;;  %v3269_v28 = vadd.f32 %v3268_v21, %v3267_v27  ;;  %v8030_v35 = vsub.f32 %v10595_v14, %v7186_v6  ;;  %v8034_v62 = vsub.f32 %v10596_v25, %v7186_v6  ;;  %v10597_v21 = vld [vmem:[#allocation64_spill] sm:$0xff]  ;;  %v10602_v14 = vld [vmem:[#allocation69_spill] sm:$0xff] }
 0x23d   :  { %10588 = vst [vmem:[#allocation141_spill] sm:$0xff] %v8014_v33  ;;  %10590 = vst [vmem:[#allocation59_spill] sm:$0xff] %v8018_v63  ;;  %v8038_v27 = vsub.f32 %v10597_v21, %v7186_v6  ;;  %v8042_v17 = vsub.f32 %v10599_v2, %v7186_v6  ;;  %v3163_v38 = vadd.f32 %v7703_v16, %v3161_v3  ;;  %v10603_v25 = vld [vmem:[#allocation73_spill] sm:$0xff]  ;;  %v10605_v21 = vld [vmem:[#allocation72_spill] sm:$0xff]  ;;  %v8069_v3 = vpop.f32.mrf.mxu1 }
 0x23e   :  { %10592 = vst [vmem:[#allocation58_spill] sm:$0xff] %v8022_v44  ;;  %10594 = vst [vmem:[#allocation62_spill] sm:$0xff] %v8026_v61  ;;  %v3271_v15 = vadd.f32 %v3270_v5, %v3269_v28  ;;  %v8049_v31 = vsub.f32 %v10602_v14, %v7186_v6  ;;  %v8053_v11 = vsub.f32 %v10603_v25, %v7186_v6  ;;  %v10607_v2 = vld [vmem:[#allocation75_spill] sm:$0xff]  ;;  %v10609_v52 = vld [vmem:[#allocation74_spill] sm:$0xff] }
 0x23f   :  { %10598 = vst [vmem:[#allocation61_spill] sm:$0xff] %v8038_v27  ;;  %10600 = vst [vmem:[#allocation65_spill] sm:$0xff] %v8042_v17  ;;  %v8057_v54 = vsub.f32 %v10605_v21, %v7186_v6  ;;  %v8061_v13 = vsub.f32 %v10607_v2, %v7186_v6  ;;  %v8065_v16 = vsub.f32 %v10609_v52, %v7186_v6  ;;  %v10612_v14 = vld [vmem:[#allocation77_spill] sm:$0xff]  ;;  %v10614_v21 = vld [vmem:[#allocation76_spill] sm:$0xff] }
 0x240   :  { %10601 = vst [vmem:[#allocation64_spill] sm:$0xff] %v8044_v29  ;;  %10604 = vst [vmem:[#allocation70_spill] sm:$0xff] %v8053_v11  ;;  %v3343_v5 = vmul.f32 %v8008_v18, %v8008_v18  ;;  %v3273_v28 = vadd.f32 %v3272_v24, %v3271_v15  ;;  %v8073_v25 = vsub.f32 %v10612_v14, %v7186_v6  ;;  %v10616_v52 = vld [vmem:[#allocation79_spill] sm:$0xff]  ;;  %v10618_v18 = vld [vmem:[#allocation78_spill] sm:$0xff] }
 0x241   :  { %10606 = vst [vmem:[#allocation69_spill] sm:$0xff] %v8057_v54  ;;  %10608 = vst [vmem:[#allocation73_spill] sm:$0xff] %v8061_v13  ;;  %v8077_v0 = vsub.f32 %v10614_v21, %v7186_v6  ;;  %v3344_v2 = vmul.f32 %v8012_v60, %v8012_v60  ;;  %v8083_v8 = vsub.f32 %v10616_v52, %v7186_v6  ;;  %v10620_v24 = vld [vmem:[#allocation81_spill] sm:$0xff]  ;;  %v10622_v14 = vld [vmem:[#allocation80_spill] sm:$0xff]  ;;  %v8097_v21 = vpop.f32.mrf.mxu1 }
 0x242   :  { %10610 = vst [vmem:[#allocation72_spill] sm:$0xff] %v8065_v16  ;;  %10611 = vst [vmem:[#allocation75_spill] sm:$0xff] %v8069_v3  ;;  %v8087_v20 = vsub.f32 %v10618_v18, %v7186_v6  ;;  %v8091_v15 = vsub.f32 %v10620_v24, %v7186_v6  ;;  %v8095_v3 = vsub.f32 %v10622_v14, %v7186_v6  ;;  %v10625_v52 = vld [vmem:[#allocation83_spill] sm:$0xff]  ;;  %v10627_v12 = vld [vmem:[#allocation82_spill] sm:$0xff] }
 0x243   :  { %10613 = vst [vmem:[#allocation74_spill] sm:$0xff] %v8073_v25  ;;  %10615 = vst [vmem:[#allocation77_spill] sm:$0xff] %v8077_v0  ;;  %v3165_v60 = vadd.f32 %v7706_v47, %v3163_v38  ;;  %v3275_v29 = vadd.f32 %v3274_v50, %v3273_v28  ;;  %v8102_v33 = vsub.f32 %v10625_v52, %v7186_v6  ;;  %v3375_v47 = vsel %vm664_vm2, %v3343_v5, 0.0  ;;  %v8119_v50 = vpop.f32.mrf.mxu1  ;;  %v10633_v28 = vld [vmem:[#allocation87_spill] sm:$0xff] }
 0x244   :  { %10617 = vst [vmem:[#allocation76_spill] sm:$0xff] %v8083_v8  ;;  %10619 = vst [vmem:[#allocation79_spill] sm:$0xff] %v8087_v20  ;;  %v3345_v18 = vmul.f32 %v8018_v63, %v8018_v63  ;;  %v8108_v24 = vsub.f32 %v10627_v12, %v7186_v6  ;;  %v8112_v14 = vsub.f32 %v10629_v1, %v7186_v6  ;;  %v3376_v63 = vsel %vm664_vm2, %v3344_v2, 0.0  ;;  %v10635_v1 = vld [vmem:[#allocation86_spill] sm:$0xff] }
 0x245   :  { %10621 = vst [vmem:[#allocation78_spill] sm:$0xff] %v8091_v15  ;;  %10623 = vst [vmem:[#allocation81_spill] sm:$0xff] %v8095_v3  ;;  %v3277_v38 = vadd.f32 %v3276_v4, %v3275_v29  ;;  %v8123_v52 = vsub.f32 %v10633_v28, %v7186_v6  ;;  %v3346_v12 = vmul.f32 %v8022_v44, %v8022_v44  ;;  %v8138_v5 = vpop.f32.mrf.mxu1 }
 0x246   :  { %10624 = vst [vmem:[#allocation80_spill] sm:$0xff] %v8097_v21  ;;  %10626 = vst [vmem:[#allocation83_spill] sm:$0xff] %v8102_v33  ;;  %v10631_v21 = vld [vmem:[#allocation84_spill] sm:$0xff]  ;;  %v8130_v59 = vsub.f32 %v10635_v1, %v7186_v6  ;;  %v3347_v29 = vmul.f32 %v8026_v61, %v8026_v61  ;;  %v3377_v4 = vadd.f32 %v3376_v63, %v3375_v47  ;;  %v3378_v1 = vsel %vm664_vm2, %v3345_v18, 0.0 }
 0x247   :  { %10628 = vst [vmem:[#allocation82_spill] sm:$0xff] %v8108_v24  ;;  %10630 = vst [vmem:[#allocation85_spill] sm:$0xff] %v8112_v14  ;;  %v8116_v41 = vsub.f32 %v10631_v21, %v7186_v6  ;;  %v10637_v21 = vld [vmem:[#allocation89_spill] sm:$0xff]  ;;  %v3167_v28 = vadd.f32 %v7709_v42, %v3165_v60  ;;  %v3279_v44 = vadd.f32 %v7963_v23, %v3277_v38  ;;  %v8151_v61 = vpop.f32.mrf.mxu1  ;;  %v3380_v18 = vsel %vm664_vm2, %v3346_v12, 0.0 }
 0x248   :  { %10634 = vst [vmem:[#allocation87_spill] sm:$0xff] %v8123_v52  ;;  %10636 = vst [vmem:[#allocation86_spill] sm:$0xff] %v8130_v59  ;;  %v8134_v46 = vsub.f32 %v10637_v21, %v7186_v6  ;;  %v3348_v2 = vmul.f32 %v8030_v35, %v8030_v35  ;;  %v3349_v59 = vmul.f32 %v8034_v62, %v8034_v62 }
 0x249   :  { %10632 = vst [vmem:[#allocation84_spill] sm:$0xff] %v8116_v41  ;;  %v3350_v21 = vmul.f32 %v8038_v27, %v8038_v27  ;;  %v3351_v63 = vmul.f32 %v8042_v17, %v8042_v17  ;;  %v3379_v47 = vadd.f32 %v3378_v1, %v3377_v4  ;;  %v3281_v42 = vadd.f32 %v7966_v51, %v3279_v44  ;;  %v8165_v17 = vpop.f32.mrf.mxu1 }
 0x24a   :  { %v3352_v23 = vmul.f32 %v8049_v31, %v8049_v31  ;;  %v3353_v60 = vmul.f32 %v8053_v11, %v8053_v11  ;;  %v3354_v38 = vmul.f32 %v8057_v54, %v8057_v54  ;;  %v3355_v27 = vmul.f32 %v8061_v13, %v8061_v13 }
 0x24b   :  { %v3356_v4 = vmul.f32 %v8065_v16, %v8065_v16  ;;  %v3381_v1 = vadd.f32 %v3380_v18, %v3379_v47  ;;  %v8168_v51 = vadd.f32 %v7712_v19, %v3167_v28  ;;  %v3283_v44 = vadd.f32 %v7971_v39, %v3281_v42  ;;  %v8184_v28 = vpop.f32.mrf.mxu1 }
 0x24c   :  { %v3357_v12 = vmul.f32 %v8073_v25, %v8073_v25  ;;  %v3382_v11 = vsel %vm664_vm2, %v3347_v29, 0.0  ;;  %v3358_v54 = vmul.f32 %v8077_v0, %v8077_v0  ;;  %v8178_v13 = vmul.f32 %v8083_v8, %v8083_v8 }
 0x24d   :  { %v8182_v47 = vmul.f32 %v8087_v20, %v8087_v20  ;;  %v3383_v19 = vadd.f32 %v3382_v11, %v3381_v1  ;;  %v3285_v39 = vadd.f32 %v7974_v36, %v3283_v44  ;;  %v8189_v42 = vmul.f32 %v8091_v15, %v8091_v15  ;;  %v8208_v44 = vpop.f32.mrf.mxu1 }
 0x24e   :  { %v8193_v29 = vmul.f32 %v8095_v3, %v8095_v3  ;;  %v3384_v18 = vsel %vm664_vm2, %v3348_v2, 0.0  ;;  %v8198_v8 = vmul.f32 %v8102_v33, %v8102_v33  ;;  %v8202_v11 = vmul.f32 %v8108_v24, %v8108_v24 }
 0x24f   :  { %v8206_v36 = vmul.f32 %v8112_v14, %v8112_v14  ;;  %v3385_v1 = vadd.f32 %v3384_v18, %v3383_v19  ;;  %v8212_v3 = vmul.f32 %v8116_v41, %v8116_v41  ;;  %v8216_v2 = vmul.f32 %v8123_v52, %v8123_v52  ;;  %v8223_v18 = vpop.f32.mrf.mxu1  ;;  %v8230_v52 = vld [vmem:[%s10003_s6] ss:$0 sm:$0xff] }
 0x250   :  { %v3386_v33 = vsel %vm664_vm2, %v3349_v59, 0.0  ;;  %v3388_v24 = vsel %vm664_vm2, %v3350_v21, 0.0  ;;  %v3390_v20 = vsel %vm664_vm2, %v3351_v63, 0.0  ;;  %v3392_v14 = vsel %vm664_vm2, %v3352_v23, 0.0 }
 0x251   :  { %v3387_v15 = vadd.f32 %v3386_v33, %v3385_v1  ;;  %v3394_v19 = vsel %vm664_vm2, %v3353_v60, 0.0  ;;  %v3287_v41 = vadd.f32 %v7977_v55, %v3285_v39  ;;  %v3396_v0 = vsel %vm664_vm2, %v3354_v38, 0.0  ;;  %v8242_v60 = vpop.f32.mrf.mxu1 }
 0x252   :  { %v1263_v59 = vadd.f32 %v8230_v52, %v7647_v34  ;;  %v1258_v33 = vadd.f32 %v8230_v52, %v7657_v56  ;;  %v1273_v63 = vadd.f32 %v8230_v52, %v7674_v53  ;;  %v1268_v55 = vadd.f32 %v8230_v52, %v7697_v37 }
 0x253   :  { %v3389_v21 = vadd.f32 %v3388_v24, %v3387_v15  ;;  %v1767_v23 = vadd.f32 %v8230_v52, %v7722_v10  ;;  %v3398_v38 = vsel %vm664_vm2, %v3355_v27, 0.0  ;;  %v3400_v39 = vsel %vm664_vm2, %v3356_v4, 0.0  ;;  %v8246_v16 = vpop.f32.mrf.mxu1 }
 0x254   :  { %v1305_v34 = vmax.f32 %v1263_v59, 0.0  ;;  %v1304_v1 = vmax.f32 %v1258_v33, 0.0  ;;  %v1307_v56 = vmax.f32 %v1273_v63, 0.0  ;;  %v1306_v15 = vmax.f32 %v1268_v55, 0.0 }
 0x255   :  { %v3391_v25 = vadd.f32 %v3390_v20, %v3389_v21  ;;  %v1921_v24 = vmax.f32 %v1767_v23, 0.0  ;;  %v3289_v53 = vadd.f32 %v7980_v32, %v3287_v41  ;;  %v8250_v37 = vsel %vm664_vm2, %v3357_v12, 0.0  ;;  %v8282_v27 = vpop.f32.mrf.mxu1 }
 0x256   :  { %4176 = vst.msk [vmem:[%s10004_s8 + $0x1e8] sm:$0xff] %vm664_vm2, %v1305_v34  ;;  %4175 = vst.msk [vmem:[%s10004_s8 + $0x1e0] sm:$0xff] %vm664_vm2, %v1304_v1  ;;  %v1762_v10 = vadd.f32 %v8230_v52, %v7745_v49  ;;  %v1777_v20 = vadd.f32 %v8230_v52, %v7773_v22  ;;  %v1772_v49 = vadd.f32 %v8230_v52, %v7792_v40  ;;  %v3406_v55 = vsel %vm664_vm2, %v8178_v13, 0.0  ;;  %v10638_v1 = vld [vmem:[#allocation131_spill] sm:$0xff] }
 0x257   :  { %v3393_v41 = vadd.f32 %v3392_v14, %v3391_v25  ;;  %4178 = vst.msk [vmem:[%s10004_s8 + $0x1f8] sm:$0xff] %vm664_vm2, %v1307_v56  ;;  %4177 = vst.msk [vmem:[%s10004_s8 + $0x1f0] sm:$0xff] %vm664_vm2, %v1306_v15  ;;  %v1787_v22 = vadd.f32 %v8230_v52, %v7813_v57  ;;  %v1782_v32 = vadd.f32 %v8230_v52, %v7831_v9  ;;  %v8285_v25 = vsel %vm664_vm2, %v3358_v54, 0.0  ;;  %v8289_v63 = vpop.f32.mrf.mxu1 }
 0x258   :  { %4278 = vst.msk [vmem:[%s10004_s8 + $0x208] sm:$0xff] %vm664_vm2, %v1921_v24  ;;  %v1920_v14 = vmax.f32 %v1762_v10, 0.0  ;;  %v1923_v4 = vmax.f32 %v1777_v20, 0.0  ;;  %v1797_v12 = vadd.f32 %v8230_v52, %v7853_v48  ;;  %v1922_v33 = vmax.f32 %v1772_v49, 0.0  ;;  %v10640_v20 = vld [vmem:[#allocation132_spill] sm:$0xff] }
 0x259   :  { %v3395_v59 = vadd.f32 %v3394_v19, %v3393_v41  ;;  %v1925_v21 = vmax.f32 %v1787_v22, 0.0  ;;  %v1924_v40 = vmax.f32 %v1782_v32, 0.0  ;;  %v3291_v57 = vadd.f32 %v7983_v30, %v3289_v53  ;;  %v10639_v53 = vld [vmem:[#allocation134_spill] sm:$0xff]  ;;  %v10641_v41 = vld [vmem:[#allocation133_spill] sm:$0xff]  ;;  %v10642_v32 = vld [vmem:[#allocation136_spill] sm:$0xff] }
 0x25a   :  { %4277 = vst.msk [vmem:[%s10004_s8 + $0x200] sm:$0xff] %vm664_vm2, %v1920_v14  ;;  %4280 = vst.msk [vmem:[%s10004_s8 + $0x218] sm:$0xff] %vm664_vm2, %v1923_v4  ;;  %v1927_v9 = vmax.f32 %v1797_v12, 0.0  ;;  %v1792_v48 = vadd.f32 %v8230_v52, %v7872_v45  ;;  %v1807_v54 = vadd.f32 %v8230_v52, %v7888_v26  ;;  %v1802_v45 = vadd.f32 %v8230_v52, %v7901_v43  ;;  %v10643_v4 = vld [vmem:[#allocation141_spill] sm:$0xff]  ;;  %v10644_v12 = vld [vmem:[#allocation64_spill] sm:$0xff] }
 0x25b   :  { %v3397_v19 = vadd.f32 %v3396_v0, %v3395_v59  ;;  %4279 = vst.msk [vmem:[%s10004_s8 + $0x210] sm:$0xff] %vm664_vm2, %v1922_v33  ;;  %4282 = vst.msk [vmem:[%s10004_s8 + $0x228] sm:$0xff] %vm664_vm2, %v1925_v21  ;;  %v1817_v26 = vadd.f32 %v8230_v52, %v7915_v58  ;;  %v1812_v30 = vadd.f32 %v8230_v52, %v7930_v7  ;;  %v8322_v0 = vpop.f32.mrf.mxu1  ;;  %v3408_v21 = vsel %vm664_vm2, %v8182_v47, 0.0 }
 0x25c   :  { %4281 = vst.msk [vmem:[%s10004_s8 + $0x220] sm:$0xff] %vm664_vm2, %v1924_v40  ;;  %4284 = vst.msk [vmem:[%s10004_s8 + $0x238] sm:$0xff] %vm664_vm2, %v1927_v9  ;;  %v1926_v23 = vmax.f32 %v1792_v48, 0.0  ;;  %v1929_v34 = vmax.f32 %v1807_v54, 0.0  ;;  %v1827_v43 = vadd.f32 %v8230_v52, %v10638_v1  ;;  %v1928_v58 = vmax.f32 %v1802_v45, 0.0  ;;  %v10645_v9 = vld [vmem:[#allocation75_spill] sm:$0xff] }
 0x25d   :  { %v3399_v56 = vadd.f32 %v3398_v38, %v3397_v19  ;;  %v1931_v15 = vmax.f32 %v1817_v26, 0.0  ;;  %v1930_v24 = vmax.f32 %v1812_v30, 0.0  ;;  %v8332_v7 = vpop.f32.mrf.mxu1  ;;  %v3293_v10 = vadd.f32 %v10639_v53, %v3291_v57  ;;  %v10647_v1 = vld [vmem:[#allocation80_spill] sm:$0xff] }
 0x25e   :  { %4283 = vst.msk [vmem:[%s10004_s8 + $0x230] sm:$0xff] %vm664_vm2, %v1926_v23  ;;  %4286 = vst.msk [vmem:[%s10004_s8 + $0x248] sm:$0xff] %vm664_vm2, %v1929_v34  ;;  %v1933_v13 = vmax.f32 %v1827_v43, 0.0  ;;  %v1822_v38 = vadd.f32 %v8230_v52, %v10640_v20  ;;  %v1837_v49 = vadd.f32 %v8230_v52, %v10641_v41  ;;  %v1832_v14 = vadd.f32 %v8230_v52, %v10642_v32  ;;  %v10646_v23 = vld [vmem:[#allocation135_spill] sm:$0xff] }
 0x25f   :  { %v3401_v22 = vadd.f32 %v3400_v39, %v3399_v56  ;;  %4285 = vst.msk [vmem:[%s10004_s8 + $0x240] sm:$0xff] %vm664_vm2, %v1928_v58  ;;  %4288 = vst.msk [vmem:[%s10004_s8 + $0x258] sm:$0xff] %vm664_vm2, %v1931_v15  ;;  %v1847_v39 = vadd.f32 %v8230_v52, %v10643_v4  ;;  %v1842_v59 = vadd.f32 %v8230_v52, %v10644_v12  ;;  %v8365_v33 = vpop.f32.mrf.mxu1  ;;  %v3412_v4 = vsel %vm664_vm2, %v8193_v29, 0.0 }
 0x260   :  { %4287 = vst.msk [vmem:[%s10004_s8 + $0x250] sm:$0xff] %vm664_vm2, %v1930_v24  ;;  %4290 = vst.msk [vmem:[%s10004_s8 + $0x268] sm:$0xff] %vm664_vm2, %v1933_v13  ;;  %v1932_v40 = vmax.f32 %v1822_v38, 0.0  ;;  %v1935_v57 = vmax.f32 %v1837_v49, 0.0  ;;  %v1857_v48 = vadd.f32 %v8230_v52, %v10645_v9  ;;  %v1934_v19 = vmax.f32 %v1832_v14, 0.0 }
 0x261   :  { %v3403_v54 = vadd.f32 %v8250_v37, %v3401_v22  ;;  %v1937_v45 = vmax.f32 %v1847_v39, 0.0  ;;  %v1936_v26 = vmax.f32 %v1842_v59, 0.0  ;;  %v5085_v30 = vpop.f32.mrf.mxu1  ;;  %v3295_v34 = vadd.f32 %v10646_v23, %v3293_v10 }
 0x262   :  { %4289 = vst.msk [vmem:[%s10004_s8 + $0x260] sm:$0xff] %vm664_vm2, %v1932_v40  ;;  %4292 = vst.msk [vmem:[%s10004_s8 + $0x278] sm:$0xff] %vm664_vm2, %v1935_v57  ;;  %v1939_v47 = vmax.f32 %v1857_v48, 0.0  ;;  %v1852_v37 = vadd.f32 %v8230_v52, %v10647_v1  ;;  %v1867_v43 = vadd.f32 %v8230_v52, %v8119_v50  ;;  %v1862_v50 = vadd.f32 %v8230_v52, %v8138_v5 }
 0x263   :  { %v3405_v56 = vadd.f32 %v8285_v25, %v3403_v54  ;;  %4291 = vst.msk [vmem:[%s10004_s8 + $0x270] sm:$0xff] %vm664_vm2, %v1934_v19  ;;  %4294 = vst.msk [vmem:[%s10004_s8 + $0x288] sm:$0xff] %vm664_vm2, %v1937_v45  ;;  %v1877_v25 = vadd.f32 %v8230_v52, %v8151_v61  ;;  %v1872_v58 = vadd.f32 %v8230_v52, %v8165_v17  ;;  %v2415_v15 = vpop.f32.mrf.mxu1  ;;  %v3410_v24 = vsel %vm664_vm2, %v8189_v42, 0.0  ;;  %v10648_v17 = vld [vmem:[#allocation137_spill] sm:$0xff] }
 0x264   :  { %4293 = vst.msk [vmem:[%s10004_s8 + $0x280] sm:$0xff] %vm664_vm2, %v1936_v26  ;;  %4296 = vst.msk [vmem:[%s10004_s8 + $0x298] sm:$0xff] %vm664_vm2, %v1939_v47  ;;  %v1938_v53 = vmax.f32 %v1852_v37, 0.0  ;;  %v1941_v10 = vmax.f32 %v1867_v43, 0.0  ;;  %v1887_v5 = vadd.f32 %v8230_v52, %v8184_v28  ;;  %v1940_v20 = vmax.f32 %v1862_v50, 0.0 }
 0x265   :  { %v3407_v13 = vadd.f32 %v3406_v55, %v3405_v56  ;;  %v1943_v61 = vmax.f32 %v1877_v25, 0.0  ;;  %v1942_v38 = vmax.f32 %v1872_v58, 0.0  ;;  %v5088_v41 = vpop.f32.mrf.mxu1  ;;  %v3297_v49 = vadd.f32 %v10648_v17, %v3295_v34  ;;  %v10650_v58 = vld [vmem:[#allocation139_spill] sm:$0xff] }
 0x266   :  { %4295 = vst.msk [vmem:[%s10004_s8 + $0x290] sm:$0xff] %vm664_vm2, %v1938_v53  ;;  %4298 = vst.msk [vmem:[%s10004_s8 + $0x2a8] sm:$0xff] %vm664_vm2, %v1941_v10  ;;  %v1945_v42 = vmax.f32 %v1887_v5, 0.0  ;;  %v1882_v28 = vadd.f32 %v8230_v52, %v8208_v44  ;;  %v1897_v55 = vadd.f32 %v8230_v52, %v8223_v18  ;;  %v1892_v44 = vadd.f32 %v8230_v52, %v8242_v60 }
 0x267   :  { %v3409_v22 = vadd.f32 %v3408_v21, %v3407_v13  ;;  %4297 = vst.msk [vmem:[%s10004_s8 + $0x2a0] sm:$0xff] %vm664_vm2, %v1940_v20  ;;  %4300 = vst.msk [vmem:[%s10004_s8 + $0x2b8] sm:$0xff] %vm664_vm2, %v1943_v61  ;;  %v1907_v18 = vadd.f32 %v8230_v52, %v8246_v16  ;;  %v1902_v32 = vadd.f32 %v8230_v52, %v8282_v27  ;;  %v2425_v14 = vpop.f32.mrf.mxu1  ;;  %v10649_v27 = vld [vmem:[#allocation138_spill] sm:$0xff]  ;;  %v3414_v26 = vsel %vm664_vm2, %v8198_v8, 0.0 }
 0x268   :  { %4299 = vst.msk [vmem:[%s10004_s8 + $0x2b0] sm:$0xff] %vm664_vm2, %v1942_v38  ;;  %4302 = vst.msk [vmem:[%s10004_s8 + $0x2c8] sm:$0xff] %vm664_vm2, %v1945_v42  ;;  %v1944_v39 = vmax.f32 %v1882_v28, 0.0  ;;  %v1947_v12 = vmax.f32 %v1897_v55, 0.0  ;;  %v1917_v60 = vadd.f32 %v8230_v52, %v8289_v63  ;;  %v1946_v21 = vmax.f32 %v1892_v44, 0.0  ;;  %v10651_v38 = vld [vmem:[#allocation88_spill] sm:$0xff] }
 0x269   :  { %v3411_v59 = vadd.f32 %v3410_v24, %v3409_v22  ;;  %v1949_v16 = vmax.f32 %v1907_v18, 0.0  ;;  %v1948_v40 = vmax.f32 %v1902_v32, 0.0  ;;  %v5091_v57 = vpop.f32.mrf.mxu1  ;;  %v3299_v9 = vadd.f32 %v10649_v27, %v3297_v49  ;;  %v10652_v28 = vld [vmem:[#allocation86_spill] sm:$0xff]  ;;  %v10653_v32 = vld [vmem:[#allocation140_spill] sm:$0xff] }
 0x26a   :  { %4301 = vst.msk [vmem:[%s10004_s8 + $0x2c0] sm:$0xff] %vm664_vm2, %v1944_v39  ;;  %4304 = vst.msk [vmem:[%s10004_s8 + $0x2d8] sm:$0xff] %vm664_vm2, %v1947_v12  ;;  %v1951_v29 = vmax.f32 %v1917_v60, 0.0  ;;  %v1912_v63 = vadd.f32 %v8230_v52, %v8322_v0  ;;  %v2411_v48 = vadd.f32 %v8230_v52, %v8332_v7  ;;  %v2406_v0 = vadd.f32 %v8230_v52, %v8365_v33 }
 0x26b   :  { %v3413_v54 = vadd.f32 %v3412_v4, %v3411_v59  ;;  %4303 = vst.msk [vmem:[%s10004_s8 + $0x2d0] sm:$0xff] %vm664_vm2, %v1946_v21  ;;  %4306 = vst.msk [vmem:[%s10004_s8 + $0x2e8] sm:$0xff] %vm664_vm2, %v1949_v16  ;;  %v2421_v7 = vadd.f32 %v8230_v52, %v5085_v30  ;;  %v2416_v19 = vadd.f32 %v8230_v52, %v2415_v15  ;;  %v2435_v45 = vpop.f32.mrf.mxu1  ;;  %v3416_v56 = vsel %vm664_vm2, %v8202_v11, 0.0  ;;  %v10654_v4 = vld [vmem:[#allocation91_spill] sm:$0xff] }
 0x26c   :  { %4305 = vst.msk [vmem:[%s10004_s8 + $0x2e0] sm:$0xff] %vm664_vm2, %v1948_v40  ;;  %4308 = vst.msk [vmem:[%s10004_s8 + $0x2f8] sm:$0xff] %vm664_vm2, %v1951_v29  ;;  %v1950_v23 = vmax.f32 %v1912_v63, 0.0  ;;  %v2565_v34 = vmax.f32 %v2411_v48, 0.0  ;;  %v2431_v47 = vadd.f32 %v8230_v52, %v5088_v41  ;;  %v2564_v37 = vmax.f32 %v2406_v0, 0.0  ;;  %v10655_v40 = vld [vmem:[#allocation130_spill] sm:$0xff] }
 0x26d   :  { %v3415_v1 = vadd.f32 %v3414_v26, %v3413_v54  ;;  %v2567_v33 = vmax.f32 %v2421_v7, 0.0  ;;  %v2566_v43 = vmax.f32 %v2416_v19, 0.0  ;;  %v5094_v30 = vpop.f32.mrf.mxu1  ;;  %v2426_v50 = vadd.f32 %v8230_v52, %v2425_v14  ;;  %v10658_v26 = vld [vmem:[#allocation93_spill] sm:$0xff] }
 0x26e   :  { %4307 = vst.msk [vmem:[%s10004_s8 + $0x2f0] sm:$0xff] %vm664_vm2, %v1950_v23  ;;  %4408 = vst.msk [vmem:[%s10004_s8 + $0x308] sm:$0xff] %vm664_vm2, %v2565_v34  ;;  %v2569_v8 = vmax.f32 %v2431_v47, 0.0  ;;  %v2441_v25 = vadd.f32 %v8230_v52, %v5091_v57  ;;  %v3301_v15 = vadd.f32 %v10650_v58, %v3299_v9  ;;  %v3418_v11 = vsel %vm664_vm2, %v8206_v36, 0.0  ;;  %v10657_v9 = vld [vmem:[#allocation90_spill] sm:$0xff] }
 0x26f   :  { %v3417_v24 = vadd.f32 %v3416_v56, %v3415_v1  ;;  %4407 = vst.msk [vmem:[%s10004_s8 + $0x300] sm:$0xff] %vm664_vm2, %v2564_v37  ;;  %4410 = vst.msk [vmem:[%s10004_s8 + $0x318] sm:$0xff] %vm664_vm2, %v2567_v33  ;;  %v2436_v53 = vadd.f32 %v8230_v52, %v2435_v45  ;;  %v2445_v10 = vpop.f32.mrf.mxu1  ;;  %v2568_v36 = vmax.f32 %v2426_v50, 0.0  ;;  %v2451_v13 = vadd.f32 %v8230_v52, %v5094_v30  ;;  %v10659_v56 = vld [vmem:[#allocation92_spill] sm:$0xff] }
 0x270   :  { %4409 = vst.msk [vmem:[%s10004_s8 + $0x310] sm:$0xff] %vm664_vm2, %v2566_v43  ;;  %4412 = vst.msk [vmem:[%s10004_s8 + $0x328] sm:$0xff] %vm664_vm2, %v2569_v8  ;;  %v2571_v5 = vmax.f32 %v2441_v25, 0.0  ;;  %v2446_v20 = vadd.f32 %v8230_v52, %v2445_v10  ;;  %v3170_v61 = vrot.slane %v8168_v51, 4  ;;  %v8528_v41 = vsub.f32 %v10651_v38, %v7186_v6 }
 0x271   :  { %v3419_v17 = vadd.f32 %v3418_v11, %v3417_v24  ;;  %v2570_v49 = vmax.f32 %v2436_v53, 0.0  ;;  %v5097_v42 = vpop.f32.mrf.mxu1  ;;  %v3368_v55 = vmul.f32 %v10652_v28, %v10652_v28  ;;  %v3420_v22 = vsel %vm664_vm2, %v8212_v3, 0.0  ;;  %4411 = vst.msk [vmem:[%s10004_s8 + $0x320] sm:$0xff] %vm664_vm2, %v2568_v36 }
 0x272   :  { %4414 = vst.msk [vmem:[%s10004_s8 + $0x338] sm:$0xff] %vm664_vm2, %v2571_v5  ;;  %v2573_v44 = vmax.f32 %v2451_v13, 0.0  ;;  %v2572_v18 = vmax.f32 %v2446_v20, 0.0  ;;  %v3303_v14 = vadd.f32 %v10653_v32, %v3301_v15  ;;  %v8545_v39 = vsub.f32 %v10654_v4, %v7186_v6 }
 0x273   :  { %v3421_v12 = vadd.f32 %v3420_v22, %v3419_v17  ;;  %4413 = vst.msk [vmem:[%s10004_s8 + $0x330] sm:$0xff] %vm664_vm2, %v2570_v49  ;;  %v2455_v3 = vpop.f32.mrf.mxu1  ;;  %v3369_v60 = vmul.f32 %v8134_v46, %v8134_v46  ;;  %v3422_v59 = vsel %vm664_vm2, %v8216_v2, 0.0  ;;  %v2461_v21 = vadd.f32 %v8230_v52, %v5097_v42 }
 0x274   :  { %4416 = vst.msk [vmem:[%s10004_s8 + $0x348] sm:$0xff] %vm664_vm2, %v2573_v44  ;;  %4415 = vst.msk [vmem:[%s10004_s8 + $0x340] sm:$0xff] %vm664_vm2, %v2572_v18  ;;  %v2456_v16 = vadd.f32 %v8230_v52, %v2455_v3  ;;  %v10656_v57 = vrot.slane %v10655_v40, 4  ;;  %v3171_v2 = vadd.f32 %v3170_v61, %v8168_v51  ;;  %v8571_v29 = vsub.f32 %v10657_v9, %v7186_v6 }
 0x275   :  { %v3423_v63 = vadd.f32 %v3422_v59, %v3421_v12  ;;  %v5100_v48 = vpop.f32.mrf.mxu1  ;;  %v3370_v54 = vmul.f32 %v8528_v41, %v8528_v41  ;;  %v3424_v0 = vsel %vm664_vm2, %v3368_v55, 0.0  ;;  %v2575_v7 = vmax.f32 %v2461_v21, 0.0 }
 0x276   :  { %v3038_v27 = vadd.f32 %v10656_v57, %v10655_v40  ;;  %v2574_v19 = vmax.f32 %v2456_v16, 0.0  ;;  %v3304_v45 = vrot.slane %v3303_v14, 4  ;;  %v8578_v23 = vsub.f32 %v10658_v26, %v7186_v6 }
 0x277   :  { %v3425_v34 = vadd.f32 %v3424_v0, %v3423_v63  ;;  %v2465_v51 = vpop.f32.mrf.mxu1  ;;  %v3371_v47 = vmul.f32 %v8545_v39, %v8545_v39  ;;  %v3426_v1 = vsel %vm664_vm2, %v3369_v60, 0.0  ;;  %4418 = vst.msk [vmem:[%s10004_s8 + $0x358] sm:$0xff] %vm664_vm2, %v2575_v7  ;;  %v2471_v37 = vadd.f32 %v8230_v52, %v5100_v48 }
 0x278   :  { %4417 = vst.msk [vmem:[%s10004_s8 + $0x350] sm:$0xff] %vm664_vm2, %v2574_v19  ;;  %v2466_v33 = vadd.f32 %v8230_v52, %v2465_v51  ;;  %v3039_v43 = vrot.slane %v3038_v27, 2  ;;  %v3172_v30 = vrot.slane %v3171_v2, 2  ;;  %v8595_v8 = vsub.f32 %v10659_v56, %v7186_v6 }
 0x279   :  { %v3427_v50 = vadd.f32 %v3426_v1, %v3425_v34  ;;  %v5103_v25 = vpop.f32.mrf.mxu1  ;;  %v3372_v58 = vmul.f32 %v8571_v29, %v8571_v29  ;;  %v3428_v15 = vsel %vm664_vm2, %v3370_v54, 0.0  ;;  %v2577_v24 = vmax.f32 %v2471_v37, 0.0 }
 0x27a   :  { %v2576_v11 = vmax.f32 %v2466_v33, 0.0  ;;  %v3305_v53 = vadd.f32 %v3304_v45, %v3303_v14  ;;  %v3373_v5 = vmul.f32 %v8578_v23, %v8578_v23  ;;  %v3430_v13 = vsel %vm664_vm2, %v3371_v47, 0.0 }
 0x27b   :  { %v3429_v10 = vadd.f32 %v3428_v15, %v3427_v50  ;;  %v2475_v36 = vpop.f32.mrf.mxu1  ;;  %4420 = vst.msk [vmem:[%s10004_s8 + $0x368] sm:$0xff] %vm664_vm2, %v2577_v24  ;;  %v2481_v6 = vadd.f32 %v8230_v52, %v5103_v25  ;;  %v3040_v61 = vadd.f32 %v3039_v43, %v3038_v27  ;;  %v3173_v38 = vadd.f32 %v3172_v30, %v3171_v2 }
 0x27c   :  { %4419 = vst.msk [vmem:[%s10004_s8 + $0x360] sm:$0xff] %vm664_vm2, %v2576_v11  ;;  %v2476_v20 = vadd.f32 %v8230_v52, %v2475_v36  ;;  %v3374_v42 = vmul.f32 %v8595_v8, %v8595_v8  ;;  %v3432_v55 = vsel %vm664_vm2, %v3372_v58, 0.0  ;;  %v3306_v18 = vrot.slane %v3305_v53, 2 }
 0x27d   :  { %v3431_v17 = vadd.f32 %v3430_v13, %v3429_v10  ;;  %v5106_v49 = vpop.f32.mrf.mxu1  ;;  %v2579_v22 = vmax.f32 %v2481_v6, 0.0  ;;  %v3434_v4 = vsel %vm664_vm2, %v3373_v5, 0.0  ;;  %v3041_v60 = vrot.slane %v3040_v61, 1 }
 0x27e   :  { %v2578_v44 = vmax.f32 %v2476_v20, 0.0  ;;  %v2491_v12 = vadd.f32 %v8230_v52, %v5106_v49  ;;  %v3174_v59 = vrot.slane %v3173_v38, 1  ;;  %v3436_v40 = vsel %vm664_vm2, %v3374_v42, 0.0 }
 0x27f   :  { %v3433_v32 = vadd.f32 %v3432_v55, %v3431_v17  ;;  %v2485_v14 = vpop.f32.mrf.mxu1  ;;  %4422 = vst.msk [vmem:[%s10004_s8 + $0x378] sm:$0xff] %vm664_vm2, %v2579_v22  ;;  %v3307_v2 = vadd.f32 %v3306_v18, %v3305_v53  ;;  %v3042_v0 = vadd.f32 %v3041_v60, %v3040_v61 }
 0x280   :  { %4421 = vst.msk [vmem:[%s10004_s8 + $0x370] sm:$0xff] %vm664_vm2, %v2578_v44  ;;  %v2486_v3 = vadd.f32 %v8230_v52, %v2485_v14  ;;  %v2581_v57 = vmax.f32 %v2491_v12, 0.0  ;;  %v3175_v7 = vadd.f32 %v3174_v59, %v3173_v38 }
 0x281   :  { %v3435_v21 = vadd.f32 %v3434_v4, %v3433_v32  ;;  %v5109_v16 = vpop.f32.mrf.mxu1  ;;  %v3308_v51 = vrot.slane %v3307_v2, 1 }
 0x282   :  { %v2580_v27 = vmax.f32 %v2486_v3, 0.0  ;;  %4424 = vst.msk [vmem:[%s10004_s8 + $0x388] sm:$0xff] %vm664_vm2, %v2581_v57  ;;  %v2501_v48 = vadd.f32 %v8230_v52, %v5109_v16  ;;  %v3176_v43 = vadd.f32 %v3175_v7, %v3042_v0 }
 0x283   :  { %v3437_v9 = vadd.f32 %v3436_v40, %v3435_v21  ;;  %v2495_v63 = vpop.f32.mrf.mxu1  ;;  %v3309_v58 = vadd.f32 %v3308_v51, %v3307_v2  ;;  %v3451_v2 = vlaneseq  ;;  %v10660_v51 = vld [vmem:[#allocation14_spill] sm:$0xff] }
 0x284   :  { %4423 = vst.msk [vmem:[%s10004_s8 + $0x380] sm:$0xff] %vm664_vm2, %v2580_v27  ;;  %v2496_v54 = vadd.f32 %v8230_v52, %v2495_v63  ;;  %v2583_v26 = vmax.f32 %v2501_v48, 0.0 }
 0x285   :  { %v3438_v19 = vrot.slane %v3437_v9, 4  ;;  %v5112_v45 = vpop.f32.mrf.mxu1  ;;  %v3310_v10 = vadd.f32 %v3309_v58, %v3176_v43  ;;  %v3452_v7 = vshrl.u32 %v3451_v2, 7  ;;  %v10665_v58 = vld [vmem:[#allocation95_spill] sm:$0xff] }
 0x286   :  { %v2582_v34 = vmax.f32 %v2496_v54, 0.0  ;;  %4426 = vst.msk [vmem:[%s10004_s8 + $0x398] sm:$0xff] %vm664_vm2, %v2583_v26  ;;  %v2511_v37 = vadd.f32 %v8230_v52, %v5112_v45 }
 0x287   :  { %v3439_v47 = vadd.f32 %v3438_v19, %v3437_v9  ;;  %v2505_v1 = vpop.f32.mrf.mxu1  ;;  %v3448_v19 = vld [vmem:[%s10006_s3] sm:$0x1]  ;;  %v3453_v45 = vsub.s32 0, %v3452_v7 }
 0x288   :  { %4425 = vst.msk [vmem:[%s10004_s8 + $0x390] sm:$0xff] %vm664_vm2, %v2582_v34  ;;  %v2506_v33 = vadd.f32 %v8230_v52, %v2505_v1  ;;  %v2585_v50 = vmax.f32 %v2511_v37, 0.0  ;;  %v10661_v1 = vld [vmem:[#allocation18_spill] sm:$0xff] }
 0x289   :  { %v3440_v30 = vrot.slane %v3439_v47, 2  ;;  %v5115_v56 = vpop.f32.mrf.mxu1 }
 0x28a   :  { %v2584_v25 = vmax.f32 %v2506_v33, 0.0  ;;  %4428 = vst.msk [vmem:[%s10004_s8 + $0x3a8] sm:$0xff] %vm664_vm2, %v2585_v50  ;;  %v2521_v11 = vadd.f32 %v8230_v52, %v5115_v56  ;;  %v10662_v33 = vld [vmem:[#allocation20_spill] sm:$0xff]  ;;  %v10664_v50 = vld [vmem:[#allocation26_spill] sm:$0xff] }
 0x28b   :  { %v3441_v15 = vadd.f32 %v3440_v30, %v3439_v47  ;;  %v2515_v24 = vpop.f32.mrf.mxu1  ;;  %v10663_v30 = vld [vmem:[#allocation94_spill] sm:$0xff] }
 0x28c   :  { %4427 = vst.msk [vmem:[%s10004_s8 + $0x3a0] sm:$0xff] %vm664_vm2, %v2584_v25  ;;  %v2516_v53 = vadd.f32 %v8230_v52, %v2515_v24  ;;  %v2587_v13 = vmax.f32 %v2521_v11, 0.0  ;;  %v10666_v24 = vld [vmem:[#allocation96_spill] sm:$0xff] }
 0x28d   :  { %v3442_v36 = vrot.slane %v3441_v15, 1  ;;  %v5118_v5 = vpop.f32.mrf.mxu1 }
 0x28e   :  { %v2586_v6 = vmax.f32 %v2516_v53, 0.0  ;;  %4430 = vst.msk [vmem:[%s10004_s8 + $0x3b8] sm:$0xff] %vm664_vm2, %v2587_v13  ;;  %v2531_v38 = vadd.f32 %v8230_v52, %v5118_v5  ;;  %v10667_v53 = vld [vmem:[#allocation97_spill] sm:$0xff]  ;;  %v10669_v13 = vld [vmem:[#allocation99_spill] sm:$0xff] }
 0x28f   :  { %v3443_v20 = vadd.f32 %v3442_v36, %v3441_v15  ;;  %v2525_v61 = vpop.f32.mrf.mxu1  ;;  %v10668_v36 = vld [vmem:[#allocation98_spill] sm:$0xff] }
 0x290   :  { %4429 = vst.msk [vmem:[%s10004_s8 + $0x3b0] sm:$0xff] %vm664_vm2, %v2586_v6  ;;  %v2526_v17 = vadd.f32 %v8230_v52, %v2525_v61  ;;  %v2589_v55 = vmax.f32 %v2531_v38, 0.0  ;;  %v10671_v38 = vld [vmem:[#allocation101_spill] sm:$0xff] }
 0x291   :  { %v3444_v49 = vadd.f32 %v3443_v20, %v3310_v10  ;;  %v5121_v42 = vpop.f32.mrf.mxu1  ;;  %v10670_v20 = vld [vmem:[#allocation100_spill] sm:$0xff] }
 0x292   :  { %v2588_v22 = vmax.f32 %v2526_v17, 0.0  ;;  %4432 = vst.msk [vmem:[%s10004_s8 + $0x3c8] sm:$0xff] %vm664_vm2, %v2589_v55  ;;  %v2541_v32 = vadd.f32 %v8230_v52, %v5121_v42  ;;  %v10673_v55 = vld [vmem:[#allocation103_spill] sm:$0xff] }
 0x293   :  { %v3445_v44 = vmul.f32 0.0009765625, %v3444_v49  ;;  %v2535_v18 = vpop.f32.mrf.mxu1  ;;  %v10672_v49 = vld [vmem:[#allocation102_spill] sm:$0xff] }
 0x294   :  { %4431 = vst.msk [vmem:[%s10004_s8 + $0x3c0] sm:$0xff] %vm664_vm2, %v2588_v22  ;;  %v2536_v14 = vadd.f32 %v8230_v52, %v2535_v18  ;;  %v2591_v3 = vmax.f32 %v2541_v32, 0.0  ;;  %v10675_v32 = vld [vmem:[#allocation105_spill] sm:$0xff] }
 0x295   :  { %v3446_v4 = vadd.f32 1e-05, %v3445_v44  ;;  %v5124_v12 = vpop.f32.mrf.mxu1  ;;  %v10674_v44 = vld [vmem:[#allocation104_spill] sm:$0xff] }
 0x296   :  { %v2590_v60 = vmax.f32 %v2536_v14, 0.0  ;;  %4434 = vst.msk [vmem:[%s10004_s8 + $0x3d8] sm:$0xff] %vm664_vm2, %v2591_v3  ;;  %v2551_v21 = vadd.f32 %v8230_v52, %v5124_v12  ;;  %v10677_v3 = vld [vmem:[#allocation107_spill] sm:$0xff] }
 0x297   :  { %5128 = vrsqrt.f32 %v3446_v4  ;;  %v2545_v59 = vpop.f32.mrf.mxu1  ;;  %v10676_v4 = vld [vmem:[#allocation106_spill] sm:$0xff] }
 0x298   :  { %4433 = vst.msk [vmem:[%s10004_s8 + $0x3d0] sm:$0xff] %vm664_vm2, %v2590_v60  ;;  %v2546_v16 = vadd.f32 %v8230_v52, %v2545_v59  ;;  %v2593_v57 = vmax.f32 %v2551_v21, 0.0  ;;  %v10678_v59 = vld [vmem:[#allocation108_spill] sm:$0xff] }
 0x299   :  { %v5127_v40 = vpop.f32.mrf.mxu1 }
 0x29a   :  { %v2592_v27 = vmax.f32 %v2546_v16, 0.0  ;;  %4436 = vst.msk [vmem:[%s10004_s8 + $0x3e8] sm:$0xff] %vm664_vm2, %v2593_v57  ;;  %v2561_v63 = vadd.f32 %v8230_v52, %v5127_v40  ;;  %v10679_v16 = vld [vmem:[#allocation109_spill] sm:$0xff]  ;;  %v8754_v57 = vld [vmem:[%s10007_s4] ss:$0 sm:$0xff] }
 0x29b   :  { %v2555_v9 = vpop.f32.mrf.mxu1 }
 0x29c   :  { %4435 = vst.msk [vmem:[%s10004_s8 + $0x3e0] sm:$0xff] %vm664_vm2, %v2592_v27  ;;  %v2556_v48 = vadd.f32 %v8230_v52, %v2555_v9  ;;  %v2595_v54 = vmax.f32 %v2561_v63, 0.0  ;;  %v10680_v27 = vld [vmem:[#allocation110_spill] sm:$0xff]  ;;  %v10681_v9 = vld [vmem:[#allocation111_spill] sm:$0xff] }
 0x29e   :  { %v2594_v0 = vmax.f32 %v2556_v48, 0.0  ;;  %4438 = vst.msk [vmem:[%s10004_s8 + $0x3f8] sm:$0xff] %vm664_vm2, %v2595_v54  ;;  %v10682_v48 = vld [vmem:[#allocation112_spill] sm:$0xff] }
 0x2a0   :  { %4437 = vst.msk [vmem:[%s10004_s8 + $0x3f0] sm:$0xff] %vm664_vm2, %v2594_v0  ;;  %v10683_v0 = vld [vmem:[#allocation113_spill] sm:$0xff] }
 0x2a4   :  { %v5129_v26 = vpop.eup %5128 }
 0x2a5   :  { %v3449_v52 = vmul.f32 %v5129_v26, %v3448_v19  ;;  %v10684_v19 = vld [vmem:[#allocation114_spill] sm:$0xff]  ;;  %v10685_v26 = vld [vmem:[#allocation115_spill] sm:$0xff] }
 0x2a7   :  { %v8709_v34 = vrot.slane %v3449_v52, %v3453_v45 }
 0x2a9   :  { %v3455_v47 = vmul.f32 %v8709_v34, %v10660_v51  ;;  %v3456_v37 = vmul.f32 %v8709_v34, %v10661_v1  ;;  %v3457_v43 = vmul.f32 %v8709_v34, %v10662_v33  ;;  %v3458_v56 = vmul.f32 %v8709_v34, %v10663_v30  ;;  %v10686_v51 = vld [vmem:[#allocation116_spill] sm:$0xff]  ;;  %v10687_v33 = vld [vmem:[#allocation117_spill] sm:$0xff] }
 0x2aa   :  { %v3459_v25 = vmul.f32 %v8709_v34, %v10664_v50  ;;  %v3460_v15 = vmul.f32 %v8709_v34, %v10665_v58  ;;  %v3461_v11 = vmul.f32 %v8709_v34, %v10666_v24  ;;  %v3462_v10 = vmul.f32 %v8709_v34, %v10667_v53  ;;  %v10688_v50 = vld [vmem:[#allocation118_spill] sm:$0xff]  ;;  %v10689_v24 = vld [vmem:[#allocation119_spill] sm:$0xff] }
 0x2ab   :  { %v3463_v5 = vmul.f32 %v8709_v34, %v10668_v36  ;;  %v3464_v6 = vmul.f32 %v8709_v34, %v10669_v13  ;;  %v3465_v61 = vmul.f32 %v8709_v34, %v10670_v20  ;;  %v3466_v17 = vmul.f32 %v8709_v34, %v10671_v38  ;;  %v10690_v36 = vld [vmem:[#allocation120_spill] sm:$0xff]  ;;  %v10691_v20 = vld [vmem:[#allocation121_spill] sm:$0xff] }
 0x2ac   :  { %v3467_v42 = vmul.f32 %v8709_v34, %v10672_v49  ;;  %v3468_v22 = vmul.f32 %v8709_v34, %v10673_v55  ;;  %v3469_v18 = vmul.f32 %v8709_v34, %v10674_v44  ;;  %v3470_v14 = vmul.f32 %v8709_v34, %v10675_v32 }
 0x2ad   :  { %v3471_v12 = vmul.f32 %v8709_v34, %v10676_v4  ;;  %v3472_v60 = vmul.f32 %v8709_v34, %v10677_v3  ;;  %v3473_v21 = vmul.f32 %v8709_v34, %v10678_v59  ;;  %v3474_v40 = vmul.f32 %v8709_v34, %v10679_v16 }
 0x2ae   :  { %v3475_v2 = vmul.f32 %v8709_v34, %v10680_v27  ;;  %v3476_v63 = vmul.f32 %v8709_v34, %v10681_v9  ;;  %v3477_v54 = vmul.f32 %v8709_v34, %v10682_v48  ;;  %v3478_v7 = vmul.f32 %v8709_v34, %v10683_v0  ;;  %v10729_v0 = vld [vmem:[#allocation127_spill] sm:$0xff]  ;;  %v10731_v48 = vld [vmem:[#allocation37_spill] sm:$0xff] }
 0x2af   :  { %v3479_v45 = vmul.f32 %v8709_v34, %v10684_v19  ;;  %v3480_v52 = vmul.f32 %v8709_v34, %v10685_v26  ;;  %v3481_v1 = vmul.f32 %v8709_v34, %v10686_v51  ;;  %v3482_v30 = vmul.f32 %v8709_v34, %v10687_v33  ;;  %v10721_v51 = vld [vmem:[#allocation17_spill] sm:$0xff]  ;;  %v10725_v26 = vld [vmem:[#allocation123_spill] sm:$0xff] }
 0x2b0   :  { %v3483_v58 = vmul.f32 %v8709_v34, %v10688_v50  ;;  %v3484_v53 = vmul.f32 %v8709_v34, %v10689_v24  ;;  %v3485_v13 = vmul.f32 %v8709_v34, %v10690_v36  ;;  %v3486_v38 = vmul.f32 %v8709_v34, %v10691_v20  ;;  %v10722_v36 = vld [vmem:[#allocation22_spill] sm:$0xff]  ;;  %v10727_v19 = vld [vmem:[#allocation125_spill] sm:$0xff] }
 0x2b1   :  { %v8781_v49 = vadd.f32 %v8754_v57, %v3455_v47  ;;  %v8784_v55 = vadd.f32 %v8754_v57, %v3456_v37  ;;  %v8787_v44 = vadd.f32 %v8754_v57, %v3457_v43  ;;  %v8790_v32 = vadd.f32 %v8754_v57, %v3458_v56 }
 0x2b2   :  { %v8793_v4 = vadd.f32 %v8754_v57, %v3459_v25  ;;  %v8796_v3 = vadd.f32 %v8754_v57, %v3460_v15  ;;  %v8799_v59 = vadd.f32 %v8754_v57, %v3461_v11  ;;  %v8802_v47 = vadd.f32 %v8754_v57, %v3462_v10 }
 0x2b3   :  { %v8805_v37 = vadd.f32 %v8754_v57, %v3463_v5  ;;  %v8808_v43 = vadd.f32 %v8754_v57, %v3464_v6  ;;  %v8811_v56 = vadd.f32 %v8754_v57, %v3465_v61  ;;  %v8814_v25 = vadd.f32 %v8754_v57, %v3466_v17 }
 0x2b4   :  { %10692 = vst [vmem:[#allocation89_spill] sm:$0xff] %v8796_v3  ;;  %10693 = vst [vmem:[#allocation131_spill] sm:$0xff] %v8799_v59  ;;  %v8817_v15 = vadd.f32 %v8754_v57, %v3467_v42  ;;  %v8820_v11 = vadd.f32 %v8754_v57, %v3468_v22  ;;  %v8823_v10 = vadd.f32 %v8754_v57, %v3469_v18  ;;  %v10809_v59 = vld [vmem:[#allocation7_spill] sm:$0xff] }
 0x2b5   :  { %10694 = vst [vmem:[#allocation134_spill] sm:$0xff] %v8802_v47  ;;  %10695 = vst [vmem:[#allocation132_spill] sm:$0xff] %v8805_v37  ;;  %v8826_v5 = vadd.f32 %v8754_v57, %v3470_v14  ;;  %v8829_v6 = vadd.f32 %v8754_v57, %v3471_v12  ;;  %v8832_v61 = vadd.f32 %v8754_v57, %v3472_v60  ;;  %v10805_v37 = vld [vmem:[#allocation15_spill] sm:$0xff]  ;;  %v10807_v47 = vld [vmem:[#allocation21_spill] sm:$0xff] }
 0x2b6   :  { %10696 = vst [vmem:[#allocation133_spill] sm:$0xff] %v8808_v43  ;;  %10697 = vst [vmem:[#allocation136_spill] sm:$0xff] %v8811_v56  ;;  %v8835_v17 = vadd.f32 %v8754_v57, %v3473_v21  ;;  %v8838_v42 = vadd.f32 %v8754_v57, %v3474_v40  ;;  %v8841_v22 = vadd.f32 %v8754_v57, %v3475_v2  ;;  %v10803_v43 = vld [vmem:[#allocation11_spill] sm:$0xff] }
 0x2b7   :  { %10698 = vst [vmem:[#allocation141_spill] sm:$0xff] %v8814_v25  ;;  %10699 = vst [vmem:[#allocation64_spill] sm:$0xff] %v8817_v15  ;;  %v8844_v18 = vadd.f32 %v8754_v57, %v3476_v63  ;;  %v8847_v14 = vadd.f32 %v8754_v57, %v3477_v54  ;;  %v8850_v12 = vadd.f32 %v8754_v57, %v3478_v7  ;;  %v10728_v7 = vld [vmem:[#allocation126_spill] sm:$0xff]  ;;  %v10730_v54 = vld [vmem:[#allocation36_spill] sm:$0xff] }
 0x2b8   :  { %10700 = vst [vmem:[#allocation75_spill] sm:$0xff] %v8820_v11  ;;  %10701 = vst [vmem:[#allocation135_spill] sm:$0xff] %v8823_v10  ;;  %v8853_v60 = vadd.f32 %v8754_v57, %v3479_v45  ;;  %v8856_v21 = vadd.f32 %v8754_v57, %v3480_v52  ;;  %v8859_v16 = vadd.f32 %v8754_v57, %v3481_v1  ;;  %v10719_v1 = vld [vmem:[#allocation13_spill] sm:$0xff]  ;;  %v10723_v52 = vld [vmem:[#allocation23_spill] sm:$0xff] }
 0x2b9   :  { %10702 = vst [vmem:[#allocation80_spill] sm:$0xff] %v8826_v5  ;;  %10703 = vst [vmem:[#allocation137_spill] sm:$0xff] %v8829_v6  ;;  %v8862_v40 = vadd.f32 %v8754_v57, %v3482_v30  ;;  %v8865_v27 = vadd.f32 %v8754_v57, %v3483_v58  ;;  %v8868_v2 = vadd.f32 %v8754_v57, %v3484_v53  ;;  %v10720_v58 = vld [vmem:[#allocation16_spill] sm:$0xff]  ;;  %v10747_v6 = vld [vmem:[#allocation3_spill] sm:$0xff] }
 0x2ba   :  { %10704 = vst [vmem:[#allocation138_spill] sm:$0xff] %v8832_v61  ;;  %10705 = vst [vmem:[#allocation139_spill] sm:$0xff] %v8835_v17  ;;  %v8871_v9 = vadd.f32 %v8754_v57, %v3485_v13  ;;  %v8874_v63 = vadd.f32 %v8754_v57, %v3486_v38  ;;  %v3557_v50 = vmul.f32 %v8709_v34, %v10719_v1  ;;  %v10724_v38 = vld [vmem:[#allocation122_spill] sm:$0xff]  ;;  %v10726_v45 = vld [vmem:[#allocation124_spill] sm:$0xff] }
 0x2bb   :  { %10706 = vst [vmem:[#allocation88_spill] sm:$0xff] %v8838_v42  ;;  %10707 = vst [vmem:[#allocation86_spill] sm:$0xff] %v8841_v22  ;;  %v3558_v24 = vmul.f32 %v8709_v34, %v10720_v58  ;;  %v3559_v53 = vmul.f32 %v8709_v34, %v10721_v51  ;;  %v3560_v13 = vmul.f32 %v8709_v34, %v10722_v36  ;;  %v10743_v22 = vld [vmem:[#allocation67_spill] sm:$0xff]  ;;  %v10744_v42 = vld [vmem:[#allocation9_spill] sm:$0xff] }
 0x2bc   :  { %10708 = vst [vmem:[#allocation140_spill] sm:$0xff] %v8844_v18  ;;  %10709 = vst [vmem:[#allocation91_spill] sm:$0xff] %v8847_v14  ;;  %v3561_v20 = vmul.f32 %v8709_v34, %v10723_v52  ;;  %v3562_v33 = vmul.f32 %v8709_v34, %v10724_v38  ;;  %v3563_v30 = vmul.f32 %v8709_v34, %v10725_v26  ;;  %v10741_v14 = vld [vmem:[#allocation129_spill] sm:$0xff]  ;;  %v10742_v18 = vld [vmem:[#allocation66_spill] sm:$0xff] }
 0x2bd   :  { %10710 = vst [vmem:[#allocation130_spill] sm:$0xff] %v8850_v12  ;;  %10711 = vst [vmem:[#allocation90_spill] sm:$0xff] %v8853_v60  ;;  %v3564_v1 = vmul.f32 %v8709_v34, %v10726_v45  ;;  %v3565_v58 = vmul.f32 %v8709_v34, %v10727_v19  ;;  %v3566_v51 = vmul.f32 %v8709_v34, %v10728_v7  ;;  %v10739_v60 = vld [vmem:[#allocation53_spill] sm:$0xff]  ;;  %v10740_v12 = vld [vmem:[#allocation128_spill] sm:$0xff] }
 0x2be   :  { %10712 = vst [vmem:[#allocation93_spill] sm:$0xff] %v8856_v21  ;;  %10713 = vst [vmem:[#allocation92_spill] sm:$0xff] %v8859_v16  ;;  %v3567_v36 = vmul.f32 %v8709_v34, %v10729_v0  ;;  %v3568_v52 = vmul.f32 %v8709_v34, %v10730_v54  ;;  %v3569_v38 = vmul.f32 %v8709_v34, %v10731_v48  ;;  %v10737_v16 = vld [vmem:[#allocation49_spill] sm:$0xff]  ;;  %v10738_v21 = vld [vmem:[#allocation52_spill] sm:$0xff] }
 0x2bf   :  { %10714 = vst [vmem:[#allocation14_spill] sm:$0xff] %v8862_v40  ;;  %10715 = vst [vmem:[#allocation18_spill] sm:$0xff] %v8865_v27  ;;  %v10735_v27 = vld [vmem:[#allocation45_spill] sm:$0xff]  ;;  %v10736_v40 = vld [vmem:[#allocation48_spill] sm:$0xff]  ;;  %v3575_v54 = vmul.f32 %v8709_v34, %v10737_v16  ;;  %v3576_v48 = vmul.f32 %v8709_v34, %v10738_v21  ;;  %v3582_v16 = vmul.f32 %v8709_v34, %v10744_v42 }
 0x2c0   :  { %10716 = vst [vmem:[#allocation20_spill] sm:$0xff] %v8868_v2  ;;  %10717 = vst [vmem:[#allocation94_spill] sm:$0xff] %v8871_v9  ;;  %v10733_v9 = vld [vmem:[#allocation41_spill] sm:$0xff]  ;;  %v10734_v2 = vld [vmem:[#allocation44_spill] sm:$0xff]  ;;  %v3573_v7 = vmul.f32 %v8709_v34, %v10735_v27  ;;  %v3574_v0 = vmul.f32 %v8709_v34, %v10736_v40  ;;  %v3580_v27 = vmul.f32 %v8709_v34, %v10742_v18 }
 0x2c1   :  { %10718 = vst [vmem:[#allocation26_spill] sm:$0xff] %v8874_v63  ;;  %v10732_v63 = vld [vmem:[#allocation40_spill] sm:$0xff]  ;;  %v3571_v45 = vmul.f32 %v8709_v34, %v10733_v9  ;;  %v3572_v19 = vmul.f32 %v8709_v34, %v10734_v2  ;;  %v3578_v9 = vmul.f32 %v8709_v34, %v10740_v12  ;;  %v3579_v2 = vmul.f32 %v8709_v34, %v10741_v14  ;;  %v10745_v17 = vld [vmem:[#allocation2_spill] sm:$0xff]  ;;  %v10749_v10 = vld [vmem:[#allocation5_spill] sm:$0xff] }
 0x2c2   :  { %v3570_v26 = vmul.f32 %v8709_v34, %v10732_v63  ;;  %v3577_v63 = vmul.f32 %v8709_v34, %v10739_v60  ;;  %v3581_v40 = vmul.f32 %v8709_v34, %v10743_v22  ;;  %v3583_v21 = vmul.f32 %v8709_v34, %v10745_v17  ;;  %v10746_v61 = vld [vmem:[#allocation10_spill] sm:$0xff]  ;;  %v10748_v5 = vld [vmem:[#allocation12_spill] sm:$0xff]  ;;  %v10750_v11 = vld [vmem:[#allocation19_spill] sm:$0xff] }
 0x2c3   :  { %v3584_v60 = vmul.f32 %v8709_v34, %v10746_v61  ;;  %v3585_v12 = vmul.f32 %v8709_v34, %v10747_v6  ;;  %v3586_v14 = vmul.f32 %v8709_v34, %v10748_v5  ;;  %v3587_v18 = vmul.f32 %v8709_v34, %v10749_v10 }
 0x2c4   :  { %v3588_v22 = vmul.f32 %v8709_v34, %v10750_v11  ;;  %v8973_v42 = vadd.f32 %v8754_v57, %v3557_v50  ;;  %v8976_v17 = vadd.f32 %v8754_v57, %v3558_v24  ;;  %v8979_v61 = vadd.f32 %v8754_v57, %v3559_v53 }
 0x2c5   :  { %v8982_v6 = vadd.f32 %v8754_v57, %v3560_v13  ;;  %v8985_v5 = vadd.f32 %v8754_v57, %v3561_v20  ;;  %v8988_v10 = vadd.f32 %v8754_v57, %v3562_v33  ;;  %v8991_v11 = vadd.f32 %v8754_v57, %v3563_v30 }
 0x2c6   :  { %v8994_v50 = vadd.f32 %v8754_v57, %v3564_v1  ;;  %v8997_v24 = vadd.f32 %v8754_v57, %v3565_v58  ;;  %v9000_v53 = vadd.f32 %v8754_v57, %v3566_v51  ;;  %v9003_v13 = vadd.f32 %v8754_v57, %v3567_v36 }
 0x2c7   :  { %10751 = vst [vmem:[#allocation95_spill] sm:$0xff] %v8988_v10  ;;  %10752 = vst [vmem:[#allocation96_spill] sm:$0xff] %v8991_v11  ;;  %v9006_v20 = vadd.f32 %v8754_v57, %v3568_v52  ;;  %v9009_v33 = vadd.f32 %v8754_v57, %v3569_v38  ;;  %v9012_v30 = vadd.f32 %v8754_v57, %v3570_v26 }
 0x2c8   :  { %10753 = vst [vmem:[#allocation97_spill] sm:$0xff] %v8994_v50  ;;  %10754 = vst [vmem:[#allocation98_spill] sm:$0xff] %v8997_v24  ;;  %v9015_v1 = vadd.f32 %v8754_v57, %v3571_v45  ;;  %v9018_v58 = vadd.f32 %v8754_v57, %v3572_v19  ;;  %v9021_v51 = vadd.f32 %v8754_v57, %v3573_v7  ;;  %v10806_v24 = vld [vmem:[#allocation6_spill] sm:$0xff]  ;;  %v10808_v50 = vld [vmem:[#allocation8_spill] sm:$0xff] }
 0x2c9   :  { %10755 = vst [vmem:[#allocation99_spill] sm:$0xff] %v9000_v53  ;;  %10756 = vst [vmem:[#allocation100_spill] sm:$0xff] %v9003_v13  ;;  %v9024_v36 = vadd.f32 %v8754_v57, %v3574_v0  ;;  %v9027_v52 = vadd.f32 %v8754_v57, %v3575_v54  ;;  %v9030_v38 = vadd.f32 %v8754_v57, %v3576_v48  ;;  %v10802_v13 = vld [vmem:[#allocation71_spill] sm:$0xff]  ;;  %v10804_v53 = vld [vmem:[#allocation4_spill] sm:$0xff] }
 0x2ca   :  { %10757 = vst [vmem:[#allocation101_spill] sm:$0xff] %v9006_v20  ;;  %10758 = vst [vmem:[#allocation102_spill] sm:$0xff] %v9009_v33  ;;  %v9033_v26 = vadd.f32 %v8754_v57, %v3577_v63  ;;  %v9036_v45 = vadd.f32 %v8754_v57, %v3578_v9  ;;  %v9039_v19 = vadd.f32 %v8754_v57, %v3579_v2  ;;  %v10800_v33 = vld [vmem:[#allocation63_spill] sm:$0xff]  ;;  %v10801_v20 = vld [vmem:[#allocation68_spill] sm:$0xff] }
 0x2cb   :  { %10759 = vst [vmem:[#allocation103_spill] sm:$0xff] %v9012_v30  ;;  %10760 = vst [vmem:[#allocation104_spill] sm:$0xff] %v9015_v1  ;;  %v9042_v7 = vadd.f32 %v8754_v57, %v3580_v27  ;;  %v9045_v0 = vadd.f32 %v8754_v57, %v3581_v40  ;;  %v9048_v54 = vadd.f32 %v8754_v57, %v3582_v16  ;;  %v10798_v1 = vld [vmem:[#allocation57_spill] sm:$0xff]  ;;  %v10799_v30 = vld [vmem:[#allocation60_spill] sm:$0xff] }
 0x2cc   :  { %10761 = vst [vmem:[#allocation105_spill] sm:$0xff] %v9018_v58  ;;  %10762 = vst [vmem:[#allocation106_spill] sm:$0xff] %v9021_v51  ;;  %v9051_v48 = vadd.f32 %v8754_v57, %v3583_v21  ;;  %v9054_v63 = vadd.f32 %v8754_v57, %v3584_v60  ;;  %v9057_v9 = vadd.f32 %v8754_v57, %v3585_v12  ;;  %v10779_v60 = vld [vmem:[#allocation24_spill] sm:$0xff]  ;;  %v10796_v51 = vld [vmem:[#allocation51_spill] sm:$0xff] }
 0x2cd   :  { %10763 = vst [vmem:[#allocation107_spill] sm:$0xff] %v9024_v36  ;;  %10764 = vst [vmem:[#allocation108_spill] sm:$0xff] %v9027_v52  ;;  %v9060_v2 = vadd.f32 %v8754_v57, %v3586_v14  ;;  %v9063_v27 = vadd.f32 %v8754_v57, %v3587_v18  ;;  %v9066_v40 = vadd.f32 %v8754_v57, %v3588_v22  ;;  %v10781_v14 = vld [vmem:[#allocation27_spill] sm:$0xff]  ;;  %v10783_v22 = vld [vmem:[#allocation29_spill] sm:$0xff] }
 0x2ce   :  { %10765 = vst [vmem:[#allocation109_spill] sm:$0xff] %v9030_v38  ;;  %10766 = vst [vmem:[#allocation110_spill] sm:$0xff] %v9033_v26  ;;  %v3654_v12 = vmul.f32 %v8709_v34, %v10779_v60  ;;  %v3656_v18 = vmul.f32 %v8709_v34, %v10781_v14  ;;  %v3658_v16 = vmul.f32 %v8709_v34, %v10783_v22  ;;  %v10792_v26 = vld [vmem:[#allocation43_spill] sm:$0xff]  ;;  %v10793_v38 = vld [vmem:[#allocation46_spill] sm:$0xff] }
 0x2cf   :  { %10767 = vst [vmem:[#allocation111_spill] sm:$0xff] %v9036_v45  ;;  %10768 = vst [vmem:[#allocation112_spill] sm:$0xff] %v9039_v19  ;;  %v10778_v45 = vld [vmem:[#allocation25_spill] sm:$0xff]  ;;  %v10791_v19 = vld [vmem:[#allocation42_spill] sm:$0xff] }
 0x2d0   :  { %10769 = vst [vmem:[#allocation113_spill] sm:$0xff] %v9042_v7  ;;  %10770 = vst [vmem:[#allocation114_spill] sm:$0xff] %v9045_v0  ;;  %v3653_v15 = vmul.f32 %v8709_v34, %v10778_v45  ;;  %v10780_v0 = vld [vmem:[#allocation28_spill] sm:$0xff]  ;;  %v10790_v7 = vld [vmem:[#allocation39_spill] sm:$0xff] }
 0x2d1   :  { %10771 = vst [vmem:[#allocation115_spill] sm:$0xff] %v9048_v54  ;;  %10772 = vst [vmem:[#allocation116_spill] sm:$0xff] %v9051_v48  ;;  %v3655_v25 = vmul.f32 %v8709_v34, %v10780_v0  ;;  %v10788_v48 = vld [vmem:[#allocation35_spill] sm:$0xff]  ;;  %v10789_v54 = vld [vmem:[#allocation38_spill] sm:$0xff]  ;;  %v3665_v22 = vmul.f32 %v8709_v34, %v10790_v7 }
 0x2d2   :  { %10773 = vst [vmem:[#allocation117_spill] sm:$0xff] %v9054_v63  ;;  %10774 = vst [vmem:[#allocation118_spill] sm:$0xff] %v9057_v9  ;;  %v10782_v63 = vld [vmem:[#allocation30_spill] sm:$0xff]  ;;  %v3663_v14 = vmul.f32 %v8709_v34, %v10788_v48  ;;  %v10794_v52 = vld [vmem:[#allocation47_spill] sm:$0xff] }
 0x2d3   :  { %10775 = vst [vmem:[#allocation119_spill] sm:$0xff] %v9060_v2  ;;  %10776 = vst [vmem:[#allocation120_spill] sm:$0xff] %v9063_v27  ;;  %v3657_v56 = vmul.f32 %v8709_v34, %v10782_v63  ;;  %v10784_v27 = vld [vmem:[#allocation31_spill] sm:$0xff]  ;;  %v10786_v2 = vld [vmem:[#allocation33_spill] sm:$0xff]  ;;  %v3664_v63 = vmul.f32 %v8709_v34, %v10789_v54  ;;  %v3671_v54 = vmul.f32 %v8709_v34, %v10796_v51 }
 0x2d4   :  { %10777 = vst [vmem:[#allocation121_spill] sm:$0xff] %v9066_v40  ;;  %v3659_v21 = vmul.f32 %v8709_v34, %v10784_v27  ;;  %v10785_v40 = vld [vmem:[#allocation32_spill] sm:$0xff]  ;;  %v3661_v60 = vmul.f32 %v8709_v34, %v10786_v2  ;;  %v10787_v9 = vld [vmem:[#allocation34_spill] sm:$0xff]  ;;  %v3666_v27 = vmul.f32 %v8709_v34, %v10791_v19  ;;  %v3668_v2 = vmul.f32 %v8709_v34, %v10793_v38 }
 0x2d5   :  { %v3660_v45 = vmul.f32 %v8709_v34, %v10785_v40  ;;  %v3662_v0 = vmul.f32 %v8709_v34, %v10787_v9  ;;  %v3667_v40 = vmul.f32 %v8709_v34, %v10792_v26  ;;  %v3669_v9 = vmul.f32 %v8709_v34, %v10794_v52  ;;  %v10795_v36 = vld [vmem:[#allocation50_spill] sm:$0xff] }
 0x2d6   :  { %v3670_v48 = vmul.f32 %v8709_v34, %v10795_v36  ;;  %v10797_v58 = vld [vmem:[#allocation54_spill] sm:$0xff]  ;;  %v3673_v19 = vmul.f32 %v8709_v34, %v10798_v1  ;;  %v3674_v26 = vmul.f32 %v8709_v34, %v10799_v30  ;;  %v3675_v38 = vmul.f32 %v8709_v34, %v10800_v33 }
 0x2d7   :  { %v3672_v7 = vmul.f32 %v8709_v34, %v10797_v58  ;;  %v3676_v52 = vmul.f32 %v8709_v34, %v10801_v20  ;;  %v3677_v36 = vmul.f32 %v8709_v34, %v10802_v13  ;;  %v3678_v51 = vmul.f32 %v8709_v34, %v10803_v43 }
 0x2d8   :  { %v3679_v58 = vmul.f32 %v8709_v34, %v10804_v53  ;;  %v3680_v1 = vmul.f32 %v8709_v34, %v10805_v37  ;;  %v3681_v30 = vmul.f32 %v8709_v34, %v10806_v24  ;;  %v3682_v33 = vmul.f32 %v8709_v34, %v10807_v47 }
 0x2d9   :  { %v3683_v20 = vmul.f32 %v8709_v34, %v10808_v50  ;;  %v3684_v13 = vmul.f32 %v8709_v34, %v10809_v59  ;;  %v9165_v43 = vadd.f32 %v8754_v57, %v3653_v15  ;;  %v9168_v53 = vadd.f32 %v8754_v57, %v3654_v12 }
 0x2da   :  { %v9171_v37 = vadd.f32 %v8754_v57, %v3655_v25  ;;  %v9174_v24 = vadd.f32 %v8754_v57, %v3656_v18  ;;  %v9177_v47 = vadd.f32 %v8754_v57, %v3657_v56  ;;  %v9180_v50 = vadd.f32 %v8754_v57, %v3658_v16 }
 0x2db   :  { %v9183_v59 = vadd.f32 %v8754_v57, %v3659_v21  ;;  %v9186_v15 = vadd.f32 %v8754_v57, %v3660_v45  ;;  %v9189_v12 = vadd.f32 %v8754_v57, %v3661_v60  ;;  %v9192_v25 = vadd.f32 %v8754_v57, %v3662_v0 }
 0x2dc   :  { %v9195_v18 = vadd.f32 %v8754_v57, %v3663_v14  ;;  %v9198_v56 = vadd.f32 %v8754_v57, %v3664_v63  ;;  %v9201_v16 = vadd.f32 %v8754_v57, %v3665_v22  ;;  %v9204_v21 = vadd.f32 %v8754_v57, %v3666_v27 }
 0x2dd   :  { %v9207_v45 = vadd.f32 %v8754_v57, %v3667_v40  ;;  %v9210_v60 = vadd.f32 %v8754_v57, %v3668_v2  ;;  %v9213_v0 = vadd.f32 %v8754_v57, %v3669_v9  ;;  %v9216_v14 = vadd.f32 %v8754_v57, %v3670_v48 }
 0x2de   :  { %10810 = vst [vmem:[#allocation13_spill] sm:$0xff] %v9198_v56  ;;  %10811 = vst [vmem:[#allocation16_spill] sm:$0xff] %v9201_v16  ;;  %v9219_v63 = vadd.f32 %v8754_v57, %v3671_v54  ;;  %v9222_v22 = vadd.f32 %v8754_v57, %v3672_v7  ;;  %v9225_v27 = vadd.f32 %v8754_v57, %v3673_v19  ;;  %v10855_v16 = vmax.f32 %v8976_v17, 0.0 }
 0x2df   :  { %10812 = vst [vmem:[#allocation17_spill] sm:$0xff] %v9204_v21  ;;  %10813 = vst [vmem:[#allocation22_spill] sm:$0xff] %v9207_v45  ;;  %v9228_v40 = vadd.f32 %v8754_v57, %v3674_v26  ;;  %v9231_v2 = vadd.f32 %v8754_v57, %v3675_v38  ;;  %v9234_v9 = vadd.f32 %v8754_v57, %v3676_v52  ;;  %v10851_v45 = vld [vmem:[#allocation84_spill] sm:$0xff]  ;;  %v10852_v21 = vld [vmem:[#allocation87_spill] sm:$0xff]  ;;  %v10857_v56 = vmax.f32 %v8979_v61, 0.0 }
 0x2e0   :  { %10814 = vst [vmem:[#allocation23_spill] sm:$0xff] %v9210_v60  ;;  %10815 = vst [vmem:[#allocation122_spill] sm:$0xff] %v9213_v0  ;;  %v9237_v48 = vadd.f32 %v8754_v57, %v3677_v36  ;;  %v9240_v54 = vadd.f32 %v8754_v57, %v3678_v51  ;;  %v9243_v7 = vadd.f32 %v8754_v57, %v3679_v58  ;;  %v10849_v0 = vld [vmem:[#allocation82_spill] sm:$0xff]  ;;  %v10850_v60 = vld [vmem:[#allocation85_spill] sm:$0xff]  ;;  %v10864_v17 = vmax.f32 %v8793_v4, 0.0 }
 0x2e1   :  { %10816 = vst [vmem:[#allocation123_spill] sm:$0xff] %v9216_v14  ;;  %10817 = vst [vmem:[#allocation124_spill] sm:$0xff] %v9219_v63  ;;  %v9246_v19 = vadd.f32 %v8754_v57, %v3680_v1  ;;  %v9249_v26 = vadd.f32 %v8754_v57, %v3681_v30  ;;  %v9252_v38 = vadd.f32 %v8754_v57, %v3682_v33  ;;  %v10832_v1 = vld [vmem:[#allocation55_spill] sm:$0xff]  ;;  %v10834_v33 = vld [vmem:[#allocation58_spill] sm:$0xff] }
 0x2e2   :  { %10818 = vst [vmem:[#allocation125_spill] sm:$0xff] %v9222_v22  ;;  %10819 = vst [vmem:[#allocation126_spill] sm:$0xff] %v9225_v27  ;;  %v9255_v52 = vadd.f32 %v8754_v57, %v3683_v20  ;;  %v9258_v36 = vadd.f32 %v8754_v57, %v3684_v13  ;;  %v3750_v30 = vmul.f32 %v8709_v34, %v10832_v1  ;;  %v10836_v13 = vld [vmem:[#allocation61_spill] sm:$0xff]  ;;  %v10845_v27 = vld [vmem:[#allocation79_spill] sm:$0xff] }
 0x2e3   :  { %10820 = vst [vmem:[#allocation127_spill] sm:$0xff] %v9228_v40  ;;  %10821 = vst [vmem:[#allocation36_spill] sm:$0xff] %v9231_v2  ;;  %v10831_v40 = vld [vmem:[#allocation56_spill] sm:$0xff]  ;;  %v3752_v20 = vmul.f32 %v8709_v34, %v10834_v33  ;;  %v3754_v51 = vmul.f32 %v8709_v34, %v8030_v35  ;;  %v3755_v58 = vmul.f32 %v8709_v34, %v8034_v62  ;;  %v10846_v22 = vld [vmem:[#allocation78_spill] sm:$0xff] }
 0x2e4   :  { %10822 = vst [vmem:[#allocation37_spill] sm:$0xff] %v9234_v9  ;;  %10823 = vst [vmem:[#allocation40_spill] sm:$0xff] %v9237_v48  ;;  %v3749_v11 = vmul.f32 %v8709_v34, %v10831_v40  ;;  %v10833_v48 = vld [vmem:[#allocation59_spill] sm:$0xff]  ;;  %v3756_v40 = vmul.f32 %v8709_v34, %v10836_v13  ;;  %v10843_v9 = vld [vmem:[#allocation77_spill] sm:$0xff] }
 0x2e5   :  { %10824 = vst [vmem:[#allocation41_spill] sm:$0xff] %v9240_v54  ;;  %10825 = vst [vmem:[#allocation44_spill] sm:$0xff] %v9243_v7  ;;  %v3751_v3 = vmul.f32 %v8709_v34, %v10833_v48  ;;  %v3758_v48 = vmul.f32 %v8709_v34, %v8049_v31  ;;  %v10841_v7 = vld [vmem:[#allocation72_spill] sm:$0xff]  ;;  %v10842_v54 = vld [vmem:[#allocation74_spill] sm:$0xff] }
 0x2e6   :  { %10826 = vst [vmem:[#allocation45_spill] sm:$0xff] %v9246_v19  ;;  %10827 = vst [vmem:[#allocation48_spill] sm:$0xff] %v9249_v26  ;;  %v10835_v19 = vld [vmem:[#allocation62_spill] sm:$0xff]  ;;  %v10840_v26 = vld [vmem:[#allocation73_spill] sm:$0xff]  ;;  %v3762_v62 = vmul.f32 %v8709_v34, %v10841_v7  ;;  %v3763_v13 = vmul.f32 %v8709_v34, %v10842_v54  ;;  %v3770_v54 = vmul.f32 %v8709_v34, %v10849_v0 }
 0x2e7   :  { %10828 = vst [vmem:[#allocation49_spill] sm:$0xff] %v9252_v38  ;;  %10829 = vst [vmem:[#allocation52_spill] sm:$0xff] %v9255_v52  ;;  %v3753_v10 = vmul.f32 %v8709_v34, %v10835_v19  ;;  %v10838_v52 = vld [vmem:[#allocation70_spill] sm:$0xff]  ;;  %v10839_v38 = vld [vmem:[#allocation69_spill] sm:$0xff]  ;;  %v3761_v35 = vmul.f32 %v8709_v34, %v10840_v26  ;;  %v3777_v0 = vmul.f32 %v8709_v34, %v8545_v39 }
 0x2e8   :  { %10830 = vst [vmem:[#allocation53_spill] sm:$0xff] %v9258_v36  ;;  %v10837_v36 = vld [vmem:[#allocation65_spill] sm:$0xff]  ;;  %v3759_v33 = vmul.f32 %v8709_v34, %v10838_v52  ;;  %v3760_v19 = vmul.f32 %v8709_v34, %v10839_v38  ;;  %v10844_v2 = vld [vmem:[#allocation76_spill] sm:$0xff]  ;;  %v3766_v52 = vmul.f32 %v8709_v34, %v10845_v27  ;;  %v3767_v38 = vmul.f32 %v8709_v34, %v10846_v22  ;;  %v10848_v14 = vld [vmem:[#allocation83_spill] sm:$0xff] }
 0x2e9   :  { %v3757_v1 = vmul.f32 %v8709_v34, %v10837_v36  ;;  %v3764_v36 = vmul.f32 %v8709_v34, %v10843_v9  ;;  %v3765_v31 = vmul.f32 %v8709_v34, %v10844_v2  ;;  %v10847_v63 = vld [vmem:[#allocation81_spill] sm:$0xff]  ;;  %v3769_v7 = vmul.f32 %v8709_v34, %v10848_v14  ;;  %v10881_v4 = vld [vmem:[#allocation98_spill] sm:$0xff] }
 0x2ea   :  { %v3768_v26 = vmul.f32 %v8709_v34, %v10847_v63  ;;  %v3771_v9 = vmul.f32 %v8709_v34, %v10850_v60  ;;  %v3772_v2 = vmul.f32 %v8709_v34, %v10851_v45  ;;  %v3773_v27 = vmul.f32 %v8709_v34, %v10852_v21 }
 0x2eb   :  { %v3774_v22 = vmul.f32 %v8709_v34, %v10652_v28  ;;  %v3775_v63 = vmul.f32 %v8709_v34, %v8134_v46  ;;  %v3776_v14 = vmul.f32 %v8709_v34, %v8528_v41  ;;  %v3778_v60 = vmul.f32 %v8709_v34, %v8571_v29 }
 0x2ec   :  { %v3779_v45 = vmul.f32 %v8709_v34, %v8578_v23  ;;  %v3780_v21 = vmul.f32 %v8709_v34, %v8595_v8  ;;  %v9357_v28 = vadd.f32 %v8754_v57, %v3749_v11  ;;  %v9360_v46 = vadd.f32 %v8754_v57, %v3750_v30 }
 0x2ed   :  { %v9363_v41 = vadd.f32 %v8754_v57, %v3751_v3  ;;  %v9366_v39 = vadd.f32 %v8754_v57, %v3752_v20  ;;  %v9369_v29 = vadd.f32 %v8754_v57, %v3753_v10  ;;  %v9372_v23 = vadd.f32 %v8754_v57, %v3754_v51 }
 0x2ee   :  { %v9375_v8 = vadd.f32 %v8754_v57, %v3755_v58  ;;  %v9378_v34 = vadd.f32 %v8754_v57, %v3756_v40  ;;  %v9381_v11 = vadd.f32 %v8754_v57, %v3757_v1  ;;  %v9384_v3 = vadd.f32 %v8754_v57, %v3758_v48 }
 0x2ef   :  { %v9387_v30 = vadd.f32 %v8754_v57, %v3759_v33  ;;  %v9390_v10 = vadd.f32 %v8754_v57, %v3760_v19  ;;  %v9393_v51 = vadd.f32 %v8754_v57, %v3761_v35  ;;  %v9396_v58 = vadd.f32 %v8754_v57, %v3762_v62 }
 0x2f0   :  { %v9399_v20 = vadd.f32 %v8754_v57, %v3763_v13  ;;  %v9402_v40 = vadd.f32 %v8754_v57, %v3764_v36  ;;  %v9405_v1 = vadd.f32 %v8754_v57, %v3765_v31  ;;  %v9408_v48 = vadd.f32 %v8754_v57, %v3766_v52 }
 0x2f1   :  { %v9411_v33 = vadd.f32 %v8754_v57, %v3767_v38  ;;  %v9414_v19 = vadd.f32 %v8754_v57, %v3768_v26  ;;  %v9417_v35 = vadd.f32 %v8754_v57, %v3769_v7  ;;  %v9420_v62 = vadd.f32 %v8754_v57, %v3770_v54 }
 0x2f2   :  { %v9423_v13 = vadd.f32 %v8754_v57, %v3771_v9  ;;  %v9426_v36 = vadd.f32 %v8754_v57, %v3772_v2  ;;  %v9429_v31 = vadd.f32 %v8754_v57, %v3773_v27  ;;  %v9432_v52 = vadd.f32 %v8754_v57, %v3774_v22 }
 0x2f3   :  { %v9435_v38 = vadd.f32 %v8754_v57, %v3775_v63  ;;  %v9438_v26 = vadd.f32 %v8754_v57, %v3776_v14  ;;  %v9441_v7 = vadd.f32 %v8754_v57, %v3777_v0  ;;  %v9444_v54 = vadd.f32 %v8754_v57, %v3778_v60 }
 0x2f4   :  { %v9447_v9 = vadd.f32 %v8754_v57, %v3779_v45  ;;  %v9450_v2 = vadd.f32 %v8754_v57, %v3780_v21  ;;  %v10853_v63 = vmax.f32 %v8973_v42, 0.0  ;;  %v10854_v14 = vmax.f32 %v8781_v49, 0.0 }
 0x2f5   :  { %v10856_v60 = vmax.f32 %v8784_v55, 0.0  ;;  %v10858_v57 = vmax.f32 %v8787_v44, 0.0  ;;  %v10860_v22 = vmax.f32 %v8982_v6, 0.0  ;;  %v10861_v42 = vmax.f32 %v8790_v32, 0.0  ;;  %v10866_v55 = vld [vmem:[#allocation95_spill] sm:$0xff]  ;;  %v10871_v44 = vld [vmem:[#allocation96_spill] sm:$0xff] }
 0x2f6   :  { %v9488_v27 = vmax.f32 %v10854_v14, %v10853_v63  ;;  %v10863_v49 = vmax.f32 %v8985_v5, 0.0  ;;  %v10868_v14 = vld [vmem:[#allocation89_spill] sm:$0xff] }
 0x2f7   :  { %v9494_v0 = vmax.f32 %v10856_v60, %v10855_v16  ;;  %v9500_v45 = vmax.f32 %v10858_v57, %v10857_v56  ;;  %v9506_v21 = vmax.f32 %v10861_v42, %v10860_v22  ;;  %v10867_v16 = vmax.f32 %v10866_v55, 0.0  ;;  %v10873_v57 = vld [vmem:[#allocation131_spill] sm:$0xff]  ;;  %v10876_v32 = vld [vmem:[#allocation97_spill] sm:$0xff]  ;;  %v10878_v42 = vld [vmem:[#allocation134_spill] sm:$0xff] }
 0x2f8   :  { %v9512_v63 = vmax.f32 %v10864_v17, %v10863_v49  ;;  %v10869_v61 = vmax.f32 %v10868_v14, 0.0  ;;  %v10872_v56 = vmax.f32 %v10871_v44, 0.0  ;;  %v10874_v6 = vmax.f32 %v10873_v57, 0.0  ;;  %v10883_v17 = vld [vmem:[#allocation132_spill] sm:$0xff] }
 0x2f9   :  { %10859 = vst [vmem:[#allocation128_spill] sm:$0xff] %v9500_v45  ;;  %10862 = vst [vmem:[#allocation129_spill] sm:$0xff] %v9506_v21  ;;  %v10877_v22 = vmax.f32 %v10876_v32, 0.0  ;;  %v10879_v5 = vmax.f32 %v10878_v42, 0.0  ;;  %v10882_v49 = vmax.f32 %v10881_v4, 0.0  ;;  %v10884_v55 = vmax.f32 %v10883_v17, 0.0 }
 0x2fa   :  { %10865 = vst [vmem:[#allocation66_spill] sm:$0xff] %v9512_v63  ;;  %v9518_v60 = vmax.f32 %v10869_v61, %v10867_v16  ;;  %v9524_v45 = vmax.f32 %v10874_v6, %v10872_v56  ;;  %v10886_v16 = vld [vmem:[#allocation99_spill] sm:$0xff]  ;;  %v10888_v61 = vld [vmem:[#allocation133_spill] sm:$0xff]  ;;  %v10891_v56 = vld [vmem:[#allocation100_spill] sm:$0xff] }
 0x2fb   :  { %v9530_v21 = vmax.f32 %v10879_v5, %v10877_v22  ;;  %v9536_v63 = vmax.f32 %v10884_v55, %v10882_v49  ;;  %v10887_v14 = vmax.f32 %v10886_v16, 0.0  ;;  %v10889_v44 = vmax.f32 %v10888_v61, 0.0  ;;  %v10893_v6 = vld [vmem:[#allocation136_spill] sm:$0xff]  ;;  %v10896_v22 = vld [vmem:[#allocation101_spill] sm:$0xff]  ;;  %v10901_v49 = vld [vmem:[#allocation102_spill] sm:$0xff] }
 0x2fc   :  { %10870 = vst [vmem:[#allocation67_spill] sm:$0xff] %v9518_v60  ;;  %10875 = vst [vmem:[#allocation9_spill] sm:$0xff] %v9524_v45  ;;  %v10892_v57 = vmax.f32 %v10891_v56, 0.0  ;;  %v10894_v32 = vmax.f32 %v10893_v6, 0.0  ;;  %v10897_v42 = vmax.f32 %v10896_v22, 0.0  ;;  %v10898_v5 = vld [vmem:[#allocation141_spill] sm:$0xff] }
 0x2fd   :  { %10880 = vst [vmem:[#allocation2_spill] sm:$0xff] %v9530_v21  ;;  %10885 = vst [vmem:[#allocation10_spill] sm:$0xff] %v9536_v63  ;;  %v9542_v60 = vmax.f32 %v10889_v44, %v10887_v14  ;;  %v10899_v4 = vmax.f32 %v10898_v5, 0.0  ;;  %v10902_v17 = vmax.f32 %v10901_v49, 0.0  ;;  %v10903_v55 = vld [vmem:[#allocation64_spill] sm:$0xff]  ;;  %v10906_v14 = vld [vmem:[#allocation103_spill] sm:$0xff] }
 0x2fe   :  { %v9548_v45 = vmax.f32 %v10894_v32, %v10892_v57  ;;  %v10904_v16 = vmax.f32 %v10903_v55, 0.0  ;;  %v10907_v61 = vmax.f32 %v10906_v14, 0.0  ;;  %v10908_v44 = vld [vmem:[#allocation75_spill] sm:$0xff]  ;;  %v10911_v57 = vld [vmem:[#allocation104_spill] sm:$0xff] }
 0x2ff   :  { %10890 = vst [vmem:[#allocation3_spill] sm:$0xff] %v9542_v60  ;;  %v9554_v21 = vmax.f32 %v10899_v4, %v10897_v42  ;;  %v10909_v56 = vmax.f32 %v10908_v44, 0.0  ;;  %v10912_v6 = vmax.f32 %v10911_v57, 0.0  ;;  %v10913_v32 = vld [vmem:[#allocation135_spill] sm:$0xff]  ;;  %v10916_v42 = vld [vmem:[#allocation105_spill] sm:$0xff]  ;;  %v10918_v4 = vld [vmem:[#allocation80_spill] sm:$0xff] }
 0x300   :  { %10895 = vst [vmem:[#allocation12_spill] sm:$0xff] %v9548_v45  ;;  %v9560_v63 = vmax.f32 %v10904_v16, %v10902_v17  ;;  %v10914_v22 = vmax.f32 %v10913_v32, 0.0  ;;  %v10917_v5 = vmax.f32 %v10916_v42, 0.0  ;;  %v10919_v49 = vmax.f32 %v10918_v4, 0.0  ;;  %v10921_v17 = vld [vmem:[#allocation106_spill] sm:$0xff]  ;;  %v10923_v16 = vld [vmem:[#allocation137_spill] sm:$0xff] }
 0x301   :  { %10900 = vst [vmem:[#allocation5_spill] sm:$0xff] %v9554_v21  ;;  %v9566_v60 = vmax.f32 %v10909_v56, %v10907_v61  ;;  %v10922_v55 = vmax.f32 %v10921_v17, 0.0  ;;  %v10924_v14 = vmax.f32 %v10923_v16, 0.0  ;;  %v10926_v61 = vld [vmem:[#allocation107_spill] sm:$0xff]  ;;  %v10928_v56 = vld [vmem:[#allocation138_spill] sm:$0xff] }
 0x302   :  { %10905 = vst [vmem:[#allocation19_spill] sm:$0xff] %v9560_v63  ;;  %v9572_v45 = vmax.f32 %v10914_v22, %v10912_v6  ;;  %v9578_v21 = vmax.f32 %v10919_v49, %v10917_v5  ;;  %v10927_v44 = vmax.f32 %v10926_v61, 0.0  ;;  %v10929_v57 = vmax.f32 %v10928_v56, 0.0  ;;  %v10931_v6 = vld [vmem:[#allocation108_spill] sm:$0xff]  ;;  %v10933_v22 = vld [vmem:[#allocation139_spill] sm:$0xff]  ;;  %v10936_v5 = vld [vmem:[#allocation109_spill] sm:$0xff] }
 0x303   :  { %10910 = vst [vmem:[#allocation25_spill] sm:$0xff] %v9566_v60  ;;  %v9584_v63 = vmax.f32 %v10924_v14, %v10922_v55  ;;  %v10932_v32 = vmax.f32 %v10931_v6, 0.0  ;;  %v10934_v42 = vmax.f32 %v10933_v22, 0.0  ;;  %v10937_v4 = vmax.f32 %v10936_v5, 0.0  ;;  %v10938_v49 = vld [vmem:[#allocation88_spill] sm:$0xff]  ;;  %v10941_v55 = vld [vmem:[#allocation110_spill] sm:$0xff] }
 0x304   :  { %10915 = vst [vmem:[#allocation24_spill] sm:$0xff] %v9572_v45  ;;  %10920 = vst [vmem:[#allocation28_spill] sm:$0xff] %v9578_v21  ;;  %v9590_v60 = vmax.f32 %v10929_v57, %v10927_v44  ;;  %v10939_v17 = vmax.f32 %v10938_v49, 0.0  ;;  %v10942_v16 = vmax.f32 %v10941_v55, 0.0  ;;  %v10943_v14 = vld [vmem:[#allocation86_spill] sm:$0xff]  ;;  %v10946_v44 = vld [vmem:[#allocation111_spill] sm:$0xff] }
 0x305   :  { %10925 = vst [vmem:[#allocation27_spill] sm:$0xff] %v9584_v63  ;;  %v9596_v45 = vmax.f32 %v10934_v42, %v10932_v32  ;;  %v10944_v61 = vmax.f32 %v10943_v14, 0.0  ;;  %v10947_v56 = vmax.f32 %v10946_v44, 0.0  ;;  %v10948_v57 = vld [vmem:[#allocation140_spill] sm:$0xff]  ;;  %v10953_v42 = vld [vmem:[#allocation91_spill] sm:$0xff] }
 0x306   :  { %10930 = vst [vmem:[#allocation30_spill] sm:$0xff] %v9590_v60  ;;  %v9602_v21 = vmax.f32 %v10939_v17, %v10937_v4  ;;  %v10949_v6 = vmax.f32 %v10948_v57, 0.0  ;;  %v10951_v32 = vld [vmem:[#allocation112_spill] sm:$0xff]  ;;  %v10954_v5 = vmax.f32 %v10953_v42, 0.0  ;;  %v10956_v4 = vld [vmem:[#allocation113_spill] sm:$0xff]  ;;  %v10958_v17 = vld [vmem:[#allocation130_spill] sm:$0xff] }
 0x307   :  { %10935 = vst [vmem:[#allocation29_spill] sm:$0xff] %v9596_v45  ;;  %v9608_v63 = vmax.f32 %v10944_v61, %v10942_v16  ;;  %v10952_v22 = vmax.f32 %v10951_v32, 0.0  ;;  %v10957_v49 = vmax.f32 %v10956_v4, 0.0  ;;  %v10959_v55 = vmax.f32 %v10958_v17, 0.0  ;;  %v10961_v16 = vld [vmem:[#allocation114_spill] sm:$0xff] }
 0x308   :  { %10940 = vst [vmem:[#allocation31_spill] sm:$0xff] %v9602_v21  ;;  %v9614_v60 = vmax.f32 %v10949_v6, %v10947_v56  ;;  %v10962_v14 = vmax.f32 %v10961_v16, 0.0  ;;  %v10963_v61 = vld [vmem:[#allocation90_spill] sm:$0xff]  ;;  %v10966_v56 = vld [vmem:[#allocation115_spill] sm:$0xff]  ;;  %v10968_v6 = vld [vmem:[#allocation93_spill] sm:$0xff] }
 0x309   :  { %10945 = vst [vmem:[#allocation32_spill] sm:$0xff] %v9608_v63  ;;  %v9620_v45 = vmax.f32 %v10954_v5, %v10952_v22  ;;  %v9626_v21 = vmax.f32 %v10959_v55, %v10957_v49  ;;  %v10964_v44 = vmax.f32 %v10963_v61, 0.0  ;;  %v10967_v57 = vmax.f32 %v10966_v56, 0.0  ;;  %v10971_v22 = vld [vmem:[#allocation116_spill] sm:$0xff]  ;;  %v10976_v49 = vld [vmem:[#allocation117_spill] sm:$0xff]  ;;  %v10978_v55 = vld [vmem:[#allocation14_spill] sm:$0xff] }
 0x30a   :  { %10950 = vst [vmem:[#allocation33_spill] sm:$0xff] %v9614_v60  ;;  %v10969_v32 = vmax.f32 %v10968_v6, 0.0  ;;  %v10972_v42 = vmax.f32 %v10971_v22, 0.0  ;;  %v10973_v5 = vld [vmem:[#allocation92_spill] sm:$0xff]  ;;  %v10977_v17 = vmax.f32 %v10976_v49, 0.0  ;;  %v10979_v16 = vmax.f32 %v10978_v55, 0.0 }
 0x30b   :  { %10955 = vst [vmem:[#allocation34_spill] sm:$0xff] %v9620_v45  ;;  %10960 = vst [vmem:[#allocation35_spill] sm:$0xff] %v9626_v21  ;;  %v9632_v63 = vmax.f32 %v10964_v44, %v10962_v14  ;;  %v10974_v4 = vmax.f32 %v10973_v5, 0.0  ;;  %v10981_v14 = vld [vmem:[#allocation118_spill] sm:$0xff] }
 0x30c   :  { %v9638_v60 = vmax.f32 %v10969_v32, %v10967_v57  ;;  %v9650_v21 = vmax.f32 %v10979_v16, %v10977_v17  ;;  %v10982_v61 = vmax.f32 %v10981_v14, 0.0  ;;  %v10983_v44 = vld [vmem:[#allocation18_spill] sm:$0xff]  ;;  %v10985_v57 = vld [vmem:[#allocation119_spill] sm:$0xff]  ;;  %v10987_v32 = vld [vmem:[#allocation20_spill] sm:$0xff] }
 0x30d   :  { %10965 = vst [vmem:[#allocation38_spill] sm:$0xff] %v9632_v63  ;;  %v9644_v45 = vmax.f32 %v10974_v4, %v10972_v42  ;;  %v10984_v56 = vmax.f32 %v10983_v44, 0.0  ;;  %v10986_v6 = vmax.f32 %v10985_v57, 0.0  ;;  %v10988_v22 = vmax.f32 %v10987_v32, 0.0  ;;  %v10989_v42 = vld [vmem:[#allocation120_spill] sm:$0xff]  ;;  %v10991_v4 = vld [vmem:[#allocation94_spill] sm:$0xff] }
 0x30e   :  { %10970 = vst [vmem:[#allocation39_spill] sm:$0xff] %v9638_v60  ;;  %10980 = vst [vmem:[#allocation43_spill] sm:$0xff] %v9650_v21  ;;  %v10990_v5 = vmax.f32 %v10989_v42, 0.0  ;;  %v10992_v49 = vmax.f32 %v10991_v4, 0.0  ;;  %v10993_v17 = vld [vmem:[#allocation121_spill] sm:$0xff]  ;;  %v10995_v16 = vld [vmem:[#allocation26_spill] sm:$0xff] }
 0x30f   :  { %10975 = vst [vmem:[#allocation42_spill] sm:$0xff] %v9644_v45  ;;  %v9656_v63 = vmax.f32 %v10984_v56, %v10982_v61  ;;  %v9662_v60 = vmax.f32 %v10988_v22, %v10986_v6  ;;  %v10994_v55 = vmax.f32 %v10993_v17, 0.0  ;;  %v10996_v14 = vmax.f32 %v10995_v16, 0.0 }
 0x310   :  { %v9668_v45 = vmax.f32 %v10992_v49, %v10990_v5  ;;  %v10997_v61 = vmax.f32 %v9357_v28, 0.0  ;;  %v10998_v44 = vmax.f32 %v9165_v43, 0.0  ;;  %v10999_v57 = vmax.f32 %v9360_v46, 0.0 }
 0x311   :  { %v9674_v21 = vmax.f32 %v10996_v14, %v10994_v55  ;;  %v11000_v6 = vmax.f32 %v9168_v53, 0.0  ;;  %v11001_v22 = vmax.f32 %v9363_v41, 0.0  ;;  %v11002_v42 = vmax.f32 %v9171_v37, 0.0 }
 0x312   :  { %v3877_v56 = vmax.f32 %v10998_v44, %v10997_v61  ;;  %v11003_v4 = vmax.f32 %v9366_v39, 0.0  ;;  %v11004_v49 = vmax.f32 %v9174_v24, 0.0  ;;  %v11005_v28 = vmax.f32 %v9369_v29, 0.0 }
 0x313   :  { %v3878_v32 = vmax.f32 %v11000_v6, %v10999_v57  ;;  %v3879_v5 = vmax.f32 %v11002_v42, %v11001_v22  ;;  %v11006_v43 = vmax.f32 %v9177_v47, 0.0  ;;  %v11007_v46 = vmax.f32 %v9372_v23, 0.0  ;;  %v11020_v22 = vld [vmem:[#allocation13_spill] sm:$0xff] }
 0x314   :  { %v3880_v17 = vmax.f32 %v11004_v49, %v11003_v4  ;;  %v11008_v53 = vmax.f32 %v9180_v50, 0.0  ;;  %v11009_v41 = vmax.f32 %v9375_v8, 0.0  ;;  %v11010_v37 = vmax.f32 %v9183_v59, 0.0  ;;  %v11023_v4 = vld [vmem:[#allocation16_spill] sm:$0xff] }
 0x315   :  { %v3881_v55 = vmax.f32 %v11006_v43, %v11005_v28  ;;  %v11011_v39 = vmax.f32 %v9378_v34, 0.0  ;;  %v11012_v24 = vmax.f32 %v9186_v15, 0.0  ;;  %v11013_v29 = vmax.f32 %v9381_v11, 0.0  ;;  %v11026_v28 = vld [vmem:[#allocation17_spill] sm:$0xff] }
 0x316   :  { %v3882_v16 = vmax.f32 %v11008_v53, %v11007_v46  ;;  %v3883_v14 = vmax.f32 %v11010_v37, %v11009_v41  ;;  %v11014_v47 = vmax.f32 %v9189_v12, 0.0  ;;  %v11015_v23 = vmax.f32 %v9384_v3, 0.0  ;;  %v11029_v46 = vld [vmem:[#allocation22_spill] sm:$0xff]  ;;  %v11032_v41 = vld [vmem:[#allocation23_spill] sm:$0xff] }
 0x317   :  { %v3884_v61 = vmax.f32 %v11012_v24, %v11011_v39  ;;  %v11016_v50 = vmax.f32 %v9192_v25, 0.0  ;;  %v11017_v8 = vmax.f32 %v9387_v30, 0.0  ;;  %v11018_v59 = vmax.f32 %v9195_v18, 0.0  ;;  %v11035_v24 = vld [vmem:[#allocation122_spill] sm:$0xff] }
 0x318   :  { %v3885_v44 = vmax.f32 %v11014_v47, %v11013_v29  ;;  %v11019_v34 = vmax.f32 %v9390_v10, 0.0  ;;  %v11021_v15 = vmax.f32 %v11020_v22, 0.0  ;;  %v11022_v11 = vmax.f32 %v9393_v51, 0.0 }
 0x319   :  { %v3886_v57 = vmax.f32 %v11016_v50, %v11015_v23  ;;  %v3887_v6 = vmax.f32 %v11018_v59, %v11017_v8  ;;  %v11024_v12 = vmax.f32 %v11023_v4, 0.0  ;;  %v11025_v3 = vmax.f32 %v9396_v58, 0.0  ;;  %v11038_v23 = vld [vmem:[#allocation123_spill] sm:$0xff]  ;;  %v11041_v59 = vld [vmem:[#allocation124_spill] sm:$0xff] }
 0x31a   :  { %v3888_v42 = vmax.f32 %v11021_v15, %v11019_v34  ;;  %v11027_v25 = vmax.f32 %v11026_v28, 0.0  ;;  %v11028_v30 = vmax.f32 %v9399_v20, 0.0  ;;  %v11030_v18 = vmax.f32 %v11029_v46, 0.0  ;;  %v11044_v15 = vld [vmem:[#allocation125_spill] sm:$0xff] }
 0x31b   :  { %v3889_v49 = vmax.f32 %v11024_v12, %v11022_v11  ;;  %v11031_v10 = vmax.f32 %v9402_v40, 0.0  ;;  %v11033_v37 = vmax.f32 %v11032_v41, 0.0  ;;  %v11034_v51 = vmax.f32 %v9405_v1, 0.0  ;;  %v11047_v12 = vld [vmem:[#allocation126_spill] sm:$0xff] }
 0x31c   :  { %v3890_v43 = vmax.f32 %v11027_v25, %v11025_v3  ;;  %v3891_v53 = vmax.f32 %v11030_v18, %v11028_v30  ;;  %v11036_v29 = vmax.f32 %v11035_v24, 0.0  ;;  %v11037_v58 = vmax.f32 %v9408_v48, 0.0  ;;  %v11050_v25 = vld [vmem:[#allocation127_spill] sm:$0xff]  ;;  %v11053_v18 = vld [vmem:[#allocation36_spill] sm:$0xff] }
 0x31d   :  { %v3892_v39 = vmax.f32 %v11033_v37, %v11031_v10  ;;  %v11039_v50 = vmax.f32 %v11038_v23, 0.0  ;;  %v11040_v20 = vmax.f32 %v9411_v33, 0.0  ;;  %v11042_v34 = vmax.f32 %v11041_v59, 0.0  ;;  %v11056_v37 = vld [vmem:[#allocation37_spill] sm:$0xff] }
 0x31e   :  { %v3893_v47 = vmax.f32 %v11036_v29, %v11034_v51  ;;  %v11043_v40 = vmax.f32 %v9414_v19, 0.0  ;;  %v11045_v11 = vmax.f32 %v11044_v15, 0.0  ;;  %v11046_v1 = vmax.f32 %v9417_v35, 0.0  ;;  %v11059_v29 = vld [vmem:[#allocation40_spill] sm:$0xff] }
 0x31f   :  { %v3894_v8 = vmax.f32 %v11039_v50, %v11037_v58  ;;  %v3895_v22 = vmax.f32 %v11042_v34, %v11040_v20  ;;  %v11048_v3 = vmax.f32 %v11047_v12, 0.0  ;;  %v11049_v48 = vmax.f32 %v9420_v62, 0.0  ;;  %v11062_v50 = vld [vmem:[#allocation41_spill] sm:$0xff]  ;;  %v11065_v34 = vld [vmem:[#allocation44_spill] sm:$0xff] }
 0x320   :  { %v3896_v4 = vmax.f32 %v11045_v11, %v11043_v40  ;;  %v11051_v30 = vmax.f32 %v11050_v25, 0.0  ;;  %v11052_v33 = vmax.f32 %v9423_v13, 0.0  ;;  %v11054_v10 = vmax.f32 %v11053_v18, 0.0  ;;  %v11068_v11 = vld [vmem:[#allocation45_spill] sm:$0xff] }
 0x321   :  { %v9760_v28 = vmax.f32 %v11048_v3, %v11046_v1  ;;  %v11055_v41 = vmax.f32 %v9426_v36, 0.0  ;;  %v11057_v35 = vmax.f32 %v11056_v37, 0.0  ;;  %v11058_v24 = vmax.f32 %v9429_v31, 0.0  ;;  %v11071_v3 = vld [vmem:[#allocation48_spill] sm:$0xff] }
 0x322   :  { %v9766_v46 = vmax.f32 %v11051_v30, %v11049_v48  ;;  %v9772_v19 = vmax.f32 %v11054_v10, %v11052_v33  ;;  %v11060_v62 = vmax.f32 %v11059_v29, 0.0  ;;  %v11061_v23 = vmax.f32 %v9432_v52, 0.0  ;;  %v11074_v30 = vld [vmem:[#allocation49_spill] sm:$0xff]  ;;  %v11077_v10 = vld [vmem:[#allocation52_spill] sm:$0xff] }
 0x323   :  { %v9778_v51 = vmax.f32 %v11057_v35, %v11055_v41  ;;  %v11063_v13 = vmax.f32 %v11062_v50, 0.0  ;;  %v11064_v59 = vmax.f32 %v9435_v38, 0.0  ;;  %v11066_v36 = vmax.f32 %v11065_v34, 0.0  ;;  %v11080_v35 = vld [vmem:[#allocation53_spill] sm:$0xff]  ;;  %v11085_v34 = vld [vmem:[#allocation67_spill] sm:$0xff] }
 0x324   :  { %v9784_v58 = vmax.f32 %v11060_v62, %v11058_v24  ;;  %v11067_v15 = vmax.f32 %v9438_v26, 0.0  ;;  %v11069_v31 = vmax.f32 %v11068_v11, 0.0  ;;  %v11070_v12 = vmax.f32 %v9441_v7, 0.0  ;;  %v11082_v62 = vld [vmem:[#allocation128_spill] sm:$0xff]  ;;  %v11083_v50 = vld [vmem:[#allocation129_spill] sm:$0xff] }
 0x325   :  { %v9790_v20 = vmax.f32 %v11063_v13, %v11061_v23  ;;  %v9796_v40 = vmax.f32 %v11066_v36, %v11064_v59  ;;  %v11072_v52 = vmax.f32 %v11071_v3, 0.0  ;;  %v11073_v25 = vmax.f32 %v9444_v54, 0.0  ;;  %v11084_v59 = vld [vmem:[#allocation66_spill] sm:$0xff] }
 0x326   :  { %v9802_v1 = vmax.f32 %v11069_v31, %v11067_v15  ;;  %v11075_v38 = vmax.f32 %v11074_v30, 0.0  ;;  %v11076_v18 = vmax.f32 %v9447_v9, 0.0  ;;  %v11078_v26 = vmax.f32 %v11077_v10, 0.0  ;;  %v11086_v15 = vld [vmem:[#allocation9_spill] sm:$0xff]  ;;  %v11087_v31 = vld [vmem:[#allocation2_spill] sm:$0xff]  ;;  %v11090_v30 = vld [vmem:[#allocation12_spill] sm:$0xff] }
 0x327   :  { %v9808_v48 = vmax.f32 %v11072_v52, %v11070_v12  ;;  %v11079_v37 = vmax.f32 %v9450_v2, 0.0  ;;  %v11081_v7 = vmax.f32 %v11080_v35, 0.0  ;;  %v3909_v29 = vmax.f32 %v9488_v27, %v3877_v56  ;;  %v11088_v12 = vld [vmem:[#allocation10_spill] sm:$0xff]  ;;  %v11089_v52 = vld [vmem:[#allocation3_spill] sm:$0xff]  ;;  %v11091_v56 = vld [vmem:[#allocation5_spill] sm:$0xff] }
 0x328   :  { %v9814_v33 = vmax.f32 %v11075_v38, %v11073_v25  ;;  %v9820_v41 = vmax.f32 %v11078_v26, %v11076_v18  ;;  %v3910_v54 = vmax.f32 %v9494_v0, %v3878_v32  ;;  %v3911_v23 = vmax.f32 %v11082_v62, %v3879_v5  ;;  %v11092_v32 = vld [vmem:[#allocation19_spill] sm:$0xff]  ;;  %v11102_v18 = vld [vmem:[#allocation34_spill] sm:$0xff] }
 0x329   :  { %v9826_v24 = vmax.f32 %v11081_v7, %v11079_v37  ;;  %v3912_v13 = vmax.f32 %v11083_v50, %v3880_v17  ;;  %v3913_v9 = vmax.f32 %v11084_v59, %v3881_v55  ;;  %v3914_v36 = vmax.f32 %v11085_v34, %v3882_v16  ;;  %3941 = vst.msk [vmem:[%s10008_s7] sm:$0xff] %vm664_vm2, %v3909_v29  ;;  %v11093_v17 = vld [vmem:[#allocation25_spill] sm:$0xff]  ;;  %v11094_v16 = vld [vmem:[#allocation24_spill] sm:$0xff]  ;;  %v11103_v26 = vld [vmem:[#allocation35_spill] sm:$0xff] }
 0x32a   :  { %v3915_v11 = vmax.f32 %v11086_v15, %v3883_v14  ;;  %v3916_v2 = vmax.f32 %v11087_v31, %v3884_v61  ;;  %v3917_v3 = vmax.f32 %v11088_v12, %v3885_v44  ;;  %v3918_v25 = vmax.f32 %v11089_v52, %v3886_v57  ;;  %3942 = vst.msk [vmem:[%s10008_s7 + $0x8] sm:$0xff] %vm664_vm2, %v3910_v54  ;;  %v11095_v61 = vld [vmem:[#allocation28_spill] sm:$0xff]  ;;  %v11096_v57 = vld [vmem:[#allocation27_spill] sm:$0xff]  ;;  %v11106_v35 = vld [vmem:[#allocation42_spill] sm:$0xff] }
 0x32b   :  { %v3919_v27 = vmax.f32 %v11090_v30, %v3887_v6  ;;  %v3920_v0 = vmax.f32 %v11091_v56, %v3888_v42  ;;  %3943 = vst.msk [vmem:[%s10008_s7 + $0x10] sm:$0xff] %vm664_vm2, %v3911_v23  ;;  %3944 = vst.msk [vmem:[%s10008_s7 + $0x18] sm:$0xff] %vm664_vm2, %v3912_v13  ;;  %v3921_v5 = vmax.f32 %v11092_v32, %v3889_v49  ;;  %v11097_v42 = vld [vmem:[#allocation30_spill] sm:$0xff]  ;;  %v11107_v29 = vld [vmem:[#allocation43_spill] sm:$0xff] }
 0x32c   :  { %v3922_v55 = vmax.f32 %v11093_v17, %v3890_v43  ;;  %v3923_v14 = vmax.f32 %v11094_v16, %v3891_v53  ;;  %v3924_v44 = vmax.f32 %v11095_v61, %v3892_v39  ;;  %3945 = vst.msk [vmem:[%s10008_s7 + $0x20] sm:$0xff] %vm664_vm2, %v3913_v9  ;;  %3946 = vst.msk [vmem:[%s10008_s7 + $0x28] sm:$0xff] %vm664_vm2, %v3914_v36  ;;  %v11098_v43 = vld [vmem:[#allocation29_spill] sm:$0xff]  ;;  %v11099_v39 = vld [vmem:[#allocation31_spill] sm:$0xff] }
 0x32d   :  { %3947 = vst.msk [vmem:[%s10008_s7 + $0x30] sm:$0xff] %vm664_vm2, %v3915_v11  ;;  %3948 = vst.msk [vmem:[%s10008_s7 + $0x38] sm:$0xff] %vm664_vm2, %v3916_v2  ;;  %v3925_v6 = vmax.f32 %v11096_v57, %v3893_v47  ;;  %v3926_v49 = vmax.f32 %v11097_v42, %v3894_v8  ;;  %v3927_v53 = vmax.f32 %v11098_v43, %v3895_v22  ;;  %v11100_v47 = vld [vmem:[#allocation32_spill] sm:$0xff]  ;;  %v11101_v22 = vld [vmem:[#allocation33_spill] sm:$0xff] }
 0x32e   :  { %v3928_v38 = vmax.f32 %v11099_v39, %v3896_v4  ;;  %3949 = vst.msk [vmem:[%s10008_s7 + $0x40] sm:$0xff] %vm664_vm2, %v3917_v3  ;;  %3950 = vst.msk [vmem:[%s10008_s7 + $0x48] sm:$0xff] %vm664_vm2, %v3918_v25  ;;  %v3929_v8 = vmax.f32 %v11100_v47, %v9760_v28  ;;  %v3930_v4 = vmax.f32 %v11101_v22, %v9766_v46  ;;  %v11104_v28 = vld [vmem:[#allocation38_spill] sm:$0xff] }
 0x32f   :  { %3951 = vst.msk [vmem:[%s10008_s7 + $0x50] sm:$0xff] %vm664_vm2, %v3919_v27  ;;  %3952 = vst.msk [vmem:[%s10008_s7 + $0x58] sm:$0xff] %vm664_vm2, %v3920_v0  ;;  %v3931_v10 = vmax.f32 %v11102_v18, %v9772_v19  ;;  %v3932_v37 = vmax.f32 %v11103_v26, %v9778_v51  ;;  %v3933_v46 = vmax.f32 %v11104_v28, %v9784_v58  ;;  %v11105_v19 = vld [vmem:[#allocation39_spill] sm:$0xff] }
 0x330   :  { %3953 = vst.msk [vmem:[%s10008_s7 + $0x60] sm:$0xff] %vm664_vm2, %v3921_v5  ;;  %3954 = vst.msk [vmem:[%s10008_s7 + $0x68] sm:$0xff] %vm664_vm2, %v3922_v55  ;;  %v3934_v51 = vmax.f32 %v11105_v19, %v9790_v20  ;;  %v3935_v7 = vmax.f32 %v11106_v35, %v9796_v40  ;;  %v3936_v54 = vmax.f32 %v11107_v29, %v9802_v1 }
 0x331   :  { %3955 = vst.msk [vmem:[%s10008_s7 + $0x70] sm:$0xff] %vm664_vm2, %v3923_v14  ;;  %3956 = vst.msk [vmem:[%s10008_s7 + $0x78] sm:$0xff] %vm664_vm2, %v3924_v44  ;;  %v3937_v58 = vmax.f32 %v9656_v63, %v9808_v48  ;;  %v3938_v20 = vmax.f32 %v9662_v60, %v9814_v33  ;;  %v3939_v40 = vmax.f32 %v9668_v45, %v9820_v41 }
 0x332   :  { %3957 = vst.msk [vmem:[%s10008_s7 + $0x80] sm:$0xff] %vm664_vm2, %v3925_v6  ;;  %3958 = vst.msk [vmem:[%s10008_s7 + $0x88] sm:$0xff] %vm664_vm2, %v3926_v49  ;;  %v3940_v1 = vmax.f32 %v9674_v21, %v9826_v24 }
 0x333   :  { %3959 = vst.msk [vmem:[%s10008_s7 + $0x90] sm:$0xff] %vm664_vm2, %v3927_v53  ;;  %3960 = vst.msk [vmem:[%s10008_s7 + $0x98] sm:$0xff] %vm664_vm2, %v3928_v38 }
 0x334   :  { %3961 = vst.msk [vmem:[%s10008_s7 + $0xa0] sm:$0xff] %vm664_vm2, %v3929_v8  ;;  %3962 = vst.msk [vmem:[%s10008_s7 + $0xa8] sm:$0xff] %vm664_vm2, %v3930_v4 }
 0x335   :  { %3963 = vst.msk [vmem:[%s10008_s7 + $0xb0] sm:$0xff] %vm664_vm2, %v3931_v10  ;;  %3964 = vst.msk [vmem:[%s10008_s7 + $0xb8] sm:$0xff] %vm664_vm2, %v3932_v37 }
 0x336   :  { %3965 = vst.msk [vmem:[%s10008_s7 + $0xc0] sm:$0xff] %vm664_vm2, %v3933_v46  ;;  %3966 = vst.msk [vmem:[%s10008_s7 + $0xc8] sm:$0xff] %vm664_vm2, %v3934_v51 }
 0x337   :  { %3967 = vst.msk [vmem:[%s10008_s7 + $0xd0] sm:$0xff] %vm664_vm2, %v3935_v7  ;;  %3968 = vst.msk [vmem:[%s10008_s7 + $0xd8] sm:$0xff] %vm664_vm2, %v3936_v54 }
 0x338   :  { %3969 = vst.msk [vmem:[%s10008_s7 + $0xe0] sm:$0xff] %vm664_vm2, %v3937_v58  ;;  %3970 = vst.msk [vmem:[%s10008_s7 + $0xe8] sm:$0xff] %vm664_vm2, %v3938_v20 }
 0x339   :  { %3971 = vst.msk [vmem:[%s10008_s7 + $0xf0] sm:$0xff] %vm664_vm2, %v3939_v40  ;;  %3972 = vst.msk [vmem:[%s10008_s7 + $0xf8] sm:$0xff] %vm664_vm2, %v3940_v1 }

// kernel: neural_net_forward.4
= control target key start
LH: loop header
LB: loop body
LE: loop exit
PB: predicated region body
PF: predicated region fallthrough
CT: control target
= control target key end

     0   :  { %vm65_vm0 = vcmask 1043456   ;;  %vm40_vm1 = vcmask 293888   ;;  %vm588_vm2 = vcmask 31744   ;;  %s1975_s1 = inlined_call_operand.vmem [shape: f32[36,4], index: 1, kind: input, shape index: {}]   ;;  %s1976_s0 = inlined_call_operand.vmem [shape: f32[4,64,36], index: 0, kind: input, shape index: {}]   ;;  %s1977_s2 = inlined_call_operand.vmem [shape: f32[1,4], index: 2, kind: input, shape index: {}]   ;;  %s1978_s3 = inlined_call_operand.vmem [shape: f32[1,4], index: 3, kind: input, shape index: {}]   ;;  %s1979_s4 = inlined_call_operand.vmem [shape: f32[1,4], index: 4, kind: input, shape index: {}]   ;;  %s1980_s5 = inlined_call_operand.vmem [shape: f32[64,4], index: 5, kind: output, shape index: {}]  }
   0x1   :  { %v24_v0 = vld [vmem:[%s1975_s1 + $0x20] sm:$0xf]  ;;  %v23_v1 = vld [vmem:[%s1975_s1 + $0x18] sm:$0xff]  ;;  %v22_v2 = vld [vmem:[%s1975_s1 + $0x10] sm:$0xff] }
   0x2   :  { %1091 = vmatprep.subr.msk.mxu0 %vm65_vm0, %v24_v0  ;;  %1113 = vmatprep.subr.msk.mxu1 %vm65_vm0, %v24_v0  ;;  %v1227_v3 = vld [vmem:[%s1975_s1 + $0x8] sm:$0xff]  ;;  %v1232_v4 = vld [vmem:[%s1975_s1] sm:$0xff]  ;;  %v28_v9 = vld [vmem:[%s1976_s0 + $0x10] sm:$0xff] }
   0x3   :  { %1092 = vmatpush3.msk.msra.mxu0 %vm65_vm0, %v24_v0  ;;  %1114 = vmatpush3.msk.msra.mxu1 %vm65_vm0, %v24_v0  ;;  %v26_v5 = vld [vmem:[%s1976_s0] sm:$0xff]  ;;  %v27_v7 = vld [vmem:[%s1976_s0 + $0x8] sm:$0xff]  ;;  %v989_v10 = vld [vmem:[%s1976_s0 + $0x50] sm:$0xff] }
   0x4   :  { %1093 = vmatprep.subr.mxu0 %v23_v1  ;;  %1115 = vmatprep.subr.mxu1 %v23_v1  ;;  %v987_v6 = vld [vmem:[%s1976_s0 + $0x40] sm:$0xff]  ;;  %v988_v8 = vld [vmem:[%s1976_s0 + $0x48] sm:$0xff]  ;;  %v29_v11 = vld [vmem:[%s1976_s0 + $0x18] sm:$0xff] }
   0x5   :  { %1094 = vmatpush3.msra.mxu0 %v23_v1  ;;  %1116 = vmatpush3.msra.mxu1 %v23_v1  ;;  %v990_v12 = vld [vmem:[%s1976_s0 + $0x58] sm:$0xff]  ;;  %v30_v13 = vld [vmem:[%s1976_s0 + $0x20] sm:$0xff]  ;;  %v31_v15 = vld [vmem:[%s1976_s0 + $0x28] sm:$0xff] }
   0x6   :  { %1095 = vmatprep.subr.mxu0 %v22_v2  ;;  %1117 = vmatprep.subr.mxu1 %v22_v2  ;;  %v991_v14 = vld [vmem:[%s1976_s0 + $0x60] sm:$0xff]  ;;  %v992_v16 = vld [vmem:[%s1976_s0 + $0x68] sm:$0xff]  ;;  %v32_v17 = vld [vmem:[%s1976_s0 + $0x30] sm:$0xff] }
   0x7   :  { %1096 = vmatpush3.msra.mxu0 %v22_v2  ;;  %1118 = vmatpush3.msra.mxu1 %v22_v2  ;;  %v993_v18 = vld [vmem:[%s1976_s0 + $0x70] sm:$0xff]  ;;  %v33_v19 = vld [vmem:[%s1976_s0 + $0x38] sm:$0xff]  ;;  %v1004_v21 = vld [vmem:[%s1976_s0 + $0x80] sm:$0xff] }
   0x8   :  { %1097 = vmatprep.subr.mxu0 %v1227_v3  ;;  %1119 = vmatprep.subr.mxu1 %v1227_v3  ;;  %v994_v20 = vld [vmem:[%s1976_s0 + $0x78] sm:$0xff]  ;;  %v1021_v22 = vld [vmem:[%s1976_s0 + $0xc0] sm:$0xff]  ;;  %v1005_v23 = vld [vmem:[%s1976_s0 + $0x88] sm:$0xff] }
   0x9   :  { %1098 = vmatpush3.msra.mxu0 %v1227_v3  ;;  %1120 = vmatpush3.msra.mxu1 %v1227_v3  ;;  %v1022_v24 = vld [vmem:[%s1976_s0 + $0xc8] sm:$0xff]  ;;  %v1006_v25 = vld [vmem:[%s1976_s0 + $0x90] sm:$0xff]  ;;  %v1007_v27 = vld [vmem:[%s1976_s0 + $0x98] sm:$0xff] }
   0xa   :  { %1099 = vmatprep.subr.mxu0 %v1232_v4  ;;  %1121 = vmatprep.subr.mxu1 %v1232_v4  ;;  %v1023_v26 = vld [vmem:[%s1976_s0 + $0xd0] sm:$0xff]  ;;  %v1024_v28 = vld [vmem:[%s1976_s0 + $0xd8] sm:$0xff]  ;;  %v1008_v29 = vld [vmem:[%s1976_s0 + $0xa0] sm:$0xff] }
   0xb   :  { %1100 = vmatpush3.msra.mxu0 %v1232_v4  ;;  %1101 = vmatprep.mubr.msk.f32.mxu0 %vm40_vm1, %v26_v5  ;;  %v1025_v30 = vld [vmem:[%s1976_s0 + $0xe0] sm:$0xff]  ;;  %v1009_v31 = vld [vmem:[%s1976_s0 + $0xa8] sm:$0xff]  ;;  %v1010_v33 = vld [vmem:[%s1976_s0 + $0xb0] sm:$0xff] }
   0xc   :  { %1122 = vmatpush3.msra.mxu1 %v1232_v4  ;;  %1123 = vmatprep.mubr.msk.f32.mxu1 %vm40_vm1, %v987_v6  ;;  %v1026_v32 = vld [vmem:[%s1976_s0 + $0xe8] sm:$0xff]  ;;  %v1027_v34 = vld [vmem:[%s1976_s0 + $0xf0] sm:$0xff]  ;;  %v1011_v35 = vld [vmem:[%s1976_s0 + $0xb8] sm:$0xff] }
   0xd   :  { %1102 = vmatmul.mubr.msk.f32.vlgmr.msra.gmra.mxu0 %vm40_vm1, %v27_v7  ;;  %1124 = vmatmul.mubr.msk.f32.vlgmr.msra.gmra.mxu1 %vm40_vm1, %v988_v8  ;;  %v1028_v36 = vld [vmem:[%s1976_s0 + $0xf8] sm:$0xff]  ;;  %v1385_v37 = vld [vmem:[%s1977_s2] ss:$0 sm:$0xff] }
   0xe   :  { %1135 = vmatprep.subr.msk.mxu0 %vm65_vm0, %v24_v0  ;;  %1157 = vmatprep.subr.msk.mxu1 %vm65_vm0, %v24_v0 }
   0xf   :  { %1136 = vmatpush3.msk.msra.mxu0 %vm65_vm0, %v24_v0  ;;  %1104 = vmatprep.mubr.msk.f32.mxu0 %vm40_vm1, %v28_v9 }
  0x10   :  { %1126 = vmatprep.mubr.msk.f32.mxu1 %vm40_vm1, %v989_v10  ;;  %1158 = vmatpush3.msk.msra.mxu1 %vm65_vm0, %v24_v0 }
  0x11   :  { %1105 = vmatmul.mubr.msk.f32.gmra.mxu0 %vm40_vm1, %v29_v11  ;;  %1127 = vmatmul.mubr.msk.f32.gmra.mxu1 %vm40_vm1, %v990_v12 }
  0x12   :  { %1137 = vmatprep.subr.mxu0 %v23_v1  ;;  %1159 = vmatprep.subr.mxu1 %v23_v1 }
  0x13   :  { %1138 = vmatpush3.msra.mxu0 %v23_v1  ;;  %1107 = vmatprep.mubr.msk.f32.mxu0 %vm40_vm1, %v30_v13 }
  0x14   :  { %1129 = vmatprep.mubr.msk.f32.mxu1 %vm40_vm1, %v991_v14  ;;  %1139 = vmatprep.subr.mxu0 %v22_v2 }
  0x15   :  { %1160 = vmatpush3.msra.mxu1 %v23_v1  ;;  %1108 = vmatmul.mubr.msk.f32.gmra.mxu0 %vm40_vm1, %v31_v15 }
  0x16   :  { %1130 = vmatmul.mubr.msk.f32.gmra.mxu1 %vm40_vm1, %v992_v16  ;;  %1140 = vmatpush3.msra.mxu0 %v22_v2 }
  0x17   :  { %1161 = vmatprep.subr.mxu1 %v22_v2  ;;  %1141 = vmatprep.subr.mxu0 %v1227_v3 }
  0x18   :  { %1162 = vmatpush3.msra.mxu1 %v22_v2  ;;  %1110 = vmatprep.mubr.msk.f32.mxu0 %vm40_vm1, %v32_v17 }
  0x19   :  { %1132 = vmatprep.mubr.msk.f32.mxu1 %vm40_vm1, %v993_v18  ;;  %1142 = vmatpush3.msra.mxu0 %v1227_v3 }
  0x1a   :  { %1111 = vmatmul.mubr.msk.f32.gmra.mxu0 %vm40_vm1, %v33_v19  ;;  %1133 = vmatmul.mubr.msk.f32.gmra.mxu1 %vm40_vm1, %v994_v20 }
  0x1b   :  { %1163 = vmatprep.subr.mxu1 %v1227_v3  ;;  %1143 = vmatprep.subr.mxu0 %v1232_v4 }
  0x1c   :  { %1164 = vmatpush3.msra.mxu1 %v1227_v3  ;;  %1144 = vmatpush3.msra.mxu0 %v1232_v4 }
  0x1d   :  { %1165 = vmatprep.subr.mxu1 %v1232_v4  ;;  %1145 = vmatprep.mubr.msk.f32.mxu0 %vm40_vm1, %v1004_v21 }
  0x1e   :  { %1166 = vmatpush3.msra.mxu1 %v1232_v4  ;;  %1167 = vmatprep.mubr.msk.f32.mxu1 %vm40_vm1, %v1021_v22 }
  0x1f   :  { %1146 = vmatmul.mubr.msk.f32.vlgmr.msra.gmra.mxu0 %vm40_vm1, %v1005_v23  ;;  %1168 = vmatmul.mubr.msk.f32.vlgmr.msra.gmra.mxu1 %vm40_vm1, %v1022_v24 }
  0x20   :  { %1148 = vmatprep.mubr.msk.f32.mxu0 %vm40_vm1, %v1006_v25  ;;  %1170 = vmatprep.mubr.msk.f32.mxu1 %vm40_vm1, %v1023_v26 }
  0x23   :  { %1149 = vmatmul.mubr.msk.f32.gmra.mxu0 %vm40_vm1, %v1007_v27  ;;  %1171 = vmatmul.mubr.msk.f32.gmra.mxu1 %vm40_vm1, %v1024_v28 }
  0x24   :  { %1151 = vmatprep.mubr.msk.f32.mxu0 %vm40_vm1, %v1008_v29  ;;  %1173 = vmatprep.mubr.msk.f32.mxu1 %vm40_vm1, %v1025_v30 }
  0x27   :  { %1152 = vmatmul.mubr.msk.f32.gmra.mxu0 %vm40_vm1, %v1009_v31  ;;  %1174 = vmatmul.mubr.msk.f32.gmra.mxu1 %vm40_vm1, %v1026_v32 }
  0x28   :  { %1154 = vmatprep.mubr.msk.f32.mxu0 %vm40_vm1, %v1010_v33  ;;  %1176 = vmatprep.mubr.msk.f32.mxu1 %vm40_vm1, %v1027_v34 }
  0x2b   :  { %1155 = vmatmul.mubr.msk.f32.gmra.mxu0 %vm40_vm1, %v1011_v35  ;;  %1177 = vmatmul.mubr.msk.f32.gmra.mxu1 %vm40_vm1, %v1028_v36 }
  0xcd   :  { %v1103_v38 = vpop.f32.mrf.mxu0  ;;  %v1125_v39 = vpop.f32.mrf.mxu1 }
  0xce   :  { %v1388_v40 = vadd.f32 %v1125_v39, %v1385_v37  ;;  %v1391_v41 = vadd.f32 %v1103_v38, %v1385_v37 }
  0xcf   :  { %v135_v42 = vpop.f32.mrf.mxu0  ;;  %v273_v43 = vpop.f32.mrf.mxu1 }
  0xd0   :  { %v1394_v44 = vadd.f32 %v1385_v37, %v135_v42  ;;  %v1397_v45 = vadd.f32 %v1385_v37, %v273_v43  ;;  %v611_v48 = vsel %vm588_vm2, %v1388_v40, 0.0  ;;  %v590_v51 = vsel %vm588_vm2, %v1391_v41, 0.0 }
  0xd1   :  { %v1106_v46 = vpop.f32.mrf.mxu0  ;;  %v1128_v47 = vpop.f32.mrf.mxu1 }
  0xd2   :  { %v589_v49 = vsel %vm588_vm2, %v1394_v44, 0.0  ;;  %v610_v50 = vsel %vm588_vm2, %v1397_v45, 0.0  ;;  %v1408_v54 = vadd.f32 %v1106_v46, %v1385_v37  ;;  %v1411_v55 = vadd.f32 %v1128_v47, %v1385_v37 }
  0xd3   :  { %v145_v52 = vpop.f32.mrf.mxu0  ;;  %v283_v53 = vpop.f32.mrf.mxu1  ;;  %v591_v58 = vadd.f32 %v590_v51, %v589_v49  ;;  %v612_v59 = vadd.f32 %v611_v48, %v610_v50 }
  0xd4   :  { %v1414_v56 = vadd.f32 %v1385_v37, %v145_v52  ;;  %v1417_v57 = vadd.f32 %v1385_v37, %v283_v53  ;;  %v594_v3 = vsel %vm588_vm2, %v1408_v54, 0.0  ;;  %v615_v4 = vsel %vm588_vm2, %v1411_v55, 0.0 }
  0xd5   :  { %v1109_v60 = vpop.f32.mrf.mxu0 }
  0xd6   :  { %v592_v61 = vsel %vm588_vm2, %v1414_v56, 0.0  ;;  %v613_v62 = vsel %vm588_vm2, %v1417_v57, 0.0  ;;  %v1131_v63 = vpop.f32.mrf.mxu1  ;;  %v1428_v5 = vadd.f32 %v1109_v60, %v1385_v37 }
  0xd7   :  { %v593_v0 = vadd.f32 %v592_v61, %v591_v58  ;;  %v614_v1 = vadd.f32 %v613_v62, %v612_v59  ;;  %v155_v2 = vpop.f32.mrf.mxu0  ;;  %v1434_v8 = vadd.f32 %v1131_v63, %v1385_v37 }
  0xd8   :  { %v1431_v6 = vadd.f32 %v1385_v37, %v155_v2  ;;  %v293_v7 = vpop.f32.mrf.mxu1  ;;  %v598_v17 = vsel %vm588_vm2, %v1428_v5, 0.0 }
  0xd9   :  { %v595_v9 = vadd.f32 %v594_v3, %v593_v0  ;;  %v1437_v10 = vadd.f32 %v1385_v37, %v293_v7  ;;  %v616_v11 = vadd.f32 %v615_v4, %v614_v1  ;;  %v619_v21 = vsel %vm588_vm2, %v1434_v8, 0.0 }
  0xda   :  { %v596_v12 = vsel %vm588_vm2, %v1431_v6, 0.0  ;;  %v1112_v13 = vpop.f32.mrf.mxu0  ;;  %v1134_v14 = vpop.f32.mrf.mxu1 }
  0xdb   :  { %v597_v15 = vadd.f32 %v596_v12, %v595_v9  ;;  %v617_v16 = vsel %vm588_vm2, %v1437_v10, 0.0  ;;  %v1454_v26 = vadd.f32 %v1112_v13, %v1385_v37  ;;  %v1457_v27 = vadd.f32 %v1134_v14, %v1385_v37 }
  0xdc   :  { %v618_v18 = vadd.f32 %v617_v16, %v616_v11  ;;  %v165_v19 = vpop.f32.mrf.mxu0  ;;  %v303_v20 = vpop.f32.mrf.mxu1 }
  0xdd   :  { %v1448_v22 = vadd.f32 %v1385_v37, %v165_v19  ;;  %v599_v23 = vadd.f32 %v598_v17, %v597_v15  ;;  %v1451_v24 = vadd.f32 %v1385_v37, %v303_v20  ;;  %v602_v42 = vsel %vm588_vm2, %v1454_v26, 0.0 }
  0xde   :  { %v620_v25 = vadd.f32 %v619_v21, %v618_v18  ;;  %v623_v43 = vsel %vm588_vm2, %v1457_v27, 0.0 }
  0xdf   :  { %v600_v28 = vsel %vm588_vm2, %v1448_v22, 0.0  ;;  %v1147_v29 = vpop.f32.mrf.mxu0  ;;  %v1169_v30 = vpop.f32.mrf.mxu1  ;;  %v621_v32 = vsel %vm588_vm2, %v1451_v24, 0.0 }
  0xe0   :  { %v601_v31 = vadd.f32 %v600_v28, %v599_v23  ;;  %v622_v33 = vadd.f32 %v621_v32, %v620_v25  ;;  %v1464_v34 = vadd.f32 %v1169_v30, %v1385_v37  ;;  %v1467_v38 = vadd.f32 %v1147_v29, %v1385_v37 }
  0xe1   :  { %v411_v35 = vpop.f32.mrf.mxu0  ;;  %v549_v36 = vpop.f32.mrf.mxu1 }
  0xe2   :  { %v1470_v39 = vadd.f32 %v1385_v37, %v411_v35  ;;  %v1477_v46 = vadd.f32 %v1385_v37, %v549_v36  ;;  %v603_v49 = vadd.f32 %v602_v42, %v601_v31  ;;  %v624_v50 = vadd.f32 %v623_v43, %v622_v33 }
  0xe3   :  { %v1150_v47 = vpop.f32.mrf.mxu0  ;;  %v1172_v48 = vpop.f32.mrf.mxu1  ;;  %v655_v51 = vsel %vm588_vm2, %v1464_v34, 0.0  ;;  %v633_v60 = vsel %vm588_vm2, %v1467_v38, 0.0 }
  0xe4   :  { %v632_v52 = vsel %vm588_vm2, %v1470_v39, 0.0  ;;  %v654_v53 = vsel %vm588_vm2, %v1477_v46, 0.0  ;;  %v1488_v61 = vadd.f32 %v1150_v47, %v1385_v37  ;;  %v1491_v62 = vadd.f32 %v1172_v48, %v1385_v37 }
  0xe5   :  { %v421_v58 = vpop.f32.mrf.mxu0  ;;  %v559_v59 = vpop.f32.mrf.mxu1  ;;  %v604_v3 = vrot.slane %v603_v49, 4  ;;  %v625_v4 = vrot.slane %v624_v50, 4  ;;  %v634_v7 = vadd.f32 %v633_v60, %v632_v52  ;;  %v656_v9 = vadd.f32 %v655_v51, %v654_v53 }
  0xe6   :  { %v1494_v63 = vadd.f32 %v1385_v37, %v421_v58  ;;  %v1497_v0 = vadd.f32 %v1385_v37, %v559_v59  ;;  %v637_v19 = vsel %vm588_vm2, %v1488_v61, 0.0  ;;  %v659_v20 = vsel %vm588_vm2, %v1491_v62, 0.0 }
  0xe7   :  { %v1153_v1 = vpop.f32.mrf.mxu0  ;;  %v1175_v2 = vpop.f32.mrf.mxu1  ;;  %v605_v29 = vadd.f32 %v604_v3, %v603_v49  ;;  %v626_v30 = vadd.f32 %v625_v4, %v624_v50 }
  0xe8   :  { %v635_v11 = vsel %vm588_vm2, %v1494_v63, 0.0  ;;  %v657_v12 = vsel %vm588_vm2, %v1497_v0, 0.0  ;;  %v1504_v17 = vadd.f32 %v1153_v1, %v1385_v37  ;;  %v1507_v18 = vadd.f32 %v1175_v2, %v1385_v37 }
  0xe9   :  { %v431_v13 = vpop.f32.mrf.mxu0  ;;  %v569_v14 = vpop.f32.mrf.mxu1  ;;  %v636_v15 = vadd.f32 %v635_v11, %v634_v7  ;;  %v658_v16 = vadd.f32 %v657_v12, %v656_v9  ;;  %v606_v58 = vrot.slane %v605_v29, 2  ;;  %v627_v59 = vrot.slane %v626_v30, 2 }
  0xea   :  { %v1514_v21 = vadd.f32 %v1385_v37, %v431_v13  ;;  %v1517_v23 = vadd.f32 %v1385_v37, %v569_v14  ;;  %v641_v43 = vsel %vm588_vm2, %v1504_v17, 0.0  ;;  %v663_v47 = vsel %vm588_vm2, %v1507_v18, 0.0 }
  0xeb   :  { %v1156_v25 = vpop.f32.mrf.mxu0  ;;  %v1178_v28 = vpop.f32.mrf.mxu1  ;;  %v638_v31 = vadd.f32 %v637_v19, %v636_v15  ;;  %v660_v32 = vadd.f32 %v659_v20, %v658_v16  ;;  %v628_v12 = vadd.f32 %v627_v59, %v626_v30 }
  0xec   :  { %v639_v33 = vsel %vm588_vm2, %v1514_v21, 0.0  ;;  %v661_v35 = vsel %vm588_vm2, %v1517_v23, 0.0  ;;  %v1528_v49 = vadd.f32 %v1156_v25, %v1385_v37  ;;  %v1531_v50 = vadd.f32 %v1178_v28, %v1385_v37 }
  0xed   :  { %v441_v36 = vpop.f32.mrf.mxu0  ;;  %v579_v42 = vpop.f32.mrf.mxu1  ;;  %v640_v48 = vadd.f32 %v639_v33, %v638_v31  ;;  %v662_v51 = vadd.f32 %v661_v35, %v660_v32  ;;  %v629_v20 = vrot.slane %v628_v12, 1 }
  0xee   :  { %v1534_v52 = vadd.f32 %v1385_v37, %v441_v36  ;;  %v1537_v53 = vadd.f32 %v1385_v37, %v579_v42  ;;  %v645_v9 = vsel %vm588_vm2, %v1528_v49, 0.0  ;;  %v667_v11 = vsel %vm588_vm2, %v1531_v50, 0.0 }
  0xef   :  { %v642_v60 = vadd.f32 %v641_v43, %v640_v48  ;;  %v664_v1 = vadd.f32 %v663_v47, %v662_v51  ;;  %v607_v37 = vadd.f32 %v606_v58, %v605_v29  ;;  %v630_v35 = vadd.f32 %v629_v20, %v628_v12 }
  0xf0   :  { %v643_v2 = vsel %vm588_vm2, %v1534_v52, 0.0  ;;  %v665_v3 = vsel %vm588_vm2, %v1537_v53, 0.0 }
  0xf1   :  { %v644_v4 = vadd.f32 %v643_v2, %v642_v60  ;;  %v666_v7 = vadd.f32 %v665_v3, %v664_v1  ;;  %v608_v19 = vrot.slane %v607_v37, 1 }
  0xf3   :  { %v646_v13 = vadd.f32 %v645_v9, %v644_v4  ;;  %v668_v14 = vadd.f32 %v667_v11, %v666_v7  ;;  %v609_v33 = vadd.f32 %v608_v19, %v607_v37 }
  0xf5   :  { %v647_v15 = vrot.slane %v646_v13, 4  ;;  %v669_v16 = vrot.slane %v668_v14, 4  ;;  %v631_v48 = vadd.f32 %v630_v35, %v609_v33 }
  0xf7   :  { %v648_v25 = vadd.f32 %v647_v15, %v646_v13  ;;  %v670_v28 = vadd.f32 %v669_v16, %v668_v14 }
  0xf9   :  { %v649_v31 = vrot.slane %v648_v25, 2  ;;  %v671_v32 = vrot.slane %v670_v28, 2 }
  0xfb   :  { %v650_v36 = vadd.f32 %v649_v31, %v648_v25  ;;  %v672_v42 = vadd.f32 %v671_v32, %v670_v28 }
  0xfd   :  { %v651_v43 = vrot.slane %v650_v36, 1  ;;  %v673_v47 = vrot.slane %v672_v42, 1 }
  0xff   :  { %v652_v51 = vadd.f32 %v651_v43, %v650_v36  ;;  %v674_v30 = vadd.f32 %v673_v47, %v672_v42 }
 0x101   :  { %v653_v29 = vadd.f32 %v652_v51, %v631_v48 }
 0x103   :  { %v675_v58 = vadd.f32 %v674_v30, %v653_v29 }
 0x105   :  { %v1547_v59 = vmul.f32 0.00390625, %v675_v58 }
 0x107   :  { %v1551_v60 = vsub.f32 %v1394_v44, %v1547_v59  ;;  %v1555_v1 = vsub.f32 %v1391_v41, %v1547_v59  ;;  %v1559_v2 = vsub.f32 %v1414_v56, %v1547_v59  ;;  %v1563_v3 = vsub.f32 %v1408_v54, %v1547_v59 }
 0x108   :  { %v1567_v4 = vsub.f32 %v1431_v6, %v1547_v59  ;;  %v1577_v56 = vsub.f32 %v1428_v5, %v1547_v59  ;;  %v1581_v54 = vsub.f32 %v1448_v22, %v1547_v59  ;;  %v1589_v37 = vsub.f32 %v1454_v26, %v1547_v59 }
 0x109   :  { %v686_v44 = vmul.f32 %v1551_v60, %v1551_v60  ;;  %v687_v7 = vmul.f32 %v1555_v1, %v1555_v1  ;;  %v688_v41 = vmul.f32 %v1559_v2, %v1559_v2  ;;  %v689_v6 = vmul.f32 %v1563_v3, %v1563_v3 }
 0x10a   :  { %v690_v12 = vmul.f32 %v1567_v4, %v1567_v4  ;;  %v1596_v22 = vsub.f32 %v1397_v45, %v1547_v59  ;;  %v1600_v14 = vsub.f32 %v1388_v40, %v1547_v59  ;;  %v1604_v15 = vsub.f32 %v1417_v57, %v1547_v59 }
 0x10b   :  { %v694_v9 = vsel %vm588_vm2, %v686_v44, 0.0  ;;  %v695_v11 = vsel %vm588_vm2, %v687_v7, 0.0  ;;  %v697_v13 = vsel %vm588_vm2, %v688_v41, 0.0  ;;  %v691_v26 = vmul.f32 %v1577_v56, %v1577_v56 }
 0x10c   :  { %v696_v5 = vadd.f32 %v695_v11, %v694_v9  ;;  %v692_v16 = vmul.f32 %v1581_v54, %v1581_v54  ;;  %v1612_v20 = vsub.f32 %v1411_v55, %v1547_v59  ;;  %v699_v45 = vsel %vm588_vm2, %v689_v6, 0.0 }
 0x10d   :  { %v1617_v40 = vsub.f32 %v1437_v10, %v1547_v59  ;;  %v723_v57 = vmul.f32 %v1596_v22, %v1596_v22  ;;  %v724_v25 = vmul.f32 %v1600_v14, %v1600_v14  ;;  %v693_v28 = vmul.f32 %v1589_v37, %v1589_v37 }
 0x10e   :  { %v698_v19 = vadd.f32 %v697_v13, %v696_v5  ;;  %v725_v55 = vmul.f32 %v1604_v15, %v1604_v15  ;;  %v701_v32 = vsel %vm588_vm2, %v690_v12, 0.0  ;;  %v1630_v33 = vsub.f32 %v1434_v8, %v1547_v59 }
 0x10f   :  { %v1634_v10 = vsub.f32 %v1451_v24, %v1547_v59  ;;  %v731_v35 = vsel %vm588_vm2, %v723_v57, 0.0  ;;  %v703_v42 = vsel %vm588_vm2, %v691_v26, 0.0  ;;  %v726_v43 = vmul.f32 %v1612_v20, %v1612_v20 }
 0x110   :  { %v700_v31 = vadd.f32 %v699_v45, %v698_v19  ;;  %v732_v47 = vsel %vm588_vm2, %v724_v25, 0.0  ;;  %v705_v48 = vsel %vm588_vm2, %v692_v16, 0.0  ;;  %v1644_v8 = vsub.f32 %v1457_v27, %v1547_v59 }
 0x111   :  { %v727_v24 = vmul.f32 %v1617_v40, %v1617_v40  ;;  %v733_v51 = vadd.f32 %v732_v47, %v731_v35  ;;  %v734_v30 = vsel %vm588_vm2, %v725_v55, 0.0  ;;  %v1651_v58 = vsub.f32 %v1470_v39, %v1547_v59 }
 0x112   :  { %v702_v36 = vadd.f32 %v701_v32, %v700_v31  ;;  %v1655_v44 = vsub.f32 %v1467_v38, %v1547_v59  ;;  %v728_v7 = vmul.f32 %v1630_v33, %v1630_v33  ;;  %v729_v27 = vmul.f32 %v1634_v10, %v1634_v10 }
 0x113   :  { %v735_v41 = vadd.f32 %v734_v30, %v733_v51  ;;  %v1663_v6 = vsub.f32 %v1494_v63, %v1547_v59  ;;  %v736_v11 = vsel %vm588_vm2, %v726_v43, 0.0  ;;  %v1668_v39 = vsub.f32 %v1488_v61, %v1547_v59 }
 0x114   :  { %v704_v29 = vadd.f32 %v703_v42, %v702_v36  ;;  %v730_v38 = vmul.f32 %v1644_v8, %v1644_v8  ;;  %v761_v5 = vmul.f32 %v1651_v58, %v1651_v58  ;;  %v762_v13 = vmul.f32 %v1655_v44, %v1655_v44 }
 0x115   :  { %v737_v12 = vadd.f32 %v736_v11, %v735_v41  ;;  %v707_v63 = vsel %vm588_vm2, %v693_v28, 0.0  ;;  %v738_v26 = vsel %vm588_vm2, %v727_v24, 0.0  ;;  %v1680_v16 = vsub.f32 %v1514_v21, %v1547_v59 }
 0x116   :  { %v706_v9 = vadd.f32 %v705_v48, %v704_v29  ;;  %v763_v61 = vmul.f32 %v1663_v6, %v1663_v6  ;;  %v740_v45 = vsel %vm588_vm2, %v728_v7, 0.0  ;;  %v742_v57 = vsel %vm588_vm2, %v729_v27, 0.0 }
 0x117   :  { %v739_v19 = vadd.f32 %v738_v26, %v737_v12  ;;  %v769_v25 = vsel %vm588_vm2, %v761_v5, 0.0  ;;  %v1689_v28 = vsub.f32 %v1504_v17, %v1547_v59  ;;  %v764_v55 = vmul.f32 %v1668_v39, %v1668_v39 }
 0x118   :  { %v708_v31 = vadd.f32 %v707_v63, %v706_v9  ;;  %v770_v21 = vsel %vm588_vm2, %v762_v13, 0.0  ;;  %v744_v35 = vsel %vm588_vm2, %v730_v38, 0.0  ;;  %v1697_v36 = vsub.f32 %v1534_v52, %v1547_v59 }
 0x119   :  { %v741_v32 = vadd.f32 %v740_v45, %v739_v19  ;;  %v771_v42 = vadd.f32 %v770_v21, %v769_v25  ;;  %v1701_v43 = vsub.f32 %v1528_v49, %v1547_v59  ;;  %v765_v17 = vmul.f32 %v1680_v16, %v1680_v16 }
 0x11a   :  { %v772_v47 = vsel %vm588_vm2, %v763_v61, 0.0  ;;  %v1708_v48 = vsub.f32 %v1477_v46, %v1547_v59  ;;  %v1712_v52 = vsub.f32 %v1464_v34, %v1547_v59  ;;  %v1716_v29 = vsub.f32 %v1497_v0, %v1547_v59 }
 0x11b   :  { %v743_v24 = vadd.f32 %v742_v57, %v741_v32  ;;  %v773_v51 = vadd.f32 %v772_v47, %v771_v42  ;;  %v709_v49 = vrot.slane %v708_v31, 4  ;;  %v766_v30 = vmul.f32 %v1689_v28, %v1689_v28 }
 0x11c   :  { %v774_v7 = vsel %vm588_vm2, %v764_v55, 0.0  ;;  %v1723_v46 = vsub.f32 %v1491_v62, %v1547_v59  ;;  %v767_v41 = vmul.f32 %v1697_v36, %v1697_v36  ;;  %v768_v9 = vmul.f32 %v1701_v43, %v1701_v43 }
 0x11d   :  { %v745_v27 = vadd.f32 %v744_v35, %v743_v24  ;;  %v775_v34 = vadd.f32 %v774_v7, %v773_v51  ;;  %v776_v0 = vsel %vm588_vm2, %v765_v17, 0.0  ;;  %v799_v11 = vmul.f32 %v1708_v48, %v1708_v48 }
 0x11e   :  { %v800_v38 = vmul.f32 %v1712_v52, %v1712_v52  ;;  %v1736_v62 = vsub.f32 %v1517_v23, %v1547_v59  ;;  %v801_v13 = vmul.f32 %v1716_v29, %v1716_v29  ;;  %v710_v63 = vadd.f32 %v709_v49, %v708_v31 }
 0x11f   :  { %v746_v12 = vrot.slane %v745_v27, 4  ;;  %v777_v5 = vadd.f32 %v776_v0, %v775_v34  ;;  %v778_v26 = vsel %vm588_vm2, %v766_v30, 0.0  ;;  %v1743_v61 = vsub.f32 %v1507_v18, %v1547_v59 }
 0x120   :  { %v802_v19 = vmul.f32 %v1723_v46, %v1723_v46  ;;  %v807_v25 = vsel %vm588_vm2, %v799_v11, 0.0  ;;  %v808_v23 = vsel %vm588_vm2, %v800_v38, 0.0  ;;  %v780_v55 = vsel %vm588_vm2, %v767_v41, 0.0 }
 0x121   :  { %v747_v45 = vadd.f32 %v746_v12, %v745_v27  ;;  %v779_v57 = vadd.f32 %v778_v26, %v777_v5  ;;  %v809_v21 = vadd.f32 %v808_v23, %v807_v25  ;;  %v1752_v31 = vsub.f32 %v1537_v53, %v1547_v59 }
 0x122   :  { %v803_v18 = vmul.f32 %v1736_v62, %v1736_v62  ;;  %v810_v35 = vsel %vm588_vm2, %v801_v13, 0.0  ;;  %v711_v42 = vrot.slane %v710_v63, 2  ;;  %v782_v47 = vsel %vm588_vm2, %v768_v9, 0.0 }
 0x123   :  { %v781_v32 = vadd.f32 %v780_v55, %v779_v57  ;;  %v748_v17 = vrot.slane %v747_v45, 2  ;;  %v811_v24 = vadd.f32 %v810_v35, %v809_v21  ;;  %v1760_v49 = vsub.f32 %v1531_v50, %v1547_v59 }
 0x124   :  { %v804_v30 = vmul.f32 %v1743_v61, %v1743_v61  ;;  %v812_v53 = vsel %vm588_vm2, %v802_v19, 0.0  ;;  %v805_v41 = vmul.f32 %v1752_v31, %v1752_v31  ;;  %v814_v34 = vsel %vm588_vm2, %v803_v18, 0.0 }
 0x125   :  { %v783_v51 = vadd.f32 %v782_v47, %v781_v32  ;;  %v813_v7 = vadd.f32 %v812_v53, %v811_v24  ;;  %v712_v0 = vadd.f32 %v711_v42, %v710_v63  ;;  %v749_v9 = vadd.f32 %v748_v17, %v747_v45 }
 0x126   :  { %v806_v50 = vmul.f32 %v1760_v49, %v1760_v49  ;;  %v816_v59 = vsel %vm588_vm2, %v804_v30, 0.0  ;;  %v818_v13 = vsel %vm588_vm2, %v805_v41, 0.0  ;;  %v835_v41 = vlaneseq }
 0x127   :  { %v784_v27 = vrot.slane %v783_v51, 4  ;;  %v815_v11 = vadd.f32 %v814_v34, %v813_v7  ;;  %v713_v26 = vrot.slane %v712_v0, 1  ;;  %v750_v19 = vrot.slane %v749_v9, 1 }
 0x128   :  { %v820_v25 = vsel %vm588_vm2, %v806_v50, 0.0  ;;  %v836_v34 = vshrl.u32 %v835_v41, 7 }
 0x129   :  { %v785_v38 = vadd.f32 %v784_v27, %v783_v51  ;;  %v817_v12 = vadd.f32 %v816_v59, %v815_v11  ;;  %v714_v63 = vadd.f32 %v713_v26, %v712_v0  ;;  %v751_v45 = vadd.f32 %v750_v19, %v749_v9  ;;  %v832_v0 = vld [vmem:[%s1978_s3] sm:$0x1] }
 0x12a   :  { %v837_v9 = vsub.s32 0, %v836_v34  ;;  %v1781_v59 = vld [vmem:[%s1979_s4] ss:$0 sm:$0xff] }
 0x12b   :  { %v786_v5 = vrot.slane %v785_v38, 2  ;;  %v819_v57 = vadd.f32 %v818_v13, %v817_v12  ;;  %v752_v35 = vadd.f32 %v751_v45, %v714_v63 }
 0x12d   :  { %v787_v23 = vadd.f32 %v786_v5, %v785_v38  ;;  %v821_v55 = vadd.f32 %v820_v25, %v819_v57 }
 0x12f   :  { %v822_v21 = vrot.slane %v821_v55, 4  ;;  %v788_v32 = vrot.slane %v787_v23, 1 }
 0x131   :  { %v823_v18 = vadd.f32 %v822_v21, %v821_v55  ;;  %v789_v17 = vadd.f32 %v788_v32, %v787_v23 }
 0x133   :  { %v824_v42 = vrot.slane %v823_v18, 2  ;;  %v790_v24 = vadd.f32 %v789_v17, %v752_v35 }
 0x135   :  { %v825_v47 = vadd.f32 %v824_v42, %v823_v18 }
 0x137   :  { %v826_v51 = vrot.slane %v825_v47, 1 }
 0x139   :  { %v827_v30 = vadd.f32 %v826_v51, %v825_v47 }
 0x13b   :  { %v828_v53 = vadd.f32 %v827_v30, %v790_v24 }
 0x13d   :  { %v829_v7 = vmul.f32 0.00390625, %v828_v53 }
 0x13f   :  { %v830_v27 = vadd.f32 1e-05, %v829_v7 }
 0x141   :  { %1179 = vrsqrt.f32 %v830_v27 }
 0x14e   :  { %v1180_v11 = vpop.eup %1179 }
 0x14f   :  { %v833_v38 = vmul.f32 %v1180_v11, %v832_v0 }
 0x151   :  { %v1776_v50 = vrot.slane %v833_v38, %v837_v9 }
 0x153   :  { %v839_v12 = vmul.f32 %v1776_v50, %v1551_v60  ;;  %v840_v5 = vmul.f32 %v1776_v50, %v1555_v1  ;;  %v841_v13 = vmul.f32 %v1776_v50, %v1559_v2  ;;  %v842_v26 = vmul.f32 %v1776_v50, %v1563_v3 }
 0x154   :  { %v843_v19 = vmul.f32 %v1776_v50, %v1567_v4  ;;  %v844_v57 = vmul.f32 %v1776_v50, %v1577_v56  ;;  %v845_v25 = vmul.f32 %v1776_v50, %v1581_v54  ;;  %v846_v60 = vmul.f32 %v1776_v50, %v1589_v37 }
 0x155   :  { %v1800_v1 = vadd.f32 %v1781_v59, %v839_v12  ;;  %v1803_v2 = vadd.f32 %v1781_v59, %v840_v5  ;;  %v1806_v3 = vadd.f32 %v1781_v59, %v841_v13  ;;  %v1809_v4 = vadd.f32 %v1781_v59, %v842_v26 }
 0x156   :  { %v1812_v56 = vadd.f32 %v1781_v59, %v843_v19  ;;  %v1815_v54 = vadd.f32 %v1781_v59, %v844_v57  ;;  %v1818_v37 = vadd.f32 %v1781_v59, %v845_v25  ;;  %v1821_v23 = vadd.f32 %v1781_v59, %v846_v60 }
 0x157   :  { %v861_v55 = vmax.f32 %v1800_v1, 0.0  ;;  %v862_v63 = vmax.f32 %v1803_v2, 0.0  ;;  %v863_v45 = vmax.f32 %v1806_v3, 0.0  ;;  %v864_v21 = vmax.f32 %v1809_v4, 0.0 }
 0x158   :  { %v865_v32 = vmax.f32 %v1812_v56, 0.0  ;;  %v866_v18 = vmax.f32 %v1815_v54, 0.0  ;;  %v867_v35 = vmax.f32 %v1818_v37, 0.0  ;;  %v868_v42 = vmax.f32 %v1821_v23, 0.0 }
 0x159   :  { %v869_v17 = vmul.f32 %v1776_v50, %v1596_v22  ;;  %v870_v47 = vmul.f32 %v1776_v50, %v1600_v14  ;;  %v871_v24 = vmul.f32 %v1776_v50, %v1604_v15  ;;  %v872_v51 = vmul.f32 %v1776_v50, %v1612_v20 }
 0x15a   :  { %v873_v30 = vmul.f32 %v1776_v50, %v1617_v40  ;;  %v874_v53 = vmul.f32 %v1776_v50, %v1630_v33  ;;  %v875_v7 = vmul.f32 %v1776_v50, %v1634_v10  ;;  %v876_v22 = vmul.f32 %v1776_v50, %v1644_v8 }
 0x15b   :  { %v1848_v14 = vadd.f32 %v1781_v59, %v869_v17  ;;  %v1851_v15 = vadd.f32 %v1781_v59, %v870_v47  ;;  %v1854_v20 = vadd.f32 %v1781_v59, %v871_v24  ;;  %v1857_v40 = vadd.f32 %v1781_v59, %v872_v51 }
 0x15c   :  { %v1860_v33 = vadd.f32 %v1781_v59, %v873_v30  ;;  %v1863_v10 = vadd.f32 %v1781_v59, %v874_v53  ;;  %v1866_v8 = vadd.f32 %v1781_v59, %v875_v7  ;;  %v1869_v27 = vadd.f32 %v1781_v59, %v876_v22 }
 0x15d   :  { %v885_v41 = vmax.f32 %v1848_v14, 0.0  ;;  %v886_v34 = vmax.f32 %v1851_v15, 0.0  ;;  %v887_v0 = vmax.f32 %v1854_v20, 0.0  ;;  %v888_v9 = vmax.f32 %v1857_v40, 0.0 }
 0x15e   :  { %v889_v11 = vmax.f32 %v1860_v33, 0.0  ;;  %v890_v38 = vmax.f32 %v1863_v10, 0.0  ;;  %v891_v12 = vmax.f32 %v1866_v8, 0.0  ;;  %v892_v5 = vmax.f32 %v1869_v27, 0.0 }
 0x15f   :  { %v893_v13 = vmul.f32 %v1776_v50, %v1651_v58  ;;  %v894_v26 = vmul.f32 %v1776_v50, %v1655_v44  ;;  %v895_v19 = vmul.f32 %v1776_v50, %v1663_v6  ;;  %v896_v57 = vmul.f32 %v1776_v50, %v1668_v39 }
 0x160   :  { %v897_v25 = vmul.f32 %v1776_v50, %v1680_v16  ;;  %v898_v60 = vmul.f32 %v1776_v50, %v1689_v28  ;;  %v899_v17 = vmul.f32 %v1776_v50, %v1697_v36  ;;  %v900_v58 = vmul.f32 %v1776_v50, %v1701_v43 }
 0x161   :  { %v901_v44 = vadd.f32 %v1781_v59, %v893_v13  ;;  %v902_v47 = vadd.f32 %v1781_v59, %v894_v26  ;;  %v903_v6 = vadd.f32 %v1781_v59, %v895_v19  ;;  %v904_v39 = vadd.f32 %v1781_v59, %v896_v57 }
 0x162   :  { %v905_v24 = vadd.f32 %v1781_v59, %v897_v25  ;;  %v906_v16 = vadd.f32 %v1781_v59, %v898_v60  ;;  %v907_v28 = vadd.f32 %v1781_v59, %v899_v17  ;;  %v908_v51 = vadd.f32 %v1781_v59, %v900_v58 }
 0x163   :  { %v909_v36 = vmax.f32 %v901_v44, 0.0  ;;  %v910_v30 = vmax.f32 %v902_v47, 0.0  ;;  %v911_v53 = vmax.f32 %v903_v6, 0.0  ;;  %v912_v43 = vmax.f32 %v904_v39, 0.0 }
 0x164   :  { %v913_v7 = vmax.f32 %v905_v24, 0.0  ;;  %v914_v22 = vmax.f32 %v906_v16, 0.0  ;;  %v915_v14 = vmax.f32 %v907_v28, 0.0  ;;  %v916_v15 = vmax.f32 %v908_v51, 0.0 }
 0x165   :  { %v917_v20 = vmul.f32 %v1776_v50, %v1708_v48  ;;  %v918_v40 = vmul.f32 %v1776_v50, %v1712_v52  ;;  %v919_v33 = vmul.f32 %v1776_v50, %v1716_v29  ;;  %v920_v10 = vmul.f32 %v1776_v50, %v1723_v46 }
 0x166   :  { %v921_v8 = vmul.f32 %v1776_v50, %v1736_v62  ;;  %v922_v27 = vmul.f32 %v1776_v50, %v1743_v61  ;;  %v923_v13 = vmul.f32 %v1776_v50, %v1752_v31  ;;  %v924_v48 = vmul.f32 %v1776_v50, %v1760_v49 }
 0x167   :  { %v925_v52 = vadd.f32 %v1781_v59, %v917_v20  ;;  %v926_v26 = vadd.f32 %v1781_v59, %v918_v40  ;;  %v927_v29 = vadd.f32 %v1781_v59, %v919_v33  ;;  %v928_v46 = vadd.f32 %v1781_v59, %v920_v10 }
 0x168   :  { %v929_v19 = vadd.f32 %v1781_v59, %v921_v8  ;;  %v930_v62 = vadd.f32 %v1781_v59, %v922_v27  ;;  %v931_v61 = vadd.f32 %v1781_v59, %v923_v13  ;;  %v932_v57 = vadd.f32 %v1781_v59, %v924_v48 }
 0x169   :  { %v933_v31 = vmax.f32 %v925_v52, 0.0  ;;  %v934_v25 = vmax.f32 %v926_v26, 0.0  ;;  %v935_v60 = vmax.f32 %v927_v29, 0.0  ;;  %v936_v49 = vmax.f32 %v928_v46, 0.0 }
 0x16a   :  { %v937_v50 = vmax.f32 %v929_v19, 0.0  ;;  %v938_v17 = vmax.f32 %v930_v62, 0.0  ;;  %v939_v58 = vmax.f32 %v931_v61, 0.0  ;;  %v940_v44 = vmax.f32 %v932_v57, 0.0 }
 0x16b   :  { %v941_v47 = vmax.f32 %v861_v55, %v885_v41  ;;  %v942_v6 = vmax.f32 %v862_v63, %v886_v34  ;;  %v943_v39 = vmax.f32 %v863_v45, %v887_v0  ;;  %v944_v59 = vmax.f32 %v864_v21, %v888_v9 }
 0x16c   :  { %v945_v24 = vmax.f32 %v865_v32, %v889_v11  ;;  %v946_v16 = vmax.f32 %v866_v18, %v890_v38  ;;  %v947_v28 = vmax.f32 %v867_v35, %v891_v12  ;;  %v948_v1 = vmax.f32 %v868_v42, %v892_v5 }
 0x16d   :  { %v949_v2 = vmax.f32 %v909_v36, %v933_v31  ;;  %v950_v55 = vmax.f32 %v910_v30, %v934_v25  ;;  %v951_v63 = vmax.f32 %v911_v53, %v935_v60  ;;  %v952_v3 = vmax.f32 %v912_v43, %v936_v49 }
 0x16e   :  { %v953_v45 = vmax.f32 %v913_v7, %v937_v50  ;;  %v954_v41 = vmax.f32 %v914_v22, %v938_v17  ;;  %v955_v4 = vmax.f32 %v915_v14, %v939_v58  ;;  %v956_v21 = vmax.f32 %v916_v15, %v940_v44 }
 0x16f   :  { %v957_v34 = vmax.f32 %v941_v47, %v949_v2  ;;  %v958_v56 = vmax.f32 %v942_v6, %v950_v55  ;;  %v959_v32 = vmax.f32 %v943_v39, %v951_v63  ;;  %v960_v0 = vmax.f32 %v944_v59, %v952_v3 }
 0x170   :  { %v961_v54 = vmax.f32 %v945_v24, %v953_v45  ;;  %v962_v18 = vmax.f32 %v946_v16, %v954_v41  ;;  %v963_v9 = vmax.f32 %v947_v28, %v955_v4  ;;  %v964_v37 = vmax.f32 %v948_v1, %v956_v21 }
 0x171   :  { %965 = vst.msk [vmem:[%s1980_s5] sm:$0xff] %vm588_vm2, %v957_v34  ;;  %966 = vst.msk [vmem:[%s1980_s5 + $0x8] sm:$0xff] %vm588_vm2, %v958_v56 }
 0x172   :  { %967 = vst.msk [vmem:[%s1980_s5 + $0x10] sm:$0xff] %vm588_vm2, %v959_v32  ;;  %968 = vst.msk [vmem:[%s1980_s5 + $0x18] sm:$0xff] %vm588_vm2, %v960_v0 }
 0x173   :  { %969 = vst.msk [vmem:[%s1980_s5 + $0x20] sm:$0xff] %vm588_vm2, %v961_v54  ;;  %970 = vst.msk [vmem:[%s1980_s5 + $0x28] sm:$0xff] %vm588_vm2, %v962_v18 }
 0x174   :  { %971 = vst.msk [vmem:[%s1980_s5 + $0x30] sm:$0xff] %vm588_vm2, %v963_v9  ;;  %972 = vst.msk [vmem:[%s1980_s5 + $0x38] sm:$0xff] %vm588_vm2, %v964_v37 }

// kernel: neural_net_forward.5
= control target key start
LH: loop header
LB: loop body
LE: loop exit
PB: predicated region body
PF: predicated region fallthrough
CT: control target
= control target key end

     0   :  { %s7577_s0 = inlined_call_operand.vmem [shape: f32[256,3], index: 0, kind: input, shape index: {}]   ;;  %s7578_s1 = inlined_call_operand.vmem [shape: f32[1,256], index: 1, kind: input, shape index: {}]   ;;  %s7579_s2 = inlined_call_operand.vmem [shape: f32[256,1], index: 2, kind: input, shape index: {}]   ;;  %s7580_s3 = inlined_call_operand.vmem [shape: f32[1,4096], index: 3, kind: input, shape index: {}]   ;;  %s7581_s4 = inlined_call_operand.vmem [shape: f32[256,256], index: 4, kind: input, shape index: {}]   ;;  %s7582_s5 = inlined_call_operand.vmem [shape: f32[1,256], index: 5, kind: input, shape index: {}]   ;;  %s7583_s6 = inlined_call_operand.vmem [shape: f32[3,256], index: 6, kind: input, shape index: {}]   ;;  %s7584_s7 = inlined_call_operand.vmem [shape: f32[1,256], index: 7, kind: input, shape index: {}]   ;;  %s7585_s8 = inlined_call_operand.vmem [shape: f32[256,256], index: 8, kind: input, shape index: {}]   ;;  %s7586_s9 = inlined_call_operand.vmem [shape: f32[1,256], index: 9, kind: input, shape index: {}]   ;;  %s7587_s10 = inlined_call_operand.vmem [shape: f32[256,256], index: 10, kind: input, shape index: {}]   ;;  %s7588_s11 = inlined_call_operand.vmem [shape: f32[1,256], index: 11, kind: input, shape index: {}]   ;;  %s7589_s12 = inlined_call_operand.vmem [shape: f32[256,6], index: 12, kind: input, shape index: {}]   ;;  %s7590_s13 = inlined_call_operand.vmem [shape: f32[1,6], index: 13, kind: input, shape index: {}]   ;;  %s7591_s14 = inlined_call_operand.vmem [shape: f32[4096,10], index: 14, kind: input, shape index: {}]   ;;  %s7592_s15 = inlined_call_operand.vmem [shape: f32[1,10], index: 15, kind: input, shape index: {}]   ;;  %s7593_s16 = inlined_call_operand.vmem [shape: f32[256,6], index: 16, kind: output, shape index: {0}]   ;;  %s7594_s17 = inlined_call_operand.vmem [shape: f32[1,256], index: 17, kind: output, shape index: {1}]   ;;  %s7595_s18 = inlined_call_operand.hbm [shape: f32[1,10], index: 18, kind: output, shape index: {2}]  }
   0x1   :  { %7597 = sst [smem:[#allocation5_spill]] %s7577_s0 }
   0x2   :  { %7598 = sst [smem:[#allocation6_spill]] %s7578_s1 }
   0x3   :  { %v122_v0 = vld [vmem:[%s7581_s4 + $0xf8] sm:$0xff]  ;;  %v121_v1 = vld [vmem:[%s7581_s4 + $0xf0] sm:$0xff]  ;;  %v120_v2 = vld [vmem:[%s7581_s4 + $0xe8] sm:$0xff]  ;;  %vm394_vm0 = vcmask 1042432   ;;  %v4322_v5 = vmov 0.0   ;;  %s7599_s26 = sld [smem:[#allocation5_spill]]  ;;  %v157_v27 = vlaneseq }
   0x4   :  { %178 = vmatprep.subr.mxu0 %v122_v0  ;;  %v282_v3 = vld [vmem:[%s7583_s6] sm:$0x77]  ;;  %463 = vmatprep.mubr.f32.mxu1 %v4322_v5  ;;  %v118_v7 = vld [vmem:[%s7581_s4 + $0xd8] sm:$0xff]  ;;  %vm297_vm1 = vcmask 23552   ;;  %v117_v9 = vld [vmem:[%s7581_s4 + $0xd0] sm:$0xff]  ;;  %s7600_s6 = sld [smem:[#allocation6_spill]] }
   0x5   :  { %v119_v4 = vld [vmem:[%s7581_s4 + $0xe0] sm:$0xff]  ;;  %179 = vmatpush1.msra.mxu0 %v121_v1  ;;  %v296_v6 = vcombine.high %v282_v3, %v282_v3  ;;  %v116_v10 = vld [vmem:[%s7581_s4 + $0xc8] sm:$0xff]  ;;  %v114_v12 = vld [vmem:[%s7581_s4 + $0xb8] sm:$0xff]  ;;  %v4520_v33 = vshrl.u32 %v157_v27, 7 }
   0x6   :  { %180 = vmatprep.subr.mxu0 %v120_v2  ;;  %v115_v11 = vld [vmem:[%s7581_s4 + $0xc0] sm:$0xff]  ;;  %v113_v14 = vld [vmem:[%s7581_s4 + $0xb0] sm:$0xff]  ;;  %v112_v15 = vld [vmem:[%s7581_s4 + $0xa8] sm:$0xff] }
   0x7   :  { %3700 = vmatprep.subr.msk.mxu1 %vm394_vm0, %v296_v6  ;;  %181 = vmatpush1.msra.mxu0 %v119_v4  ;;  %v111_v16 = vld [vmem:[%s7581_s4 + $0xa0] sm:$0xff]  ;;  %v110_v17 = vld [vmem:[%s7581_s4 + $0x98] sm:$0xff]  ;;  %v109_v19 = vld [vmem:[%s7581_s4 + $0x90] sm:$0xff]  ;;  %v4540_v39 = vsub.s32 1, %v4520_v33 }
   0x8   :  { %3701 = vmatpush1.msk.msra.mxu1 %vm394_vm0, %v282_v3  ;;  %182 = vmatprep.subr.mxu0 %v118_v7  ;;  %v108_v20 = vld [vmem:[%s7581_s4 + $0x88] sm:$0xff]  ;;  %v107_v21 = vld [vmem:[%s7581_s4 + $0x80] sm:$0xff]  ;;  %v106_v22 = vld [vmem:[%s7581_s4 + $0x78] sm:$0xff] }
   0x9   :  { %v57_v8 = vld [vmem:[%s7599_s26] sm:$0xff]  ;;  %183 = vmatpush1.msra.mxu0 %v117_v9  ;;  %v58_v13 = vld [vmem:[%s7599_s26 + $0x8] sm:$0xff]  ;;  %v59_v18 = vld [vmem:[%s7599_s26 + $0x10] sm:$0xff] }
   0xa   :  { %3702 = vmatmul.mubr.msk.f32.vlgmr.msra.gmra.mxu1 %vm297_vm1, %v57_v8  ;;  %184 = vmatprep.subr.mxu0 %v116_v10  ;;  %v60_v23 = vld [vmem:[%s7599_s26 + $0x18] sm:$0xff]  ;;  %v105_v24 = vld [vmem:[%s7581_s4 + $0x70] sm:$0xff]  ;;  %v104_v25 = vld [vmem:[%s7581_s4 + $0x68] sm:$0xff] }
   0xb   :  { %469 = vmatprep.mubr.f32.mxu1 %v4322_v5  ;;  %185 = vmatpush1.msra.mxu0 %v115_v11  ;;  %v103_v26 = vld [vmem:[%s7581_s4 + $0x60] sm:$0xff]  ;;  %v102_v28 = vld [vmem:[%s7581_s4 + $0x58] sm:$0xff]  ;;  %v101_v30 = vld [vmem:[%s7581_s4 + $0x50] sm:$0xff] }
   0xc   :  { %186 = vmatprep.subr.mxu0 %v114_v12  ;;  %v61_v29 = vld [vmem:[%s7599_s26 + $0x20] sm:$0xff]  ;;  %v100_v31 = vld [vmem:[%s7581_s4 + $0x48] sm:$0xff]  ;;  %v98_v34 = vld [vmem:[%s7581_s4 + $0x38] sm:$0xff] }
   0xd   :  { %187 = vmatpush1.msra.mxu0 %v113_v14  ;;  %v99_v32 = vld [vmem:[%s7581_s4 + $0x40] sm:$0xff]  ;;  %v62_v35 = vld [vmem:[%s7599_s26 + $0x28] sm:$0xff]  ;;  %v97_v36 = vld [vmem:[%s7581_s4 + $0x30] sm:$0xff] }
   0xe   :  { %3703 = vmatmul.mubr.msk.f32.gmra.mxu1 %vm297_vm1, %v58_v13  ;;  %188 = vmatprep.subr.mxu0 %v112_v15  ;;  %v96_v37 = vld [vmem:[%s7581_s4 + $0x28] sm:$0xff]  ;;  %v95_v38 = vld [vmem:[%s7581_s4 + $0x20] sm:$0xff]  ;;  %v94_v40 = vld [vmem:[%s7581_s4 + $0x18] sm:$0xff] }
   0xf   :  { %475 = vmatprep.mubr.f32.mxu1 %v4322_v5  ;;  %189 = vmatpush1.msra.mxu0 %v111_v16  ;;  %v4549_v41 = vld [vmem:[%s7600_s6] sm:$0x3]  ;;  %v63_v42 = vld [vmem:[%s7599_s26 + $0x30] sm:$0xff]  ;;  %v92_v45 = vld [vmem:[%s7581_s4 + $0x8] sm:$0xff] }
  0x10   :  { %190 = vmatprep.subr.mxu0 %v110_v17  ;;  %v93_v43 = vld [vmem:[%s7581_s4 + $0x10] sm:$0xff]  ;;  %v90_v44 = vmax.f32 %v4549_v41, 0.0  ;;  %v91_v46 = vld [vmem:[%s7581_s4] sm:$0xff]  ;;  %v154_v48 = vld [vmem:[%s7581_s4 + $0x1f8] sm:$0xff] }
  0x11   :  { %191 = vmatpush1.msra.mxu0 %v109_v19  ;;  %v64_v49 = vld [vmem:[%s7599_s26 + $0x38] sm:$0xff]  ;;  %v153_v50 = vld [vmem:[%s7581_s4 + $0x1f0] sm:$0xff]  ;;  %v152_v51 = vld [vmem:[%s7581_s4 + $0x1e8] sm:$0xff] }
  0x12   :  { %3704 = vmatmul.mubr.msk.f32.gmra.mxu1 %vm297_vm1, %v59_v18  ;;  %192 = vmatprep.subr.mxu0 %v108_v20  ;;  %v164_v47 = vrot.slane %v90_v44, %v4540_v39  ;;  %v151_v52 = vld [vmem:[%s7581_s4 + $0x1e0] sm:$0xff] }
  0x13   :  { %481 = vmatprep.mubr.f32.mxu1 %v4322_v5  ;;  %193 = vmatpush1.msra.mxu0 %v107_v21 }
  0x14   :  { %194 = vmatprep.subr.mxu0 %v106_v22  ;;  %242 = vmatprep.mubr.f32.mxu0 %v164_v47 }
  0x15   :  { %195 = vmatpush1.msra.mxu0 %v105_v24 }
  0x16   :  { %3705 = vmatmul.mubr.msk.f32.gmra.mxu1 %vm297_vm1, %v60_v23  ;;  %196 = vmatprep.subr.mxu0 %v104_v25 }
  0x17   :  { %487 = vmatprep.mubr.f32.mxu1 %v4322_v5  ;;  %197 = vmatpush1.msra.mxu0 %v103_v26 }
  0x18   :  { %198 = vmatprep.subr.mxu0 %v102_v28 }
  0x19   :  { %199 = vmatpush1.msra.mxu0 %v101_v30 }
  0x1a   :  { %3706 = vmatmul.mubr.msk.f32.gmra.mxu1 %vm297_vm1, %v61_v29  ;;  %200 = vmatprep.subr.mxu0 %v100_v31 }
  0x1b   :  { %493 = vmatprep.mubr.f32.mxu1 %v4322_v5  ;;  %201 = vmatpush1.msra.mxu0 %v99_v32 }
  0x1c   :  { %202 = vmatprep.subr.mxu0 %v98_v34 }
  0x1d   :  { %203 = vmatpush1.msra.mxu0 %v97_v36 }
  0x1e   :  { %3707 = vmatmul.mubr.msk.f32.gmra.mxu1 %vm297_vm1, %v62_v35  ;;  %204 = vmatprep.subr.mxu0 %v96_v37 }
  0x1f   :  { %499 = vmatprep.mubr.f32.mxu1 %v4322_v5  ;;  %205 = vmatpush1.msra.mxu0 %v95_v38 }
  0x20   :  { %206 = vmatprep.subr.mxu0 %v94_v40 }
  0x21   :  { %207 = vmatpush1.msra.mxu0 %v93_v43 }
  0x22   :  { %3708 = vmatmul.mubr.msk.f32.gmra.mxu1 %vm297_vm1, %v63_v42  ;;  %208 = vmatprep.subr.mxu0 %v92_v45 }
  0x23   :  { %505 = vmatprep.mubr.f32.mxu1 %v4322_v5  ;;  %209 = vmatpush1.msra.mxu0 %v91_v46 }
  0x24   :  { %210 = vmatprep.subr.mxu0 %v154_v48 }
  0x25   :  { %24 = vsyncpa [#allocation3], 0  ;;  %211 = vmatpush2.msra.mxu0 %v153_v50  ;;  %v150_v53 = vld [vmem:[%s7581_s4 + $0x1d8] sm:$0xff]  ;;  %v65_v54 = vld [vmem:[%s7599_s26 + $0x40] sm:$0xff]  ;;  %v4688_v20 = vsub.s32 0, %v4520_v33  ;;  %vm271_vm2 = vcmp.lt.s32.totalorder %v157_v27, 256 }
  0x26   :  { %3709 = vmatmul.mubr.msk.f32.gmra.mxu1 %vm297_vm1, %v64_v49  ;;  %212 = vmatprep.subr.mxu0 %v152_v51  ;;  %v149_v55 = vld [vmem:[%s7581_s4 + $0x1d0] sm:$0xff]  ;;  %v148_v56 = vld [vmem:[%s7581_s4 + $0x1c8] sm:$0xff]  ;;  %v147_v57 = vld [vmem:[%s7581_s4 + $0x1c0] sm:$0xff]  ;;  %vm1842_vm3 = vcmask 48128   ;;  %vm3676_vm4 = vcmask 73728  }
  0x27   :  { %511 = vmatprep.mubr.f32.mxu1 %v4322_v5  ;;  %213 = vmatpush2.msra.mxu0 %v151_v52  ;;  %v146_v58 = vld [vmem:[%s7581_s4 + $0x1b8] sm:$0xff]  ;;  %v66_v59 = vld [vmem:[%s7599_s26 + $0x48] sm:$0xff]  ;;  %v145_v60 = vld [vmem:[%s7581_s4 + $0x1b0] sm:$0xff]  ;;  %v160_v26 = vrot.slane %v90_v44, %v4688_v20 }
  0x28   :  { %214 = vmatprep.subr.mxu0 %v150_v53  ;;  %v144_v61 = vld [vmem:[%s7581_s4 + $0x1a8] sm:$0xff]  ;;  %v143_v62 = vld [vmem:[%s7581_s4 + $0x1a0] sm:$0xff]  ;;  %v142_v63 = vld [vmem:[%s7581_s4 + $0x198] sm:$0xff] }
  0x29   :  { %215 = vmatpush2.msra.mxu0 %v149_v55  ;;  %v67_v0 = vld [vmem:[%s7599_s26 + $0x50] sm:$0xff]  ;;  %v140_v2 = vld [vmem:[%s7581_s4 + $0x188] sm:$0xff]  ;;  %v139_v3 = vld [vmem:[%s7581_s4 + $0x180] sm:$0xff] }
  0x2a   :  { %3710 = vmatmul.mubr.msk.f32.gmra.mxu1 %vm297_vm1, %v65_v54  ;;  %216 = vmatprep.subr.mxu0 %v148_v56  ;;  %v141_v1 = vld [vmem:[%s7581_s4 + $0x190] sm:$0xff]  ;;  %v138_v4 = vld [vmem:[%s7581_s4 + $0x178] sm:$0xff]  ;;  %v136_v8 = vld [vmem:[%s7581_s4 + $0x168] sm:$0xff] }
  0x2b   :  { %517 = vmatprep.mubr.f32.mxu1 %v4322_v5  ;;  %217 = vmatpush2.msra.mxu0 %v147_v57  ;;  %v68_v6 = vld [vmem:[%s7599_s26 + $0x58] sm:$0xff]  ;;  %v137_v7 = vld [vmem:[%s7581_s4 + $0x170] sm:$0xff]  ;;  %v135_v9 = vld [vmem:[%s7581_s4 + $0x160] sm:$0xff] }
  0x2c   :  { %218 = vmatprep.subr.mxu0 %v146_v58  ;;  %v134_v10 = vld [vmem:[%s7581_s4 + $0x158] sm:$0xff]  ;;  %v69_v11 = vld [vmem:[%s7599_s26 + $0x60] sm:$0xff]  ;;  %v133_v12 = vld [vmem:[%s7581_s4 + $0x150] sm:$0xff] }
  0x2d   :  { %219 = vmatpush2.msra.mxu0 %v145_v60  ;;  %v132_v13 = vld [vmem:[%s7581_s4 + $0x148] sm:$0xff]  ;;  %v131_v14 = vld [vmem:[%s7581_s4 + $0x140] sm:$0xff]  ;;  %v130_v15 = vld [vmem:[%s7581_s4 + $0x138] sm:$0xff] }
  0x2e   :  { %3711 = vmatmul.mubr.msk.f32.gmra.mxu1 %vm297_vm1, %v66_v59  ;;  %220 = vmatprep.subr.mxu0 %v144_v61  ;;  %v70_v16 = vld [vmem:[%s7599_s26 + $0x68] sm:$0xff]  ;;  %v129_v17 = vld [vmem:[%s7581_s4 + $0x130] sm:$0xff]  ;;  %v127_v19 = vld [vmem:[%s7581_s4 + $0x120] sm:$0xff] }
  0x2f   :  { %523 = vmatprep.mubr.f32.mxu1 %v4322_v5  ;;  %221 = vmatpush2.msra.mxu0 %v143_v62  ;;  %v128_v18 = vld [vmem:[%s7581_s4 + $0x128] sm:$0xff]  ;;  %v126_v21 = vld [vmem:[%s7581_s4 + $0x118] sm:$0xff]  ;;  %v71_v22 = vld [vmem:[%s7599_s26 + $0x70] sm:$0xff] }
  0x30   :  { %222 = vmatprep.subr.mxu0 %v142_v63  ;;  %v125_v23 = vld [vmem:[%s7581_s4 + $0x110] sm:$0xff]  ;;  %v124_v24 = vld [vmem:[%s7581_s4 + $0x108] sm:$0xff]  ;;  %v123_v25 = vld [vmem:[%s7581_s4 + $0x100] sm:$0xff] }
  0x31   :  { %223 = vmatpush2.msra.mxu0 %v141_v1  ;;  %v72_v28 = vld [vmem:[%s7599_s26 + $0x78] sm:$0xff]  ;;  %v73_v29 = vld [vmem:[%s7599_s26 + $0x80] sm:$0xff]  ;;  %v74_v30 = vld [vmem:[%s7599_s26 + $0x88] sm:$0xff] }
  0x32   :  { %3712 = vmatmul.mubr.msk.f32.gmra.mxu1 %vm297_vm1, %v67_v0  ;;  %224 = vmatprep.subr.mxu0 %v140_v2  ;;  %v75_v31 = vld [vmem:[%s7599_s26 + $0x90] sm:$0xff]  ;;  %v815_v32 = vld [vmem:[%s7585_s8 + $0xf8] sm:$0xff]  ;;  %v813_v36 = vld [vmem:[%s7585_s8 + $0xe8] sm:$0xff] }
  0x33   :  { %529 = vmatprep.mubr.f32.mxu1 %v4322_v5  ;;  %225 = vmatpush2.msra.mxu0 %v139_v3  ;;  %v814_v34 = vld [vmem:[%s7585_s8 + $0xf0] sm:$0xff]  ;;  %v76_v35 = vld [vmem:[%s7599_s26 + $0x98] sm:$0xff]  ;;  %v812_v37 = vld [vmem:[%s7585_s8 + $0xe0] sm:$0xff] }
  0x34   :  { %226 = vmatprep.subr.mxu0 %v138_v4  ;;  %v811_v38 = vld [vmem:[%s7585_s8 + $0xd8] sm:$0xff]  ;;  %v810_v40 = vld [vmem:[%s7585_s8 + $0xd0] sm:$0xff]  ;;  %v77_v41 = vld [vmem:[%s7599_s26 + $0xa0] sm:$0xff] }
  0x35   :  { %227 = vmatpush2.msra.mxu0 %v137_v7  ;;  %v809_v42 = vld [vmem:[%s7585_s8 + $0xc8] sm:$0xff]  ;;  %v808_v43 = vld [vmem:[%s7585_s8 + $0xc0] sm:$0xff]  ;;  %v807_v44 = vld [vmem:[%s7585_s8 + $0xb8] sm:$0xff] }
  0x36   :  { %3713 = vmatmul.mubr.msk.f32.gmra.mxu1 %vm297_vm1, %v68_v6  ;;  %228 = vmatprep.subr.mxu0 %v136_v8  ;;  %v806_v45 = vld [vmem:[%s7585_s8 + $0xb0] sm:$0xff]  ;;  %v78_v46 = vld [vmem:[%s7599_s26 + $0xa8] sm:$0xff]  ;;  %v804_v48 = vld [vmem:[%s7585_s8 + $0xa0] sm:$0xff] }
  0x37   :  { %535 = vmatprep.mubr.f32.mxu1 %v4322_v5  ;;  %229 = vmatpush2.msra.mxu0 %v135_v9  ;;  %v805_v47 = vld [vmem:[%s7585_s8 + $0xa8] sm:$0xff]  ;;  %v803_v49 = vld [vmem:[%s7585_s8 + $0x98] sm:$0xff]  ;;  %v802_v50 = vld [vmem:[%s7585_s8 + $0x90] sm:$0xff] }
  0x38   :  { %230 = vmatprep.subr.mxu0 %v134_v10  ;;  %v79_v51 = vld [vmem:[%s7599_s26 + $0xb0] sm:$0xff]  ;;  %v801_v52 = vld [vmem:[%s7585_s8 + $0x88] sm:$0xff]  ;;  %v800_v53 = vld [vmem:[%s7585_s8 + $0x80] sm:$0xff] }
  0x39   :  { %231 = vmatpush2.msra.mxu0 %v133_v12  ;;  %v799_v54 = vld [vmem:[%s7585_s8 + $0x78] sm:$0xff]  ;;  %v798_v55 = vld [vmem:[%s7585_s8 + $0x70] sm:$0xff]  ;;  %v797_v57 = vld [vmem:[%s7585_s8 + $0x68] sm:$0xff] }
  0x3a   :  { %3714 = vmatmul.mubr.msk.f32.gmra.mxu1 %vm297_vm1, %v69_v11  ;;  %232 = vmatprep.subr.mxu0 %v132_v13  ;;  %v80_v56 = vld [vmem:[%s7599_s26 + $0xb8] sm:$0xff]  ;;  %v796_v58 = vld [vmem:[%s7585_s8 + $0x60] sm:$0xff]  ;;  %v794_v60 = vld [vmem:[%s7585_s8 + $0x50] sm:$0xff] }
  0x3b   :  { %541 = vmatprep.mubr.f32.mxu1 %v4322_v5  ;;  %233 = vmatpush2.msra.mxu0 %v131_v14  ;;  %v795_v59 = vld [vmem:[%s7585_s8 + $0x58] sm:$0xff]  ;;  %v81_v61 = vld [vmem:[%s7599_s26 + $0xc0] sm:$0xff]  ;;  %v793_v62 = vld [vmem:[%s7585_s8 + $0x48] sm:$0xff] }
  0x3c   :  { %234 = vmatprep.subr.mxu0 %v130_v15  ;;  %v792_v63 = vld [vmem:[%s7585_s8 + $0x40] sm:$0xff]  ;;  %v791_v0 = vld [vmem:[%s7585_s8 + $0x38] sm:$0xff]  ;;  %v790_v1 = vld [vmem:[%s7585_s8 + $0x30] sm:$0xff] }
  0x3d   :  { %235 = vmatpush2.msra.mxu0 %v129_v17  ;;  %v82_v2 = vld [vmem:[%s7599_s26 + $0xc8] sm:$0xff]  ;;  %v788_v4 = vld [vmem:[%s7585_s8 + $0x20] sm:$0xff]  ;;  %v787_v6 = vld [vmem:[%s7585_s8 + $0x18] sm:$0xff] }
  0x3e   :  { %3715 = vmatmul.mubr.msk.f32.gmra.mxu1 %vm297_vm1, %v70_v16  ;;  %236 = vmatprep.subr.mxu0 %v128_v18  ;;  %v789_v3 = vld [vmem:[%s7585_s8 + $0x28] sm:$0xff]  ;;  %v786_v7 = vld [vmem:[%s7585_s8 + $0x10] sm:$0xff]  ;;  %v784_v10 = vld [vmem:[%s7585_s8] sm:$0xff] }
  0x3f   :  { %547 = vmatprep.mubr.f32.mxu1 %v4322_v5  ;;  %237 = vmatpush2.msra.mxu0 %v127_v19  ;;  %v83_v8 = vld [vmem:[%s7599_s26 + $0xd0] sm:$0xff]  ;;  %v785_v9 = vld [vmem:[%s7585_s8 + $0x8] sm:$0xff]  ;;  %v847_v11 = vld [vmem:[%s7585_s8 + $0x1f8] sm:$0xff] }
  0x40   :  { %238 = vmatprep.subr.mxu0 %v126_v21  ;;  %v846_v12 = vld [vmem:[%s7585_s8 + $0x1f0] sm:$0xff]  ;;  %v84_v13 = vld [vmem:[%s7599_s26 + $0xd8] sm:$0xff]  ;;  %v845_v14 = vld [vmem:[%s7585_s8 + $0x1e8] sm:$0xff] }
  0x41   :  { %239 = vmatpush2.msra.mxu0 %v125_v23  ;;  %v844_v15 = vld [vmem:[%s7585_s8 + $0x1e0] sm:$0xff]  ;;  %v843_v16 = vld [vmem:[%s7585_s8 + $0x1d8] sm:$0xff]  ;;  %v842_v17 = vld [vmem:[%s7585_s8 + $0x1d0] sm:$0xff] }
  0x42   :  { %3716 = vmatmul.mubr.msk.f32.gmra.mxu1 %vm297_vm1, %v71_v22  ;;  %240 = vmatprep.subr.mxu0 %v124_v24  ;;  %v85_v18 = vld [vmem:[%s7599_s26 + $0xe0] sm:$0xff]  ;;  %v841_v19 = vld [vmem:[%s7585_s8 + $0x1c8] sm:$0xff]  ;;  %v839_v22 = vld [vmem:[%s7585_s8 + $0x1b8] sm:$0xff] }
  0x43   :  { %553 = vmatprep.mubr.f32.mxu1 %v4322_v5  ;;  %241 = vmatpush2.msra.mxu0 %v123_v25  ;;  %v840_v21 = vld [vmem:[%s7585_s8 + $0x1c0] sm:$0xff]  ;;  %v838_v23 = vld [vmem:[%s7585_s8 + $0x1b0] sm:$0xff]  ;;  %v86_v24 = vld [vmem:[%s7599_s26 + $0xe8] sm:$0xff] }
  0x44   :  { %243 = vmatmul.mubr.f32.vlgmr.msra.gmra.mxu0 %v160_v26  ;;  %860 = vmatprep.subr.mxu0 %v815_v32  ;;  %v837_v25 = vld [vmem:[%s7585_s8 + $0x1a8] sm:$0xff]  ;;  %v836_v26 = vld [vmem:[%s7585_s8 + $0x1a0] sm:$0xff] }
  0x45   :  { %861 = vmatpush1.msra.mxu0 %v814_v34  ;;  %v832_v32 = vld [vmem:[%s7585_s8 + $0x180] sm:$0xff]  ;;  %v831_v34 = vld [vmem:[%s7585_s8 + $0x178] sm:$0xff] }
  0x46   :  { %3717 = vmatmul.mubr.msk.f32.gmra.mxu1 %vm297_vm1, %v72_v28  ;;  %862 = vmatprep.subr.mxu0 %v813_v36  ;;  %v835_v28 = vld [vmem:[%s7585_s8 + $0x198] sm:$0xff]  ;;  %v1181_v27 = vld [vmem:[%s7587_s10] sm:$0xff] }
  0x47   :  { %559 = vmatprep.mubr.f32.mxu1 %v4322_v5  ;;  %863 = vmatpush1.msra.mxu0 %v812_v37  ;;  %v88_v36 = vld [vmem:[%s7599_s26 + $0xf8] sm:$0xff]  ;;  %v829_v37 = vld [vmem:[%s7585_s8 + $0x168] sm:$0xff] }
  0x48   :  { %864 = vmatprep.subr.mxu0 %v811_v38  ;;  %v828_v38 = vld [vmem:[%s7585_s8 + $0x160] sm:$0xff] }
  0x49   :  { %865 = vmatpush1.msra.mxu0 %v810_v40  ;;  %v827_v40 = vld [vmem:[%s7585_s8 + $0x158] sm:$0xff] }
  0x4a   :  { %3718 = vmatmul.mubr.msk.f32.gmra.mxu1 %vm297_vm1, %v73_v29  ;;  %866 = vmatprep.subr.mxu0 %v809_v42  ;;  %v834_v29 = vld [vmem:[%s7585_s8 + $0x190] sm:$0xff]  ;;  %v825_v42 = vld [vmem:[%s7585_s8 + $0x148] sm:$0xff] }
  0x4b   :  { %565 = vmatprep.mubr.f32.mxu1 %v4322_v5  ;;  %867 = vmatpush1.msra.mxu0 %v808_v43  ;;  %v824_v43 = vld [vmem:[%s7585_s8 + $0x140] sm:$0xff] }
  0x4c   :  { %868 = vmatprep.subr.mxu0 %v807_v44  ;;  %v823_v44 = vld [vmem:[%s7585_s8 + $0x138] sm:$0xff] }
  0x4d   :  { %869 = vmatpush1.msra.mxu0 %v806_v45  ;;  %v822_v45 = vld [vmem:[%s7585_s8 + $0x130] sm:$0xff] }
  0x4e   :  { %3719 = vmatmul.mubr.msk.f32.gmra.mxu1 %vm297_vm1, %v74_v30  ;;  %870 = vmatprep.subr.mxu0 %v805_v47  ;;  %v87_v30 = vld [vmem:[%s7599_s26 + $0xf0] sm:$0xff]  ;;  %v820_v47 = vld [vmem:[%s7585_s8 + $0x120] sm:$0xff] }
  0x4f   :  { %571 = vmatprep.mubr.f32.mxu1 %v4322_v5  ;;  %871 = vmatpush1.msra.mxu0 %v804_v48  ;;  %v819_v48 = vld [vmem:[%s7585_s8 + $0x118] sm:$0xff] }
  0x50   :  { %872 = vmatprep.subr.mxu0 %v803_v49  ;;  %v818_v49 = vld [vmem:[%s7585_s8 + $0x110] sm:$0xff] }
  0x51   :  { %873 = vmatpush1.msra.mxu0 %v802_v50  ;;  %v817_v50 = vld [vmem:[%s7585_s8 + $0x108] sm:$0xff] }
  0x52   :  { %3720 = vmatmul.mubr.msk.f32.gmra.mxu1 %vm297_vm1, %v75_v31  ;;  %874 = vmatprep.subr.mxu0 %v801_v52  ;;  %v833_v31 = vld [vmem:[%s7585_s8 + $0x188] sm:$0xff] }
  0x53   :  { %577 = vmatprep.mubr.f32.mxu1 %v4322_v5  ;;  %875 = vmatpush1.msra.mxu0 %v800_v53 }
  0x54   :  { %876 = vmatprep.subr.mxu0 %v799_v54 }
  0x55   :  { %877 = vmatpush1.msra.mxu0 %v798_v55 }
  0x56   :  { %3721 = vmatmul.mubr.msk.f32.gmra.mxu1 %vm297_vm1, %v76_v35  ;;  %878 = vmatprep.subr.mxu0 %v797_v57  ;;  %v830_v35 = vld [vmem:[%s7585_s8 + $0x170] sm:$0xff] }
  0x57   :  { %583 = vmatprep.mubr.f32.mxu1 %v4322_v5  ;;  %879 = vmatpush1.msra.mxu0 %v796_v58 }
  0x58   :  { %880 = vmatprep.subr.mxu0 %v795_v59 }
  0x59   :  { %881 = vmatpush1.msra.mxu0 %v794_v60 }
  0x5a   :  { %3722 = vmatmul.mubr.msk.f32.gmra.mxu1 %vm297_vm1, %v77_v41  ;;  %882 = vmatprep.subr.mxu0 %v793_v62  ;;  %v826_v41 = vld [vmem:[%s7585_s8 + $0x150] sm:$0xff] }
  0x5b   :  { %589 = vmatprep.mubr.f32.mxu1 %v4322_v5  ;;  %883 = vmatpush1.msra.mxu0 %v792_v63  ;;  %v1211_v63 = vld [vmem:[%s7587_s10 + $0xf0] sm:$0xff] }
  0x5c   :  { %884 = vmatprep.subr.mxu0 %v791_v0 }
  0x5d   :  { %885 = vmatpush1.msra.mxu0 %v790_v1  ;;  %v1210_v1 = vld [vmem:[%s7587_s10 + $0xe8] sm:$0xff] }
  0x5e   :  { %3723 = vmatmul.mubr.msk.f32.gmra.mxu1 %vm297_vm1, %v78_v46  ;;  %886 = vmatprep.subr.mxu0 %v789_v3  ;;  %v821_v46 = vld [vmem:[%s7585_s8 + $0x128] sm:$0xff]  ;;  %v1209_v3 = vld [vmem:[%s7587_s10 + $0xe0] sm:$0xff] }
  0x5f   :  { %595 = vmatprep.mubr.f32.mxu1 %v4322_v5  ;;  %887 = vmatpush1.msra.mxu0 %v788_v4 }
  0x60   :  { %888 = vmatprep.subr.mxu0 %v787_v6  ;;  %v1208_v6 = vld [vmem:[%s7587_s10 + $0xd8] sm:$0xff] }
  0x61   :  { %889 = vmatpush1.msra.mxu0 %v786_v7 }
  0x62   :  { %3724 = vmatmul.mubr.msk.f32.gmra.mxu1 %vm297_vm1, %v79_v51  ;;  %890 = vmatprep.subr.mxu0 %v785_v9  ;;  %v816_v51 = vld [vmem:[%s7585_s8 + $0x100] sm:$0xff] }
  0x63   :  { %601 = vmatprep.mubr.f32.mxu1 %v4322_v5  ;;  %891 = vmatpush1.msra.mxu0 %v784_v10  ;;  %v1206_v10 = vld [vmem:[%s7587_s10 + $0xc8] sm:$0xff] }
  0x64   :  { %892 = vmatprep.subr.mxu0 %v847_v11 }
  0x65   :  { %893 = vmatpush2.msra.mxu0 %v846_v12  ;;  %v1205_v12 = vld [vmem:[%s7587_s10 + $0xc0] sm:$0xff] }
  0x66   :  { %3725 = vmatmul.mubr.msk.f32.gmra.mxu1 %vm297_vm1, %v80_v56  ;;  %894 = vmatprep.subr.mxu0 %v845_v14  ;;  %v1204_v14 = vld [vmem:[%s7587_s10 + $0xb8] sm:$0xff] }
  0x67   :  { %607 = vmatprep.mubr.f32.mxu1 %v4322_v5  ;;  %895 = vmatpush2.msra.mxu0 %v844_v15 }
  0x68   :  { %896 = vmatprep.subr.mxu0 %v843_v16  ;;  %v1203_v16 = vld [vmem:[%s7587_s10 + $0xb0] sm:$0xff] }
  0x69   :  { %897 = vmatpush2.msra.mxu0 %v842_v17 }
  0x6a   :  { %3726 = vmatmul.mubr.msk.f32.gmra.mxu1 %vm297_vm1, %v81_v61  ;;  %898 = vmatprep.subr.mxu0 %v841_v19  ;;  %v1212_v61 = vld [vmem:[%s7587_s10 + $0xf8] sm:$0xff] }
  0x6b   :  { %613 = vmatprep.mubr.f32.mxu1 %v4322_v5  ;;  %899 = vmatpush2.msra.mxu0 %v840_v21  ;;  %v1201_v21 = vld [vmem:[%s7587_s10 + $0xa0] sm:$0xff] }
  0x6c   :  { %900 = vmatprep.subr.mxu0 %v839_v22  ;;  %1257 = vmatprep.subr.mxu1 %v1212_v61 }
  0x6d   :  { %901 = vmatpush2.msra.mxu0 %v838_v23  ;;  %1258 = vmatpush1.msra.mxu1 %v1211_v63  ;;  %v1200_v23 = vld [vmem:[%s7587_s10 + $0x98] sm:$0xff]  ;;  %v1190_v63 = vld [vmem:[%s7587_s10 + $0x48] sm:$0xff] }
  0x6e   :  { %3727 = vmatmul.mubr.msk.f32.gmra.mxu1 %vm297_vm1, %v82_v2  ;;  %902 = vmatprep.subr.mxu0 %v837_v25  ;;  %v1199_v25 = vld [vmem:[%s7587_s10 + $0x90] sm:$0xff] }
  0x6f   :  { %619 = vmatprep.mubr.f32.mxu1 %v4322_v5  ;;  %903 = vmatpush2.msra.mxu0 %v836_v26 }
  0x70   :  { %904 = vmatprep.subr.mxu0 %v835_v28  ;;  %1259 = vmatprep.subr.mxu1 %v1210_v1  ;;  %v1198_v28 = vld [vmem:[%s7587_s10 + $0x88] sm:$0xff] }
  0x71   :  { %905 = vmatpush2.msra.mxu0 %v834_v29  ;;  %1260 = vmatpush1.msra.mxu1 %v1209_v3 }
  0x72   :  { %3728 = vmatmul.mubr.msk.f32.gmra.mxu1 %vm297_vm1, %v83_v8  ;;  %906 = vmatprep.subr.mxu0 %v833_v31  ;;  %v1207_v8 = vld [vmem:[%s7587_s10 + $0xd0] sm:$0xff] }
  0x73   :  { %625 = vmatprep.mubr.f32.mxu1 %v4322_v5  ;;  %907 = vmatpush2.msra.mxu0 %v832_v32  ;;  %v1196_v32 = vld [vmem:[%s7587_s10 + $0x78] sm:$0xff] }
  0x74   :  { %908 = vmatprep.subr.mxu0 %v831_v34  ;;  %1261 = vmatprep.subr.mxu1 %v1208_v6 }
  0x75   :  { %909 = vmatpush2.msra.mxu0 %v830_v35  ;;  %1262 = vmatpush1.msra.mxu1 %v1207_v8  ;;  %v1195_v35 = vld [vmem:[%s7587_s10 + $0x70] sm:$0xff] }
  0x76   :  { %3729 = vmatmul.mubr.msk.f32.gmra.mxu1 %vm297_vm1, %v84_v13  ;;  %910 = vmatprep.subr.mxu0 %v829_v37  ;;  %v1194_v37 = vld [vmem:[%s7587_s10 + $0x68] sm:$0xff] }
  0x77   :  { %631 = vmatprep.mubr.f32.mxu1 %v4322_v5  ;;  %911 = vmatpush2.msra.mxu0 %v828_v38 }
  0x78   :  { %912 = vmatprep.subr.mxu0 %v827_v40  ;;  %1263 = vmatprep.subr.mxu1 %v1206_v10  ;;  %v155_v40 = vld [vmem:[%s7582_s5] sm:$0x3] }
  0x79   :  { %913 = vmatpush2.msra.mxu0 %v826_v41  ;;  %1264 = vmatpush1.msra.mxu1 %v1205_v12  ;;  %v1193_v41 = vld [vmem:[%s7587_s10 + $0x60] sm:$0xff] }
  0x7a   :  { %3730 = vmatmul.mubr.msk.f32.gmra.mxu1 %vm297_vm1, %v85_v18  ;;  %914 = vmatprep.subr.mxu0 %v825_v42  ;;  %v1202_v18 = vld [vmem:[%s7587_s10 + $0xa8] sm:$0xff] }
  0x7b   :  { %637 = vmatprep.mubr.f32.mxu1 %v4322_v5  ;;  %915 = vmatpush2.msra.mxu0 %v824_v43  ;;  %v1192_v43 = vld [vmem:[%s7587_s10 + $0x58] sm:$0xff] }
  0x7c   :  { %916 = vmatprep.subr.mxu0 %v823_v44  ;;  %1265 = vmatprep.subr.mxu1 %v1204_v14  ;;  %v171_v44 = vrot.slane %v155_v40, %v4688_v20  ;;  %v1189_v14 = vld [vmem:[%s7587_s10 + $0x40] sm:$0xff] }
  0x7d   :  { %917 = vmatpush2.msra.mxu0 %v822_v45  ;;  %1266 = vmatpush1.msra.mxu1 %v1203_v16  ;;  %v283_v45 = vld [vmem:[%s7584_s7] sm:$0x3] }
  0x7e   :  { %3731 = vmatmul.mubr.msk.f32.gmra.mxu1 %vm297_vm1, %v86_v24  ;;  %918 = vmatprep.subr.mxu0 %v821_v46  ;;  %v5129_v1 = vrot.slane %v283_v45, %v4540_v39  ;;  %v5132_v3 = vrot.slane %v283_v45, %v4688_v20 }
  0x7f   :  { %643 = vmatprep.mubr.f32.mxu1 %v4322_v5  ;;  %919 = vmatpush2.msra.mxu0 %v820_v47  ;;  %v175_v47 = vrot.slane %v155_v40, %v4540_v39 }
  0x80   :  { %920 = vmatprep.subr.mxu0 %v819_v48  ;;  %1267 = vmatprep.subr.mxu1 %v1202_v18 }
  0x81   :  { %921 = vmatpush2.msra.mxu0 %v818_v49  ;;  %1268 = vmatpush1.msra.mxu1 %v1201_v21  ;;  %v1191_v49 = vld [vmem:[%s7587_s10 + $0x50] sm:$0xff]  ;;  %v1188_v21 = vld [vmem:[%s7587_s10 + $0x38] sm:$0xff] }
  0x82   :  { %3732 = vmatmul.mubr.msk.f32.gmra.mxu1 %vm297_vm1, %v87_v30  ;;  %922 = vmatprep.subr.mxu0 %v817_v50  ;;  %v1197_v30 = vld [vmem:[%s7587_s10 + $0x80] sm:$0xff] }
  0x83   :  { %649 = vmatprep.mubr.f32.mxu1 %v4322_v5  ;;  %923 = vmatpush2.msra.mxu0 %v816_v51  ;;  %v4323_v51 = vmov 1966171168  }
  0x84   :  { %1617 = vmatprep.subr.mxu0 %v4322_v5  ;;  %1269 = vmatprep.subr.mxu1 %v1200_v23  ;;  %v255_v61 = vunpack.c.l.s4 %v4323_v51 }
  0x85   :  { %1270 = vmatpush1.msra.mxu1 %v1199_v25 }
  0x86   :  { %3733 = vmatmul.mubr.msk.f32.gmra.mxu1 %vm297_vm1, %v88_v36  ;;  %1271 = vmatprep.subr.mxu1 %v1198_v28  ;;  %v256_v16 = vunpack.c.0.s8 %v255_v61  ;;  %v1185_v61 = vld [vmem:[%s7587_s10 + $0x20] sm:$0xff] }
  0x87   :  { %1272 = vmatpush1.msra.mxu1 %v1197_v30 }
  0x88   :  { %1273 = vmatprep.subr.mxu1 %v1196_v32  ;;  %v259_v40 = vsub.s32 %v256_v16, %v4520_v33 }
  0x89   :  { %1274 = vmatpush1.msra.mxu1 %v1195_v35 }
  0x8a   :  { %1275 = vmatprep.subr.mxu1 %v1194_v37  ;;  %v1187_v37 = vld [vmem:[%s7587_s10 + $0x30] sm:$0xff] }
  0x8b   :  { %1276 = vmatpush1.msra.mxu1 %v1193_v41 }
  0x8c   :  { %1277 = vmatprep.subr.mxu1 %v1192_v43 }
  0x8d   :  { %1278 = vmatpush1.msra.mxu1 %v1191_v49 }
  0x8e   :  { %1279 = vmatprep.subr.mxu1 %v1190_v63 }
  0x8f   :  { %1280 = vmatpush1.msra.mxu1 %v1189_v14 }
  0x90   :  { %1281 = vmatprep.subr.mxu1 %v1188_v21 }
  0x91   :  { %1282 = vmatpush1.msra.mxu1 %v1187_v37 }
  0xca   :  { %v4989_v52 = vpop.f32.mrf.mxu1 }
  0xcb   :  { %v466_v23 = vadd.f32 %v4989_v52, %v5132_v3  ;;  %v1186_v52 = vld [vmem:[%s7587_s10 + $0x28] sm:$0xff] }
  0xcc   :  { %v4991_v53 = vpop.f32.mrf.mxu1  ;;  %1283 = vmatprep.subr.mxu1 %v1186_v52 }
  0xcd   :  { %v468_v25 = vadd.f32 %v4991_v53, %v5129_v1  ;;  %v656_v53 = vmax.f32 %v466_v23, 0.0  ;;  %1284 = vmatpush1.msra.mxu1 %v1185_v61 }
  0xce   :  { %v4993_v54 = vpop.f32.mrf.mxu1 }
  0xcf   :  { %v657_v43 = vmax.f32 %v468_v25, 0.0 }
  0xd0   :  { %v4995_v55 = vpop.f32.mrf.mxu1 }
  0xd1   :  { %v474_v30 = vadd.f32 %v4995_v55, %v5129_v1  ;;  %v472_v55 = vadd.f32 %v4993_v54, %v5132_v3  ;;  %v1184_v54 = vld [vmem:[%s7587_s10 + $0x18] sm:$0xff] }
  0xd2   :  { %v4997_v56 = vpop.f32.mrf.mxu1  ;;  %1285 = vmatprep.subr.mxu1 %v1184_v54  ;;  %v1239_v54 = vld [vmem:[%s7587_s10 + $0x1d0] sm:$0xff] }
  0xd3   :  { %v659_v45 = vmax.f32 %v474_v30, 0.0 }
  0xd4   :  { %v4999_v57 = vpop.f32.mrf.mxu1 }
  0xd6   :  { %v5001_v58 = vpop.f32.mrf.mxu1 }
  0xd8   :  { %v5003_v59 = vpop.f32.mrf.mxu1 }
  0xd9   :  { %v486_v21 = vadd.f32 %v5003_v59, %v5129_v1 }
  0xda   :  { %v5005_v60 = vpop.f32.mrf.mxu1 }
  0xdb   :  { %v663_v52 = vmax.f32 %v486_v21, 0.0 }
  0xdc   :  { %v5010_v62 = vpop.f32.mrf.mxu1 }
  0xde   :  { %v5015_v0 = vpop.f32.mrf.mxu1 }
  0xe0   :  { %v5020_v2 = vpop.f32.mrf.mxu1 }
  0xe2   :  { %v5025_v4 = vpop.f32.mrf.mxu1 }
  0xe4   :  { %v5030_v7 = vpop.f32.mrf.mxu1 }
  0xe6   :  { %v5035_v9 = vpop.f32.mrf.mxu1 }
  0xe8   :  { %v5040_v11 = vpop.f32.mrf.mxu1 }
  0xea   :  { %v5045_v13 = vpop.f32.mrf.mxu1 }
  0xec   :  { %v5050_v15 = vpop.f32.mrf.mxu1 }
  0xee   :  { %v5055_v17 = vpop.f32.mrf.mxu1 }
  0xf0   :  { %v5060_v19 = vpop.f32.mrf.mxu1 }
  0xf2   :  { %v5065_v22 = vpop.f32.mrf.mxu1 }
  0xf4   :  { %v5070_v24 = vpop.f32.mrf.mxu1 }
  0xf6   :  { %v5075_v26 = vpop.f32.mrf.mxu1 }
  0xf8   :  { %v5080_v29 = vpop.f32.mrf.mxu1 }
  0xfa   :  { %v5085_v31 = vpop.f32.mrf.mxu1 }
  0xfc   :  { %v5090_v34 = vpop.f32.mrf.mxu1 }
  0xfe   :  { %v5095_v36 = vpop.f32.mrf.mxu1 }
 0x100   :  { %v5100_v38 = vpop.f32.mrf.mxu1 }
 0x102   :  { %v5108_v42 = vpop.f32.mrf.mxu1 }
 0x104   :  { %v5117_v46 = vpop.f32.mrf.mxu1  ;;  %v244_v48 = vpop.f32.mrf.mxu0 }
 0x105   :  { %v245_v6 = vadd.f32 %v244_v48, %v171_v44 }
 0x106   :  { %v5123_v50 = vpop.f32.mrf.mxu1  ;;  %v246_v8 = vpop.f32.mrf.mxu0 }
 0x107   :  { %v247_v10 = vadd.f32 %v246_v8, %v175_v47  ;;  %v249_v28 = vmax.f32 %v245_v6, 0.0  ;;  %v480_v47 = vadd.f32 %v4999_v57, %v5129_v1  ;;  %v1183_v57 = vld [vmem:[%s7587_s10 + $0x10] sm:$0xff]  ;;  %v658_v8 = vmax.f32 %v472_v55, 0.0  ;;  %v1242_v55 = vld [vmem:[%s7587_s10 + $0x1e8] sm:$0xff] }
 0x108   :  { %v5134_v12 = vpop.f32.mrf.mxu1  ;;  %1286 = vmatpush1.msra.mxu1 %v1183_v57 }
 0x109   :  { %v250_v32 = vmax.f32 %v247_v10, 0.0  ;;  %v5164_v44 = vrot.slane %v249_v28, %v4688_v20  ;;  %v478_v10 = vadd.f32 %v4997_v56, %v5132_v3  ;;  %v661_v16 = vmax.f32 %v480_v47, 0.0  ;;  %v1244_v56 = vld [vmem:[%s7587_s10 + $0x1f8] sm:$0xff] }
 0x10a   :  { %v5139_v18 = vpop.f32.mrf.mxu1 }
 0x10b   :  { %v253_v48 = vcombine.low %v249_v28, %v250_v32  ;;  %v5169_v49 = vrot.slane %v250_v32, %v4688_v20  ;;  %v720_v14 = vmul.f32 %v656_v53, %v5164_v44  ;;  %v1182_v28 = vld [vmem:[%s7587_s10 + $0x8] sm:$0xff]  ;;  %v660_v59 = vmax.f32 %v478_v10, 0.0 }
 0x10c   :  { %v5150_v35 = vpop.f32.mrf.mxu1  ;;  %v484_v32 = vadd.f32 %v5001_v58, %v5132_v3  ;;  %v722_v37 = vmul.f32 %v658_v8, %v5164_v44  ;;  %1287 = vmatprep.subr.mxu1 %v1182_v28  ;;  %v492_v53 = vadd.f32 %v5010_v62, %v5129_v1  ;;  %v1241_v58 = vld [vmem:[%s7587_s10 + $0x1e0] sm:$0xff]  ;;  %v1240_v62 = vld [vmem:[%s7587_s10 + $0x1d8] sm:$0xff]  ;;  %v1238_v8 = vld [vmem:[%s7587_s10 + $0x1c8] sm:$0xff]  ;;  %v504_v28 = vadd.f32 %v5030_v7, %v5129_v1 }
 0x10d   :  { %v260_v63 = vrot.slane %v253_v48, %v259_v40  ;;  %v721_v6 = vmul.f32 %v657_v43, %v5169_v49  ;;  %v723_v25 = vmul.f32 %v659_v45, %v5169_v49  ;;  %v725_v43 = vmul.f32 %v661_v16, %v5169_v49  ;;  %1288 = vmatpush1.msra.mxu1 %v1181_v27  ;;  %v1232_v7 = vld [vmem:[%s7587_s10 + $0x198] sm:$0xff] }
 0x10e   :  { %v5156_v41 = vpop.f32.mrf.mxu1  ;;  %1289 = vmatprep.subr.mxu1 %v1244_v56  ;;  %v662_v47 = vmax.f32 %v484_v32, 0.0  ;;  %v490_v48 = vadd.f32 %v5005_v60, %v5132_v3  ;;  %v724_v61 = vmul.f32 %v660_v59, %v5164_v44  ;;  %v727_v57 = vmul.f32 %v663_v52, %v5169_v49  ;;  %v1237_v60 = vld [vmem:[%s7587_s10 + $0x1c0] sm:$0xff]  ;;  %v1234_v56 = vld [vmem:[%s7587_s10 + $0x1a8] sm:$0xff]  ;;  %v1231_v52 = vld [vmem:[%s7587_s10 + $0x190] sm:$0xff] }
 0x10f   :  { %v267_v23 = vrot.slane %v260_v63, %v259_v40  ;;  %924 = vmatprep.mubr.f32.mxu0 %v721_v6  ;;  %v1243_v40 = vld [vmem:[%s7587_s10 + $0x1f0] sm:$0xff]  ;;  %v665_v63 = vmax.f32 %v492_v53, 0.0  ;;  %v498_v6 = vadd.f32 %v5020_v2, %v5129_v1  ;;  %v1236_v2 = vld [vmem:[%s7587_s10 + $0x1b8] sm:$0xff]  ;;  %v496_v16 = vadd.f32 %v5015_v0, %v5132_v3  ;;  %v1233_v0 = vld [vmem:[%s7587_s10 + $0x1a0] sm:$0xff] }
 0x110   :  { %v5171_v51 = vpop.f32.mrf.mxu1  ;;  %925 = vmatmul.mubr.f32.vlgmr.msra.gmra.mxu0 %v720_v14  ;;  %1290 = vmatpush2.msra.mxu1 %v1243_v40  ;;  %v664_v14 = vmax.f32 %v490_v48, 0.0  ;;  %v726_v21 = vmul.f32 %v662_v47, %v5164_v44  ;;  %v669_v53 = vmax.f32 %v504_v28, 0.0  ;;  %v508_v48 = vadd.f32 %v5035_v9, %v5132_v3  ;;  %v1225_v9 = vld [vmem:[%s7587_s10 + $0x160] sm:$0xff] }
 0x111   :  { %273 = vst.msk [vmem:[%s7594_s17] sm:$0x3] %vm271_vm2, %v267_v23  ;;  %930 = vmatprep.mubr.f32.mxu0 %v723_v25  ;;  %1291 = vmatprep.subr.mxu1 %v1242_v55  ;;  %v1235_v23 = vld [vmem:[%s7587_s10 + $0x1b0] sm:$0xff]  ;;  %v667_v25 = vmax.f32 %v498_v6, 0.0  ;;  %v729_v27 = vmul.f32 %v665_v63, %v5169_v49  ;;  %v666_v32 = vmax.f32 %v496_v16, 0.0  ;;  %v516_v6 = vadd.f32 %v5050_v15, %v5129_v1  ;;  %v1224_v15 = vld [vmem:[%s7587_s10 + $0x158] sm:$0xff] }
 0x112   :  { %v5193_v30 = vpop.f32.mrf.mxu1  ;;  %1292 = vmatpush2.msra.mxu1 %v1241_v58  ;;  %v728_v40 = vmul.f32 %v664_v14, %v5164_v44  ;;  %v1230_v58 = vld [vmem:[%s7587_s10 + $0x188] sm:$0xff]  ;;  %v514_v14 = vadd.f32 %v5045_v13, %v5132_v3  ;;  %v1221_v13 = vld [vmem:[%s7587_s10 + $0x140] sm:$0xff] }
 0x113   :  { %1293 = vmatprep.subr.mxu1 %v1240_v62  ;;  %v731_v55 = vmul.f32 %v667_v25, %v5169_v49  ;;  %v522_v25 = vadd.f32 %v5060_v19, %v5129_v1  ;;  %v1220_v19 = vld [vmem:[%s7587_s10 + $0x138] sm:$0xff] }
 0x114   :  { %v5216_v45 = vpop.f32.mrf.mxu1  ;;  %931 = vmatmul.mubr.f32.gmra.mxu0 %v722_v37  ;;  %1294 = vmatpush2.msra.mxu1 %v1239_v54  ;;  %v502_v37 = vadd.f32 %v5025_v4, %v5132_v3  ;;  %v1229_v4 = vld [vmem:[%s7587_s10 + $0x180] sm:$0xff]  ;;  %v1227_v54 = vld [vmem:[%s7587_s10 + $0x170] sm:$0xff] }
 0x115   :  { %936 = vmatprep.mubr.f32.mxu0 %v725_v43  ;;  %1295 = vmatprep.subr.mxu1 %v1238_v8  ;;  %v510_v43 = vadd.f32 %v5040_v11, %v5129_v1  ;;  %v1228_v11 = vld [vmem:[%s7587_s10 + $0x178] sm:$0xff]  ;;  %v1226_v8 = vld [vmem:[%s7587_s10 + $0x168] sm:$0xff] }
 0x116   :  { %v5236_v10 = vpop.f32.mrf.mxu1  ;;  %1296 = vmatpush2.msra.mxu1 %v1237_v60  ;;  %v668_v47 = vmax.f32 %v502_v37, 0.0  ;;  %v1219_v37 = vld [vmem:[%s7587_s10 + $0x130] sm:$0xff] }
 0x117   :  { %1297 = vmatprep.subr.mxu1 %v1236_v2  ;;  %v671_v63 = vmax.f32 %v510_v43, 0.0  ;;  %v670_v2 = vmax.f32 %v508_v48, 0.0  ;;  %v1218_v43 = vld [vmem:[%s7587_s10 + $0x128] sm:$0xff]  ;;  %v534_v48 = vadd.f32 %v5080_v29, %v5129_v1 }
 0x118   :  { %937 = vmatmul.mubr.f32.gmra.mxu0 %v724_v61  ;;  %v5256_v59 = vpop.f32.mrf.mxu1  ;;  %1298 = vmatpush2.msra.mxu1 %v1235_v23  ;;  %v730_v61 = vmul.f32 %v666_v32, %v5164_v44  ;;  %v732_v16 = vmul.f32 %v668_v47, %v5164_v44  ;;  %v673_v23 = vmax.f32 %v516_v6, 0.0  ;;  %v532_v6 = vadd.f32 %v5075_v26, %v5132_v3 }
 0x119   :  { %942 = vmatprep.mubr.f32.mxu0 %v727_v57  ;;  %1299 = vmatprep.subr.mxu1 %v1234_v56  ;;  %v733_v57 = vmul.f32 %v669_v53, %v5169_v49  ;;  %v735_v28 = vmul.f32 %v671_v63, %v5169_v49  ;;  %v734_v32 = vmul.f32 %v670_v2, %v5164_v44 }
 0x11a   :  { %1300 = vmatpush2.msra.mxu1 %v1233_v0  ;;  %v5276_v62 = vpop.f32.mrf.mxu1  ;;  %v672_v0 = vmax.f32 %v514_v14, 0.0  ;;  %v737_v53 = vmul.f32 %v673_v23, %v5169_v49  ;;  %v538_v2 = vadd.f32 %v5085_v31, %v5132_v3  ;;  %v546_v26 = vadd.f32 %v5100_v38, %v5129_v1 }
 0x11b   :  { %1301 = vmatprep.subr.mxu1 %v1232_v7  ;;  %v520_v7 = vadd.f32 %v5055_v17, %v5132_v3  ;;  %v1217_v17 = vld [vmem:[%s7587_s10 + $0x120] sm:$0xff]  ;;  %v552_v31 = vadd.f32 %v5117_v46, %v5129_v1 }
 0x11c   :  { %943 = vmatmul.mubr.f32.gmra.mxu0 %v726_v21  ;;  %1302 = vmatpush2.msra.mxu1 %v1231_v52  ;;  %v5296_v60 = vpop.f32.mrf.mxu1  ;;  %v1223_v21 = vld [vmem:[%s7587_s10 + $0x150] sm:$0xff]  ;;  %v528_v52 = vadd.f32 %v5070_v24, %v5129_v1  ;;  %v1216_v24 = vld [vmem:[%s7587_s10 + $0x118] sm:$0xff] }
 0x11d   :  { %948 = vmatprep.mubr.f32.mxu0 %v729_v27  ;;  %1303 = vmatprep.subr.mxu1 %v1230_v58  ;;  %v1222_v27 = vld [vmem:[%s7587_s10 + $0x148] sm:$0xff]  ;;  %v674_v58 = vmax.f32 %v520_v7, 0.0 }
 0x11e   :  { %1304 = vmatpush2.msra.mxu1 %v1229_v4  ;;  %v5316_v56 = vpop.f32.mrf.mxu1  ;;  %v526_v4 = vadd.f32 %v5065_v22, %v5132_v3  ;;  %v677_v47 = vmax.f32 %v528_v52, 0.0 }
 0x11f   :  { %1305 = vmatprep.subr.mxu1 %v1228_v11  ;;  %v736_v11 = vmul.f32 %v672_v0, %v5164_v44  ;;  %v738_v22 = vmul.f32 %v674_v58, %v5164_v44  ;;  %v550_v0 = vadd.f32 %v5108_v42, %v5132_v3  ;;  %v564_v42 = vadd.f32 %v5150_v35, %v5129_v1 }
 0x120   :  { %949 = vmatmul.mubr.f32.gmra.mxu0 %v728_v40  ;;  %1306 = vmatpush2.msra.mxu1 %v1227_v54  ;;  %v675_v40 = vmax.f32 %v522_v25, 0.0  ;;  %v676_v63 = vmax.f32 %v526_v4, 0.0  ;;  %v741_v29 = vmul.f32 %v677_v47, %v5169_v49  ;;  %v544_v25 = vadd.f32 %v5095_v36, %v5132_v3 }
 0x121   :  { %954 = vmatprep.mubr.f32.mxu0 %v731_v55  ;;  %1307 = vmatprep.subr.mxu1 %v1226_v8  ;;  %v5336_v55 = vpop.f32.mrf.mxu1  ;;  %v540_v8 = vadd.f32 %v5090_v34, %v5129_v1  ;;  %v680_v34 = vmax.f32 %v538_v2, 0.0  ;;  %v558_v36 = vadd.f32 %v5134_v12, %v5129_v1  ;;  %v684_v46 = vmax.f32 %v550_v0, 0.0  ;;  %v1213_v0 = vld [vmem:[%s7587_s10 + $0x100] sm:$0xff] }
 0x122   :  { %1308 = vmatpush2.msra.mxu1 %v1225_v9  ;;  %v740_v14 = vmul.f32 %v676_v63, %v5164_v44  ;;  %v682_v38 = vmax.f32 %v544_v25, 0.0  ;;  %v562_v4 = vadd.f32 %v5139_v18, %v5132_v3  ;;  %v568_v63 = vadd.f32 %v5156_v41, %v5132_v3 }
 0x123   :  { %1309 = vmatprep.subr.mxu1 %v1224_v15  ;;  %v5350_v54 = vpop.f32.mrf.mxu1  ;;  %v678_v15 = vmax.f32 %v532_v6, 0.0  ;;  %v744_v7 = vmul.f32 %v680_v34, %v5164_v44  ;;  %v748_v12 = vmul.f32 %v684_v46, %v5164_v44  ;;  %v576_v18 = vadd.f32 %v5216_v45, %v5129_v1 }
 0x124   :  { %955 = vmatmul.mubr.f32.gmra.mxu0 %v730_v61  ;;  %1310 = vmatpush2.msra.mxu1 %v1223_v21  ;;  %v739_v61 = vmul.f32 %v675_v40, %v5169_v49  ;;  %v746_v52 = vmul.f32 %v682_v38, %v5164_v44  ;;  %v582_v41 = vadd.f32 %v5256_v59, %v5129_v1  ;;  %v1215_v59 = vld [vmem:[%s7587_s10 + $0x110] sm:$0xff] }
 0x125   :  { %960 = vmatprep.mubr.f32.mxu0 %v733_v57  ;;  %1311 = vmatprep.subr.mxu1 %v1222_v27  ;;  %v679_v57 = vmax.f32 %v534_v48, 0.0  ;;  %v5358_v9 = vpop.f32.mrf.mxu1  ;;  %v683_v27 = vmax.f32 %v546_v26, 0.0  ;;  %v580_v26 = vadd.f32 %v5236_v10, %v5132_v3  ;;  %v594_v38 = vadd.f32 %v5336_v55, %v5129_v1 }
 0x126   :  { %1312 = vmatpush2.msra.mxu1 %v1221_v13  ;;  %v695_v34 = vmax.f32 %v582_v41, 0.0  ;;  %v600_v55 = vadd.f32 %v5358_v9, %v5129_v1 }
 0x127   :  { %1313 = vmatprep.subr.mxu1 %v1220_v19  ;;  %v743_v21 = vmul.f32 %v679_v57, %v5169_v49  ;;  %v5366_v23 = vpop.f32.mrf.mxu1  ;;  %v699_v46 = vmax.f32 %v594_v38, 0.0 }
 0x128   :  { %961 = vmatmul.mubr.f32.gmra.mxu0 %v732_v16  ;;  %1314 = vmatpush2.msra.mxu1 %v1219_v37  ;;  %v681_v16 = vmax.f32 %v540_v8, 0.0  ;;  %v747_v37 = vmul.f32 %v683_v27, %v5169_v49  ;;  %v690_v8 = vmax.f32 %v568_v63, 0.0  ;;  %v694_v27 = vmax.f32 %v580_v26, 0.0 }
 0x129   :  { %966 = vmatprep.mubr.f32.mxu0 %v735_v28  ;;  %1315 = vmatprep.subr.mxu1 %v1218_v43  ;;  %v742_v28 = vmul.f32 %v678_v15, %v5164_v44  ;;  %v5374_v19 = vpop.f32.mrf.mxu1  ;;  %v687_v43 = vmax.f32 %v558_v36, 0.0  ;;  %v693_v15 = vmax.f32 %v576_v18, 0.0 }
 0x12a   :  { %1316 = vmatpush2.msra.mxu1 %v1217_v17  ;;  %v745_v13 = vmul.f32 %v681_v16, %v5169_v49  ;;  %v754_v45 = vmul.f32 %v690_v8, %v5164_v44 }
 0x12b   :  { %1317 = vmatprep.subr.mxu1 %v1216_v24  ;;  %v5382_v40 = vpop.f32.mrf.mxu1  ;;  %v751_v47 = vmul.f32 %v687_v43, %v5169_v49 }
 0x12c   :  { %967 = vmatmul.mubr.f32.gmra.mxu0 %v734_v32  ;;  %v685_v32 = vmax.f32 %v552_v31, 0.0  ;;  %1318 = vmatpush2.msra.mxu1 %v1215_v59  ;;  %v586_v31 = vadd.f32 %v5276_v62, %v5132_v3  ;;  %v592_v62 = vadd.f32 %v5316_v56, %v5132_v3  ;;  %v606_v56 = vadd.f32 %v5374_v19, %v5129_v1 }
 0x12d   :  { %972 = vmatprep.mubr.f32.mxu0 %v737_v53  ;;  %v556_v53 = vadd.f32 %v5123_v50, %v5132_v3  ;;  %v5390_v24 = vpop.f32.mrf.mxu1  ;;  %v570_v50 = vadd.f32 %v5171_v51, %v5129_v1  ;;  %v610_v63 = vadd.f32 %v5382_v40, %v5132_v3 }
 0x12e   :  { %v749_v17 = vmul.f32 %v685_v32, %v5169_v49  ;;  %v758_v32 = vmul.f32 %v694_v27, %v5164_v44  ;;  %v696_v36 = vmax.f32 %v586_v31, 0.0  ;;  %v698_v43 = vmax.f32 %v592_v62, 0.0 }
 0x12f   :  { %v686_v58 = vmax.f32 %v556_v53, 0.0  ;;  %v5398_v48 = vpop.f32.mrf.mxu1  ;;  %v691_v6 = vmax.f32 %v570_v50, 0.0 }
 0x130   :  { %973 = vmatmul.mubr.f32.gmra.mxu0 %v736_v11  ;;  %v689_v11 = vmax.f32 %v564_v42, 0.0  ;;  %v760_v53 = vmul.f32 %v696_v36, %v5164_v44  ;;  %v598_v42 = vadd.f32 %v5350_v54, %v5132_v3  ;;  %v762_v9 = vmul.f32 %v698_v43, %v5164_v44 }
 0x131   :  { %978 = vmatprep.mubr.f32.mxu0 %v739_v61  ;;  %v750_v35 = vmul.f32 %v686_v58, %v5164_v44  ;;  %v688_v61 = vmax.f32 %v562_v4, 0.0  ;;  %v5406_v57 = vpop.f32.mrf.mxu1  ;;  %v755_v2 = vmul.f32 %v691_v6, %v5169_v49  ;;  %v612_v54 = vadd.f32 %v5390_v24, %v5129_v1 }
 0x132   :  { %v700_v4 = vmax.f32 %v598_v42, 0.0  ;;  %v616_v8 = vadd.f32 %v5398_v48, %v5132_v3 }
 0x133   :  { %v752_v51 = vmul.f32 %v688_v61, %v5164_v44  ;;  %v705_v18 = vmax.f32 %v612_v54, 0.0 }
 0x134   :  { %979 = vmatmul.mubr.f32.gmra.mxu0 %v738_v22  ;;  %v753_v22 = vmul.f32 %v689_v11, %v5169_v49  ;;  %v604_v11 = vadd.f32 %v5366_v23, %v5132_v3  ;;  %v764_v19 = vmul.f32 %v700_v4, %v5164_v44  ;;  %v618_v23 = vadd.f32 %v5406_v57, %v5129_v1 }
 0x135   :  { %984 = vmatprep.mubr.f32.mxu0 %v741_v29  ;;  %v574_v29 = vadd.f32 %v5193_v30, %v5132_v3  ;;  %v588_v30 = vadd.f32 %v5296_v60, %v5129_v1  ;;  %v759_v60 = vmul.f32 %v695_v34, %v5169_v49  ;;  %v706_v57 = vmax.f32 %v616_v8, 0.0  ;;  %v1583_v8 = vld [vmem:[%s7589_s12 + $0x28] sm:$0xff] }
 0x136   :  { %v702_v61 = vmax.f32 %v604_v11, 0.0 }
 0x137   :  { %v692_v16 = vmax.f32 %v574_v29, 0.0  ;;  %v769_v29 = vmul.f32 %v705_v18, %v5169_v49  ;;  %v770_v34 = vmul.f32 %v706_v57, %v5164_v44  ;;  %v1587_v18 = vld [vmem:[%s7589_s12 + $0x48] sm:$0xff] }
 0x138   :  { %985 = vmatmul.mubr.f32.gmra.mxu0 %v740_v14  ;;  %v5414_v14 = vpop.f32.mrf.mxu1  ;;  %v766_v24 = vmul.f32 %v702_v61, %v5164_v44  ;;  %v1590_v61 = vld [vmem:[%s7589_s12 + $0x60] sm:$0xff] }
 0x139   :  { %990 = vmatprep.mubr.f32.mxu0 %v743_v21  ;;  %v757_v21 = vmul.f32 %v693_v15, %v5169_v49  ;;  %v756_v10 = vmul.f32 %v692_v16, %v5164_v44  ;;  %v707_v15 = vmax.f32 %v618_v23, 0.0  ;;  %v1586_v23 = vld [vmem:[%s7589_s12 + $0x40] sm:$0xff] }
 0x13a   :  { %v623_v25 = vpop.f32.mrf.mxu1 }
 0x13b   :  { %v624_v40 = vadd.f32 %v623_v25, %v5129_v1  ;;  %v771_v16 = vmul.f32 %v707_v15, %v5169_v49 }
 0x13c   :  { %991 = vmatmul.mubr.f32.gmra.mxu0 %v742_v28  ;;  %v1214_v28 = vld [vmem:[%s7587_s10 + $0x108] sm:$0xff] }
 0x13d   :  { %996 = vmatprep.mubr.f32.mxu0 %v745_v13  ;;  %1319 = vmatprep.subr.mxu1 %v1214_v28  ;;  %v697_v13 = vmax.f32 %v588_v30, 0.0  ;;  %v709_v26 = vmax.f32 %v624_v40, 0.0  ;;  %v1582_v40 = vld [vmem:[%s7589_s12 + $0x20] sm:$0xff] }
 0x13e   :  { %1320 = vmatpush2.msra.mxu1 %v1213_v0 }
 0x13f   :  { %v773_v25 = vmul.f32 %v709_v26, %v5169_v49 }
 0x140   :  { %997 = vmatmul.mubr.f32.gmra.mxu0 %v744_v7  ;;  %v627_v7 = vpop.f32.mrf.mxu1 }
 0x141   :  { %1002 = vmatprep.mubr.f32.mxu0 %v747_v37  ;;  %v761_v37 = vmul.f32 %v697_v13, %v5169_v49  ;;  %v628_v59 = vadd.f32 %v627_v7, %v5132_v3 }
 0x143   :  { %v710_v31 = vmax.f32 %v628_v59, 0.0 }
 0x144   :  { %1003 = vmatmul.mubr.f32.gmra.mxu0 %v746_v52  ;;  %v629_v52 = vpop.f32.mrf.mxu1 }
 0x145   :  { %1008 = vmatprep.mubr.f32.mxu0 %v749_v17  ;;  %v763_v17 = vmul.f32 %v699_v46, %v5169_v49  ;;  %v774_v7 = vmul.f32 %v710_v31, %v5164_v44  ;;  %v1893_v31 = vld [vmem:[%s7591_s14 + $0x70] sm:$0xff] }
 0x146   :  { %v633_v58 = vpop.f32.mrf.mxu1 }
 0x148   :  { %1009 = vmatmul.mubr.f32.gmra.mxu0 %v748_v12  ;;  %v701_v12 = vmax.f32 %v600_v55, 0.0 }
 0x149   :  { %1014 = vmatprep.mubr.f32.mxu0 %v751_v47  ;;  %v703_v47 = vmax.f32 %v606_v56, 0.0 }
 0x14a   :  { %v765_v50 = vmul.f32 %v701_v12, %v5169_v49 }
 0x14b   :  { %v767_v6 = vmul.f32 %v703_v47, %v5169_v49 }
 0x14c   :  { %1015 = vmatmul.mubr.f32.gmra.mxu0 %v750_v35  ;;  %v635_v35 = vpop.f32.mrf.mxu1 }
 0x14d   :  { %1020 = vmatprep.mubr.f32.mxu0 %v753_v22 }
 0x14e   :  { %v639_v22 = vpop.f32.mrf.mxu1 }
 0x14f   :  { %v640_v62 = vadd.f32 %v639_v22, %v5132_v3  ;;  %v1585_v22 = vld [vmem:[%s7589_s12 + $0x38] sm:$0xff] }
 0x150   :  { %1021 = vmatmul.mubr.f32.gmra.mxu0 %v752_v51  ;;  %v704_v51 = vmax.f32 %v610_v63, 0.0  ;;  %v641_v41 = vpop.f32.mrf.mxu1  ;;  %v1589_v63 = vld [vmem:[%s7589_s12 + $0x58] sm:$0xff] }
 0x151   :  { %1026 = vmatprep.mubr.f32.mxu0 %v755_v2  ;;  %v642_v0 = vadd.f32 %v641_v41, %v5129_v1  ;;  %v714_v43 = vmax.f32 %v640_v62, 0.0  ;;  %v1907_v62 = vld [vmem:[%s7591_s14 + $0xe0] sm:$0xff] }
 0x152   :  { %v768_v2 = vmul.f32 %v704_v51, %v5164_v44  ;;  %v645_v48 = vpop.f32.mrf.mxu1  ;;  %v848_v51 = vld [vmem:[%s7586_s9] sm:$0x3] }
 0x153   :  { %v715_v46 = vmax.f32 %v642_v0, 0.0  ;;  %v646_v42 = vadd.f32 %v645_v48, %v5132_v3  ;;  %v5547_v15 = vrot.slane %v848_v51, %v4540_v39 }
 0x154   :  { %1027 = vmatmul.mubr.f32.gmra.mxu0 %v754_v45  ;;  %v622_v45 = vadd.f32 %v5414_v14, %v5132_v3  ;;  %v647_v27 = vpop.f32.mrf.mxu1 }
 0x155   :  { %1032 = vmatprep.mubr.f32.mxu0 %v757_v21  ;;  %v630_v21 = vadd.f32 %v629_v52, %v5129_v1  ;;  %v648_v55 = vadd.f32 %v647_v27, %v5129_v1  ;;  %v1909_v27 = vld [vmem:[%s7591_s14 + $0xf0] sm:$0xff] }
 0x156   :  { %v708_v30 = vmax.f32 %v622_v45, 0.0 }
 0x157   :  { %v711_v28 = vmax.f32 %v630_v21, 0.0  ;;  %v717_v12 = vmax.f32 %v648_v55, 0.0  ;;  %v1580_v21 = vld [vmem:[%s7589_s12 + $0x10] sm:$0xff]  ;;  %v1578_v55 = vld [vmem:[%s7589_s12] sm:$0xff] }
 0x158   :  { %1033 = vmatmul.mubr.f32.gmra.mxu0 %v756_v10  ;;  %v636_v10 = vadd.f32 %v635_v35, %v5129_v1  ;;  %v772_v14 = vmul.f32 %v708_v30, %v5164_v44 }
 0x159   :  { %1038 = vmatprep.mubr.f32.mxu0 %v759_v60  ;;  %v634_v60 = vadd.f32 %v633_v58, %v5132_v3  ;;  %v775_v13 = vmul.f32 %v711_v28, %v5169_v49  ;;  %v778_v58 = vmul.f32 %v714_v43, %v5164_v44  ;;  %v781_v11 = vmul.f32 %v717_v12, %v5169_v49  ;;  %v1579_v28 = vld [vmem:[%s7589_s12 + $0x8] sm:$0xff]  ;;  %v1890_v12 = vld [vmem:[%s7591_s14 + $0x58] sm:$0xff] }
 0x15a   :  { %v713_v38 = vmax.f32 %v636_v10, 0.0 }
 0x15b   :  { %v712_v36 = vmax.f32 %v634_v60, 0.0 }
 0x15c   :  { %1039 = vmatmul.mubr.f32.gmra.mxu0 %v758_v32  ;;  %v651_v32 = vpop.f32.mrf.mxu1 }
 0x15d   :  { %1044 = vmatprep.mubr.f32.mxu0 %v761_v37  ;;  %v777_v37 = vmul.f32 %v713_v38, %v5169_v49  ;;  %v652_v4 = vadd.f32 %v651_v32, %v5132_v3  ;;  %v1910_v3 = vld [vmem:[%s7591_s14 + $0xf8] sm:$0xff] }
 0x15e   :  { %v653_v52 = vpop.f32.mrf.mxu1  ;;  %3735 = vmatprep.subr.mxu1 %v1910_v3 }
 0x15f   :  { %v654_v56 = vadd.f32 %v653_v52, %v5129_v1  ;;  %v718_v54 = vmax.f32 %v652_v4, 0.0  ;;  %v1889_v4 = vld [vmem:[%s7591_s14 + $0x50] sm:$0xff] }
 0x160   :  { %1045 = vmatmul.mubr.f32.gmra.mxu0 %v760_v53  ;;  %v776_v53 = vmul.f32 %v712_v36, %v5164_v44 }
 0x161   :  { %1050 = vmatprep.mubr.f32.mxu0 %v763_v17  ;;  %v779_v17 = vmul.f32 %v715_v46, %v5169_v49  ;;  %v782_v1 = vmul.f32 %v718_v54, %v5164_v44  ;;  %v1891_v46 = vld [vmem:[%s7591_s14 + $0x60] sm:$0xff] }
 0x164   :  { %1051 = vmatmul.mubr.f32.gmra.mxu0 %v762_v9  ;;  %v716_v9 = vmax.f32 %v646_v42, 0.0 }
 0x165   :  { %1056 = vmatprep.mubr.f32.mxu0 %v765_v50  ;;  %v719_v50 = vmax.f32 %v654_v56, 0.0 }
 0x166   :  { %v780_v47 = vmul.f32 %v716_v9, %v5164_v44  ;;  %v1591_v44 = vld [vmem:[%s7589_s12 + $0x68] sm:$0xff] }
 0x167   :  { %v783_v35 = vmul.f32 %v719_v50, %v5169_v49  ;;  %v1592_v49 = vld [vmem:[%s7589_s12 + $0x70] sm:$0xff] }
 0x168   :  { %1057 = vmatmul.mubr.f32.gmra.mxu0 %v764_v19  ;;  %v1593_v19 = vld [vmem:[%s7589_s12 + $0x78] sm:$0xff] }
 0x169   :  { %1062 = vmatprep.mubr.f32.mxu0 %v767_v6  ;;  %1618 = vmatpush1.msra.mxu0 %v1593_v19  ;;  %v1588_v6 = vld [vmem:[%s7589_s12 + $0x50] sm:$0xff]  ;;  %v1888_v19 = vld [vmem:[%s7591_s14 + $0x48] sm:$0xff] }
 0x16a   :  { %1619 = vmatprep.subr.mxu0 %v4322_v5 }
 0x16b   :  { %1620 = vmatpush1.msra.mxu0 %v1592_v49  ;;  %v1903_v49 = vld [vmem:[%s7591_s14 + $0xc0] sm:$0xff] }
 0x16c   :  { %1063 = vmatmul.mubr.f32.gmra.mxu0 %v766_v24  ;;  %1621 = vmatprep.subr.mxu0 %v4322_v5  ;;  %v1584_v24 = vld [vmem:[%s7589_s12 + $0x30] sm:$0xff] }
 0x16d   :  { %1068 = vmatprep.mubr.f32.mxu0 %v769_v29  ;;  %1622 = vmatpush1.msra.mxu0 %v1591_v44  ;;  %v5544_v29 = vrot.slane %v848_v51, %v4688_v20  ;;  %v1886_v51 = vld [vmem:[%s7591_s14 + $0x38] sm:$0xff] }
 0x16e   :  { %1623 = vmatprep.subr.mxu0 %v4322_v5 }
 0x16f   :  { %1624 = vmatpush1.msra.mxu0 %v1590_v61  ;;  %v1887_v61 = vld [vmem:[%s7591_s14 + $0x40] sm:$0xff] }
 0x170   :  { %1069 = vmatmul.mubr.f32.gmra.mxu0 %v768_v2  ;;  %1625 = vmatprep.subr.mxu0 %v4322_v5  ;;  %v1581_v2 = vld [vmem:[%s7589_s12 + $0x18] sm:$0xff] }
 0x171   :  { %1074 = vmatprep.mubr.f32.mxu0 %v771_v16  ;;  %1626 = vmatpush1.msra.mxu0 %v1589_v63  ;;  %v1608_v63 = vld [vmem:[%s7589_s12 + $0xf0] sm:$0xff] }
 0x172   :  { %1627 = vmatprep.subr.mxu0 %v4322_v5 }
 0x173   :  { %1628 = vmatpush1.msra.mxu0 %v1588_v6 }
 0x174   :  { %1075 = vmatmul.mubr.f32.gmra.mxu0 %v770_v34  ;;  %1629 = vmatprep.subr.mxu0 %v4322_v5 }
 0x175   :  { %1080 = vmatprep.mubr.f32.mxu0 %v773_v25  ;;  %1630 = vmatpush1.msra.mxu0 %v1587_v18  ;;  %v1894_v25 = vld [vmem:[%s7591_s14 + $0x78] sm:$0xff] }
 0x176   :  { %1631 = vmatprep.subr.mxu0 %v4322_v5  ;;  %v1902_v18 = vld [vmem:[%s7591_s14 + $0xb8] sm:$0xff] }
 0x177   :  { %1632 = vmatpush1.msra.mxu0 %v1586_v23 }
 0x178   :  { %1081 = vmatmul.mubr.f32.gmra.mxu0 %v772_v14  ;;  %1633 = vmatprep.subr.mxu0 %v4322_v5 }
 0x179   :  { %1086 = vmatprep.mubr.f32.mxu0 %v775_v13  ;;  %1634 = vmatpush1.msra.mxu0 %v1585_v22  ;;  %v1908_v13 = vld [vmem:[%s7591_s14 + $0xe8] sm:$0xff] }
 0x17a   :  { %1635 = vmatprep.subr.mxu0 %v4322_v5 }
 0x17b   :  { %1636 = vmatpush1.msra.mxu0 %v1584_v24 }
 0x17c   :  { %1087 = vmatmul.mubr.f32.gmra.mxu0 %v774_v7  ;;  %1637 = vmatprep.subr.mxu0 %v4322_v5  ;;  %v1892_v7 = vld [vmem:[%s7591_s14 + $0x68] sm:$0xff] }
 0x17d   :  { %1092 = vmatprep.mubr.f32.mxu0 %v777_v37  ;;  %1638 = vmatpush1.msra.mxu0 %v1583_v8 }
 0x17e   :  { %1639 = vmatprep.subr.mxu0 %v4322_v5 }
 0x17f   :  { %1640 = vmatpush1.msra.mxu0 %v1582_v40  ;;  %v1901_v40 = vld [vmem:[%s7591_s14 + $0xb0] sm:$0xff] }
 0x180   :  { %1093 = vmatmul.mubr.f32.gmra.mxu0 %v776_v53  ;;  %1641 = vmatprep.subr.mxu0 %v4322_v5  ;;  %v1906_v53 = vld [vmem:[%s7591_s14 + $0xd8] sm:$0xff] }
 0x181   :  { %1098 = vmatprep.mubr.f32.mxu0 %v779_v17  ;;  %1642 = vmatpush1.msra.mxu0 %v1581_v2  ;;  %v1885_v2 = vld [vmem:[%s7591_s14 + $0x30] sm:$0xff] }
 0x182   :  { %1643 = vmatprep.subr.mxu0 %v4322_v5 }
 0x183   :  { %1644 = vmatpush1.msra.mxu0 %v1580_v21 }
 0x184   :  { %1099 = vmatmul.mubr.f32.gmra.mxu0 %v778_v58  ;;  %1645 = vmatprep.subr.mxu0 %v4322_v5  ;;  %v1905_v58 = vld [vmem:[%s7591_s14 + $0xd0] sm:$0xff] }
 0x185   :  { %1104 = vmatprep.mubr.f32.mxu0 %v781_v11  ;;  %1646 = vmatpush1.msra.mxu0 %v1579_v28  ;;  %v1609_v11 = vld [vmem:[%s7589_s12 + $0xf8] sm:$0xff]  ;;  %v1883_v28 = vld [vmem:[%s7591_s14 + $0x20] sm:$0xff] }
 0x186   :  { %1647 = vmatprep.subr.mxu0 %v4322_v5 }
 0x187   :  { %1648 = vmatpush1.msra.mxu0 %v1578_v55 }
 0x188   :  { %1105 = vmatmul.mubr.f32.gmra.mxu0 %v780_v47  ;;  %1649 = vmatprep.subr.mxu0 %v4322_v5  ;;  %v1904_v47 = vld [vmem:[%s7591_s14 + $0xc8] sm:$0xff] }
 0x189   :  { %1110 = vmatprep.mubr.f32.mxu0 %v783_v35  ;;  %1650 = vmatpush2.msra.mxu0 %v1609_v11 }
 0x18a   :  { %1651 = vmatprep.subr.mxu0 %v4322_v5 }
 0x18b   :  { %1652 = vmatpush2.msra.mxu0 %v1608_v63 }
 0x18c   :  { %1111 = vmatmul.mubr.f32.gmra.mxu0 %v782_v1  ;;  %1653 = vmatprep.subr.mxu0 %v4322_v5 }
 0x1d0   :  { %v926_v41 = vpop.f32.mrf.mxu0 }
 0x1d1   :  { %v927_v57 = vadd.f32 %v926_v41, %v5544_v29 }
 0x1d2   :  { %v928_v45 = vpop.f32.mrf.mxu0 }
 0x1d3   :  { %v929_v16 = vadd.f32 %v928_v45, %v5547_v15  ;;  %v1117_v34 = vmax.f32 %v927_v57, 0.0  ;;  %v1607_v57 = vld [vmem:[%s7589_s12 + $0xe8] sm:$0xff] }
 0x1d4   :  { %v932_v26 = vpop.f32.mrf.mxu0  ;;  %1654 = vmatpush2.msra.mxu0 %v1607_v57 }
 0x1d5   :  { %v1118_v48 = vmax.f32 %v929_v16, 0.0  ;;  %v933_v30 = vadd.f32 %v932_v26, %v5544_v29  ;;  %v1900_v16 = vld [vmem:[%s7591_s14 + $0xa8] sm:$0xff]  ;;  %1655 = vmatprep.subr.mxu0 %v4322_v5 }
 0x1d6   :  { %v934_v59 = vpop.f32.mrf.mxu0 }
 0x1d7   :  { %v935_v10 = vadd.f32 %v934_v59, %v5547_v15  ;;  %1321 = vmatprep.mubr.f32.mxu1 %v1118_v48  ;;  %v1119_v38 = vmax.f32 %v933_v30, 0.0  ;;  %v1899_v59 = vld [vmem:[%s7591_s14 + $0xa0] sm:$0xff] }
 0x1d8   :  { %v938_v14 = vpop.f32.mrf.mxu0  ;;  %1322 = vmatmul.mubr.f32.vlgmr.msra.gmra.mxu1 %v1117_v34  ;;  %v1884_v34 = vld [vmem:[%s7591_s14 + $0x28] sm:$0xff] }
 0x1d9   :  { %v1120_v60 = vmax.f32 %v935_v10, 0.0  ;;  %3736 = vmatpush3.msra.mxu1 %v1894_v25  ;;  %v939_v0 = vadd.f32 %v938_v14, %v5544_v29  ;;  %v1606_v10 = vld [vmem:[%s7589_s12 + $0xe0] sm:$0xff]  ;;  %v1898_v14 = vld [vmem:[%s7591_s14 + $0x98] sm:$0xff] }
 0x1da   :  { %v940_v32 = vpop.f32.mrf.mxu0  ;;  %3737 = vmatprep.subr.mxu1 %v1909_v27  ;;  %1656 = vmatpush2.msra.mxu0 %v1606_v10  ;;  %v1599_v10 = vld [vmem:[%s7589_s12 + $0xa8] sm:$0xff] }
 0x1db   :  { %v941_v36 = vadd.f32 %v940_v32, %v5547_v15  ;;  %1327 = vmatprep.mubr.f32.mxu1 %v1120_v60  ;;  %3738 = vmatpush3.msra.mxu1 %v1893_v31  ;;  %v1121_v43 = vmax.f32 %v939_v0, 0.0  ;;  %v1897_v32 = vld [vmem:[%s7591_s14 + $0x90] sm:$0xff] }
 0x1dc   :  { %v944_v37 = vpop.f32.mrf.mxu0  ;;  %1328 = vmatmul.mubr.f32.gmra.mxu1 %v1119_v38  ;;  %3739 = vmatprep.subr.mxu1 %v1908_v13  ;;  %v1882_v38 = vld [vmem:[%s7591_s14 + $0x18] sm:$0xff] }
 0x1dd   :  { %v1122_v52 = vmax.f32 %v941_v36, 0.0  ;;  %3740 = vmatpush3.msra.mxu1 %v1892_v7  ;;  %v945_v42 = vadd.f32 %v944_v37, %v5544_v29  ;;  %1657 = vmatprep.subr.mxu0 %v4322_v5  ;;  %v1881_v36 = vld [vmem:[%s7591_s14 + $0x10] sm:$0xff] }
 0x1de   :  { %v946_v17 = vpop.f32.mrf.mxu0  ;;  %3741 = vmatprep.subr.mxu1 %v1907_v62  ;;  %v1605_v62 = vld [vmem:[%s7589_s12 + $0xd8] sm:$0xff] }
 0x1df   :  { %v947_v56 = vadd.f32 %v946_v17, %v5547_v15  ;;  %1333 = vmatprep.mubr.f32.mxu1 %v1122_v52  ;;  %3742 = vmatpush3.msra.mxu1 %v1891_v46  ;;  %v1123_v54 = vmax.f32 %v945_v42, 0.0  ;;  %v1896_v46 = vld [vmem:[%s7591_s14 + $0x88] sm:$0xff]  ;;  %v1895_v17 = vld [vmem:[%s7591_s14 + $0x80] sm:$0xff] }
 0x1e0   :  { %v950_v9 = vpop.f32.mrf.mxu0  ;;  %1334 = vmatmul.mubr.f32.gmra.mxu1 %v1121_v43  ;;  %3743 = vmatprep.subr.mxu1 %v1906_v53  ;;  %v1880_v43 = vld [vmem:[%s7591_s14 + $0x8] sm:$0xff] }
 0x1e1   :  { %v1124_v50 = vmax.f32 %v947_v56, 0.0  ;;  %3744 = vmatpush3.msra.mxu1 %v1890_v12  ;;  %v951_v35 = vadd.f32 %v950_v9, %v5544_v29  ;;  %1658 = vmatpush2.msra.mxu0 %v1605_v62  ;;  %v1879_v56 = vld [vmem:[%s7591_s14] sm:$0xff] }
 0x1e2   :  { %v952_v1 = vpop.f32.mrf.mxu0  ;;  %3745 = vmatprep.subr.mxu1 %v1905_v58  ;;  %1659 = vmatprep.subr.mxu0 %v4322_v5  ;;  %v1604_v58 = vld [vmem:[%s7589_s12 + $0xd0] sm:$0xff] }
 0x1e3   :  { %v953_v3 = vadd.f32 %v952_v1, %v5547_v15  ;;  %1339 = vmatprep.mubr.f32.mxu1 %v1124_v50  ;;  %3746 = vmatpush3.msra.mxu1 %v1889_v4  ;;  %v1125_v23 = vmax.f32 %v951_v35, 0.0  ;;  %v1942_v4 = vld [vmem:[%s7591_s14 + $0x1f8] sm:$0xff]  ;;  %v1603_v1 = vld [vmem:[%s7589_s12 + $0xc8] sm:$0xff] }
 0x1e4   :  { %v956_v44 = vpop.f32.mrf.mxu0  ;;  %1340 = vmatmul.mubr.f32.gmra.mxu1 %v1123_v54  ;;  %3747 = vmatprep.subr.mxu1 %v1904_v47 }
 0x1e5   :  { %v1126_v6 = vmax.f32 %v953_v3, 0.0  ;;  %3748 = vmatpush3.msra.mxu1 %v1888_v19  ;;  %v957_v22 = vadd.f32 %v956_v44, %v5544_v29  ;;  %1660 = vmatpush2.msra.mxu0 %v1604_v58 }
 0x1e6   :  { %v958_v24 = vpop.f32.mrf.mxu0  ;;  %3749 = vmatprep.subr.mxu1 %v1903_v49  ;;  %1661 = vmatprep.subr.mxu0 %v4322_v5 }
 0x1e7   :  { %v959_v8 = vadd.f32 %v958_v24, %v5547_v15  ;;  %1345 = vmatprep.mubr.f32.mxu1 %v1126_v6  ;;  %3750 = vmatpush3.msra.mxu1 %v1887_v61  ;;  %v1127_v26 = vmax.f32 %v957_v22, 0.0  ;;  %v1602_v6 = vld [vmem:[%s7589_s12 + $0xc0] sm:$0xff] }
 0x1e8   :  { %v962_v41 = vpop.f32.mrf.mxu0  ;;  %1346 = vmatmul.mubr.f32.gmra.mxu1 %v1125_v23  ;;  %3751 = vmatprep.subr.mxu1 %v1902_v18 }
 0x1e9   :  { %v1128_v45 = vmax.f32 %v959_v8, 0.0  ;;  %3752 = vmatpush3.msra.mxu1 %v1886_v51  ;;  %v963_v21 = vadd.f32 %v962_v41, %v5544_v29  ;;  %1662 = vmatpush2.msra.mxu0 %v1603_v1 }
 0x1ea   :  { %v964_v48 = vpop.f32.mrf.mxu0  ;;  %3753 = vmatprep.subr.mxu1 %v1901_v40  ;;  %1663 = vmatprep.subr.mxu0 %v4322_v5  ;;  %v1601_v40 = vld [vmem:[%s7589_s12 + $0xb8] sm:$0xff] }
 0x1eb   :  { %v965_v30 = vadd.f32 %v964_v48, %v5547_v15  ;;  %1351 = vmatprep.mubr.f32.mxu1 %v1128_v45  ;;  %3754 = vmatpush3.msra.mxu1 %v1885_v2  ;;  %v1129_v31 = vmax.f32 %v963_v21, 0.0  ;;  %v1600_v21 = vld [vmem:[%s7589_s12 + $0xb0] sm:$0xff] }
 0x1ec   :  { %v968_v25 = vpop.f32.mrf.mxu0  ;;  %1352 = vmatmul.mubr.f32.gmra.mxu1 %v1127_v26  ;;  %3755 = vmatprep.subr.mxu1 %v1900_v16 }
 0x1ed   :  { %v1130_v27 = vmax.f32 %v965_v30, 0.0  ;;  %3756 = vmatpush3.msra.mxu1 %v1884_v34  ;;  %v969_v60 = vadd.f32 %v968_v25, %v5544_v29  ;;  %1664 = vmatpush2.msra.mxu0 %v1602_v6 }
 0x1ee   :  { %v970_v13 = vpop.f32.mrf.mxu0  ;;  %3757 = vmatprep.subr.mxu1 %v1899_v59  ;;  %1665 = vmatprep.subr.mxu0 %v4322_v5 }
 0x1ef   :  { %v971_v0 = vadd.f32 %v970_v13, %v5547_v15  ;;  %1357 = vmatprep.mubr.f32.mxu1 %v1130_v27  ;;  %3758 = vmatpush3.msra.mxu1 %v1883_v28  ;;  %v1131_v55 = vmax.f32 %v969_v60, 0.0 }
 0x1f0   :  { %v974_v7 = vpop.f32.mrf.mxu0  ;;  %1358 = vmatmul.mubr.f32.gmra.mxu1 %v1129_v31  ;;  %3759 = vmatprep.subr.mxu1 %v1898_v14 }
 0x1f1   :  { %v1132_v37 = vmax.f32 %v971_v0, 0.0  ;;  %3760 = vmatpush3.msra.mxu1 %v1882_v38  ;;  %v975_v52 = vadd.f32 %v974_v7, %v5544_v29  ;;  %1666 = vmatpush2.msra.mxu0 %v1601_v40  ;;  %v1598_v0 = vld [vmem:[%s7589_s12 + $0xa0] sm:$0xff] }
 0x1f2   :  { %v976_v53 = vpop.f32.mrf.mxu0  ;;  %3761 = vmatprep.subr.mxu1 %v1897_v32  ;;  %1667 = vmatprep.subr.mxu0 %v4322_v5 }
 0x1f3   :  { %v977_v42 = vadd.f32 %v976_v53, %v5547_v15  ;;  %1363 = vmatprep.mubr.f32.mxu1 %v1132_v37  ;;  %3762 = vmatpush3.msra.mxu1 %v1881_v36  ;;  %v1133_v11 = vmax.f32 %v975_v52, 0.0 }
 0x1f4   :  { %v980_v12 = vpop.f32.mrf.mxu0  ;;  %1364 = vmatmul.mubr.f32.gmra.mxu1 %v1131_v55  ;;  %3763 = vmatprep.subr.mxu1 %v1896_v46  ;;  %v1597_v55 = vld [vmem:[%s7589_s12 + $0x98] sm:$0xff] }
 0x1f5   :  { %v1134_v9 = vmax.f32 %v977_v42, 0.0  ;;  %3764 = vmatpush3.msra.mxu1 %v1880_v43  ;;  %v981_v50 = vadd.f32 %v980_v12, %v5544_v29  ;;  %1668 = vmatpush2.msra.mxu0 %v1600_v21 }
 0x1f6   :  { %v982_v47 = vpop.f32.mrf.mxu0  ;;  %3765 = vmatprep.subr.mxu1 %v1895_v17  ;;  %1669 = vmatprep.subr.mxu0 %v4322_v5 }
 0x1f7   :  { %v983_v54 = vadd.f32 %v982_v47, %v5547_v15  ;;  %1369 = vmatprep.mubr.f32.mxu1 %v1134_v9  ;;  %3766 = vmatpush3.msra.mxu1 %v1879_v56  ;;  %v1135_v3 = vmax.f32 %v981_v50, 0.0  ;;  %v1596_v56 = vld [vmem:[%s7589_s12 + $0x90] sm:$0xff] }
 0x1f8   :  { %v986_v35 = vpop.f32.mrf.mxu0  ;;  %1370 = vmatmul.mubr.f32.gmra.mxu1 %v1133_v11  ;;  %3770 = vmatprep.subr.mxu1 %v1942_v4 }
 0x1f9   :  { %v1136_v19 = vmax.f32 %v983_v54, 0.0  ;;  %v987_v49 = vadd.f32 %v986_v35, %v5544_v29  ;;  %1670 = vmatpush2.msra.mxu0 %v1599_v10 }
 0x1fa   :  { %v988_v44 = vpop.f32.mrf.mxu0  ;;  %1671 = vmatprep.subr.mxu0 %v4322_v5 }
 0x1fb   :  { %v989_v61 = vadd.f32 %v988_v44, %v5547_v15  ;;  %1375 = vmatprep.mubr.f32.mxu1 %v1136_v19  ;;  %v1137_v23 = vmax.f32 %v987_v49, 0.0  ;;  %1672 = vmatpush2.msra.mxu0 %v1598_v0  ;;  %v1595_v49 = vld [vmem:[%s7589_s12 + $0x88] sm:$0xff] }
 0x1fc   :  { %v992_v63 = vpop.f32.mrf.mxu0  ;;  %1376 = vmatmul.mubr.f32.gmra.mxu1 %v1135_v3  ;;  %1673 = vmatprep.subr.mxu0 %v4322_v5 }
 0x1fd   :  { %v1138_v18 = vmax.f32 %v989_v61, 0.0  ;;  %v993_v22 = vadd.f32 %v992_v63, %v5544_v29  ;;  %1674 = vmatpush2.msra.mxu0 %v1597_v55 }
 0x1fe   :  { %v994_v24 = vpop.f32.mrf.mxu0  ;;  %1675 = vmatprep.subr.mxu0 %v4322_v5 }
 0x1ff   :  { %v995_v51 = vadd.f32 %v994_v24, %v5547_v15  ;;  %1381 = vmatprep.mubr.f32.mxu1 %v1138_v18  ;;  %v1139_v2 = vmax.f32 %v993_v22, 0.0  ;;  %1676 = vmatpush2.msra.mxu0 %v1596_v56  ;;  %v1594_v22 = vld [vmem:[%s7589_s12 + $0x80] sm:$0xff] }
 0x200   :  { %v998_v8 = vpop.f32.mrf.mxu0  ;;  %1382 = vmatmul.mubr.f32.gmra.mxu1 %v1137_v23  ;;  %1677 = vmatprep.subr.mxu0 %v4322_v5 }
 0x201   :  { %v1140_v41 = vmax.f32 %v995_v51, 0.0  ;;  %v999_v57 = vadd.f32 %v998_v8, %v5544_v29  ;;  %1678 = vmatpush2.msra.mxu0 %v1595_v49  ;;  %v2038_v8 = vld [vmem:[%s7591_s14 + $0x4f8] sm:$0xff] }
 0x202   :  { %v1000_v45 = vpop.f32.mrf.mxu0  ;;  %1679 = vmatprep.subr.mxu0 %v4322_v5 }
 0x203   :  { %v1001_v16 = vadd.f32 %v1000_v45, %v5547_v15  ;;  %1387 = vmatprep.mubr.f32.mxu1 %v1140_v41  ;;  %v1141_v34 = vmax.f32 %v999_v57, 0.0  ;;  %1680 = vmatpush2.msra.mxu0 %v1594_v22 }
 0x204   :  { %v1004_v26 = vpop.f32.mrf.mxu0  ;;  %1388 = vmatmul.mubr.f32.gmra.mxu1 %v1139_v2  ;;  %3875 = vmatprep.subr.mxu0 %v2038_v8 }
 0x205   :  { %v1142_v48 = vmax.f32 %v1001_v16, 0.0  ;;  %v1005_v30 = vadd.f32 %v1004_v26, %v5544_v29 }
 0x206   :  { %v1006_v59 = vpop.f32.mrf.mxu0 }
 0x207   :  { %v1007_v25 = vadd.f32 %v1006_v59, %v5547_v15  ;;  %1393 = vmatprep.mubr.f32.mxu1 %v1142_v48  ;;  %v1143_v14 = vmax.f32 %v1005_v30, 0.0 }
 0x208   :  { %v1010_v28 = vpop.f32.mrf.mxu0  ;;  %1394 = vmatmul.mubr.f32.gmra.mxu1 %v1141_v34 }
 0x209   :  { %v1144_v27 = vmax.f32 %v1007_v25, 0.0  ;;  %v1011_v31 = vadd.f32 %v1010_v28, %v5544_v29 }
 0x20a   :  { %v1012_v60 = vpop.f32.mrf.mxu0 }
 0x20b   :  { %v1013_v13 = vadd.f32 %v1012_v60, %v5547_v15  ;;  %1399 = vmatprep.mubr.f32.mxu1 %v1144_v27  ;;  %v1145_v7 = vmax.f32 %v1011_v31, 0.0 }
 0x20c   :  { %v1016_v38 = vpop.f32.mrf.mxu0  ;;  %1400 = vmatmul.mubr.f32.gmra.mxu1 %v1143_v14 }
 0x20d   :  { %v1146_v32 = vmax.f32 %v1013_v13, 0.0  ;;  %v1017_v36 = vadd.f32 %v1016_v38, %v5544_v29 }
 0x20e   :  { %v1018_v62 = vpop.f32.mrf.mxu0 }
 0x20f   :  { %v1019_v37 = vadd.f32 %v1018_v62, %v5547_v15  ;;  %1405 = vmatprep.mubr.f32.mxu1 %v1146_v32  ;;  %v1147_v53 = vmax.f32 %v1017_v36, 0.0 }
 0x210   :  { %v1022_v46 = vpop.f32.mrf.mxu0  ;;  %1406 = vmatmul.mubr.f32.gmra.mxu1 %v1145_v7 }
 0x211   :  { %v1148_v52 = vmax.f32 %v1019_v37, 0.0  ;;  %v1023_v43 = vadd.f32 %v1022_v46, %v5544_v29 }
 0x212   :  { %v1024_v42 = vpop.f32.mrf.mxu0 }
 0x213   :  { %v1025_v17 = vadd.f32 %v1024_v42, %v5547_v15  ;;  %1411 = vmatprep.mubr.f32.mxu1 %v1148_v52  ;;  %v1149_v9 = vmax.f32 %v1023_v43, 0.0 }
 0x214   :  { %v1028_v12 = vpop.f32.mrf.mxu0  ;;  %1412 = vmatmul.mubr.f32.gmra.mxu1 %v1147_v53 }
 0x215   :  { %v1150_v58 = vmax.f32 %v1025_v17, 0.0  ;;  %v1029_v4 = vadd.f32 %v1028_v12, %v5544_v29 }
 0x216   :  { %v1030_v11 = vpop.f32.mrf.mxu0 }
 0x217   :  { %v1031_v50 = vadd.f32 %v1030_v11, %v5547_v15  ;;  %1417 = vmatprep.mubr.f32.mxu1 %v1150_v58  ;;  %v1151_v35 = vmax.f32 %v1029_v4, 0.0 }
 0x218   :  { %v1034_v47 = vpop.f32.mrf.mxu0  ;;  %1418 = vmatmul.mubr.f32.gmra.mxu1 %v1149_v9 }
 0x219   :  { %v1152_v54 = vmax.f32 %v1031_v50, 0.0  ;;  %v1035_v1 = vadd.f32 %v1034_v47, %v5544_v29 }
 0x21a   :  { %v1036_v19 = vpop.f32.mrf.mxu0 }
 0x21b   :  { %v1037_v3 = vadd.f32 %v1036_v19, %v5547_v15  ;;  %1423 = vmatprep.mubr.f32.mxu1 %v1152_v54  ;;  %v1153_v63 = vmax.f32 %v1035_v1, 0.0 }
 0x21c   :  { %v1040_v44 = vpop.f32.mrf.mxu0  ;;  %1424 = vmatmul.mubr.f32.gmra.mxu1 %v1151_v35 }
 0x21d   :  { %v1154_v61 = vmax.f32 %v1037_v3, 0.0  ;;  %v1041_v6 = vadd.f32 %v1040_v44, %v5544_v29 }
 0x21e   :  { %v1042_v18 = vpop.f32.mrf.mxu0 }
 0x21f   :  { %v1043_v23 = vadd.f32 %v1042_v18, %v5547_v15  ;;  %1429 = vmatprep.mubr.f32.mxu1 %v1154_v61  ;;  %v1155_v5 = vmax.f32 %v1041_v6, 0.0 }
 0x220   :  { %v1046_v24 = vpop.f32.mrf.mxu0  ;;  %1430 = vmatmul.mubr.f32.gmra.mxu1 %v1153_v63 }
 0x221   :  { %v1156_v51 = vmax.f32 %v1043_v23, 0.0  ;;  %v1047_v40 = vadd.f32 %v1046_v24, %v5544_v29 }
 0x222   :  { %v1048_v41 = vpop.f32.mrf.mxu0 }
 0x223   :  { %v1049_v2 = vadd.f32 %v1048_v41, %v5547_v15  ;;  %1435 = vmatprep.mubr.f32.mxu1 %v1156_v51  ;;  %v1157_v16 = vmax.f32 %v1047_v40, 0.0 }
 0x224   :  { %v1052_v57 = vpop.f32.mrf.mxu0  ;;  %1436 = vmatmul.mubr.f32.gmra.mxu1 %v1155_v5 }
 0x225   :  { %v1158_v45 = vmax.f32 %v1049_v2, 0.0  ;;  %v1053_v26 = vadd.f32 %v1052_v57, %v5544_v29 }
 0x226   :  { %v1054_v21 = vpop.f32.mrf.mxu0 }
 0x227   :  { %v1055_v48 = vadd.f32 %v1054_v21, %v5547_v15  ;;  %1441 = vmatprep.mubr.f32.mxu1 %v1158_v45  ;;  %v1159_v59 = vmax.f32 %v1053_v26, 0.0 }
 0x228   :  { %v1058_v34 = vpop.f32.mrf.mxu0  ;;  %1442 = vmatmul.mubr.f32.gmra.mxu1 %v1157_v16 }
 0x229   :  { %v1160_v30 = vmax.f32 %v1055_v48, 0.0  ;;  %v1059_v25 = vadd.f32 %v1058_v34, %v5544_v29  ;;  %v5797_v34 = vld [vmem:[%s7580_s3] sm:$0xff] }
 0x22a   :  { %v1060_v28 = vpop.f32.mrf.mxu0 }
 0x22b   :  { %v1061_v10 = vadd.f32 %v1060_v28, %v5547_v15  ;;  %1447 = vmatprep.mubr.f32.mxu1 %v1160_v30  ;;  %v1161_v31 = vmax.f32 %v1059_v25, 0.0  ;;  %v2403_v25 = vrot.slane %v5797_v34, %v4540_v39  ;;  %v5803_v28 = vsub.s32 3, %v4520_v33 }
 0x22c   :  { %v1064_v27 = vpop.f32.mrf.mxu0  ;;  %1448 = vmatmul.mubr.f32.gmra.mxu1 %v1159_v59 }
 0x22d   :  { %v1162_v14 = vmax.f32 %v1061_v10, 0.0  ;;  %v1065_v60 = vadd.f32 %v1064_v27, %v5544_v29  ;;  %v2411_v27 = vrot.slane %v5797_v34, %v5803_v28 }
 0x22e   :  { %v1066_v13 = vpop.f32.mrf.mxu0 }
 0x22f   :  { %v1067_v38 = vadd.f32 %v1066_v13, %v5547_v15  ;;  %1453 = vmatprep.mubr.f32.mxu1 %v1162_v14  ;;  %v1163_v7 = vmax.f32 %v1065_v60, 0.0  ;;  %v1941_v14 = vld [vmem:[%s7591_s14 + $0x1f0] sm:$0xff]  ;;  %v1940_v60 = vld [vmem:[%s7591_s14 + $0x1e8] sm:$0xff] }
 0x230   :  { %v1070_v0 = vpop.f32.mrf.mxu0  ;;  %1454 = vmatmul.mubr.f32.gmra.mxu1 %v1161_v31  ;;  %v1925_v31 = vld [vmem:[%s7591_s14 + $0x170] sm:$0xff]  ;;  %v1924_v13 = vld [vmem:[%s7591_s14 + $0x168] sm:$0xff] }
 0x231   :  { %v1164_v32 = vmax.f32 %v1067_v38, 0.0  ;;  %v1071_v36 = vadd.f32 %v1070_v0, %v5544_v29  ;;  %v1939_v38 = vld [vmem:[%s7591_s14 + $0x1e0] sm:$0xff] }
 0x232   :  { %v1072_v62 = vpop.f32.mrf.mxu0  ;;  %v1923_v0 = vld [vmem:[%s7591_s14 + $0x160] sm:$0xff] }
 0x233   :  { %v1073_v37 = vadd.f32 %v1072_v62, %v5547_v15  ;;  %1459 = vmatprep.mubr.f32.mxu1 %v1164_v32  ;;  %v1165_v52 = vmax.f32 %v1071_v36, 0.0  ;;  %v1938_v32 = vld [vmem:[%s7591_s14 + $0x1d8] sm:$0xff]  ;;  %v1937_v36 = vld [vmem:[%s7591_s14 + $0x1d0] sm:$0xff] }
 0x234   :  { %v1076_v46 = vpop.f32.mrf.mxu0  ;;  %1460 = vmatmul.mubr.f32.gmra.mxu1 %v1163_v7  ;;  %v1922_v7 = vld [vmem:[%s7591_s14 + $0x158] sm:$0xff]  ;;  %v1921_v62 = vld [vmem:[%s7591_s14 + $0x150] sm:$0xff] }
 0x235   :  { %v1166_v55 = vmax.f32 %v1073_v37, 0.0  ;;  %v1077_v53 = vadd.f32 %v1076_v46, %v5544_v29  ;;  %v1936_v37 = vld [vmem:[%s7591_s14 + $0x1c8] sm:$0xff] }
 0x236   :  { %v1078_v43 = vpop.f32.mrf.mxu0  ;;  %v1920_v46 = vld [vmem:[%s7591_s14 + $0x148] sm:$0xff] }
 0x237   :  { %v1079_v42 = vadd.f32 %v1078_v43, %v5547_v15  ;;  %1465 = vmatprep.mubr.f32.mxu1 %v1166_v55  ;;  %v1167_v56 = vmax.f32 %v1077_v53, 0.0  ;;  %v1935_v55 = vld [vmem:[%s7591_s14 + $0x1c0] sm:$0xff]  ;;  %v1934_v53 = vld [vmem:[%s7591_s14 + $0x1b8] sm:$0xff] }
 0x238   :  { %v1082_v17 = vpop.f32.mrf.mxu0  ;;  %1466 = vmatmul.mubr.f32.gmra.mxu1 %v1165_v52  ;;  %v1919_v52 = vld [vmem:[%s7591_s14 + $0x140] sm:$0xff]  ;;  %v1918_v43 = vld [vmem:[%s7591_s14 + $0x138] sm:$0xff] }
 0x239   :  { %v1168_v12 = vmax.f32 %v1079_v42, 0.0  ;;  %v1083_v58 = vadd.f32 %v1082_v17, %v5544_v29  ;;  %v1933_v42 = vld [vmem:[%s7591_s14 + $0x1b0] sm:$0xff] }
 0x23a   :  { %v1084_v9 = vpop.f32.mrf.mxu0  ;;  %v1917_v17 = vld [vmem:[%s7591_s14 + $0x130] sm:$0xff] }
 0x23b   :  { %v1085_v4 = vadd.f32 %v1084_v9, %v5547_v15  ;;  %1471 = vmatprep.mubr.f32.mxu1 %v1168_v12  ;;  %v1169_v47 = vmax.f32 %v1083_v58, 0.0  ;;  %v1932_v12 = vld [vmem:[%s7591_s14 + $0x1a8] sm:$0xff]  ;;  %v1931_v58 = vld [vmem:[%s7591_s14 + $0x1a0] sm:$0xff] }
 0x23c   :  { %v1088_v11 = vpop.f32.mrf.mxu0  ;;  %1472 = vmatmul.mubr.f32.gmra.mxu1 %v1167_v56  ;;  %v1916_v56 = vld [vmem:[%s7591_s14 + $0x128] sm:$0xff]  ;;  %v1915_v9 = vld [vmem:[%s7591_s14 + $0x120] sm:$0xff] }
 0x23d   :  { %v1170_v50 = vmax.f32 %v1085_v4, 0.0  ;;  %v1089_v54 = vadd.f32 %v1088_v11, %v5544_v29  ;;  %v1930_v4 = vld [vmem:[%s7591_s14 + $0x198] sm:$0xff] }
 0x23e   :  { %v1090_v35 = vpop.f32.mrf.mxu0  ;;  %v1914_v11 = vld [vmem:[%s7591_s14 + $0x118] sm:$0xff] }
 0x23f   :  { %v1091_v1 = vadd.f32 %v1090_v35, %v5547_v15  ;;  %1477 = vmatprep.mubr.f32.mxu1 %v1170_v50  ;;  %v1171_v49 = vmax.f32 %v1089_v54, 0.0  ;;  %v1929_v50 = vld [vmem:[%s7591_s14 + $0x190] sm:$0xff]  ;;  %v5891_v54 = vsub.s32 2, %v4520_v33  ;;  %v1928_v35 = vld [vmem:[%s7591_s14 + $0x188] sm:$0xff] }
 0x240   :  { %v1094_v19 = vpop.f32.mrf.mxu0  ;;  %1478 = vmatmul.mubr.f32.gmra.mxu1 %v1169_v47  ;;  %v1913_v47 = vld [vmem:[%s7591_s14 + $0x110] sm:$0xff] }
 0x241   :  { %v1172_v3 = vmax.f32 %v1091_v1, 0.0  ;;  %v1095_v44 = vadd.f32 %v1094_v19, %v5544_v29  ;;  %v5897_v1 = vsub.s32 5, %v4520_v33  ;;  %v1912_v19 = vld [vmem:[%s7591_s14 + $0x108] sm:$0xff] }
 0x242   :  { %v1096_v61 = vpop.f32.mrf.mxu0 }
 0x243   :  { %v1097_v63 = vadd.f32 %v1096_v61, %v5547_v15  ;;  %1483 = vmatprep.mubr.f32.mxu1 %v1172_v3  ;;  %v1173_v23 = vmax.f32 %v1095_v44, 0.0  ;;  %v1927_v3 = vld [vmem:[%s7591_s14 + $0x180] sm:$0xff]  ;;  %v2407_v44 = vrot.slane %v5797_v34, %v5891_v54  ;;  %v1974_v61 = vld [vmem:[%s7591_s14 + $0x2f8] sm:$0xff] }
 0x244   :  { %v1100_v6 = vpop.f32.mrf.mxu0  ;;  %1484 = vmatmul.mubr.f32.gmra.mxu1 %v1171_v49  ;;  %v1911_v49 = vld [vmem:[%s7591_s14 + $0x100] sm:$0xff] }
 0x245   :  { %v1174_v18 = vmax.f32 %v1097_v63, 0.0  ;;  %v1101_v22 = vadd.f32 %v1100_v6, %v5544_v29  ;;  %v2419_v63 = vrot.slane %v5797_v34, %v5897_v1  ;;  %v1958_v6 = vld [vmem:[%s7591_s14 + $0x278] sm:$0xff] }
 0x246   :  { %v1102_v24 = vpop.f32.mrf.mxu0 }
 0x247   :  { %v1103_v51 = vadd.f32 %v1102_v24, %v5547_v15  ;;  %1489 = vmatprep.mubr.f32.mxu1 %v1174_v18  ;;  %v1175_v40 = vmax.f32 %v1101_v22, 0.0  ;;  %v1973_v18 = vld [vmem:[%s7591_s14 + $0x2f0] sm:$0xff]  ;;  %v1972_v22 = vld [vmem:[%s7591_s14 + $0x2e8] sm:$0xff] }
 0x248   :  { %v1106_v8 = vpop.f32.mrf.mxu0  ;;  %1490 = vmatmul.mubr.f32.gmra.mxu1 %v1173_v23  ;;  %v1957_v23 = vld [vmem:[%s7591_s14 + $0x270] sm:$0xff]  ;;  %v1956_v24 = vld [vmem:[%s7591_s14 + $0x268] sm:$0xff] }
 0x249   :  { %v1176_v5 = vmax.f32 %v1103_v51, 0.0  ;;  %v1107_v41 = vadd.f32 %v1106_v8, %v5544_v29  ;;  %v1971_v51 = vld [vmem:[%s7591_s14 + $0x2e0] sm:$0xff] }
 0x24a   :  { %v1108_v2 = vpop.f32.mrf.mxu0  ;;  %v1955_v8 = vld [vmem:[%s7591_s14 + $0x260] sm:$0xff] }
 0x24b   :  { %v1109_v57 = vadd.f32 %v1108_v2, %v5547_v15  ;;  %1495 = vmatprep.mubr.f32.mxu1 %v1176_v5  ;;  %v1177_v26 = vmax.f32 %v1107_v41, 0.0  ;;  %v1970_v5 = vld [vmem:[%s7591_s14 + $0x2d8] sm:$0xff]  ;;  %v1969_v41 = vld [vmem:[%s7591_s14 + $0x2d0] sm:$0xff] }
 0x24c   :  { %v1112_v45 = vpop.f32.mrf.mxu0  ;;  %1496 = vmatmul.mubr.f32.gmra.mxu1 %v1175_v40  ;;  %v1954_v40 = vld [vmem:[%s7591_s14 + $0x258] sm:$0xff]  ;;  %v1953_v2 = vld [vmem:[%s7591_s14 + $0x250] sm:$0xff] }
 0x24d   :  { %v1178_v16 = vmax.f32 %v1109_v57, 0.0  ;;  %v1113_v21 = vadd.f32 %v1112_v45, %v5544_v29  ;;  %v2399_v29 = vrot.slane %v5797_v34, %v4688_v20  ;;  %v1968_v57 = vld [vmem:[%s7591_s14 + $0x2c8] sm:$0xff] }
 0x24e   :  { %v1114_v48 = vpop.f32.mrf.mxu0  ;;  %v1952_v45 = vld [vmem:[%s7591_s14 + $0x248] sm:$0xff] }
 0x24f   :  { %v1115_v30 = vadd.f32 %v1114_v48, %v5547_v15  ;;  %1501 = vmatprep.mubr.f32.mxu1 %v1178_v16  ;;  %v1179_v10 = vmax.f32 %v1113_v21, 0.0  ;;  %v1926_v15 = vld [vmem:[%s7591_s14 + $0x178] sm:$0xff]  ;;  %v1967_v16 = vld [vmem:[%s7591_s14 + $0x2c0] sm:$0xff] }
 0x250   :  { %1502 = vmatmul.mubr.f32.gmra.mxu1 %v1177_v26  ;;  %v1951_v26 = vld [vmem:[%s7591_s14 + $0x240] sm:$0xff]  ;;  %v1966_v21 = vld [vmem:[%s7591_s14 + $0x2b8] sm:$0xff] }
 0x251   :  { %v1180_v59 = vmax.f32 %v1115_v30, 0.0  ;;  %v1950_v48 = vld [vmem:[%s7591_s14 + $0x238] sm:$0xff]  ;;  %v1965_v30 = vld [vmem:[%s7591_s14 + $0x2b0] sm:$0xff] }
 0x253   :  { %1507 = vmatprep.mubr.f32.mxu1 %v1180_v59  ;;  %v1949_v59 = vld [vmem:[%s7591_s14 + $0x230] sm:$0xff] }
 0x254   :  { %1508 = vmatmul.mubr.f32.gmra.mxu1 %v1179_v10  ;;  %v1948_v10 = vld [vmem:[%s7591_s14 + $0x228] sm:$0xff] }
 0x255   :  { %2620 = vmatprep.mubr.f32.mxu1 %v2403_v25  ;;  %v1964_v25 = vld [vmem:[%s7591_s14 + $0x2a8] sm:$0xff] }
 0x258   :  { %2621 = vmatmul.mubr.f32.vlgmr.msra.gmra.mxu1 %v2399_v29  ;;  %v1963_v29 = vld [vmem:[%s7591_s14 + $0x2a0] sm:$0xff] }
 0x259   :  { %3771 = vmatpush3.msra.mxu1 %v1926_v15  ;;  %2690 = vmatprep.mubr.f32.mxu1 %v2411_v27  ;;  %v1947_v27 = vld [vmem:[%s7591_s14 + $0x220] sm:$0xff]  ;;  %v1962_v15 = vld [vmem:[%s7591_s14 + $0x298] sm:$0xff] }
 0x25a   :  { %3772 = vmatprep.subr.mxu1 %v1941_v14  ;;  %v1946_v14 = vld [vmem:[%s7591_s14 + $0x218] sm:$0xff] }
 0x25b   :  { %3773 = vmatpush3.msra.mxu1 %v1925_v31  ;;  %v1961_v31 = vld [vmem:[%s7591_s14 + $0x290] sm:$0xff] }
 0x25c   :  { %3774 = vmatprep.subr.mxu1 %v1940_v60  ;;  %v1945_v60 = vld [vmem:[%s7591_s14 + $0x210] sm:$0xff] }
 0x25d   :  { %3775 = vmatpush3.msra.mxu1 %v1924_v13  ;;  %v5997_v13 = vsub.s32 4, %v4520_v33 }
 0x25e   :  { %3776 = vmatprep.subr.mxu1 %v1939_v38  ;;  %v1960_v38 = vld [vmem:[%s7591_s14 + $0x288] sm:$0xff] }
 0x25f   :  { %3777 = vmatpush3.msra.mxu1 %v1923_v0  ;;  %v6003_v0 = vsub.s32 7, %v4520_v33 }
 0x260   :  { %3778 = vmatprep.subr.mxu1 %v1938_v32  ;;  %v1944_v32 = vld [vmem:[%s7591_s14 + $0x208] sm:$0xff] }
 0x261   :  { %3779 = vmatpush3.msra.mxu1 %v1922_v7  ;;  %v1245_v7 = vld [vmem:[%s7588_s11] sm:$0x3] }
 0x262   :  { %3780 = vmatprep.subr.mxu1 %v1937_v36  ;;  %v1959_v36 = vld [vmem:[%s7591_s14 + $0x280] sm:$0xff] }
 0x263   :  { %3781 = vmatpush3.msra.mxu1 %v1921_v62  ;;  %v1943_v62 = vld [vmem:[%s7591_s14 + $0x200] sm:$0xff] }
 0x264   :  { %3782 = vmatprep.subr.mxu1 %v1936_v37  ;;  %v2415_v37 = vrot.slane %v5797_v34, %v5997_v13 }
 0x265   :  { %3783 = vmatpush3.msra.mxu1 %v1920_v46  ;;  %v2006_v46 = vld [vmem:[%s7591_s14 + $0x3f8] sm:$0xff] }
 0x266   :  { %3784 = vmatprep.subr.mxu1 %v1935_v55  ;;  %v2427_v55 = vrot.slane %v5797_v34, %v6003_v0 }
 0x267   :  { %3785 = vmatpush3.msra.mxu1 %v1919_v52  ;;  %v6025_v52 = vrot.slane %v1245_v7, %v4688_v20 }
 0x268   :  { %3786 = vmatprep.subr.mxu1 %v1934_v53  ;;  %v1990_v53 = vld [vmem:[%s7591_s14 + $0x378] sm:$0xff] }
 0x269   :  { %3787 = vmatpush3.msra.mxu1 %v1918_v43  ;;  %v6031_v43 = vrot.slane %v1245_v7, %v4540_v39  ;;  %v1981_v7 = vld [vmem:[%s7591_s14 + $0x330] sm:$0xff] }
 0x26a   :  { %3788 = vmatprep.subr.mxu1 %v1933_v42  ;;  %v2005_v42 = vld [vmem:[%s7591_s14 + $0x3f0] sm:$0xff] }
 0x26b   :  { %3789 = vmatpush3.msra.mxu1 %v1917_v17 }
 0x26c   :  { %3790 = vmatprep.subr.mxu1 %v1932_v12  ;;  %v1989_v12 = vld [vmem:[%s7591_s14 + $0x370] sm:$0xff] }
 0x26d   :  { %3791 = vmatpush3.msra.mxu1 %v1916_v56  ;;  %v2004_v56 = vld [vmem:[%s7591_s14 + $0x3e8] sm:$0xff] }
 0x26e   :  { %3792 = vmatprep.subr.mxu1 %v1931_v58 }
 0x26f   :  { %3793 = vmatpush3.msra.mxu1 %v1915_v9 }
 0x270   :  { %3794 = vmatprep.subr.mxu1 %v1930_v4  ;;  %v1988_v4 = vld [vmem:[%s7591_s14 + $0x368] sm:$0xff] }
 0x271   :  { %3795 = vmatpush3.msra.mxu1 %v1914_v11 }
 0x272   :  { %3796 = vmatprep.subr.mxu1 %v1929_v50  ;;  %v2003_v50 = vld [vmem:[%s7591_s14 + $0x3e0] sm:$0xff] }
 0x273   :  { %3797 = vmatpush3.msra.mxu1 %v1913_v47 }
 0x274   :  { %3798 = vmatprep.subr.mxu1 %v1928_v35  ;;  %v1987_v35 = vld [vmem:[%s7591_s14 + $0x360] sm:$0xff] }
 0x275   :  { %3799 = vmatpush3.msra.mxu1 %v1912_v19 }
 0x276   :  { %3800 = vmatprep.subr.mxu1 %v1927_v3  ;;  %v2002_v3 = vld [vmem:[%s7591_s14 + $0x3d8] sm:$0xff] }
 0x277   :  { %3801 = vmatpush3.msra.mxu1 %v1911_v49 }
 0x278   :  { %3805 = vmatprep.subr.mxu1 %v1974_v61  ;;  %2691 = vmatmul.mubr.f32.vlgmr.msra.gmra.mxu1 %v2407_v44 }
 0x279   :  { %3806 = vmatpush3.msra.mxu1 %v1958_v6  ;;  %2760 = vmatprep.mubr.f32.mxu1 %v2419_v63  ;;  %v1986_v63 = vld [vmem:[%s7591_s14 + $0x358] sm:$0xff] }
 0x27a   :  { %3807 = vmatprep.subr.mxu1 %v1973_v18  ;;  %v2022_v6 = vld [vmem:[%s7591_s14 + $0x478] sm:$0xff] }
 0x27b   :  { %3808 = vmatpush3.msra.mxu1 %v1957_v23  ;;  %v2001_v23 = vld [vmem:[%s7591_s14 + $0x3d0] sm:$0xff] }
 0x27c   :  { %3809 = vmatprep.subr.mxu1 %v1972_v22  ;;  %v2037_v22 = vld [vmem:[%s7591_s14 + $0x4f0] sm:$0xff] }
 0x27d   :  { %3810 = vmatpush3.msra.mxu1 %v1956_v24 }
 0x27e   :  { %3811 = vmatprep.subr.mxu1 %v1971_v51  ;;  %v1985_v51 = vld [vmem:[%s7591_s14 + $0x350] sm:$0xff] }
 0x27f   :  { %3812 = vmatpush3.msra.mxu1 %v1955_v8 }
 0x280   :  { %3813 = vmatprep.subr.mxu1 %v1970_v5  ;;  %v2000_v5 = vld [vmem:[%s7591_s14 + $0x3c8] sm:$0xff] }
 0x281   :  { %3814 = vmatpush3.msra.mxu1 %v1954_v40 }
 0x282   :  { %3815 = vmatprep.subr.mxu1 %v1969_v41 }
 0x283   :  { %3816 = vmatpush3.msra.mxu1 %v1953_v2 }
 0x284   :  { %3817 = vmatprep.subr.mxu1 %v1968_v57  ;;  %v1984_v57 = vld [vmem:[%s7591_s14 + $0x348] sm:$0xff] }
 0x285   :  { %3818 = vmatpush3.msra.mxu1 %v1952_v45  ;;  %v2021_v45 = vld [vmem:[%s7591_s14 + $0x470] sm:$0xff] }
 0x286   :  { %3819 = vmatprep.subr.mxu1 %v1967_v16 }
 0x287   :  { %3820 = vmatpush3.msra.mxu1 %v1951_v26  ;;  %v1999_v26 = vld [vmem:[%s7591_s14 + $0x3c0] sm:$0xff] }
 0x288   :  { %3821 = vmatprep.subr.mxu1 %v1966_v21  ;;  %v2036_v21 = vld [vmem:[%s7591_s14 + $0x4e8] sm:$0xff] }
 0x289   :  { %3822 = vmatpush3.msra.mxu1 %v1950_v48 }
 0x28a   :  { %3823 = vmatprep.subr.mxu1 %v1965_v30  ;;  %v1983_v30 = vld [vmem:[%s7591_s14 + $0x340] sm:$0xff] }
 0x28b   :  { %3824 = vmatpush3.msra.mxu1 %v1949_v59 }
 0x28c   :  { %3825 = vmatprep.subr.mxu1 %v1964_v25  ;;  %v1998_v25 = vld [vmem:[%s7591_s14 + $0x3b8] sm:$0xff] }
 0x28d   :  { %3826 = vmatpush3.msra.mxu1 %v1948_v10 }
 0x28e   :  { %3827 = vmatprep.subr.mxu1 %v1963_v29 }
 0x28f   :  { %3828 = vmatpush3.msra.mxu1 %v1947_v27 }
 0x290   :  { %3829 = vmatprep.subr.mxu1 %v1962_v15  ;;  %v1982_v15 = vld [vmem:[%s7591_s14 + $0x338] sm:$0xff] }
 0x291   :  { %3830 = vmatpush3.msra.mxu1 %v1946_v14  ;;  %v2020_v14 = vld [vmem:[%s7591_s14 + $0x468] sm:$0xff] }
 0x292   :  { %3831 = vmatprep.subr.mxu1 %v1961_v31 }
 0x293   :  { %3832 = vmatpush3.msra.mxu1 %v1945_v60  ;;  %v1997_v60 = vld [vmem:[%s7591_s14 + $0x3b0] sm:$0xff] }
 0x294   :  { %3833 = vmatprep.subr.mxu1 %v1960_v38  ;;  %v2035_v38 = vld [vmem:[%s7591_s14 + $0x4e0] sm:$0xff] }
 0x295   :  { %3834 = vmatpush3.msra.mxu1 %v1944_v32 }
 0x296   :  { %3835 = vmatprep.subr.mxu1 %v1959_v36 }
 0x297   :  { %3836 = vmatpush3.msra.mxu1 %v1943_v62  ;;  %v1996_v62 = vld [vmem:[%s7591_s14 + $0x3a8] sm:$0xff] }
 0x298   :  { %3840 = vmatprep.subr.mxu1 %v2006_v46  ;;  %v1323_v17 = vpop.f32.mrf.mxu1  ;;  %2761 = vmatmul.mubr.f32.vlgmr.msra.gmra.mxu1 %v2415_v37 }
 0x299   :  { %3841 = vmatpush3.msra.mxu1 %v1990_v53  ;;  %2830 = vmatprep.mubr.f32.mxu1 %v2427_v55  ;;  %v1324_v58 = vadd.f32 %v1323_v17, %v6025_v52  ;;  %v1980_v53 = vld [vmem:[%s7591_s14 + $0x328] sm:$0xff] }
 0x29a   :  { %3842 = vmatprep.subr.mxu1 %v2005_v42  ;;  %v1325_v9 = vpop.f32.mrf.mxu1  ;;  %v2019_v42 = vld [vmem:[%s7591_s14 + $0x460] sm:$0xff] }
 0x29b   :  { %v1326_v11 = vadd.f32 %v1325_v9, %v6031_v43  ;;  %3843 = vmatpush3.msra.mxu1 %v1989_v12  ;;  %v1514_v49 = vmax.f32 %v1324_v58, 0.0  ;;  %v1995_v12 = vld [vmem:[%s7591_s14 + $0x3a0] sm:$0xff] }
 0x29c   :  { %3844 = vmatprep.subr.mxu1 %v2004_v56  ;;  %v1329_v47 = vpop.f32.mrf.mxu1  ;;  %v2034_v56 = vld [vmem:[%s7591_s14 + $0x4d8] sm:$0xff]  ;;  %v1979_v9 = vld [vmem:[%s7591_s14 + $0x320] sm:$0xff] }
 0x29d   :  { %v1515_v19 = vmax.f32 %v1326_v11, 0.0  ;;  %3845 = vmatpush3.msra.mxu1 %v1988_v4  ;;  %v1330_v44 = vadd.f32 %v1329_v47, %v6025_v52  ;;  %v1994_v11 = vld [vmem:[%s7591_s14 + $0x398] sm:$0xff] }
 0x29e   :  { %3846 = vmatprep.subr.mxu1 %v2003_v50  ;;  %v1331_v61 = vpop.f32.mrf.mxu1 }
 0x29f   :  { %v1332_v18 = vadd.f32 %v1331_v61, %v6031_v43  ;;  %3847 = vmatpush3.msra.mxu1 %v1987_v35  ;;  %1681 = vmatprep.mubr.f32.mxu0 %v1515_v19  ;;  %v1516_v40 = vmax.f32 %v1330_v44, 0.0  ;;  %v1978_v19 = vld [vmem:[%s7591_s14 + $0x318] sm:$0xff]  ;;  %v1993_v44 = vld [vmem:[%s7591_s14 + $0x390] sm:$0xff] }
 0x2a0   :  { %3848 = vmatprep.subr.mxu1 %v2002_v3  ;;  %v1335_v24 = vpop.f32.mrf.mxu1  ;;  %1682 = vmatmul.mubr.f32.vlgmr.msra.gmra.mxu0 %v1514_v49  ;;  %v2018_v3 = vld [vmem:[%s7591_s14 + $0x458] sm:$0xff]  ;;  %v2033_v61 = vld [vmem:[%s7591_s14 + $0x4d0] sm:$0xff] }
 0x2a1   :  { %v1517_v8 = vmax.f32 %v1332_v18, 0.0  ;;  %3849 = vmatpush3.msra.mxu1 %v1986_v63  ;;  %3876 = vmatpush3.msra.mxu0 %v2022_v6  ;;  %v1336_v41 = vadd.f32 %v1335_v24, %v6025_v52  ;;  %v1977_v6 = vld [vmem:[%s7591_s14 + $0x310] sm:$0xff]  ;;  %v6154_v18 = vsub.s32 6, %v4520_v33 }
 0x2a2   :  { %3850 = vmatprep.subr.mxu1 %v2001_v23  ;;  %v1337_v2 = vpop.f32.mrf.mxu1  ;;  %3877 = vmatprep.subr.mxu0 %v2037_v22  ;;  %v1992_v22 = vld [vmem:[%s7591_s14 + $0x388] sm:$0xff]  ;;  %v2017_v33 = vld [vmem:[%s7591_s14 + $0x450] sm:$0xff] }
 0x2a3   :  { %v1338_v16 = vadd.f32 %v1337_v2, %v6031_v43  ;;  %3851 = vmatpush3.msra.mxu1 %v1985_v51  ;;  %1686 = vmatprep.mubr.f32.mxu0 %v1517_v8  ;;  %v1518_v10 = vmax.f32 %v1336_v41, 0.0  ;;  %v1991_v41 = vld [vmem:[%s7591_s14 + $0x380] sm:$0xff]  ;;  %v2032_v2 = vld [vmem:[%s7591_s14 + $0x4c8] sm:$0xff] }
 0x2a4   :  { %3852 = vmatprep.subr.mxu1 %v2000_v5  ;;  %v1341_v48 = vpop.f32.mrf.mxu1  ;;  %1687 = vmatmul.mubr.f32.gmra.mxu0 %v1516_v40  ;;  %v1976_v5 = vld [vmem:[%s7591_s14 + $0x308] sm:$0xff] }
 0x2a5   :  { %v1519_v59 = vmax.f32 %v1338_v16, 0.0  ;;  %3853 = vmatpush3.msra.mxu1 %v1984_v57  ;;  %3878 = vmatpush3.msra.mxu0 %v2021_v45  ;;  %v1342_v29 = vadd.f32 %v1341_v48, %v6025_v52  ;;  %v1975_v45 = vld [vmem:[%s7591_s14 + $0x300] sm:$0xff]  ;;  %v2423_v16 = vrot.slane %v5797_v34, %v6154_v18 }
 0x2a6   :  { %3854 = vmatprep.subr.mxu1 %v1999_v26  ;;  %v1343_v27 = vpop.f32.mrf.mxu1  ;;  %3879 = vmatprep.subr.mxu0 %v2036_v21  ;;  %v2031_v34 = vld [vmem:[%s7591_s14 + $0x4c0] sm:$0xff] }
 0x2a7   :  { %v1344_v31 = vadd.f32 %v1343_v27, %v6031_v43  ;;  %3855 = vmatpush3.msra.mxu1 %v1983_v30  ;;  %1691 = vmatprep.mubr.f32.mxu0 %v1519_v59  ;;  %v1520_v37 = vmax.f32 %v1342_v29, 0.0  ;;  %v2016_v59 = vld [vmem:[%s7591_s14 + $0x448] sm:$0xff]  ;;  %v2054_v29 = vld [vmem:[%s7591_s14 + $0x578] sm:$0xff] }
 0x2a8   :  { %3856 = vmatprep.subr.mxu1 %v1998_v25  ;;  %v1347_v32 = vpop.f32.mrf.mxu1  ;;  %1692 = vmatmul.mubr.f32.gmra.mxu0 %v1518_v10  ;;  %v2070_v25 = vld [vmem:[%s7591_s14 + $0x5f8] sm:$0xff] }
 0x2a9   :  { %v1521_v36 = vmax.f32 %v1344_v31, 0.0  ;;  %3857 = vmatpush3.msra.mxu1 %v1982_v15  ;;  %3880 = vmatpush3.msra.mxu0 %v2020_v14  ;;  %v1348_v46 = vadd.f32 %v1347_v32, %v6025_v52  ;;  %v2015_v15 = vld [vmem:[%s7591_s14 + $0x440] sm:$0xff]  ;;  %v2030_v31 = vld [vmem:[%s7591_s14 + $0x4b8] sm:$0xff] }
 0x2aa   :  { %3858 = vmatprep.subr.mxu1 %v1997_v60  ;;  %v1349_v55 = vpop.f32.mrf.mxu1  ;;  %3881 = vmatprep.subr.mxu0 %v2035_v38 }
 0x2ab   :  { %v1350_v17 = vadd.f32 %v1349_v55, %v6031_v43  ;;  %3859 = vmatpush3.msra.mxu1 %v1981_v7  ;;  %1696 = vmatprep.mubr.f32.mxu0 %v1521_v36  ;;  %v1522_v50 = vmax.f32 %v1348_v46, 0.0  ;;  %v2014_v7 = vld [vmem:[%s7591_s14 + $0x438] sm:$0xff]  ;;  %v2069_v36 = vld [vmem:[%s7591_s14 + $0x5f0] sm:$0xff] }
 0x2ac   :  { %3860 = vmatprep.subr.mxu1 %v1996_v62  ;;  %v1353_v58 = vpop.f32.mrf.mxu1  ;;  %1697 = vmatmul.mubr.f32.gmra.mxu0 %v1520_v37  ;;  %v2029_v37 = vld [vmem:[%s7591_s14 + $0x4b0] sm:$0xff] }
 0x2ad   :  { %v1523_v4 = vmax.f32 %v1350_v17, 0.0  ;;  %3861 = vmatpush3.msra.mxu1 %v1980_v53  ;;  %3882 = vmatpush3.msra.mxu0 %v2019_v42  ;;  %v1354_v47 = vadd.f32 %v1353_v58, %v6025_v52  ;;  %v2053_v46 = vld [vmem:[%s7591_s14 + $0x570] sm:$0xff]  ;;  %v2028_v17 = vld [vmem:[%s7591_s14 + $0x4a8] sm:$0xff] }
 0x2ae   :  { %3862 = vmatprep.subr.mxu1 %v1995_v12  ;;  %v1355_v35 = vpop.f32.mrf.mxu1  ;;  %3883 = vmatprep.subr.mxu0 %v2034_v56  ;;  %v2013_v53 = vld [vmem:[%s7591_s14 + $0x430] sm:$0xff] }
 0x2af   :  { %v1356_v49 = vadd.f32 %v1355_v35, %v6031_v43  ;;  %3863 = vmatpush3.msra.mxu1 %v1979_v9  ;;  %1701 = vmatprep.mubr.f32.mxu0 %v1523_v4  ;;  %v1524_v24 = vmax.f32 %v1354_v47, 0.0  ;;  %v2012_v9 = vld [vmem:[%s7591_s14 + $0x428] sm:$0xff] }
 0x2b0   :  { %3864 = vmatprep.subr.mxu1 %v1994_v11  ;;  %v1359_v63 = vpop.f32.mrf.mxu1  ;;  %1702 = vmatmul.mubr.f32.gmra.mxu0 %v1522_v50  ;;  %v2068_v4 = vld [vmem:[%s7591_s14 + $0x5e8] sm:$0xff]  ;;  %v2027_v50 = vld [vmem:[%s7591_s14 + $0x4a0] sm:$0xff] }
 0x2b1   :  { %v1525_v23 = vmax.f32 %v1356_v49, 0.0  ;;  %3865 = vmatpush3.msra.mxu1 %v1978_v19  ;;  %3884 = vmatpush3.msra.mxu0 %v2018_v3  ;;  %v1360_v51 = vadd.f32 %v1359_v63, %v6025_v52  ;;  %v2052_v47 = vld [vmem:[%s7591_s14 + $0x568] sm:$0xff]  ;;  %v2011_v19 = vld [vmem:[%s7591_s14 + $0x420] sm:$0xff]  ;;  %v2026_v49 = vld [vmem:[%s7591_s14 + $0x498] sm:$0xff] }
 0x2b2   :  { %3866 = vmatprep.subr.mxu1 %v1993_v44  ;;  %v1361_v8 = vpop.f32.mrf.mxu1  ;;  %3885 = vmatprep.subr.mxu0 %v2033_v61 }
 0x2b3   :  { %v1362_v40 = vadd.f32 %v1361_v8, %v6031_v43  ;;  %3867 = vmatpush3.msra.mxu1 %v1977_v6  ;;  %1706 = vmatprep.mubr.f32.mxu0 %v1525_v23  ;;  %v1526_v21 = vmax.f32 %v1360_v51, 0.0  ;;  %v2010_v6 = vld [vmem:[%s7591_s14 + $0x418] sm:$0xff]  ;;  %v2067_v23 = vld [vmem:[%s7591_s14 + $0x5e0] sm:$0xff]  ;;  %v2025_v51 = vld [vmem:[%s7591_s14 + $0x490] sm:$0xff] }
 0x2b4   :  { %3868 = vmatprep.subr.mxu1 %v1992_v22  ;;  %v1365_v57 = vpop.f32.mrf.mxu1  ;;  %1707 = vmatmul.mubr.f32.gmra.mxu0 %v1524_v24  ;;  %v2051_v24 = vld [vmem:[%s7591_s14 + $0x560] sm:$0xff] }
 0x2b5   :  { %v1527_v26 = vmax.f32 %v1362_v40, 0.0  ;;  %3869 = vmatpush3.msra.mxu1 %v1976_v5  ;;  %3886 = vmatpush3.msra.mxu0 %v2017_v33  ;;  %v1366_v48 = vadd.f32 %v1365_v57, %v6025_v52  ;;  %v2066_v5 = vld [vmem:[%s7591_s14 + $0x5d8] sm:$0xff] }
 0x2b6   :  { %3870 = vmatprep.subr.mxu1 %v1991_v41  ;;  %v1367_v30 = vpop.f32.mrf.mxu1  ;;  %3887 = vmatprep.subr.mxu0 %v2032_v2  ;;  %v2050_v40 = vld [vmem:[%s7591_s14 + $0x558] sm:$0xff] }
 0x2b7   :  { %v1368_v10 = vadd.f32 %v1367_v30, %v6031_v43  ;;  %3871 = vmatpush3.msra.mxu1 %v1975_v45  ;;  %1711 = vmatprep.mubr.f32.mxu0 %v1527_v26  ;;  %v1528_v60 = vmax.f32 %v1366_v48, 0.0  ;;  %v2009_v45 = vld [vmem:[%s7591_s14 + $0x410] sm:$0xff]  ;;  %v2024_v48 = vld [vmem:[%s7591_s14 + $0x488] sm:$0xff] }
 0x2b8   :  { %2831 = vmatmul.mubr.f32.vlgmr.msra.gmra.mxu1 %v2423_v16  ;;  %v1371_v27 = vpop.f32.mrf.mxu1  ;;  %1712 = vmatmul.mubr.f32.gmra.mxu0 %v1526_v21  ;;  %v2065_v16 = vld [vmem:[%s7591_s14 + $0x5d0] sm:$0xff] }
 0x2b9   :  { %v1529_v14 = vmax.f32 %v1368_v10, 0.0  ;;  %3888 = vmatpush3.msra.mxu0 %v2016_v59  ;;  %3910 = vmatprep.subr.mxu1 %v2070_v25  ;;  %v1372_v38 = vadd.f32 %v1371_v27, %v6025_v52  ;;  %v2049_v21 = vld [vmem:[%s7591_s14 + $0x550] sm:$0xff]  ;;  %v2064_v59 = vld [vmem:[%s7591_s14 + $0x5c8] sm:$0xff] }
 0x2ba   :  { %v1373_v32 = vpop.f32.mrf.mxu1  ;;  %3889 = vmatprep.subr.mxu0 %v2031_v34  ;;  %3911 = vmatpush3.msra.mxu1 %v2054_v29  ;;  %v2048_v10 = vld [vmem:[%s7591_s14 + $0x548] sm:$0xff] }
 0x2bb   :  { %v1374_v62 = vadd.f32 %v1373_v32, %v6031_v43  ;;  %1716 = vmatprep.mubr.f32.mxu0 %v1529_v14  ;;  %3890 = vmatpush3.msra.mxu0 %v2015_v15  ;;  %v1530_v12 = vmax.f32 %v1372_v38, 0.0  ;;  %v2063_v15 = vld [vmem:[%s7591_s14 + $0x5c0] sm:$0xff]  ;;  %v2008_v14 = vld [vmem:[%s7591_s14 + $0x408] sm:$0xff] }
 0x2bc   :  { %v1377_v55 = vpop.f32.mrf.mxu1  ;;  %1717 = vmatmul.mubr.f32.gmra.mxu0 %v1528_v60  ;;  %3891 = vmatprep.subr.mxu0 %v2030_v31  ;;  %v2047_v60 = vld [vmem:[%s7591_s14 + $0x540] sm:$0xff]  ;;  %v6295_v32 = vld [vmem:[%s7580_s3 + $0x8] sm:$0xff] }
 0x2bd   :  { %v1531_v42 = vmax.f32 %v1374_v62, 0.0  ;;  %3892 = vmatpush3.msra.mxu0 %v2014_v7  ;;  %3912 = vmatprep.subr.mxu1 %v2069_v36  ;;  %v1378_v56 = vadd.f32 %v1377_v55, %v6025_v52  ;;  %v2023_v38 = vld [vmem:[%s7591_s14 + $0x480] sm:$0xff]  ;;  %v2062_v36 = vld [vmem:[%s7591_s14 + $0x5b8] sm:$0xff] }
 0x2be   :  { %v1379_v58 = vpop.f32.mrf.mxu1  ;;  %3893 = vmatprep.subr.mxu0 %v2029_v37  ;;  %3913 = vmatpush3.msra.mxu1 %v2053_v46  ;;  %v2046_v37 = vld [vmem:[%s7591_s14 + $0x538] sm:$0xff] }
 0x2bf   :  { %v1380_v11 = vadd.f32 %v1379_v58, %v6031_v43  ;;  %1721 = vmatprep.mubr.f32.mxu0 %v1531_v42  ;;  %3894 = vmatpush3.msra.mxu0 %v2013_v53  ;;  %v1532_v44 = vmax.f32 %v1378_v56, 0.0  ;;  %v2061_v42 = vld [vmem:[%s7591_s14 + $0x5b0] sm:$0xff] }
 0x2c0   :  { %v1383_v35 = vpop.f32.mrf.mxu1  ;;  %1722 = vmatmul.mubr.f32.gmra.mxu0 %v1530_v12  ;;  %3895 = vmatprep.subr.mxu0 %v2028_v17  ;;  %v2007_v17 = vld [vmem:[%s7591_s14 + $0x400] sm:$0xff]  ;;  %v2443_v12 = vrot.slane %v6295_v32, %v5803_v28  ;;  %v2045_v58 = vld [vmem:[%s7591_s14 + $0x530] sm:$0xff] }
 0x2c1   :  { %v1533_v3 = vmax.f32 %v1380_v11, 0.0  ;;  %3896 = vmatpush3.msra.mxu0 %v2012_v9  ;;  %3914 = vmatprep.subr.mxu1 %v2068_v4  ;;  %v1384_v61 = vadd.f32 %v1383_v35, %v6025_v52  ;;  %v2060_v4 = vld [vmem:[%s7591_s14 + $0x5a8] sm:$0xff] }
 0x2c2   :  { %v1385_v63 = vpop.f32.mrf.mxu1  ;;  %3897 = vmatprep.subr.mxu0 %v2027_v50  ;;  %3915 = vmatpush3.msra.mxu1 %v2052_v47  ;;  %v2044_v50 = vld [vmem:[%s7591_s14 + $0x528] sm:$0xff] }
 0x2c3   :  { %v1386_v22 = vadd.f32 %v1385_v63, %v6031_v43  ;;  %1726 = vmatprep.mubr.f32.mxu0 %v1533_v3  ;;  %3898 = vmatpush3.msra.mxu0 %v2011_v19  ;;  %v1534_v41 = vmax.f32 %v1384_v61, 0.0  ;;  %v2059_v3 = vld [vmem:[%s7591_s14 + $0x5a0] sm:$0xff] }
 0x2c4   :  { %v1389_v8 = vpop.f32.mrf.mxu1  ;;  %1727 = vmatmul.mubr.f32.gmra.mxu0 %v1532_v44  ;;  %3899 = vmatprep.subr.mxu0 %v2026_v49  ;;  %v2102_v49 = vld [vmem:[%s7591_s14 + $0x6f8] sm:$0xff]  ;;  %v2043_v61 = vld [vmem:[%s7591_s14 + $0x520] sm:$0xff] }
 0x2c5   :  { %v1535_v33 = vmax.f32 %v1386_v22, 0.0  ;;  %3900 = vmatpush3.msra.mxu0 %v2010_v6  ;;  %3916 = vmatprep.subr.mxu1 %v2067_v23  ;;  %v1390_v2 = vadd.f32 %v1389_v8, %v6025_v52  ;;  %v2058_v6 = vld [vmem:[%s7591_s14 + $0x598] sm:$0xff] }
 0x2c6   :  { %v1391_v57 = vpop.f32.mrf.mxu1  ;;  %3917 = vmatpush3.msra.mxu1 %v2051_v24  ;;  %3901 = vmatprep.subr.mxu0 %v2025_v51  ;;  %v2042_v22 = vld [vmem:[%s7591_s14 + $0x518] sm:$0xff] }
 0x2c7   :  { %v1392_v26 = vadd.f32 %v1391_v57, %v6031_v43  ;;  %1731 = vmatprep.mubr.f32.mxu0 %v1535_v33  ;;  %3918 = vmatprep.subr.mxu1 %v2066_v5  ;;  %v1536_v34 = vmax.f32 %v1390_v2, 0.0  ;;  %v2057_v5 = vld [vmem:[%s7591_s14 + $0x590] sm:$0xff]  ;;  %v2056_v2 = vld [vmem:[%s7591_s14 + $0x588] sm:$0xff] }
 0x2c8   :  { %v1395_v30 = vpop.f32.mrf.mxu1  ;;  %1732 = vmatmul.mubr.f32.gmra.mxu0 %v1534_v41  ;;  %3919 = vmatpush3.msra.mxu1 %v2050_v40  ;;  %v2041_v40 = vld [vmem:[%s7591_s14 + $0x510] sm:$0xff] }
 0x2c9   :  { %v1537_v25 = vmax.f32 %v1392_v26, 0.0  ;;  %3902 = vmatpush3.msra.mxu0 %v2009_v45  ;;  %3920 = vmatprep.subr.mxu1 %v2065_v16  ;;  %v1396_v29 = vadd.f32 %v1395_v30, %v6025_v52  ;;  %v2040_v45 = vld [vmem:[%s7591_s14 + $0x508] sm:$0xff] }
 0x2ca   :  { %v1397_v27 = vpop.f32.mrf.mxu1  ;;  %3921 = vmatpush3.msra.mxu1 %v2049_v21  ;;  %3903 = vmatprep.subr.mxu0 %v2024_v48  ;;  %v2055_v48 = vld [vmem:[%s7591_s14 + $0x580] sm:$0xff] }
 0x2cb   :  { %v1398_v31 = vadd.f32 %v1397_v27, %v6031_v43  ;;  %1736 = vmatprep.mubr.f32.mxu0 %v1537_v25  ;;  %3922 = vmatprep.subr.mxu1 %v2064_v59  ;;  %v1538_v46 = vmax.f32 %v1396_v29, 0.0  ;;  %v2039_v59 = vld [vmem:[%s7591_s14 + $0x500] sm:$0xff]  ;;  %v2459_v27 = vrot.slane %v6295_v32, %v6003_v0 }
 0x2cc   :  { %v1401_v7 = vpop.f32.mrf.mxu1  ;;  %1737 = vmatmul.mubr.f32.gmra.mxu0 %v1536_v34  ;;  %3923 = vmatpush3.msra.mxu1 %v2048_v10  ;;  %v2134_v10 = vld [vmem:[%s7591_s14 + $0x7f8] sm:$0xff]  ;;  %v2439_v34 = vrot.slane %v6295_v32, %v5891_v54 }
 0x2cd   :  { %v1539_v62 = vmax.f32 %v1398_v31, 0.0  ;;  %3924 = vmatprep.subr.mxu1 %v2063_v15  ;;  %3904 = vmatpush3.msra.mxu0 %v2008_v14  ;;  %v1402_v55 = vadd.f32 %v1401_v7, %v6025_v52  ;;  %v2133_v7 = vld [vmem:[%s7591_s14 + $0x7f0] sm:$0xff] }
 0x2ce   :  { %v1403_v53 = vpop.f32.mrf.mxu1  ;;  %3925 = vmatpush3.msra.mxu1 %v2047_v60  ;;  %3905 = vmatprep.subr.mxu0 %v2023_v38  ;;  %v2118_v60 = vld [vmem:[%s7591_s14 + $0x778] sm:$0xff] }
 0x2cf   :  { %v1404_v56 = vadd.f32 %v1403_v53, %v6031_v43  ;;  %1741 = vmatprep.mubr.f32.mxu0 %v1539_v62  ;;  %3926 = vmatprep.subr.mxu1 %v2062_v36  ;;  %v1540_v47 = vmax.f32 %v1402_v55, 0.0  ;;  %v2117_v62 = vld [vmem:[%s7591_s14 + $0x770] sm:$0xff] }
 0x2d0   :  { %v1407_v9 = vpop.f32.mrf.mxu1  ;;  %1742 = vmatmul.mubr.f32.gmra.mxu0 %v1538_v46  ;;  %3927 = vmatpush3.msra.mxu1 %v2046_v37  ;;  %v2132_v46 = vld [vmem:[%s7591_s14 + $0x7e8] sm:$0xff] }
 0x2d1   :  { %v1541_v11 = vmax.f32 %v1404_v56, 0.0  ;;  %3928 = vmatprep.subr.mxu1 %v2061_v42  ;;  %3906 = vmatpush3.msra.mxu0 %v2007_v17  ;;  %v1408_v35 = vadd.f32 %v1407_v9, %v6025_v52  ;;  %v2116_v17 = vld [vmem:[%s7591_s14 + $0x768] sm:$0xff]  ;;  %v2131_v56 = vld [vmem:[%s7591_s14 + $0x7e0] sm:$0xff] }
 0x2d2   :  { %v1409_v19 = vpop.f32.mrf.mxu1  ;;  %3929 = vmatpush3.msra.mxu1 %v2045_v58  ;;  %2970 = vmatprep.mubr.f32.mxu1 %v2443_v12  ;;  %v2115_v9 = vld [vmem:[%s7591_s14 + $0x760] sm:$0xff] }
 0x2d3   :  { %v1410_v44 = vadd.f32 %v1409_v19, %v6031_v43  ;;  %1746 = vmatprep.mubr.f32.mxu0 %v1541_v11  ;;  %3930 = vmatprep.subr.mxu1 %v2060_v4  ;;  %v1542_v24 = vmax.f32 %v1408_v35, 0.0  ;;  %v2130_v11 = vld [vmem:[%s7591_s14 + $0x7d8] sm:$0xff] }
 0x2d4   :  { %v1413_v63 = vpop.f32.mrf.mxu1  ;;  %1747 = vmatmul.mubr.f32.gmra.mxu0 %v1540_v47  ;;  %3931 = vmatpush3.msra.mxu1 %v2044_v50  ;;  %v2114_v19 = vld [vmem:[%s7591_s14 + $0x758] sm:$0xff] }
 0x2d5   :  { %v1543_v23 = vmax.f32 %v1410_v44, 0.0  ;;  %3932 = vmatprep.subr.mxu1 %v2059_v3  ;;  %3945 = vmatprep.subr.mxu0 %v2102_v49  ;;  %v1414_v51 = vadd.f32 %v1413_v63, %v6025_v52  ;;  %v2129_v49 = vld [vmem:[%s7591_s14 + $0x7d0] sm:$0xff] }
 0x2d6   :  { %v1415_v8 = vpop.f32.mrf.mxu1  ;;  %3933 = vmatpush3.msra.mxu1 %v2043_v61  ;;  %v2113_v61 = vld [vmem:[%s7591_s14 + $0x750] sm:$0xff] }
 0x2d7   :  { %v1416_v33 = vadd.f32 %v1415_v8, %v6031_v43  ;;  %1751 = vmatprep.mubr.f32.mxu0 %v1543_v23  ;;  %3934 = vmatprep.subr.mxu1 %v2058_v6  ;;  %v1544_v16 = vmax.f32 %v1414_v51, 0.0  ;;  %v2128_v6 = vld [vmem:[%s7591_s14 + $0x7c8] sm:$0xff] }
 0x2d8   :  { %v1419_v41 = vpop.f32.mrf.mxu1  ;;  %1752 = vmatmul.mubr.f32.gmra.mxu0 %v1542_v24  ;;  %3935 = vmatpush3.msra.mxu1 %v2042_v22  ;;  %v2112_v51 = vld [vmem:[%s7591_s14 + $0x748] sm:$0xff] }
 0x2d9   :  { %v1545_v57 = vmax.f32 %v1416_v33, 0.0  ;;  %3936 = vmatprep.subr.mxu1 %v2057_v5  ;;  %v1420_v26 = vadd.f32 %v1419_v41, %v6025_v52  ;;  %v2127_v5 = vld [vmem:[%s7591_s14 + $0x7c0] sm:$0xff] }
 0x2da   :  { %v1421_v21 = vpop.f32.mrf.mxu1  ;;  %3937 = vmatpush3.msra.mxu1 %v2041_v40  ;;  %v2111_v40 = vld [vmem:[%s7591_s14 + $0x740] sm:$0xff] }
 0x2db   :  { %v1422_v30 = vadd.f32 %v1421_v21, %v6031_v43  ;;  %1756 = vmatprep.mubr.f32.mxu0 %v1545_v57  ;;  %3938 = vmatprep.subr.mxu1 %v2056_v2  ;;  %v1546_v15 = vmax.f32 %v1420_v26, 0.0  ;;  %v2126_v2 = vld [vmem:[%s7591_s14 + $0x7b8] sm:$0xff] }
 0x2dc   :  { %v1425_v25 = vpop.f32.mrf.mxu1  ;;  %1757 = vmatmul.mubr.f32.gmra.mxu0 %v1544_v16  ;;  %3939 = vmatpush3.msra.mxu1 %v2040_v45  ;;  %v2110_v26 = vld [vmem:[%s7591_s14 + $0x738] sm:$0xff] }
 0x2dd   :  { %v1547_v29 = vmax.f32 %v1422_v30, 0.0  ;;  %3940 = vmatprep.subr.mxu1 %v2055_v48  ;;  %v1426_v14 = vadd.f32 %v1425_v25, %v6025_v52  ;;  %v2125_v48 = vld [vmem:[%s7591_s14 + $0x7b0] sm:$0xff] }
 0x2de   :  { %v1427_v31 = vpop.f32.mrf.mxu1  ;;  %3941 = vmatpush3.msra.mxu1 %v2039_v59  ;;  %v2109_v59 = vld [vmem:[%s7591_s14 + $0x730] sm:$0xff] }
 0x2df   :  { %v1428_v38 = vadd.f32 %v1427_v31, %v6031_v43  ;;  %1761 = vmatprep.mubr.f32.mxu0 %v1547_v29  ;;  %3980 = vmatprep.subr.mxu1 %v2134_v10  ;;  %v1548_v55 = vmax.f32 %v1426_v14, 0.0  ;;  %v2124_v10 = vld [vmem:[%s7591_s14 + $0x7a8] sm:$0xff]  ;;  %v2123_v31 = vld [vmem:[%s7591_s14 + $0x7a0] sm:$0xff] }
 0x2e0   :  { %v1431_v36 = vpop.f32.mrf.mxu1  ;;  %1762 = vmatmul.mubr.f32.gmra.mxu0 %v1546_v15  ;;  %2971 = vmatmul.mubr.f32.vlgmr.msra.gmra.mxu1 %v2439_v34  ;;  %v2108_v15 = vld [vmem:[%s7591_s14 + $0x728] sm:$0xff] }
 0x2e1   :  { %v1549_v37 = vmax.f32 %v1428_v38, 0.0  ;;  %3981 = vmatpush3.msra.mxu1 %v2118_v60  ;;  %3110 = vmatprep.mubr.f32.mxu1 %v2459_v27  ;;  %v1432_v53 = vadd.f32 %v1431_v36, %v6025_v52  ;;  %v2107_v38 = vld [vmem:[%s7591_s14 + $0x720] sm:$0xff]  ;;  %v2122_v36 = vld [vmem:[%s7591_s14 + $0x798] sm:$0xff] }
 0x2e2   :  { %v1433_v42 = vpop.f32.mrf.mxu1  ;;  %3982 = vmatprep.subr.mxu1 %v2133_v7 }
 0x2e3   :  { %v1434_v12 = vadd.f32 %v1433_v42, %v6031_v43  ;;  %1766 = vmatprep.mubr.f32.mxu0 %v1549_v37  ;;  %3983 = vmatpush3.msra.mxu1 %v2117_v62  ;;  %v1550_v50 = vmax.f32 %v1432_v53, 0.0  ;;  %v2121_v42 = vld [vmem:[%s7591_s14 + $0x790] sm:$0xff] }
 0x2e4   :  { %v1437_v58 = vpop.f32.mrf.mxu1  ;;  %1767 = vmatmul.mubr.f32.gmra.mxu0 %v1548_v55  ;;  %3984 = vmatprep.subr.mxu1 %v2132_v46  ;;  %v2106_v55 = vld [vmem:[%s7591_s14 + $0x718] sm:$0xff] }
 0x2e5   :  { %v1551_v4 = vmax.f32 %v1434_v12, 0.0  ;;  %3985 = vmatpush3.msra.mxu1 %v2116_v17  ;;  %v1438_v47 = vadd.f32 %v1437_v58, %v6025_v52  ;;  %v2105_v12 = vld [vmem:[%s7591_s14 + $0x710] sm:$0xff]  ;;  %v2120_v58 = vld [vmem:[%s7591_s14 + $0x788] sm:$0xff] }
 0x2e6   :  { %v1439_v35 = vpop.f32.mrf.mxu1  ;;  %3986 = vmatprep.subr.mxu1 %v2131_v56 }
 0x2e7   :  { %v1440_v3 = vadd.f32 %v1439_v35, %v6031_v43  ;;  %1771 = vmatprep.mubr.f32.mxu0 %v1551_v4  ;;  %3987 = vmatpush3.msra.mxu1 %v2115_v9  ;;  %v1552_v23 = vmax.f32 %v1438_v47, 0.0  ;;  %v2119_v35 = vld [vmem:[%s7591_s14 + $0x780] sm:$0xff] }
 0x2e8   :  { %v1443_v44 = vpop.f32.mrf.mxu1  ;;  %1772 = vmatmul.mubr.f32.gmra.mxu0 %v1550_v50  ;;  %3988 = vmatprep.subr.mxu1 %v2130_v11  ;;  %v2104_v50 = vld [vmem:[%s7591_s14 + $0x708] sm:$0xff] }
 0x2e9   :  { %v1553_v63 = vmax.f32 %v1440_v3, 0.0  ;;  %3989 = vmatpush3.msra.mxu1 %v2114_v19  ;;  %v1444_v22 = vadd.f32 %v1443_v44, %v6025_v52  ;;  %v6477_v19 = vld [vmem:[%s7580_s3 + $0x10] sm:$0xff] }
 0x2ea   :  { %v1445_v24 = vpop.f32.mrf.mxu1  ;;  %3990 = vmatprep.subr.mxu1 %v2129_v49  ;;  %v2103_v49 = vld [vmem:[%s7591_s14 + $0x700] sm:$0xff] }
 0x2eb   :  { %v1446_v8 = vadd.f32 %v1445_v24, %v6031_v43  ;;  %1776 = vmatprep.mubr.f32.mxu0 %v1553_v63  ;;  %3991 = vmatpush3.msra.mxu1 %v2113_v61  ;;  %v1554_v57 = vmax.f32 %v1444_v22, 0.0  ;;  %v2198_v61 = vld [vmem:[%s7591_s14 + $0x9f8] sm:$0xff]  ;;  %v2455_v63 = vrot.slane %v6295_v32, %v6154_v18  ;;  %v2475_v24 = vrot.slane %v6477_v19, %v5803_v28 }
 0x2ec   :  { %v1449_v33 = vpop.f32.mrf.mxu1  ;;  %1777 = vmatmul.mubr.f32.gmra.mxu0 %v1552_v23  ;;  %3992 = vmatprep.subr.mxu1 %v2128_v6 }
 0x2ed   :  { %v1555_v41 = vmax.f32 %v1446_v8, 0.0  ;;  %3993 = vmatpush3.msra.mxu1 %v2112_v51  ;;  %v1450_v45 = vadd.f32 %v1449_v33, %v6025_v52  ;;  %v2182_v8 = vld [vmem:[%s7591_s14 + $0x978] sm:$0xff]  ;;  %v2197_v33 = vld [vmem:[%s7591_s14 + $0x9f0] sm:$0xff] }
 0x2ee   :  { %v1451_v16 = vpop.f32.mrf.mxu1  ;;  %3994 = vmatprep.subr.mxu1 %v2127_v5 }
 0x2ef   :  { %v1452_v21 = vadd.f32 %v1451_v16, %v6031_v43  ;;  %1781 = vmatprep.mubr.f32.mxu0 %v1555_v41  ;;  %3995 = vmatpush3.msra.mxu1 %v2111_v40  ;;  %v1556_v34 = vmax.f32 %v1450_v45, 0.0  ;;  %v2181_v41 = vld [vmem:[%s7591_s14 + $0x970] sm:$0xff]  ;;  %v2196_v16 = vld [vmem:[%s7591_s14 + $0x9e8] sm:$0xff] }
 0x2f0   :  { %v1455_v30 = vpop.f32.mrf.mxu1  ;;  %1782 = vmatmul.mubr.f32.gmra.mxu0 %v1554_v57  ;;  %3996 = vmatprep.subr.mxu1 %v2126_v2 }
 0x2f1   :  { %v1557_v25 = vmax.f32 %v1452_v21, 0.0  ;;  %3997 = vmatpush3.msra.mxu1 %v2110_v26  ;;  %v1456_v29 = vadd.f32 %v1455_v30, %v6025_v52  ;;  %v2180_v21 = vld [vmem:[%s7591_s14 + $0x968] sm:$0xff]  ;;  %v2195_v30 = vld [vmem:[%s7591_s14 + $0x9e0] sm:$0xff] }
 0x2f2   :  { %v1457_v27 = vpop.f32.mrf.mxu1  ;;  %3998 = vmatprep.subr.mxu1 %v2125_v48 }
 0x2f3   :  { %v1458_v14 = vadd.f32 %v1457_v27, %v6031_v43  ;;  %1786 = vmatprep.mubr.f32.mxu0 %v1557_v25  ;;  %3999 = vmatpush3.msra.mxu1 %v2109_v59  ;;  %v1558_v62 = vmax.f32 %v1456_v29, 0.0  ;;  %v2179_v25 = vld [vmem:[%s7591_s14 + $0x960] sm:$0xff]  ;;  %v2194_v27 = vld [vmem:[%s7591_s14 + $0x9d8] sm:$0xff] }
 0x2f4   :  { %v1461_v60 = vpop.f32.mrf.mxu1  ;;  %1787 = vmatmul.mubr.f32.gmra.mxu0 %v1556_v34  ;;  %4000 = vmatprep.subr.mxu1 %v2124_v10 }
 0x2f5   :  { %v1559_v7 = vmax.f32 %v1458_v14, 0.0  ;;  %4001 = vmatpush3.msra.mxu1 %v2108_v15  ;;  %v1462_v37 = vadd.f32 %v1461_v60, %v6025_v52  ;;  %v2178_v14 = vld [vmem:[%s7591_s14 + $0x958] sm:$0xff]  ;;  %v2193_v60 = vld [vmem:[%s7591_s14 + $0x9d0] sm:$0xff] }
 0x2f6   :  { %v1463_v46 = vpop.f32.mrf.mxu1  ;;  %4002 = vmatprep.subr.mxu1 %v2123_v31 }
 0x2f7   :  { %v1464_v53 = vadd.f32 %v1463_v46, %v6031_v43  ;;  %1791 = vmatprep.mubr.f32.mxu0 %v1559_v7  ;;  %4003 = vmatpush3.msra.mxu1 %v2107_v38  ;;  %v1560_v9 = vmax.f32 %v1462_v37, 0.0  ;;  %v2177_v7 = vld [vmem:[%s7591_s14 + $0x950] sm:$0xff]  ;;  %v2192_v46 = vld [vmem:[%s7591_s14 + $0x9c8] sm:$0xff] }
 0x2f8   :  { %v1467_v17 = vpop.f32.mrf.mxu1  ;;  %1792 = vmatmul.mubr.f32.gmra.mxu0 %v1558_v62  ;;  %4004 = vmatprep.subr.mxu1 %v2122_v36 }
 0x2f9   :  { %v1561_v56 = vmax.f32 %v1464_v53, 0.0  ;;  %4005 = vmatpush3.msra.mxu1 %v2106_v55  ;;  %v1468_v4 = vadd.f32 %v1467_v17, %v6025_v52  ;;  %v2176_v53 = vld [vmem:[%s7591_s14 + $0x948] sm:$0xff]  ;;  %v2191_v17 = vld [vmem:[%s7591_s14 + $0x9c0] sm:$0xff] }
 0x2fa   :  { %v1469_v11 = vpop.f32.mrf.mxu1  ;;  %4006 = vmatprep.subr.mxu1 %v2121_v42 }
 0x2fb   :  { %v1470_v47 = vadd.f32 %v1469_v11, %v6031_v43  ;;  %1796 = vmatprep.mubr.f32.mxu0 %v1561_v56  ;;  %4007 = vmatpush3.msra.mxu1 %v2105_v12  ;;  %v1562_v6 = vmax.f32 %v1468_v4, 0.0  ;;  %v2175_v56 = vld [vmem:[%s7591_s14 + $0x940] sm:$0xff]  ;;  %v2190_v11 = vld [vmem:[%s7591_s14 + $0x9b8] sm:$0xff] }
 0x2fc   :  { %v1473_v3 = vpop.f32.mrf.mxu1  ;;  %1797 = vmatmul.mubr.f32.gmra.mxu0 %v1560_v9  ;;  %4008 = vmatprep.subr.mxu1 %v2120_v58 }
 0x2fd   :  { %v1563_v44 = vmax.f32 %v1470_v47, 0.0  ;;  %4009 = vmatpush3.msra.mxu1 %v2104_v50  ;;  %v1474_v23 = vadd.f32 %v1473_v3, %v6025_v52  ;;  %v2174_v47 = vld [vmem:[%s7591_s14 + $0x938] sm:$0xff]  ;;  %v2189_v3 = vld [vmem:[%s7591_s14 + $0x9b0] sm:$0xff] }
 0x2fe   :  { %v1475_v22 = vpop.f32.mrf.mxu1  ;;  %4010 = vmatprep.subr.mxu1 %v2119_v35 }
 0x2ff   :  { %v1476_v51 = vadd.f32 %v1475_v22, %v6031_v43  ;;  %1801 = vmatprep.mubr.f32.mxu0 %v1563_v44  ;;  %4011 = vmatpush3.msra.mxu1 %v2103_v49  ;;  %v1564_v2 = vmax.f32 %v1474_v23, 0.0  ;;  %v2173_v44 = vld [vmem:[%s7591_s14 + $0x930] sm:$0xff]  ;;  %v2188_v23 = vld [vmem:[%s7591_s14 + $0x9a8] sm:$0xff] }
 0x300   :  { %v1479_v5 = vpop.f32.mrf.mxu1  ;;  %1802 = vmatmul.mubr.f32.gmra.mxu0 %v1562_v6  ;;  %4050 = vmatprep.subr.mxu1 %v2198_v61 }
 0x301   :  { %v1565_v40 = vmax.f32 %v1476_v51, 0.0  ;;  %3111 = vmatmul.mubr.f32.vlgmr.msra.gmra.mxu1 %v2455_v63  ;;  %v1480_v57 = vadd.f32 %v1479_v5, %v6025_v52 }
 0x302   :  { %v1481_v45 = vpop.f32.mrf.mxu1  ;;  %4051 = vmatpush3.msra.mxu1 %v2182_v8  ;;  %3250 = vmatprep.mubr.f32.mxu1 %v2475_v24  ;;  %v2172_v24 = vld [vmem:[%s7591_s14 + $0x928] sm:$0xff]  ;;  %v2187_v8 = vld [vmem:[%s7591_s14 + $0x9a0] sm:$0xff] }
 0x303   :  { %v1482_v26 = vadd.f32 %v1481_v45, %v6031_v43  ;;  %1806 = vmatprep.mubr.f32.mxu0 %v1565_v40  ;;  %4052 = vmatprep.subr.mxu1 %v2197_v33  ;;  %v1566_v10 = vmax.f32 %v1480_v57, 0.0  ;;  %v2171_v33 = vld [vmem:[%s7591_s14 + $0x920] sm:$0xff]  ;;  %v2186_v57 = vld [vmem:[%s7591_s14 + $0x998] sm:$0xff] }
 0x304   :  { %v1485_v48 = vpop.f32.mrf.mxu1  ;;  %1807 = vmatmul.mubr.f32.gmra.mxu0 %v1564_v2  ;;  %4053 = vmatpush3.msra.mxu1 %v2181_v41 }
 0x305   :  { %v1567_v59 = vmax.f32 %v1482_v26, 0.0  ;;  %4054 = vmatprep.subr.mxu1 %v2196_v16  ;;  %v1486_v34 = vadd.f32 %v1485_v48, %v6025_v52  ;;  %v2170_v16 = vld [vmem:[%s7591_s14 + $0x918] sm:$0xff] }
 0x306   :  { %v1487_v29 = vpop.f32.mrf.mxu1  ;;  %4055 = vmatpush3.msra.mxu1 %v2180_v21  ;;  %v2435_v21 = vrot.slane %v6295_v32, %v4540_v39 }
 0x307   :  { %v1488_v15 = vadd.f32 %v1487_v29, %v6031_v43  ;;  %1811 = vmatprep.mubr.f32.mxu0 %v1567_v59  ;;  %4056 = vmatprep.subr.mxu1 %v2195_v30  ;;  %v1568_v36 = vmax.f32 %v1486_v34, 0.0  ;;  %v2184_v30 = vld [vmem:[%s7591_s14 + $0x988] sm:$0xff]  ;;  %v2451_v34 = vrot.slane %v6295_v32, %v5897_v1  ;;  %v2167_v29 = vld [vmem:[%s7591_s14 + $0x900] sm:$0xff] }
 0x308   :  { %v1491_v31 = vpop.f32.mrf.mxu1  ;;  %1812 = vmatmul.mubr.f32.gmra.mxu0 %v1566_v10  ;;  %4057 = vmatpush3.msra.mxu1 %v2179_v25  ;;  %v2168_v59 = vld [vmem:[%s7591_s14 + $0x908] sm:$0xff]  ;;  %v2431_v25 = vrot.slane %v6295_v32, %v4688_v20  ;;  %v2183_v10 = vld [vmem:[%s7591_s14 + $0x980] sm:$0xff] }
 0x309   :  { %v1569_v38 = vmax.f32 %v1488_v15, 0.0  ;;  %4058 = vmatprep.subr.mxu1 %v2194_v27  ;;  %v1492_v62 = vadd.f32 %v1491_v31, %v6025_v52  ;;  %v2086_v27 = vld [vmem:[%s7591_s14 + $0x678] sm:$0xff]  ;;  %v2101_v15 = vld [vmem:[%s7591_s14 + $0x6f0] sm:$0xff]  ;;  %v2471_v31 = vrot.slane %v6477_v19, %v5891_v54 }
 0x30a   :  { %v1493_v37 = vpop.f32.mrf.mxu1  ;;  %4059 = vmatpush3.msra.mxu1 %v2178_v14  ;;  %v2262_v14 = vld [vmem:[%s7591_s14 + $0xbf8] sm:$0xff] }
 0x30b   :  { %v1494_v55 = vadd.f32 %v1493_v37, %v6031_v43  ;;  %1816 = vmatprep.mubr.f32.mxu0 %v1569_v38  ;;  %4060 = vmatprep.subr.mxu1 %v2193_v60  ;;  %v1570_v58 = vmax.f32 %v1492_v62, 0.0  ;;  %v2085_v60 = vld [vmem:[%s7591_s14 + $0x670] sm:$0xff]  ;;  %v2100_v38 = vld [vmem:[%s7591_s14 + $0x6e8] sm:$0xff]  ;;  %v2099_v37 = vld [vmem:[%s7591_s14 + $0x6e0] sm:$0xff] }
 0x30c   :  { %v1497_v42 = vpop.f32.mrf.mxu1  ;;  %1817 = vmatmul.mubr.f32.gmra.mxu0 %v1568_v36  ;;  %4061 = vmatpush3.msra.mxu1 %v2177_v7  ;;  %v2246_v7 = vld [vmem:[%s7591_s14 + $0xb78] sm:$0xff]  ;;  %v2084_v36 = vld [vmem:[%s7591_s14 + $0x668] sm:$0xff]  ;;  %v2261_v62 = vld [vmem:[%s7591_s14 + $0xbf0] sm:$0xff] }
 0x30d   :  { %v1571_v12 = vmax.f32 %v1494_v55, 0.0  ;;  %4062 = vmatprep.subr.mxu1 %v2192_v46  ;;  %v1498_v9 = vadd.f32 %v1497_v42, %v6025_v52  ;;  %v2245_v46 = vld [vmem:[%s7591_s14 + $0xb70] sm:$0xff]  ;;  %v2083_v55 = vld [vmem:[%s7591_s14 + $0x660] sm:$0xff]  ;;  %v2098_v42 = vld [vmem:[%s7591_s14 + $0x6d8] sm:$0xff] }
 0x30e   :  { %v1499_v4 = vpop.f32.mrf.mxu1  ;;  %4063 = vmatpush3.msra.mxu1 %v2176_v53  ;;  %v2260_v53 = vld [vmem:[%s7591_s14 + $0xbe8] sm:$0xff] }
 0x30f   :  { %v1500_v50 = vadd.f32 %v1499_v4, %v6031_v43  ;;  %1821 = vmatprep.mubr.f32.mxu0 %v1571_v12  ;;  %4064 = vmatprep.subr.mxu1 %v2191_v17  ;;  %v1572_v61 = vmax.f32 %v1498_v9, 0.0  ;;  %v2244_v17 = vld [vmem:[%s7591_s14 + $0xb68] sm:$0xff]  ;;  %v2082_v12 = vld [vmem:[%s7591_s14 + $0x658] sm:$0xff]  ;;  %v2243_v9 = vld [vmem:[%s7591_s14 + $0xb60] sm:$0xff] }
 0x310   :  { %v1503_v35 = vpop.f32.mrf.mxu1  ;;  %1822 = vmatmul.mubr.f32.gmra.mxu0 %v1570_v58  ;;  %4065 = vmatpush3.msra.mxu1 %v2175_v56  ;;  %v2259_v56 = vld [vmem:[%s7591_s14 + $0xbe0] sm:$0xff]  ;;  %v2097_v58 = vld [vmem:[%s7591_s14 + $0x6d0] sm:$0xff] }
 0x311   :  { %v1573_v49 = vmax.f32 %v1500_v50, 0.0  ;;  %4066 = vmatprep.subr.mxu1 %v2190_v11  ;;  %v1504_v63 = vadd.f32 %v1503_v35, %v6025_v52  ;;  %v2081_v4 = vld [vmem:[%s7591_s14 + $0x650] sm:$0xff]  ;;  %v2258_v11 = vld [vmem:[%s7591_s14 + $0xbd8] sm:$0xff]  ;;  %v2096_v50 = vld [vmem:[%s7591_s14 + $0x6c8] sm:$0xff] }
 0x312   :  { %v1505_v6 = vpop.f32.mrf.mxu1  ;;  %4067 = vmatpush3.msra.mxu1 %v2174_v47  ;;  %v2242_v47 = vld [vmem:[%s7591_s14 + $0xb58] sm:$0xff]  ;;  %v2080_v35 = vld [vmem:[%s7591_s14 + $0x648] sm:$0xff] }
 0x313   :  { %v1506_v22 = vadd.f32 %v1505_v6, %v6031_v43  ;;  %1826 = vmatprep.mubr.f32.mxu0 %v1573_v49  ;;  %4068 = vmatprep.subr.mxu1 %v2189_v3  ;;  %v1574_v40 = vmax.f32 %v1504_v63, 0.0  ;;  %v2257_v3 = vld [vmem:[%s7591_s14 + $0xbd0] sm:$0xff]  ;;  %v2095_v49 = vld [vmem:[%s7591_s14 + $0x6c0] sm:$0xff]  ;;  %v2256_v63 = vld [vmem:[%s7591_s14 + $0xbc8] sm:$0xff] }
 0x314   :  { %v1509_v51 = vpop.f32.mrf.mxu1  ;;  %1827 = vmatmul.mubr.f32.gmra.mxu0 %v1572_v61  ;;  %4069 = vmatpush3.msra.mxu1 %v2173_v44  ;;  %v2241_v44 = vld [vmem:[%s7591_s14 + $0xb50] sm:$0xff]  ;;  %v2079_v61 = vld [vmem:[%s7591_s14 + $0x640] sm:$0xff]  ;;  %v2094_v6 = vld [vmem:[%s7591_s14 + $0x6b8] sm:$0xff] }
 0x315   :  { %v1575_v5 = vmax.f32 %v1506_v22, 0.0  ;;  %4070 = vmatprep.subr.mxu1 %v2188_v23  ;;  %v1510_v41 = vadd.f32 %v1509_v51, %v6025_v52  ;;  %v2185_v52 = vld [vmem:[%s7591_s14 + $0x990] sm:$0xff]  ;;  %v2240_v23 = vld [vmem:[%s7591_s14 + $0xb48] sm:$0xff]  ;;  %v2078_v22 = vld [vmem:[%s7591_s14 + $0x638] sm:$0xff] }
 0x316   :  { %v1511_v2 = vpop.f32.mrf.mxu1  ;;  %4071 = vmatpush3.msra.mxu1 %v2172_v24  ;;  %v2255_v24 = vld [vmem:[%s7591_s14 + $0xbc0] sm:$0xff]  ;;  %v2093_v51 = vld [vmem:[%s7591_s14 + $0x6b0] sm:$0xff] }
 0x317   :  { %v1512_v45 = vadd.f32 %v1511_v2, %v6031_v43  ;;  %1831 = vmatprep.mubr.f32.mxu0 %v1575_v5  ;;  %4072 = vmatprep.subr.mxu1 %v2187_v8  ;;  %v2169_v43 = vld [vmem:[%s7591_s14 + $0x910] sm:$0xff]  ;;  %v1576_v48 = vmax.f32 %v1510_v41, 0.0  ;;  %v2239_v8 = vld [vmem:[%s7591_s14 + $0xb40] sm:$0xff]  ;;  %v2238_v41 = vld [vmem:[%s7591_s14 + $0xb38] sm:$0xff] }
 0x318   :  { %1832 = vmatmul.mubr.f32.gmra.mxu0 %v1574_v40  ;;  %4073 = vmatpush3.msra.mxu1 %v2171_v33  ;;  %v2077_v5 = vld [vmem:[%s7591_s14 + $0x630] sm:$0xff]  ;;  %v2254_v33 = vld [vmem:[%s7591_s14 + $0xbb8] sm:$0xff]  ;;  %v2092_v40 = vld [vmem:[%s7591_s14 + $0x6a8] sm:$0xff] }
 0x319   :  { %v1577_v26 = vmax.f32 %v1512_v45, 0.0  ;;  %4074 = vmatprep.subr.mxu1 %v2186_v57  ;;  %v2076_v2 = vld [vmem:[%s7591_s14 + $0x628] sm:$0xff]  ;;  %v2253_v57 = vld [vmem:[%s7591_s14 + $0xbb0] sm:$0xff]  ;;  %v2091_v45 = vld [vmem:[%s7591_s14 + $0x6a0] sm:$0xff] }
 0x31a   :  { %4075 = vmatpush3.msra.mxu1 %v2170_v16  ;;  %v2237_v16 = vld [vmem:[%s7591_s14 + $0xb30] sm:$0xff] }
 0x31b   :  { %1836 = vmatprep.mubr.f32.mxu0 %v1577_v26  ;;  %4076 = vmatprep.subr.mxu1 %v2185_v52  ;;  %v2075_v52 = vld [vmem:[%s7591_s14 + $0x620] sm:$0xff]  ;;  %v2252_v26 = vld [vmem:[%s7591_s14 + $0xba8] sm:$0xff] }
 0x31c   :  { %1837 = vmatmul.mubr.f32.gmra.mxu0 %v1576_v48  ;;  %4077 = vmatpush3.msra.mxu1 %v2169_v43  ;;  %v2236_v43 = vld [vmem:[%s7591_s14 + $0xb28] sm:$0xff]  ;;  %v2074_v48 = vld [vmem:[%s7591_s14 + $0x618] sm:$0xff] }
 0x31d   :  { %2900 = vmatprep.mubr.f32.mxu0 %v2435_v21  ;;  %4078 = vmatprep.subr.mxu1 %v2184_v30  ;;  %v2090_v21 = vld [vmem:[%s7591_s14 + $0x698] sm:$0xff]  ;;  %v2251_v30 = vld [vmem:[%s7591_s14 + $0xba0] sm:$0xff] }
 0x31e   :  { %4079 = vmatpush3.msra.mxu1 %v2168_v59  ;;  %v2089_v59 = vld [vmem:[%s7591_s14 + $0x690] sm:$0xff] }
 0x31f   :  { %4080 = vmatprep.subr.mxu1 %v2183_v10  ;;  %v2073_v10 = vld [vmem:[%s7591_s14 + $0x610] sm:$0xff] }
 0x320   :  { %2901 = vmatmul.mubr.f32.vlgmr.msra.gmra.mxu0 %v2431_v25  ;;  %4081 = vmatpush3.msra.mxu1 %v2167_v29  ;;  %v2235_v25 = vld [vmem:[%s7591_s14 + $0xb20] sm:$0xff]  ;;  %v2088_v29 = vld [vmem:[%s7591_s14 + $0x688] sm:$0xff] }
 0x321   :  { %3946 = vmatpush3.msra.mxu0 %v2086_v27  ;;  %3040 = vmatprep.mubr.f32.mxu0 %v2451_v34  ;;  %v2250_v34 = vld [vmem:[%s7591_s14 + $0xb98] sm:$0xff] }
 0x322   :  { %3947 = vmatprep.subr.mxu0 %v2101_v15  ;;  %4120 = vmatprep.subr.mxu1 %v2262_v14  ;;  %v2234_v27 = vld [vmem:[%s7591_s14 + $0xb18] sm:$0xff]  ;;  %v2072_v15 = vld [vmem:[%s7591_s14 + $0x608] sm:$0xff]  ;;  %v2249_v14 = vld [vmem:[%s7591_s14 + $0xb90] sm:$0xff] }
 0x323   :  { %3948 = vmatpush3.msra.mxu0 %v2085_v60  ;;  %3251 = vmatmul.mubr.f32.vlgmr.msra.gmra.mxu1 %v2471_v31  ;;  %v2087_v31 = vld [vmem:[%s7591_s14 + $0x680] sm:$0xff]  ;;  %v2233_v60 = vld [vmem:[%s7591_s14 + $0xb10] sm:$0xff] }
 0x324   :  { %3949 = vmatprep.subr.mxu0 %v2100_v38  ;;  %4121 = vmatpush3.msra.mxu1 %v2246_v7  ;;  %v2071_v38 = vld [vmem:[%s7591_s14 + $0x600] sm:$0xff]  ;;  %v2447_v7 = vrot.slane %v6295_v32, %v5997_v13  ;;  %v2165_v32 = vld [vmem:[%s7591_s14 + $0x8f0] sm:$0xff] }
 0x325   :  { %3950 = vmatpush3.msra.mxu0 %v2084_v36  ;;  %4122 = vmatprep.subr.mxu1 %v2261_v62  ;;  %v2248_v36 = vld [vmem:[%s7591_s14 + $0xb88] sm:$0xff]  ;;  %v2166_v62 = vld [vmem:[%s7591_s14 + $0x8f8] sm:$0xff] }
 0x326   :  { %3951 = vmatprep.subr.mxu0 %v2099_v37  ;;  %4123 = vmatpush3.msra.mxu1 %v2245_v46  ;;  %v2467_v37 = vrot.slane %v6477_v19, %v4540_v39  ;;  %v2150_v46 = vld [vmem:[%s7591_s14 + $0x878] sm:$0xff] }
 0x327   :  { %3952 = vmatpush3.msra.mxu0 %v2083_v55  ;;  %4124 = vmatprep.subr.mxu1 %v2260_v53  ;;  %v2232_v55 = vld [vmem:[%s7591_s14 + $0xb08] sm:$0xff]  ;;  %v2149_v53 = vld [vmem:[%s7591_s14 + $0x870] sm:$0xff] }
 0x328   :  { %3953 = vmatprep.subr.mxu0 %v2098_v42  ;;  %4125 = vmatpush3.msra.mxu1 %v2244_v17  ;;  %v2247_v42 = vld [vmem:[%s7591_s14 + $0xb80] sm:$0xff]  ;;  %v2164_v17 = vld [vmem:[%s7591_s14 + $0x8e8] sm:$0xff] }
 0x329   :  { %3954 = vmatpush3.msra.mxu0 %v2082_v12  ;;  %4126 = vmatprep.subr.mxu1 %v2259_v56  ;;  %v2231_v12 = vld [vmem:[%s7591_s14 + $0xb00] sm:$0xff]  ;;  %v2491_v56 = vrot.slane %v6477_v19, %v6003_v0 }
 0x32a   :  { %3955 = vmatprep.subr.mxu0 %v2097_v58  ;;  %4127 = vmatpush3.msra.mxu1 %v2243_v9  ;;  %v2148_v58 = vld [vmem:[%s7591_s14 + $0x868] sm:$0xff]  ;;  %v2163_v9 = vld [vmem:[%s7591_s14 + $0x8e0] sm:$0xff] }
 0x32b   :  { %3956 = vmatpush3.msra.mxu0 %v2081_v4  ;;  %4128 = vmatprep.subr.mxu1 %v2258_v11  ;;  %v2326_v4 = vld [vmem:[%s7591_s14 + $0xdf8] sm:$0xff]  ;;  %v2487_v11 = vrot.slane %v6477_v19, %v6154_v18 }
 0x32c   :  { %3957 = vmatprep.subr.mxu0 %v2096_v50  ;;  %4129 = vmatpush3.msra.mxu1 %v2242_v47  ;;  %v2147_v50 = vld [vmem:[%s7591_s14 + $0x860] sm:$0xff]  ;;  %v2162_v47 = vld [vmem:[%s7591_s14 + $0x8d8] sm:$0xff] }
 0x32d   :  { %3958 = vmatpush3.msra.mxu0 %v2080_v35  ;;  %4130 = vmatprep.subr.mxu1 %v2257_v3  ;;  %v2310_v35 = vld [vmem:[%s7591_s14 + $0xd78] sm:$0xff] }
 0x32e   :  { %3959 = vmatprep.subr.mxu0 %v2095_v49  ;;  %4131 = vmatpush3.msra.mxu1 %v2241_v44  ;;  %v2146_v3 = vld [vmem:[%s7591_s14 + $0x858] sm:$0xff]  ;;  %v2325_v49 = vld [vmem:[%s7591_s14 + $0xdf0] sm:$0xff] }
 0x32f   :  { %3960 = vmatpush3.msra.mxu0 %v2079_v61  ;;  %4132 = vmatprep.subr.mxu1 %v2256_v63  ;;  %v2161_v44 = vld [vmem:[%s7591_s14 + $0x8d0] sm:$0xff] }
 0x330   :  { %3961 = vmatprep.subr.mxu0 %v2094_v6  ;;  %4133 = vmatpush3.msra.mxu1 %v2240_v23  ;;  %v2309_v61 = vld [vmem:[%s7591_s14 + $0xd70] sm:$0xff]  ;;  %v2324_v6 = vld [vmem:[%s7591_s14 + $0xde8] sm:$0xff] }
 0x331   :  { %3962 = vmatpush3.msra.mxu0 %v2078_v22  ;;  %4134 = vmatprep.subr.mxu1 %v2255_v24  ;;  %v2145_v63 = vld [vmem:[%s7591_s14 + $0x850] sm:$0xff]  ;;  %v2160_v23 = vld [vmem:[%s7591_s14 + $0x8c8] sm:$0xff] }
 0x332   :  { %3963 = vmatprep.subr.mxu0 %v2093_v51  ;;  %4135 = vmatpush3.msra.mxu1 %v2239_v8  ;;  %v2308_v22 = vld [vmem:[%s7591_s14 + $0xd68] sm:$0xff]  ;;  %v2323_v51 = vld [vmem:[%s7591_s14 + $0xde0] sm:$0xff] }
 0x333   :  { %3964 = vmatpush3.msra.mxu0 %v2077_v5  ;;  %4136 = vmatprep.subr.mxu1 %v2254_v33  ;;  %v2144_v24 = vld [vmem:[%s7591_s14 + $0x848] sm:$0xff]  ;;  %v2159_v8 = vld [vmem:[%s7591_s14 + $0x8c0] sm:$0xff] }
 0x334   :  { %3965 = vmatprep.subr.mxu0 %v2092_v40  ;;  %4137 = vmatpush3.msra.mxu1 %v2238_v41  ;;  %v2307_v5 = vld [vmem:[%s7591_s14 + $0xd60] sm:$0xff]  ;;  %v2322_v40 = vld [vmem:[%s7591_s14 + $0xdd8] sm:$0xff] }
 0x335   :  { %3966 = vmatpush3.msra.mxu0 %v2076_v2  ;;  %4138 = vmatprep.subr.mxu1 %v2253_v57  ;;  %v2143_v33 = vld [vmem:[%s7591_s14 + $0x840] sm:$0xff]  ;;  %v2158_v41 = vld [vmem:[%s7591_s14 + $0x8b8] sm:$0xff] }
 0x336   :  { %3967 = vmatprep.subr.mxu0 %v2091_v45  ;;  %4139 = vmatpush3.msra.mxu1 %v2237_v16  ;;  %v2306_v2 = vld [vmem:[%s7591_s14 + $0xd58] sm:$0xff]  ;;  %v2321_v45 = vld [vmem:[%s7591_s14 + $0xdd0] sm:$0xff] }
 0x337   :  { %3968 = vmatpush3.msra.mxu0 %v2075_v52  ;;  %4140 = vmatprep.subr.mxu1 %v2252_v26  ;;  %v2142_v57 = vld [vmem:[%s7591_s14 + $0x838] sm:$0xff]  ;;  %v2157_v16 = vld [vmem:[%s7591_s14 + $0x8b0] sm:$0xff] }
 0x338   :  { %3969 = vmatprep.subr.mxu0 %v2090_v21  ;;  %4141 = vmatpush3.msra.mxu1 %v2236_v43  ;;  %v2305_v52 = vld [vmem:[%s7591_s14 + $0xd50] sm:$0xff]  ;;  %v2320_v21 = vld [vmem:[%s7591_s14 + $0xdc8] sm:$0xff] }
 0x339   :  { %3970 = vmatpush3.msra.mxu0 %v2074_v48  ;;  %4142 = vmatprep.subr.mxu1 %v2251_v30  ;;  %v2141_v26 = vld [vmem:[%s7591_s14 + $0x830] sm:$0xff]  ;;  %v2156_v43 = vld [vmem:[%s7591_s14 + $0x8a8] sm:$0xff] }
 0x33a   :  { %3971 = vmatprep.subr.mxu0 %v2089_v59  ;;  %4143 = vmatpush3.msra.mxu1 %v2235_v25  ;;  %v2304_v48 = vld [vmem:[%s7591_s14 + $0xd48] sm:$0xff]  ;;  %v2319_v59 = vld [vmem:[%s7591_s14 + $0xdc0] sm:$0xff] }
 0x33b   :  { %3972 = vmatpush3.msra.mxu0 %v2073_v10  ;;  %4144 = vmatprep.subr.mxu1 %v2250_v34  ;;  %v2140_v30 = vld [vmem:[%s7591_s14 + $0x828] sm:$0xff]  ;;  %v2155_v25 = vld [vmem:[%s7591_s14 + $0x8a0] sm:$0xff] }
 0x33c   :  { %3973 = vmatprep.subr.mxu0 %v2088_v29  ;;  %4145 = vmatpush3.msra.mxu1 %v2234_v27  ;;  %v2303_v10 = vld [vmem:[%s7591_s14 + $0xd40] sm:$0xff]  ;;  %v2318_v29 = vld [vmem:[%s7591_s14 + $0xdb8] sm:$0xff] }
 0x33d   :  { %3974 = vmatpush3.msra.mxu0 %v2072_v15  ;;  %4146 = vmatprep.subr.mxu1 %v2249_v14  ;;  %v2139_v34 = vld [vmem:[%s7591_s14 + $0x820] sm:$0xff]  ;;  %v2154_v27 = vld [vmem:[%s7591_s14 + $0x898] sm:$0xff] }
 0x33e   :  { %3975 = vmatprep.subr.mxu0 %v2087_v31  ;;  %4147 = vmatpush3.msra.mxu1 %v2233_v60  ;;  %v2302_v15 = vld [vmem:[%s7591_s14 + $0xd38] sm:$0xff]  ;;  %v2317_v31 = vld [vmem:[%s7591_s14 + $0xdb0] sm:$0xff] }
 0x33f   :  { %3976 = vmatpush3.msra.mxu0 %v2071_v38  ;;  %4148 = vmatprep.subr.mxu1 %v2248_v36  ;;  %v2138_v14 = vld [vmem:[%s7591_s14 + $0x818] sm:$0xff]  ;;  %v2153_v60 = vld [vmem:[%s7591_s14 + $0x890] sm:$0xff]  ;;  %v2316_v36 = vld [vmem:[%s7591_s14 + $0xda8] sm:$0xff] }
 0x340   :  { %3041 = vmatmul.mubr.f32.vlgmr.msra.gmra.mxu0 %v2447_v7  ;;  %4015 = vmatprep.subr.mxu0 %v2166_v62  ;;  %v2301_v38 = vld [vmem:[%s7591_s14 + $0xd30] sm:$0xff]  ;;  %v2152_v62 = vld [vmem:[%s7591_s14 + $0x888] sm:$0xff] }
 0x341   :  { %4016 = vmatpush3.msra.mxu0 %v2150_v46  ;;  %3180 = vmatprep.mubr.f32.mxu0 %v2467_v37  ;;  %v2137_v7 = vld [vmem:[%s7591_s14 + $0x810] sm:$0xff]  ;;  %v2300_v37 = vld [vmem:[%s7591_s14 + $0xd28] sm:$0xff] }
 0x342   :  { %4017 = vmatprep.subr.mxu0 %v2165_v32  ;;  %4149 = vmatpush3.msra.mxu1 %v2232_v55  ;;  %v2136_v46 = vld [vmem:[%s7591_s14 + $0x808] sm:$0xff]  ;;  %v2315_v32 = vld [vmem:[%s7591_s14 + $0xda0] sm:$0xff] }
 0x343   :  { %4018 = vmatpush3.msra.mxu0 %v2149_v53  ;;  %4150 = vmatprep.subr.mxu1 %v2247_v42  ;;  %v2151_v55 = vld [vmem:[%s7591_s14 + $0x880] sm:$0xff] }
 0x344   :  { %4019 = vmatprep.subr.mxu0 %v2164_v17  ;;  %4151 = vmatpush3.msra.mxu1 %v2231_v12  ;;  %v2299_v53 = vld [vmem:[%s7591_s14 + $0xd20] sm:$0xff]  ;;  %v2463_v17 = vrot.slane %v6477_v19, %v4688_v20  ;;  %v2314_v12 = vld [vmem:[%s7591_s14 + $0xd98] sm:$0xff] }
 0x345   :  { %4020 = vmatpush3.msra.mxu0 %v2148_v58  ;;  %3390 = vmatprep.mubr.f32.mxu1 %v2491_v56  ;;  %v2135_v42 = vld [vmem:[%s7591_s14 + $0x800] sm:$0xff]  ;;  %v2230_v56 = vld [vmem:[%s7591_s14 + $0xaf8] sm:$0xff]  ;;  %v2483_v58 = vrot.slane %v6477_v19, %v5897_v1 }
 0x346   :  { %4021 = vmatprep.subr.mxu0 %v2163_v9  ;;  %4190 = vmatprep.subr.mxu1 %v2326_v4  ;;  %v6982_v9 = vld [vmem:[%s7590_s13] ss:$0 sm:$0xff]  ;;  %v2214_v4 = vld [vmem:[%s7591_s14 + $0xa78] sm:$0xff] }
 0x347   :  { %4022 = vmatpush3.msra.mxu0 %v2147_v50  ;;  %3391 = vmatmul.mubr.f32.vlgmr.msra.gmra.mxu1 %v2487_v11  ;;  %v2229_v11 = vld [vmem:[%s7591_s14 + $0xaf0] sm:$0xff]  ;;  %v2298_v19 = vld [vmem:[%s7591_s14 + $0xd18] sm:$0xff] }
 0x348   :  { %4023 = vmatprep.subr.mxu0 %v2162_v47  ;;  %4191 = vmatpush3.msra.mxu1 %v2310_v35  ;;  %v2213_v47 = vld [vmem:[%s7591_s14 + $0xa70] sm:$0xff] }
 0x349   :  { %4024 = vmatpush3.msra.mxu0 %v2146_v3  ;;  %4192 = vmatprep.subr.mxu1 %v2325_v49  ;;  %v2313_v35 = vld [vmem:[%s7591_s14 + $0xd90] sm:$0xff]  ;;  %v2228_v49 = vld [vmem:[%s7591_s14 + $0xae8] sm:$0xff] }
 0x34a   :  { %4025 = vmatprep.subr.mxu0 %v2161_v44  ;;  %4193 = vmatpush3.msra.mxu1 %v2309_v61  ;;  %v2297_v44 = vld [vmem:[%s7591_s14 + $0xd10] sm:$0xff] }
 0x34b   :  { %4026 = vmatpush3.msra.mxu0 %v2145_v63  ;;  %4194 = vmatprep.subr.mxu1 %v2324_v6  ;;  %v2212_v63 = vld [vmem:[%s7591_s14 + $0xa68] sm:$0xff] }
 0x34c   :  { %4027 = vmatprep.subr.mxu0 %v2160_v23  ;;  %4195 = vmatpush3.msra.mxu1 %v2308_v22  ;;  %v2312_v6 = vld [vmem:[%s7591_s14 + $0xd88] sm:$0xff]  ;;  %v7015_v23 = vld [vmem:[%s7580_s3 + $0x18] sm:$0xff]  ;;  %v2227_v22 = vld [vmem:[%s7591_s14 + $0xae0] sm:$0xff] }
 0x34d   :  { %4028 = vmatpush3.msra.mxu0 %v2144_v24  ;;  %4196 = vmatprep.subr.mxu1 %v2323_v51  ;;  %v2296_v24 = vld [vmem:[%s7591_s14 + $0xd08] sm:$0xff] }
 0x34e   :  { %4029 = vmatprep.subr.mxu0 %v2159_v8  ;;  %4197 = vmatpush3.msra.mxu1 %v2307_v5  ;;  %v2211_v8 = vld [vmem:[%s7591_s14 + $0xa60] sm:$0xff] }
 0x34f   :  { %4030 = vmatpush3.msra.mxu0 %v2143_v33  ;;  %4198 = vmatprep.subr.mxu1 %v2322_v40  ;;  %v2311_v5 = vld [vmem:[%s7591_s14 + $0xd80] sm:$0xff]  ;;  %v2226_v40 = vld [vmem:[%s7591_s14 + $0xad8] sm:$0xff] }
 0x350   :  { %4031 = vmatprep.subr.mxu0 %v2158_v41  ;;  %4199 = vmatpush3.msra.mxu1 %v2306_v2  ;;  %v2295_v41 = vld [vmem:[%s7591_s14 + $0xd00] sm:$0xff]  ;;  %v2507_v2 = vrot.slane %v7015_v23, %v5803_v28  ;;  %v2390_v28 = vld [vmem:[%s7591_s14 + $0xff8] sm:$0xff] }
 0x351   :  { %4032 = vmatpush3.msra.mxu0 %v2142_v57  ;;  %4200 = vmatprep.subr.mxu1 %v2321_v45  ;;  %v2210_v45 = vld [vmem:[%s7591_s14 + $0xa58] sm:$0xff] }
 0x352   :  { %4033 = vmatprep.subr.mxu0 %v2157_v16  ;;  %4201 = vmatpush3.msra.mxu1 %v2305_v52  ;;  %v2225_v16 = vld [vmem:[%s7591_s14 + $0xad0] sm:$0xff]  ;;  %v2503_v52 = vrot.slane %v7015_v23, %v5891_v54 }
 0x353   :  { %4034 = vmatpush3.msra.mxu0 %v2141_v26  ;;  %4202 = vmatprep.subr.mxu1 %v2320_v21  ;;  %v2209_v21 = vld [vmem:[%s7591_s14 + $0xa50] sm:$0xff] }
 0x354   :  { %4035 = vmatprep.subr.mxu0 %v2156_v43  ;;  %4203 = vmatpush3.msra.mxu1 %v2304_v48  ;;  %v2224_v48 = vld [vmem:[%s7591_s14 + $0xac8] sm:$0xff] }
 0x355   :  { %4036 = vmatpush3.msra.mxu0 %v2140_v30  ;;  %4204 = vmatprep.subr.mxu1 %v2319_v59  ;;  %v2374_v30 = vld [vmem:[%s7591_s14 + $0xf78] sm:$0xff]  ;;  %v2208_v59 = vld [vmem:[%s7591_s14 + $0xa48] sm:$0xff] }
 0x356   :  { %4037 = vmatprep.subr.mxu0 %v2155_v25  ;;  %4205 = vmatpush3.msra.mxu1 %v2303_v10  ;;  %v2389_v25 = vld [vmem:[%s7591_s14 + $0xff0] sm:$0xff]  ;;  %v2223_v10 = vld [vmem:[%s7591_s14 + $0xac0] sm:$0xff] }
 0x357   :  { %4038 = vmatpush3.msra.mxu0 %v2139_v34  ;;  %4206 = vmatprep.subr.mxu1 %v2318_v29  ;;  %v2373_v34 = vld [vmem:[%s7591_s14 + $0xf70] sm:$0xff] }
 0x358   :  { %4039 = vmatprep.subr.mxu0 %v2154_v27  ;;  %4207 = vmatpush3.msra.mxu1 %v2302_v15  ;;  %v2207_v27 = vld [vmem:[%s7591_s14 + $0xa40] sm:$0xff]  ;;  %v2388_v15 = vld [vmem:[%s7591_s14 + $0xfe8] sm:$0xff] }
 0x359   :  { %4040 = vmatpush3.msra.mxu0 %v2138_v14  ;;  %4208 = vmatprep.subr.mxu1 %v2317_v31  ;;  %v2222_v31 = vld [vmem:[%s7591_s14 + $0xab8] sm:$0xff] }
 0x35a   :  { %4041 = vmatprep.subr.mxu0 %v2153_v60  ;;  %4209 = vmatpush3.msra.mxu1 %v2301_v38  ;;  %v2372_v60 = vld [vmem:[%s7591_s14 + $0xf68] sm:$0xff] }
 0x35b   :  { %4042 = vmatpush3.msra.mxu0 %v2137_v7  ;;  %4210 = vmatprep.subr.mxu1 %v2316_v36  ;;  %v2206_v7 = vld [vmem:[%s7591_s14 + $0xa38] sm:$0xff]  ;;  %v2387_v36 = vld [vmem:[%s7591_s14 + $0xfe0] sm:$0xff] }
 0x35c   :  { %4043 = vmatprep.subr.mxu0 %v2152_v62  ;;  %4211 = vmatpush3.msra.mxu1 %v2300_v37  ;;  %v2221_v62 = vld [vmem:[%s7591_s14 + $0xab0] sm:$0xff]  ;;  %v2371_v37 = vld [vmem:[%s7591_s14 + $0xf60] sm:$0xff] }
 0x35d   :  { %4044 = vmatpush3.msra.mxu0 %v2136_v46  ;;  %4212 = vmatprep.subr.mxu1 %v2315_v32  ;;  %v2205_v32 = vld [vmem:[%s7591_s14 + $0xa30] sm:$0xff] }
 0x35e   :  { %4045 = vmatprep.subr.mxu0 %v2151_v55  ;;  %4213 = vmatpush3.msra.mxu1 %v2299_v53  ;;  %v2386_v55 = vld [vmem:[%s7591_s14 + $0xfd8] sm:$0xff] }
 0x35f   :  { %4046 = vmatpush3.msra.mxu0 %v2135_v42  ;;  %4214 = vmatprep.subr.mxu1 %v2314_v12  ;;  %v2220_v42 = vld [vmem:[%s7591_s14 + $0xaa8] sm:$0xff] }
 0x360   :  { %3181 = vmatmul.mubr.f32.vlgmr.msra.gmra.mxu0 %v2463_v17  ;;  %4085 = vmatprep.subr.mxu0 %v2230_v56  ;;  %v1683_v50 = vpop.f32.mrf.mxu0  ;;  %v2370_v17 = vld [vmem:[%s7591_s14 + $0xf58] sm:$0xff]  ;;  %v2204_v56 = vld [vmem:[%s7591_s14 + $0xa28] sm:$0xff] }
 0x361   :  { %v1684_v3 = vadd.f32 %v6982_v9, %v1683_v50  ;;  %4086 = vmatpush3.msra.mxu0 %v2214_v4  ;;  %3320 = vmatprep.mubr.f32.mxu0 %v2483_v58  ;;  %v2385_v58 = vld [vmem:[%s7591_s14 + $0xfd0] sm:$0xff]  ;;  %v2219_v4 = vld [vmem:[%s7591_s14 + $0xaa0] sm:$0xff] }
 0x362   :  { %4087 = vmatprep.subr.mxu0 %v2229_v11  ;;  %v1685_v61 = vpop.f32.mrf.mxu0  ;;  %4215 = vmatpush3.msra.mxu1 %v2298_v19  ;;  %v2369_v11 = vld [vmem:[%s7591_s14 + $0xf50] sm:$0xff]  ;;  %v2203_v50 = vld [vmem:[%s7591_s14 + $0xa20] sm:$0xff] }
 0x363   :  { %1843 = vst.msk [vmem:[%s7593_s16] sm:$0xff] %vm1842_vm3, %v1684_v3  ;;  %4088 = vmatpush3.msra.mxu0 %v2213_v47  ;;  %4216 = vmatprep.subr.mxu1 %v2313_v35  ;;  %v2384_v47 = vld [vmem:[%s7591_s14 + $0xfc8] sm:$0xff]  ;;  %v2218_v3 = vld [vmem:[%s7591_s14 + $0xa98] sm:$0xff] }
 0x364   :  { %4089 = vmatprep.subr.mxu0 %v2228_v49  ;;  %v1688_v51 = vpop.f32.mrf.mxu0  ;;  %4217 = vmatpush3.msra.mxu1 %v2297_v44  ;;  %v2368_v49 = vld [vmem:[%s7591_s14 + $0xf48] sm:$0xff]  ;;  %v2202_v61 = vld [vmem:[%s7591_s14 + $0xa18] sm:$0xff] }
 0x365   :  { %v1689_v33 = vadd.f32 %v6982_v9, %v1688_v51  ;;  %4090 = vmatpush3.msra.mxu0 %v2212_v63  ;;  %4218 = vmatprep.subr.mxu1 %v2312_v6  ;;  %v2383_v63 = vld [vmem:[%s7591_s14 + $0xfc0] sm:$0xff]  ;;  %v2217_v6 = vld [vmem:[%s7591_s14 + $0xa90] sm:$0xff] }
 0x366   :  { %4091 = vmatprep.subr.mxu0 %v2227_v22  ;;  %v1690_v57 = vpop.f32.mrf.mxu0  ;;  %4219 = vmatpush3.msra.mxu1 %v2296_v24  ;;  %v2367_v22 = vld [vmem:[%s7591_s14 + $0xf40] sm:$0xff]  ;;  %v2201_v51 = vld [vmem:[%s7591_s14 + $0xa10] sm:$0xff] }
 0x367   :  { %1844 = vst.msk [vmem:[%s7593_s16 + $0x8] sm:$0xff] %vm1842_vm3, %v1689_v33  ;;  %4092 = vmatpush3.msra.mxu0 %v2211_v8  ;;  %4220 = vmatprep.subr.mxu1 %v2311_v5  ;;  %v2382_v8 = vld [vmem:[%s7591_s14 + $0xfb8] sm:$0xff]  ;;  %v2216_v33 = vld [vmem:[%s7591_s14 + $0xa88] sm:$0xff]  ;;  %v2381_v57 = vld [vmem:[%s7591_s14 + $0xfb0] sm:$0xff] }
 0x368   :  { %4093 = vmatprep.subr.mxu0 %v2226_v40  ;;  %v1693_v26 = vpop.f32.mrf.mxu0  ;;  %4221 = vmatpush3.msra.mxu1 %v2295_v41  ;;  %v2366_v40 = vld [vmem:[%s7591_s14 + $0xf38] sm:$0xff] }
 0x369   :  { %v1694_v43 = vadd.f32 %v6982_v9, %v1693_v26  ;;  %4094 = vmatpush3.msra.mxu0 %v2210_v45  ;;  %3530 = vmatprep.mubr.f32.mxu1 %v2507_v2  ;;  %v2200_v2 = vld [vmem:[%s7591_s14 + $0xa08] sm:$0xff]  ;;  %v2215_v45 = vld [vmem:[%s7591_s14 + $0xa80] sm:$0xff]  ;;  %v4299_v26 = vld [vmem:[%s7580_s3 + $0x10] sm:$0xff] }
 0x36a   :  { %4095 = vmatprep.subr.mxu0 %v2225_v16  ;;  %v1695_v54 = vpop.f32.mrf.mxu0  ;;  %4260 = vmatprep.subr.mxu1 %v2390_v28  ;;  %v2365_v16 = vld [vmem:[%s7591_s14 + $0xf30] sm:$0xff] }
 0x36b   :  { %1845 = vst.msk [vmem:[%s7593_s16 + $0x10] sm:$0xff] %vm1842_vm3, %v1694_v43  ;;  %4096 = vmatpush3.msra.mxu0 %v2209_v21  ;;  %3531 = vmatmul.mubr.f32.vlgmr.msra.gmra.mxu1 %v2503_v52  ;;  %v2199_v52 = vld [vmem:[%s7591_s14 + $0xa00] sm:$0xff]  ;;  %v2479_v21 = vrot.slane %v4299_v26, %v5997_v13  ;;  %v2380_v43 = vld [vmem:[%s7591_s14 + $0xfa8] sm:$0xff]  ;;  %v2499_v54 = vrot.slane %v7015_v23, %v4540_v39 }
 0x36c   :  { %4097 = vmatprep.subr.mxu0 %v2224_v48  ;;  %v1698_v29 = vpop.f32.mrf.mxu0  ;;  %4261 = vmatpush3.msra.mxu1 %v2374_v30  ;;  %v2294_v30 = vld [vmem:[%s7591_s14 + $0xcf8] sm:$0xff]  ;;  %v2364_v39 = vld [vmem:[%s7591_s14 + $0xf28] sm:$0xff] }
 0x36d   :  { %v1699_v14 = vadd.f32 %v6982_v9, %v1698_v29  ;;  %4098 = vmatpush3.msra.mxu0 %v2208_v59  ;;  %4262 = vmatprep.subr.mxu1 %v2389_v25  ;;  %v2278_v25 = vld [vmem:[%s7591_s14 + $0xc78] sm:$0xff]  ;;  %v2277_v29 = vld [vmem:[%s7591_s14 + $0xc70] sm:$0xff] }
 0x36e   :  { %4099 = vmatprep.subr.mxu0 %v2223_v10  ;;  %v1700_v38 = vpop.f32.mrf.mxu0  ;;  %4263 = vmatpush3.msra.mxu1 %v2373_v34  ;;  %v2293_v10 = vld [vmem:[%s7591_s14 + $0xcf0] sm:$0xff] }
 0x36f   :  { %1846 = vst.msk [vmem:[%s7593_s16 + $0x18] sm:$0xff] %vm1842_vm3, %v1699_v14  ;;  %4100 = vmatpush3.msra.mxu0 %v2207_v27  ;;  %4264 = vmatprep.subr.mxu1 %v2388_v15  ;;  %v2379_v27 = vld [vmem:[%s7591_s14 + $0xfa0] sm:$0xff]  ;;  %v2292_v14 = vld [vmem:[%s7591_s14 + $0xce8] sm:$0xff] }
 0x370   :  { %4101 = vmatprep.subr.mxu0 %v2222_v31  ;;  %v1703_v46 = vpop.f32.mrf.mxu0  ;;  %4265 = vmatpush3.msra.mxu1 %v2372_v60  ;;  %v2363_v31 = vld [vmem:[%s7591_s14 + $0xf20] sm:$0xff]  ;;  %v2276_v38 = vld [vmem:[%s7591_s14 + $0xc68] sm:$0xff] }
 0x371   :  { %v1704_v53 = vadd.f32 %v6982_v9, %v1703_v46  ;;  %4102 = vmatpush3.msra.mxu0 %v2206_v7  ;;  %4266 = vmatprep.subr.mxu1 %v2387_v36  ;;  %v2378_v7 = vld [vmem:[%s7591_s14 + $0xf98] sm:$0xff]  ;;  %v2291_v36 = vld [vmem:[%s7591_s14 + $0xce0] sm:$0xff] }
 0x372   :  { %4103 = vmatprep.subr.mxu0 %v2221_v62  ;;  %v1705_v12 = vpop.f32.mrf.mxu0  ;;  %4267 = vmatpush3.msra.mxu1 %v2371_v37  ;;  %v2362_v62 = vld [vmem:[%s7591_s14 + $0xf18] sm:$0xff]  ;;  %v2275_v46 = vld [vmem:[%s7591_s14 + $0xc60] sm:$0xff] }
 0x373   :  { %1847 = vst.msk [vmem:[%s7593_s16 + $0x20] sm:$0xff] %vm1842_vm3, %v1704_v53  ;;  %4104 = vmatpush3.msra.mxu0 %v2205_v32  ;;  %4268 = vmatprep.subr.mxu1 %v2386_v55  ;;  %v2377_v32 = vld [vmem:[%s7591_s14 + $0xf90] sm:$0xff]  ;;  %v2290_v53 = vld [vmem:[%s7591_s14 + $0xcd8] sm:$0xff] }
 0x374   :  { %4105 = vmatprep.subr.mxu0 %v2220_v42  ;;  %v1708_v19 = vpop.f32.mrf.mxu0  ;;  %4269 = vmatpush3.msra.mxu1 %v2370_v17  ;;  %v2361_v42 = vld [vmem:[%s7591_s14 + $0xf10] sm:$0xff]  ;;  %v2274_v12 = vld [vmem:[%s7591_s14 + $0xc58] sm:$0xff] }
 0x375   :  { %v1709_v35 = vadd.f32 %v6982_v9, %v1708_v19  ;;  %4106 = vmatpush3.msra.mxu0 %v2204_v56  ;;  %4270 = vmatprep.subr.mxu1 %v2385_v58  ;;  %v2376_v56 = vld [vmem:[%s7591_s14 + $0xf88] sm:$0xff]  ;;  %v2289_v58 = vld [vmem:[%s7591_s14 + $0xcd0] sm:$0xff] }
 0x376   :  { %4107 = vmatprep.subr.mxu0 %v2219_v4  ;;  %v1710_v44 = vpop.f32.mrf.mxu0  ;;  %4271 = vmatpush3.msra.mxu1 %v2369_v11  ;;  %v2360_v4 = vld [vmem:[%s7591_s14 + $0xf08] sm:$0xff]  ;;  %v2273_v19 = vld [vmem:[%s7591_s14 + $0xc50] sm:$0xff] }
 0x377   :  { %1848 = vst.msk [vmem:[%s7593_s16 + $0x28] sm:$0xff] %vm1842_vm3, %v1709_v35  ;;  %4108 = vmatpush3.msra.mxu0 %v2203_v50  ;;  %4272 = vmatprep.subr.mxu1 %v2384_v47  ;;  %v2375_v50 = vld [vmem:[%s7591_s14 + $0xf80] sm:$0xff]  ;;  %v2288_v35 = vld [vmem:[%s7591_s14 + $0xcc8] sm:$0xff] }
 0x378   :  { %4109 = vmatprep.subr.mxu0 %v2218_v3  ;;  %v1713_v24 = vpop.f32.mrf.mxu0  ;;  %4273 = vmatpush3.msra.mxu1 %v2368_v49  ;;  %v2359_v3 = vld [vmem:[%s7591_s14 + $0xf00] sm:$0xff]  ;;  %v2523_v49 = vrot.slane %v7015_v23, %v6003_v0 }
 0x379   :  { %v1714_v5 = vadd.f32 %v6982_v9, %v1713_v24  ;;  %4110 = vmatpush3.msra.mxu0 %v2202_v61  ;;  %4274 = vmatprep.subr.mxu1 %v2383_v63  ;;  %v2272_v61 = vld [vmem:[%s7591_s14 + $0xc48] sm:$0xff]  ;;  %v2519_v63 = vrot.slane %v7015_v23, %v6154_v18  ;;  %v2287_v0 = vld [vmem:[%s7591_s14 + $0xcc0] sm:$0xff]  ;;  %v2286_v24 = vld [vmem:[%s7591_s14 + $0xcb8] sm:$0xff] }
 0x37a   :  { %4111 = vmatprep.subr.mxu0 %v2217_v6  ;;  %v1715_v41 = vpop.f32.mrf.mxu0  ;;  %4275 = vmatpush3.msra.mxu1 %v2367_v22  ;;  %v2271_v22 = vld [vmem:[%s7591_s14 + $0xc40] sm:$0xff] }
 0x37b   :  { %1849 = vst.msk [vmem:[%s7593_s16 + $0x30] sm:$0xff] %vm1842_vm3, %v1714_v5  ;;  %4112 = vmatpush3.msra.mxu0 %v2201_v51  ;;  %4276 = vmatprep.subr.mxu1 %v2382_v8  ;;  %v2270_v8 = vld [vmem:[%s7591_s14 + $0xc38] sm:$0xff]  ;;  %v2285_v5 = vld [vmem:[%s7591_s14 + $0xcb0] sm:$0xff] }
 0x37c   :  { %4113 = vmatprep.subr.mxu0 %v2216_v33  ;;  %v1718_v28 = vpop.f32.mrf.mxu0  ;;  %4277 = vmatpush3.msra.mxu1 %v2366_v40  ;;  %v2269_v40 = vld [vmem:[%s7591_s14 + $0xc30] sm:$0xff] }
 0x37d   :  { %v1719_v48 = vadd.f32 %v6982_v9, %v1718_v28  ;;  %4114 = vmatpush3.msra.mxu0 %v2200_v2  ;;  %4278 = vmatprep.subr.mxu1 %v2381_v57  ;;  %v2284_v2 = vld [vmem:[%s7591_s14 + $0xca8] sm:$0xff] }
 0x37e   :  { %4115 = vmatprep.subr.mxu0 %v2215_v45  ;;  %v1720_v59 = vpop.f32.mrf.mxu0  ;;  %4279 = vmatpush3.msra.mxu1 %v2365_v16  ;;  %v2268_v45 = vld [vmem:[%s7591_s14 + $0xc28] sm:$0xff]  ;;  %v2283_v16 = vld [vmem:[%s7591_s14 + $0xca0] sm:$0xff] }
 0x37f   :  { %1850 = vst.msk [vmem:[%s7593_s16 + $0x38] sm:$0xff] %vm1842_vm3, %v1719_v48  ;;  %4116 = vmatpush3.msra.mxu0 %v2199_v52  ;;  %4280 = vmatprep.subr.mxu1 %v2380_v43  ;;  %v2267_v52 = vld [vmem:[%s7591_s14 + $0xc20] sm:$0xff]  ;;  %v2266_v48 = vld [vmem:[%s7591_s14 + $0xc18] sm:$0xff]  ;;  %v2265_v59 = vld [vmem:[%s7591_s14 + $0xc10] sm:$0xff] }
 0x380   :  { %3321 = vmatmul.mubr.f32.vlgmr.msra.gmra.mxu0 %v2479_v21  ;;  %4155 = vmatprep.subr.mxu0 %v2294_v30  ;;  %v1723_v34 = vpop.f32.mrf.mxu0  ;;  %v2282_v21 = vld [vmem:[%s7591_s14 + $0xc98] sm:$0xff]  ;;  %v2281_v30 = vld [vmem:[%s7591_s14 + $0xc90] sm:$0xff] }
 0x381   :  { %v1724_v15 = vadd.f32 %v6982_v9, %v1723_v34  ;;  %4156 = vmatpush3.msra.mxu0 %v2278_v25  ;;  %3460 = vmatprep.mubr.f32.mxu0 %v2499_v54  ;;  %v2264_v34 = vld [vmem:[%s7591_s14 + $0xc08] sm:$0xff] }
 0x382   :  { %4157 = vmatprep.subr.mxu0 %v2293_v10  ;;  %v1725_v60 = vpop.f32.mrf.mxu0  ;;  %4281 = vmatpush3.msra.mxu1 %v2364_v39  ;;  %v2280_v10 = vld [vmem:[%s7591_s14 + $0xc88] sm:$0xff] }
 0x383   :  { %1851 = vst.msk [vmem:[%s7593_s16 + $0x40] sm:$0xff] %vm1842_vm3, %v1724_v15  ;;  %4158 = vmatpush3.msra.mxu0 %v2277_v29  ;;  %4282 = vmatprep.subr.mxu1 %v2379_v27  ;;  %v2279_v29 = vld [vmem:[%s7591_s14 + $0xc80] sm:$0xff]  ;;  %v2358_v60 = vld [vmem:[%s7591_s14 + $0xef8] sm:$0xff] }
 0x384   :  { %4159 = vmatprep.subr.mxu0 %v2292_v14  ;;  %v1728_v37 = vpop.f32.mrf.mxu0  ;;  %4283 = vmatpush3.msra.mxu1 %v2363_v31  ;;  %v2263_v15 = vld [vmem:[%s7591_s14 + $0xc00] sm:$0xff]  ;;  %v2495_v14 = vrot.slane %v7015_v23, %v4688_v20  ;;  %v2357_v20 = vld [vmem:[%s7591_s14 + $0xef0] sm:$0xff] }
 0x385   :  { %v1729_v55 = vadd.f32 %v6982_v9, %v1728_v37  ;;  %4160 = vmatpush3.msra.mxu0 %v2276_v38  ;;  %4284 = vmatprep.subr.mxu1 %v2378_v7  ;;  %v2515_v38 = vrot.slane %v7015_v23, %v5897_v1  ;;  %v2341_v1 = vld [vmem:[%s7591_s14 + $0xe70] sm:$0xff] }
 0x386   :  { %4161 = vmatprep.subr.mxu0 %v2291_v36  ;;  %v1730_v17 = vpop.f32.mrf.mxu0  ;;  %4285 = vmatpush3.msra.mxu1 %v2362_v62  ;;  %v2342_v36 = vld [vmem:[%s7591_s14 + $0xe78] sm:$0xff] }
 0x387   :  { %1852 = vst.msk [vmem:[%s7593_s16 + $0x48] sm:$0xff] %vm1842_vm3, %v1729_v55  ;;  %4162 = vmatpush3.msra.mxu0 %v2275_v46  ;;  %4286 = vmatprep.subr.mxu1 %v2377_v32  ;;  %v2356_v46 = vld [vmem:[%s7591_s14 + $0xee8] sm:$0xff]  ;;  %v2339_v17 = vld [vmem:[%s7591_s14 + $0xe60] sm:$0xff] }
 0x388   :  { %4163 = vmatprep.subr.mxu0 %v2290_v53  ;;  %v1733_v11 = vpop.f32.mrf.mxu0  ;;  %4287 = vmatpush3.msra.mxu1 %v2361_v42  ;;  %v2340_v55 = vld [vmem:[%s7591_s14 + $0xe68] sm:$0xff]  ;;  %v2355_v53 = vld [vmem:[%s7591_s14 + $0xee0] sm:$0xff] }
 0x389   :  { %v1734_v47 = vadd.f32 %v6982_v9, %v1733_v11  ;;  %4164 = vmatpush3.msra.mxu0 %v2274_v12  ;;  %4288 = vmatprep.subr.mxu1 %v2376_v56  ;;  %v2354_v56 = vld [vmem:[%s7591_s14 + $0xed8] sm:$0xff]  ;;  %v2353_v11 = vld [vmem:[%s7591_s14 + $0xed0] sm:$0xff] }
 0x38a   :  { %4165 = vmatprep.subr.mxu0 %v2289_v58  ;;  %v1735_v44 = vpop.f32.mrf.mxu0  ;;  %4289 = vmatpush3.msra.mxu1 %v2360_v4  ;;  %v2338_v4 = vld [vmem:[%s7591_s14 + $0xe58] sm:$0xff] }
 0x38b   :  { %1853 = vst.msk [vmem:[%s7593_s16 + $0x50] sm:$0xff] %vm1842_vm3, %v1734_v47  ;;  %4166 = vmatpush3.msra.mxu0 %v2273_v19  ;;  %4290 = vmatprep.subr.mxu1 %v2375_v50  ;;  %v2337_v50 = vld [vmem:[%s7591_s14 + $0xe50] sm:$0xff]  ;;  %v2351_v44 = vld [vmem:[%s7591_s14 + $0xec0] sm:$0xff] }
 0x38c   :  { %4167 = vmatprep.subr.mxu0 %v2288_v35  ;;  %v1738_v6 = vpop.f32.mrf.mxu0  ;;  %4291 = vmatpush3.msra.mxu1 %v2359_v3  ;;  %v2352_v35 = vld [vmem:[%s7591_s14 + $0xec8] sm:$0xff] }
 0x38d   :  { %v1739_v18 = vadd.f32 %v6982_v9, %v1738_v6  ;;  %4168 = vmatpush3.msra.mxu0 %v2272_v61  ;;  %3670 = vmatprep.mubr.f32.mxu1 %v2523_v49  ;;  %v2336_v49 = vld [vmem:[%s7591_s14 + $0xe48] sm:$0xff]  ;;  %v2350_v6 = vld [vmem:[%s7591_s14 + $0xeb8] sm:$0xff] }
 0x38e   :  { %4169 = vmatprep.subr.mxu0 %v2287_v0  ;;  %v1740_v51 = vpop.f32.mrf.mxu0  ;;  %3671 = vmatmul.mubr.f32.vlgmr.msra.gmra.mxu1 %v2519_v63  ;;  %v2335_v63 = vld [vmem:[%s7591_s14 + $0xe40] sm:$0xff] }
 0x38f   :  { %1854 = vst.msk [vmem:[%s7593_s16 + $0x58] sm:$0xff] %vm1842_vm3, %v1739_v18  ;;  %4170 = vmatpush3.msra.mxu0 %v2271_v22  ;;  %v2334_v18 = vld [vmem:[%s7591_s14 + $0xe38] sm:$0xff] }
 0x390   :  { %4171 = vmatprep.subr.mxu0 %v2286_v24  ;;  %v1743_v33 = vpop.f32.mrf.mxu0  ;;  %v2349_v24 = vld [vmem:[%s7591_s14 + $0xeb0] sm:$0xff] }
 0x391   :  { %v1744_v41 = vadd.f32 %v6982_v9, %v1743_v33  ;;  %4172 = vmatpush3.msra.mxu0 %v2270_v8  ;;  %v2333_v8 = vld [vmem:[%s7591_s14 + $0xe30] sm:$0xff]  ;;  %v2348_v33 = vld [vmem:[%s7591_s14 + $0xea8] sm:$0xff] }
 0x392   :  { %4173 = vmatprep.subr.mxu0 %v2285_v5  ;;  %v1745_v57 = vpop.f32.mrf.mxu0 }
 0x393   :  { %1855 = vst.msk [vmem:[%s7593_s16 + $0x60] sm:$0xff] %vm1842_vm3, %v1744_v41  ;;  %4174 = vmatpush3.msra.mxu0 %v2269_v40  ;;  %v2332_v41 = vld [vmem:[%s7591_s14 + $0xe28] sm:$0xff] }
 0x394   :  { %4175 = vmatprep.subr.mxu0 %v2284_v2  ;;  %v1748_v28 = vpop.f32.mrf.mxu0  ;;  %v2347_v2 = vld [vmem:[%s7591_s14 + $0xea0] sm:$0xff] }
 0x395   :  { %v1749_v26 = vadd.f32 %v6982_v9, %v1748_v28  ;;  %4176 = vmatpush3.msra.mxu0 %v2268_v45  ;;  %v2331_v45 = vld [vmem:[%s7591_s14 + $0xe20] sm:$0xff]  ;;  %v2346_v28 = vld [vmem:[%s7591_s14 + $0xe98] sm:$0xff] }
 0x396   :  { %4177 = vmatprep.subr.mxu0 %v2283_v16  ;;  %v1750_v43 = vpop.f32.mrf.mxu0 }
 0x397   :  { %1856 = vst.msk [vmem:[%s7593_s16 + $0x68] sm:$0xff] %vm1842_vm3, %v1749_v26  ;;  %4178 = vmatpush3.msra.mxu0 %v2267_v52  ;;  %v2330_v26 = vld [vmem:[%s7591_s14 + $0xe18] sm:$0xff] }
 0x398   :  { %4179 = vmatprep.subr.mxu0 %v2282_v21  ;;  %v1753_v54 = vpop.f32.mrf.mxu0  ;;  %v2345_v21 = vld [vmem:[%s7591_s14 + $0xe90] sm:$0xff] }
 0x399   :  { %v1754_v25 = vadd.f32 %v6982_v9, %v1753_v54  ;;  %4180 = vmatpush3.msra.mxu0 %v2266_v48  ;;  %v2329_v48 = vld [vmem:[%s7591_s14 + $0xe10] sm:$0xff]  ;;  %v2344_v54 = vld [vmem:[%s7591_s14 + $0xe88] sm:$0xff] }
 0x39a   :  { %4181 = vmatprep.subr.mxu0 %v2281_v30  ;;  %v1755_v39 = vpop.f32.mrf.mxu0 }
 0x39b   :  { %1857 = vst.msk [vmem:[%s7593_s16 + $0x70] sm:$0xff] %vm1842_vm3, %v1754_v25  ;;  %4182 = vmatpush3.msra.mxu0 %v2265_v59  ;;  %v2328_v25 = vld [vmem:[%s7591_s14 + $0xe08] sm:$0xff] }
 0x39c   :  { %4183 = vmatprep.subr.mxu0 %v2280_v10  ;;  %v1758_v27 = vpop.f32.mrf.mxu0  ;;  %v2343_v10 = vld [vmem:[%s7591_s14 + $0xe80] sm:$0xff] }
 0x39d   :  { %v1759_v31 = vadd.f32 %v6982_v9, %v1758_v27  ;;  %4184 = vmatpush3.msra.mxu0 %v2264_v34  ;;  %v2327_v34 = vld [vmem:[%s7591_s14 + $0xe00] sm:$0xff] }
 0x39e   :  { %4185 = vmatprep.subr.mxu0 %v2279_v29  ;;  %v1760_v7 = vpop.f32.mrf.mxu0  ;;  %v2511_v29 = vrot.slane %v7015_v23, %v5997_v13 }
 0x39f   :  { %1858 = vst.msk [vmem:[%s7593_s16 + $0x78] sm:$0xff] %vm1842_vm3, %v1759_v31  ;;  %4186 = vmatpush3.msra.mxu0 %v2263_v15 }
 0x3a0   :  { %3461 = vmatmul.mubr.f32.vlgmr.msra.gmra.mxu0 %v2495_v14  ;;  %4225 = vmatprep.subr.mxu0 %v2358_v60  ;;  %v1763_v62 = vpop.f32.mrf.mxu0 }
 0x3a1   :  { %v1764_v37 = vadd.f32 %v6982_v9, %v1763_v62  ;;  %4226 = vmatpush3.msra.mxu0 %v2342_v36  ;;  %3600 = vmatprep.mubr.f32.mxu0 %v2515_v38 }
 0x3a2   :  { %4227 = vmatprep.subr.mxu0 %v2357_v20  ;;  %v1765_v32 = vpop.f32.mrf.mxu0 }
 0x3a3   :  { %1859 = vst.msk [vmem:[%s7593_s16 + $0x80] sm:$0xff] %vm1842_vm3, %v1764_v37  ;;  %4228 = vmatpush3.msra.mxu0 %v2341_v1 }
 0x3a4   :  { %4229 = vmatprep.subr.mxu0 %v2356_v46  ;;  %v1768_v42 = vpop.f32.mrf.mxu0 }
 0x3a5   :  { %v1769_v12 = vadd.f32 %v6982_v9, %v1768_v42  ;;  %4230 = vmatpush3.msra.mxu0 %v2340_v55 }
 0x3a6   :  { %4231 = vmatprep.subr.mxu0 %v2355_v53  ;;  %v1770_v58 = vpop.f32.mrf.mxu0 }
 0x3a7   :  { %1860 = vst.msk [vmem:[%s7593_s16 + $0x88] sm:$0xff] %vm1842_vm3, %v1769_v12  ;;  %4232 = vmatpush3.msra.mxu0 %v2339_v17 }
 0x3a8   :  { %4233 = vmatprep.subr.mxu0 %v2354_v56  ;;  %v1773_v19 = vpop.f32.mrf.mxu0 }
 0x3a9   :  { %v1774_v47 = vadd.f32 %v6982_v9, %v1773_v19  ;;  %4234 = vmatpush3.msra.mxu0 %v2338_v4 }
 0x3aa   :  { %4235 = vmatprep.subr.mxu0 %v2353_v11  ;;  %v1775_v3 = vpop.f32.mrf.mxu0 }
 0x3ab   :  { %1861 = vst.msk [vmem:[%s7593_s16 + $0x90] sm:$0xff] %vm1842_vm3, %v1774_v47  ;;  %4236 = vmatpush3.msra.mxu0 %v2337_v50  ;;  %v3767_v50 = vpop.f32.mrf.mxu1 }
 0x3ac   :  { %4237 = vmatprep.subr.mxu0 %v2352_v35  ;;  %v1778_v61 = vpop.f32.mrf.mxu0 }
 0x3ad   :  { %v1779_v0 = vadd.f32 %v6982_v9, %v1778_v61  ;;  %4238 = vmatpush3.msra.mxu0 %v2336_v49  ;;  %v3768_v47 = vpop.f32.mrf.mxu1  ;;  %v2391_v61 = vld [vmem:[%s7592_s15] sm:$0x1]  ;;  %s4324_s15 = smov [#allocation2]  }
 0x3ae   :  { %4239 = vmatprep.subr.mxu0 %v2351_v44  ;;  %v1780_v22 = vpop.f32.mrf.mxu0  ;;  %v3769_v44 = vadd.f32 %v3768_v47, %v3767_v50 }
 0x3af   :  { %1862 = vst.msk [vmem:[%s7593_s16 + $0x98] sm:$0xff] %vm1842_vm3, %v1779_v0  ;;  %4240 = vmatpush3.msra.mxu0 %v2335_v63  ;;  %v3802_v35 = vpop.f32.mrf.mxu1 }
 0x3b0   :  { %4241 = vmatprep.subr.mxu0 %v2350_v6  ;;  %v1783_v51 = vpop.f32.mrf.mxu0  ;;  %v2623_v6 = vadd.f32 %v3769_v44, %v2391_v61 }
 0x3b1   :  { %v1784_v5 = vadd.f32 %v6982_v9, %v1783_v51  ;;  %4242 = vmatpush3.msra.mxu0 %v2334_v18  ;;  %v3803_v3 = vpop.f32.mrf.mxu1 }
 0x3b2   :  { %4243 = vmatprep.subr.mxu0 %v2349_v24  ;;  %v1785_v40 = vpop.f32.mrf.mxu0 }
 0x3b3   :  { %1863 = vst.msk [vmem:[%s7593_s16 + $0xa0] sm:$0xff] %vm1842_vm3, %v1784_v5  ;;  %4244 = vmatpush3.msra.mxu0 %v2333_v8  ;;  %v3837_v49 = vpop.f32.mrf.mxu1 }
 0x3b4   :  { %4245 = vmatprep.subr.mxu0 %v2348_v33  ;;  %v1788_v57 = vpop.f32.mrf.mxu0 }
 0x3b5   :  { %v1789_v16 = vadd.f32 %v6982_v9, %v1788_v57  ;;  %4246 = vmatpush3.msra.mxu0 %v2332_v41  ;;  %v3838_v63 = vpop.f32.mrf.mxu1 }
 0x3b6   :  { %4247 = vmatprep.subr.mxu0 %v2347_v2  ;;  %v1790_v52 = vpop.f32.mrf.mxu0  ;;  %v3839_v51 = vadd.f32 %v3838_v63, %v3837_v49 }
 0x3b7   :  { %1864 = vst.msk [vmem:[%s7593_s16 + $0xa8] sm:$0xff] %vm1842_vm3, %v1789_v16  ;;  %4248 = vmatpush3.msra.mxu0 %v2331_v45  ;;  %v3872_v0 = vpop.f32.mrf.mxu1 }
 0x3b8   :  { %4249 = vmatprep.subr.mxu0 %v2346_v28  ;;  %v1793_v43 = vpop.f32.mrf.mxu0 }
 0x3b9   :  { %v1794_v30 = vadd.f32 %v6982_v9, %v1793_v43  ;;  %4250 = vmatpush3.msra.mxu0 %v2330_v26  ;;  %v3873_v18 = vpop.f32.mrf.mxu1 }
 0x3ba   :  { %4251 = vmatprep.subr.mxu0 %v2345_v21  ;;  %v1795_v59 = vpop.f32.mrf.mxu0  ;;  %v3874_v33 = vadd.f32 %v3873_v18, %v3872_v0 }
 0x3bb   :  { %1865 = vst.msk [vmem:[%s7593_s16 + $0xb0] sm:$0xff] %vm1842_vm3, %v1794_v30  ;;  %4252 = vmatpush3.msra.mxu0 %v2329_v48  ;;  %v3942_v8 = vpop.f32.mrf.mxu1 }
 0x3bc   :  { %4253 = vmatprep.subr.mxu0 %v2344_v54  ;;  %v1798_v39 = vpop.f32.mrf.mxu0 }
 0x3bd   :  { %v1799_v27 = vadd.f32 %v6982_v9, %v1798_v39  ;;  %4254 = vmatpush3.msra.mxu0 %v2328_v25  ;;  %v3943_v57 = vpop.f32.mrf.mxu1 }
 0x3be   :  { %4255 = vmatprep.subr.mxu0 %v2343_v10  ;;  %v1800_v15 = vpop.f32.mrf.mxu0  ;;  %v3944_v21 = vadd.f32 %v3943_v57, %v3942_v8 }
 0x3bf   :  { %1866 = vst.msk [vmem:[%s7593_s16 + $0xb8] sm:$0xff] %vm1842_vm3, %v1799_v27  ;;  %4256 = vmatpush3.msra.mxu0 %v2327_v34 }
 0x3c0   :  { %3601 = vmatmul.mubr.f32.vlgmr.msra.gmra.mxu0 %v2511_v29  ;;  %v1803_v14 = vpop.f32.mrf.mxu0 }
 0x3c1   :  { %v1804_v31 = vadd.f32 %v6982_v9, %v1803_v14  ;;  %v4012_v16 = vpop.f32.mrf.mxu1 }
 0x3c2   :  { %v1805_v60 = vpop.f32.mrf.mxu0 }
 0x3c3   :  { %1867 = vst.msk [vmem:[%s7593_s16 + $0xc0] sm:$0xff] %vm1842_vm3, %v1804_v31  ;;  %v4013_v48 = vpop.f32.mrf.mxu1 }
 0x3c4   :  { %v1808_v13 = vpop.f32.mrf.mxu0  ;;  %v4014_v10 = vadd.f32 %v4013_v48, %v4012_v16 }
 0x3c5   :  { %v1809_v23 = vadd.f32 %v6982_v9, %v1808_v13 }
 0x3c6   :  { %v1810_v38 = vpop.f32.mrf.mxu0 }
 0x3c7   :  { %1868 = vst.msk [vmem:[%s7593_s16 + $0xc8] sm:$0xff] %vm1842_vm3, %v1809_v23 }
 0x3c8   :  { %v1813_v7 = vpop.f32.mrf.mxu0 }
 0x3c9   :  { %v1814_v36 = vadd.f32 %v6982_v9, %v1813_v7 }
 0x3ca   :  { %v1815_v20 = vpop.f32.mrf.mxu0 }
 0x3cb   :  { %1869 = vst.msk [vmem:[%s7593_s16 + $0xd0] sm:$0xff] %vm1842_vm3, %v1814_v36 }
 0x3cc   :  { %v1818_v62 = vpop.f32.mrf.mxu0 }
 0x3cd   :  { %v1819_v1 = vadd.f32 %v6982_v9, %v1818_v62 }
 0x3ce   :  { %v1820_v37 = vpop.f32.mrf.mxu0 }
 0x3cf   :  { %1870 = vst.msk [vmem:[%s7593_s16 + $0xd8] sm:$0xff] %vm1842_vm3, %v1819_v1 }
 0x3d0   :  { %v1823_v46 = vpop.f32.mrf.mxu0 }
 0x3d1   :  { %v1824_v32 = vadd.f32 %v6982_v9, %v1823_v46 }
 0x3d2   :  { %v1825_v55 = vpop.f32.mrf.mxu0 }
 0x3d3   :  { %1871 = vst.msk [vmem:[%s7593_s16 + $0xe0] sm:$0xff] %vm1842_vm3, %v1824_v32 }
 0x3d4   :  { %v1828_v53 = vpop.f32.mrf.mxu0 }
 0x3d5   :  { %v1829_v42 = vadd.f32 %v6982_v9, %v1828_v53 }
 0x3d6   :  { %v1830_v17 = vpop.f32.mrf.mxu0 }
 0x3d7   :  { %1872 = vst.msk [vmem:[%s7593_s16 + $0xe8] sm:$0xff] %vm1842_vm3, %v1829_v42 }
 0x3d8   :  { %v1833_v12 = vpop.f32.mrf.mxu0 }
 0x3d9   :  { %v1834_v56 = vadd.f32 %v6982_v9, %v1833_v12 }
 0x3da   :  { %v1835_v58 = vpop.f32.mrf.mxu0 }
 0x3db   :  { %1873 = vst.msk [vmem:[%s7593_s16 + $0xf0] sm:$0xff] %vm1842_vm3, %v1834_v56 }
 0x3dc   :  { %v1838_v4 = vpop.f32.mrf.mxu0 }
 0x3dd   :  { %v1839_v11 = vadd.f32 %v6982_v9, %v1838_v4  ;;  %v3804_v9 = vadd.f32 %v3803_v3, %v3802_v35 }
 0x3de   :  { %v1840_v19 = vpop.f32.mrf.mxu0 }
 0x3df   :  { %1874 = vst.msk [vmem:[%s7593_s16 + $0xf8] sm:$0xff] %vm1842_vm3, %v1839_v11  ;;  %v2693_v24 = vadd.f32 %v3804_v9, %v2623_v6  ;;  %s3688_s16 = sshll.u32 %s4324_s15, 4  ;;  %s3689_s16 = int_to_ptr.vmem [resolvable:$true] %s3688_s16 }
 0x3e0   :  { %v3907_v22 = vpop.f32.mrf.mxu0  ;;  %s4300_s29 = scalar_lea.vmem %s3689_s16, 16  ;;  %s4304_s30 = scalar_lea.vmem %s3689_s16, 32 }
 0x3e1   :  { %v2763_v41 = vadd.f32 %v3839_v51, %v2693_v24  ;;  %p4301_p0 = scmp.ne.s32.totalorder %s3689_s16, %s4300_s29  ;;  %p4305_p1 = scmp.lt.s32.totalorder %s3689_s16, %s3689_s16 }
 0x3e2   :  { %v3908_v5 = vpop.f32.mrf.mxu0  ;;  %p4306_p2 = scmp.lt.s32.totalorder %s4304_s30, %s4300_s29 }
 0x3e3   :  { %v3909_v2 = vadd.f32 %v3908_v5, %v3907_v22  ;;  %v2833_v45 = vadd.f32 %v3874_v33, %v2763_v41  ;;  %v4082_v54 = vpop.f32.mrf.mxu1 }
 0x3e4   :  { %p4307_p3 = por %p4306_p2, %p4305_p1 }
 0x3e5   :  { %v2903_v52 = vadd.f32 %v3909_v2, %v2833_v45  ;;  %v4083_v29 = vpop.f32.mrf.mxu1 }
 0x3e6   :  { %v4084_v60 = vadd.f32 %v4083_v29, %v4082_v54  ;;  %p4308_p4 = pnand %p4307_p3, %p4301_p0 }
 0x3e7   :  { %v2973_v30 = vadd.f32 %v3944_v21, %v2903_v52 }
 0x400   :  { %v3977_v40 = vpop.f32.mrf.mxu0 }
 0x402   :  { %v3978_v28 = vpop.f32.mrf.mxu0 }
 0x403   :  { %v3979_v43 = vadd.f32 %v3978_v28, %v3977_v40 }
 0x405   :  { %v3043_v25 = vadd.f32 %v3979_v43, %v2973_v30 }
 0x407   :  { %v3113_v27 = vadd.f32 %v4014_v10, %v3043_v25  ;;  %v4152_v15 = vpop.f32.mrf.mxu1 }
 0x409   :  { %v4153_v38 = vpop.f32.mrf.mxu1 }
 0x40a   :  { %v4154_v1 = vadd.f32 %v4153_v38, %v4152_v15 }
 0x420   :  { %v4047_v26 = vpop.f32.mrf.mxu0 }
 0x422   :  { %v4048_v59 = vpop.f32.mrf.mxu0 }
 0x423   :  { %v4049_v34 = vadd.f32 %v4048_v59, %v4047_v26 }
 0x425   :  { %v3183_v31 = vadd.f32 %v4049_v34, %v3113_v27 }
 0x427   :  { %v3253_v7 = vadd.f32 %v4084_v60, %v3183_v31 }
 0x42b   :  { %v4222_v36 = vpop.f32.mrf.mxu1 }
 0x42d   :  { %v4223_v46 = vpop.f32.mrf.mxu1 }
 0x42e   :  { %v4224_v42 = vadd.f32 %v4223_v46, %v4222_v36 }
 0x440   :  { %v4117_v39 = vpop.f32.mrf.mxu0 }
 0x442   :  { %v4118_v14 = vpop.f32.mrf.mxu0 }
 0x443   :  { %v4119_v23 = vadd.f32 %v4118_v14, %v4117_v39 }
 0x445   :  { %v3323_v62 = vadd.f32 %v4119_v23, %v3253_v7 }
 0x447   :  { %v3393_v32 = vadd.f32 %v4154_v1, %v3323_v62 }
 0x44e   :  { %v4292_v55 = vpop.f32.mrf.mxu1 }
 0x450   :  { %v4293_v56 = vpop.f32.mrf.mxu1 }
 0x451   :  { %v4294_v19 = vadd.f32 %v4293_v56, %v4292_v55 }
 0x460   :  { %v4187_v13 = vpop.f32.mrf.mxu0 }
 0x462   :  { %v4188_v20 = vpop.f32.mrf.mxu0 }
 0x463   :  { %v4189_v37 = vadd.f32 %v4188_v20, %v4187_v13 }
 0x465   :  { %v3463_v53 = vadd.f32 %v4189_v37, %v3393_v32 }
 0x467   :  { %v3533_v58 = vadd.f32 %v4224_v42, %v3463_v53 }
 0x480   :  { %v4257_v17 = vpop.f32.mrf.mxu0 }
 0x482   :  { %v4258_v12 = vpop.f32.mrf.mxu0 }
 0x483   :  { %v4259_v4 = vadd.f32 %v4258_v12, %v4257_v17 }
 0x485   :  { %v3603_v11 = vadd.f32 %v4259_v4, %v3533_v58 }
 0x487   :  { %v3673_v50 = vadd.f32 %v4294_v19, %v3603_v11 }
 0x489   :  { %3677 = vst.msk [vmem:[#allocation2] sm:$0x1] %vm3676_vm4, %v3673_v50 }
 0x48a   :  { %4311 = shalt.err (!%p4308_p4)
}
 0x48b   :  { %3691 = dma.vmem_to_hbm [thread:$0]  %s3689_s16, 16, %s7595_s18, [#allocation3]  }
 0x48c   :  { %4320 = dma.done.wait [#allocation3], 16  }
 0x48d   :  { %4321 = vsyncadd [#allocation3], 4294967280 }
 0x48e   :  { %3699 = vsyncpa [#allocation3], 1 }

</bundles_post_ra>
